<compile_context>
chip_gen: v7x
topology: tpu7x:2x2x1
jax: 0.10.0
libtpu: 0.0.40
codegen_flags: <defaults>
</compile_context>

<pallas_src>
import functools

import jax
import jax.numpy as jnp
from jax.experimental import pallas as pl
from jax.experimental.pallas import tpu as pltpu

_SZ = 100
K_IN = 3 * _SZ * _SZ          # 30000
HIDDEN = 512

# Layer-1 K tiling: 4 accumulation steps of TK = 59*128 lanes each.
KT = 4
TK = 7552
KP = KT * TK                  # 30208 (0.69% zero padding of W1, one-time)


def _round_up(x, m):
    return (x + m - 1) // m * m


# ---------------------------------------------------------------------------
# Fused kernel: streams bf16 W1 tiles (the only HBM-bound operand),
# accumulates x @ W1 into a f32 VMEM scratch, and on the last grid step runs
# the whole tail on small VMEM-resident operands.
# ---------------------------------------------------------------------------
def fused_kernel(x_ref, w1_ref, b1_ref, w2_ref, b2_ref, w3_ref, b3_ref,
                 o_ref, acc_ref):
    k = pl.program_id(0)

    @pl.when(k == 0)
    def _():
        acc_ref[...] = jnp.zeros_like(acc_ref)

    # Mask the K tail: x is unpadded (B, 30000), so the last tile extends past
    # column 30000 and Pallas leaves the out-of-bounds region unspecified.
    col = k * TK + jax.lax.broadcasted_iota(jnp.int32, x_ref.shape, 1)
    x_tile = jnp.where(col < K_IN, x_ref[...], 0.0).astype(jnp.bfloat16)
    acc_ref[...] += jnp.dot(x_tile, w1_ref[...],
                            preferred_element_type=jnp.float32)

    @pl.when(k == pl.num_programs(0) - 1)
    def _():
        h1 = jnp.maximum(acc_ref[...] + b1_ref[...], 0.0)
        h2 = jnp.dot(h1, w2_ref[...], preferred_element_type=jnp.float32)
        h2 = jnp.maximum(h2 + b2_ref[...], 0.0)
        logits = jnp.dot(h2, w3_ref[...], preferred_element_type=jnp.float32)
        o_ref[...] = (logits + b3_ref[...]).astype(o_ref.dtype)


# ---------------------------------------------------------------------------
# One-time parameter preparation (hoisted out of the per-call forward).
# ---------------------------------------------------------------------------
def prepare_params(params, n_labels):
    """Pad/cast weights once: W1 -> (KP, 512) bf16 (zero rows beyond 30000),
    W3/b3 lane-padded f32."""
    w1, b1, w2, b2, w3, b3 = params
    n_pad = _round_up(max(n_labels, 128), 128)

    w1_p = jnp.zeros((KP, HIDDEN), jnp.bfloat16).at[:K_IN, :].set(
        w1.astype(jnp.bfloat16))
    b1_p = b1.reshape(1, HIDDEN).astype(jnp.float32)
    w2_p = w2.astype(jnp.float32)
    b2_p = b2.reshape(1, HIDDEN).astype(jnp.float32)
    w3_p = jnp.zeros((HIDDEN, n_pad), jnp.float32).at[:, :n_labels].set(
        w3.astype(jnp.float32))
    b3_p = jnp.zeros((1, n_pad), jnp.float32).at[:, :n_labels].set(
        b3.reshape(1, n_labels).astype(jnp.float32))
    return (w1_p, b1_p, w2_p, b2_p, w3_p, b3_p)


# ---------------------------------------------------------------------------
# Forward pass: per-call work is one reshape + one pallas_call.
# ---------------------------------------------------------------------------
@functools.partial(jax.jit, static_argnames=("n_labels",))
def neural_network_forward(x_nchw, prepared_params, n_labels):
    """x_nchw: (B, 3, 100, 100) float32. Returns logits (B, n_labels)."""
    w1_p, b1_p, w2_p, b2_p, w3_p, b3_p = prepared_params
    B = x_nchw.shape[0]
    n_pad = w3_p.shape[1]

    # nn.Flatten: row-major over (C, H, W). No cast / pad here.
    x = x_nchw.reshape(B, K_IN)

    cost = pl.CostEstimate(
        flops=2 * B * KP * HIDDEN + 2 * B * HIDDEN * HIDDEN + 2 * B * HIDDEN * n_pad,
        transcendentals=0,
        bytes_accessed=(KP * HIDDEN * 2            # W1 (bf16, dominant)
                        + B * K_IN * 4             # x (f32)
                        + HIDDEN * HIDDEN * 4      # W2
                        + HIDDEN * n_pad * 4       # W3
                        + (2 * HIDDEN + n_pad) * 4 # biases
                        + B * n_pad * 4),          # logits
    )

    logits_p = pl.pallas_call(
        fused_kernel,
        out_shape=jax.ShapeDtypeStruct((B, n_pad), jnp.float32),
        grid_spec=pltpu.PrefetchScalarGridSpec(
            num_scalar_prefetch=0,
            grid=(KT,),
            in_specs=[
                pl.BlockSpec((B, TK), lambda k: (0, k)),           # x tile
                pl.BlockSpec((TK, HIDDEN), lambda k: (k, 0)),      # W1 tile (streamed)
                pl.BlockSpec((1, HIDDEN), lambda k: (0, 0)),       # b1 (resident)
                pl.BlockSpec((HIDDEN, HIDDEN), lambda k: (0, 0)),  # W2 (resident)
                pl.BlockSpec((1, HIDDEN), lambda k: (0, 0)),       # b2 (resident)
                pl.BlockSpec((HIDDEN, n_pad), lambda k: (0, 0)),   # W3 (resident)
                pl.BlockSpec((1, n_pad), lambda k: (0, 0)),        # b3 (resident)
            ],
            out_specs=pl.BlockSpec((B, n_pad), lambda k: (0, 0)),
            scratch_shapes=[pltpu.VMEM((B, HIDDEN), jnp.float32)],
        ),
        compiler_params=pltpu.CompilerParams(
            dimension_semantics=("arbitrary",),
            vmem_limit_bytes=32 * 1024 * 1024,
        ),
        cost_estimate=cost,
    )(x, w1_p, b1_p, w2_p, b2_p, w3_p, b3_p)

    return logits_p[:, :n_labels]


# ---------------------------------------------------------------------------
# Init + reference
# ---------------------------------------------------------------------------
def init_params(key, n_labels):
    """Deterministic init matching nn.Linear shapes (uniform +-1/sqrt(fan_in))."""
    ks = jax.random.split(key, 6)

    def lin(kw, kb, fan_in, fan_out):
        bound = 1.0 / jnp.sqrt(fan_in)
        w = jax.random.uniform(kw, (fan_in, fan_out), jnp.float32, -bound, bound)
        b = jax.random.uniform(kb, (fan_out,), jnp.float32, -bound, bound)
        return w, b

    w1, b1 = lin(ks[0], ks[1], K_IN, HIDDEN)
    w2, b2 = lin(ks[2], ks[3], HIDDEN, HIDDEN)
    w3, b3 = lin(ks[4], ks[5], HIDDEN, n_labels)
    return (w1, b1, w2, b2, w3, b3)


def reference_forward(x_nchw, params):
    w1, b1, w2, b2, w3, b3 = params
    x = x_nchw.reshape(x_nchw.shape[0], -1).astype(jnp.float32)
    h = jnp.maximum(x @ w1 + b1, 0.0)
    h = jnp.maximum(h @ w2 + b2, 0.0)
    return h @ w3 + b3


if __name__ == "__main__":
    n_labels = 10
    batch = 2

    key = jax.random.PRNGKey(0)
    k_x, k_p = jax.random.split(key)

    x = jax.random.normal(k_x, (batch, 3, _SZ, _SZ), jnp.float32)
    params = init_params(k_p, n_labels)
    prepared = prepare_params(params, n_labels)   # one-time pad/cast (hoisted)

    logits = neural_network_forward(x, prepared, n_labels)
    logits = jax.block_until_ready(logits)

    ref = reference_forward(x, params)
    assert logits.shape == (batch, n_labels)
    max_err = float(jnp.max(jnp.abs(logits - ref)))
    # bf16 x/W1 stream vs f32 reference -> relaxed tolerance.
    assert jnp.allclose(logits, ref, atol=2e-2, rtol=2e-2), (
        f"mismatch vs reference (max abs err {max_err})")

    print("KERNEL_OK")
</pallas_src>

<mosaic_0001>
module attributes {stable_mosaic.version = 11 : i64} {
  func.func @fused_kernel(%arg0: i32, %arg1: memref<2x7552xf32, #tpu.memory_space<vmem>>, %arg2: memref<7552x512xbf16, #tpu.memory_space<vmem>>, %arg3: memref<1x512xf32, #tpu.memory_space<vmem>>, %arg4: memref<512x512xf32, #tpu.memory_space<vmem>>, %arg5: memref<1x512xf32, #tpu.memory_space<vmem>>, %arg6: memref<512x128xf32, #tpu.memory_space<vmem>>, %arg7: memref<1x128xf32, #tpu.memory_space<vmem>>, %arg8: memref<2x128xf32, #tpu.memory_space<vmem>>, %arg9: memref<2x512xf32, #tpu.memory_space<vmem>>) attributes {dimension_semantics = [#tpu.dimension_semantics<arbitrary>], iteration_bounds = array<i64: 4>, scalar_prefetch = 0 : i64, scratch_operands = 1 : i64, tpu.core_type = #tpu.core_type<tc>, window_params = [{transform_indices = @transform_0, window_bounds = array<i64: 2, 7552>}, {transform_indices = @transform_1, window_bounds = array<i64: 7552, 512>}, {pipeline_mode = #tpu.pipeline_mode<synchronous>, transform_indices = @transform_2, window_bounds = array<i64: 1, 512>}, {pipeline_mode = #tpu.pipeline_mode<synchronous>, transform_indices = @transform_3, window_bounds = array<i64: 512, 512>}, {pipeline_mode = #tpu.pipeline_mode<synchronous>, transform_indices = @transform_4, window_bounds = array<i64: 1, 512>}, {pipeline_mode = #tpu.pipeline_mode<synchronous>, transform_indices = @transform_5, window_bounds = array<i64: 512, 128>}, {pipeline_mode = #tpu.pipeline_mode<synchronous>, transform_indices = @transform_6, window_bounds = array<i64: 1, 128>}, {pipeline_mode = #tpu.pipeline_mode<synchronous>, transform_indices = @transform_7, window_bounds = array<i64: 2, 128>}]} {
    %c0_i32 = arith.constant 0 : i32
    %0 = arith.cmpi eq, %arg0, %c0_i32 : i32
    %1 = arith.extui %0 : i1 to i32
    %c0_i32_0 = arith.constant 0 : i32
    %2 = arith.cmpi ne, %1, %c0_i32_0 : i32
    scf.if %2 {
      %cst_10 = arith.constant 0.000000e+00 : f32
      %21 = vector.broadcast %cst_10 : f32 to vector<2x512xf32>
      %c0_11 = arith.constant 0 : index
      %c0_12 = arith.constant 0 : index
      %22 = vector.load %arg9[%c0_11, %c0_12] : memref<2x512xf32, #tpu.memory_space<vmem>>, vector<2x512xf32>
      tpu.vector_store %arg9[%c0_11, %c0_12], %21 {strides = array<i32>} : memref<2x512xf32, #tpu.memory_space<vmem>>, vector<2x512xf32>,
    } else {
    }
    %c7552_i32 = arith.constant 7552 : i32
    %3 = arith.muli %arg0, %c7552_i32 : i32
    %4 = tpu.iota {dimensions = array<i32: 1>} : vector<2x7552xi32>
    %5 = vector.broadcast %3 : i32 to vector<2x7552xi32>
    %6 = arith.addi %5, %4 : vector<2x7552xi32>
    %c30000_i32 = arith.constant 30000 : i32
    %7 = vector.broadcast %c30000_i32 : i32 to vector<2x7552xi32>
    %8 = arith.cmpi slt, %6, %7 : vector<2x7552xi32>
    %c0 = arith.constant 0 : index
    %c0_1 = arith.constant 0 : index
    %9 = vector.load %arg1[%c0, %c0_1] : memref<2x7552xf32, #tpu.memory_space<vmem>>, vector<2x7552xf32>
    %cst = arith.constant 0.000000e+00 : f32
    %10 = vector.broadcast %cst : f32 to vector<2x7552xf32>
    %11 = arith.select %8, %9, %10 : vector<2x7552xi1>, vector<2x7552xf32>
    %12 = arith.truncf %11 : vector<2x7552xf32> to vector<2x7552xbf16>
    %c0_2 = arith.constant 0 : index
    %c0_3 = arith.constant 0 : index
    %13 = vector.load %arg9[%c0_2, %c0_3] : memref<2x512xf32, #tpu.memory_space<vmem>>, vector<2x512xf32>
    %c0_4 = arith.constant 0 : index
    %c0_5 = arith.constant 0 : index
    %14 = vector.load %arg2[%c0_4, %c0_5] : memref<7552x512xbf16, #tpu.memory_space<vmem>>, vector<7552x512xbf16>
    %cst_6 = arith.constant dense<0.000000e+00> : vector<2x512xf32>
    %15 = tpu.matmul %12, %14, %cst_6 {dimension_numbers = #tpu.dot_dimension_numbers<[1], [0], [0], [1], [0, 0, 1, 1], [], []>} : vector<2x7552xbf16>, vector<7552x512xbf16>, vector<2x512xf32> -> vector<2x512xf32>
    %16 = arith.addf %13, %15 : vector<2x512xf32>
    %c0_7 = arith.constant 0 : index
    %c0_8 = arith.constant 0 : index
    %17 = vector.load %arg9[%c0_7, %c0_8] : memref<2x512xf32, #tpu.memory_space<vmem>>, vector<2x512xf32>
    tpu.vector_store %arg9[%c0_7, %c0_8], %16 {strides = array<i32>} : memref<2x512xf32, #tpu.memory_space<vmem>>, vector<2x512xf32>,
    %c3_i32 = arith.constant 3 : i32
    %18 = arith.cmpi eq, %arg0, %c3_i32 : i32
    %19 = arith.extui %18 : i1 to i32
    %c0_i32_9 = arith.constant 0 : i32
    %20 = arith.cmpi ne, %19, %c0_i32_9 : i32
    scf.if %20 {
      %c0_10 = arith.constant 0 : index
      %c0_11 = arith.constant 0 : index
      %21 = vector.load %arg9[%c0_10, %c0_11] : memref<2x512xf32, #tpu.memory_space<vmem>>, vector<2x512xf32>
      %c0_12 = arith.constant 0 : index
      %c0_13 = arith.constant 0 : index
      %22 = vector.load %arg3[%c0_12, %c0_13] : memref<1x512xf32, #tpu.memory_space<vmem>>, vector<1x512xf32>
      %23 = vector.broadcast %22 : vector<1x512xf32> to vector<2x512xf32>
      %24 = arith.addf %21, %23 : vector<2x512xf32>
      %cst_14 = arith.constant 0.000000e+00 : f32
      %25 = vector.broadcast %cst_14 : f32 to vector<2x512xf32>
      %26 = arith.maximumf %24, %25 : vector<2x512xf32>
      %c0_15 = arith.constant 0 : index
      %c0_16 = arith.constant 0 : index
      %27 = vector.load %arg4[%c0_15, %c0_16] : memref<512x512xf32, #tpu.memory_space<vmem>>, vector<512x512xf32>
      %cst_17 = arith.constant dense<0.000000e+00> : vector<2x512xf32>
      %28 = tpu.matmul %26, %27, %cst_17 {dimension_numbers = #tpu.dot_dimension_numbers<[1], [0], [0], [1], [0, 0, 1, 1], [], []>} : vector<2x512xf32>, vector<512x512xf32>, vector<2x512xf32> -> vector<2x512xf32>
      %c0_18 = arith.constant 0 : index
      %c0_19 = arith.constant 0 : index
      %29 = vector.load %arg5[%c0_18, %c0_19] : memref<1x512xf32, #tpu.memory_space<vmem>>, vector<1x512xf32>
      %30 = vector.broadcast %29 : vector<1x512xf32> to vector<2x512xf32>
      %31 = arith.addf %28, %30 : vector<2x512xf32>
      %cst_20 = arith.constant 0.000000e+00 : f32
      %32 = vector.broadcast %cst_20 : f32 to vector<2x512xf32>
      %33 = arith.maximumf %31, %32 : vector<2x512xf32>
      %c0_21 = arith.constant 0 : index
      %c0_22 = arith.constant 0 : index
      %34 = vector.load %arg6[%c0_21, %c0_22] : memref<512x128xf32, #tpu.memory_space<vmem>>, vector<512x128xf32>
      %cst_23 = arith.constant dense<0.000000e+00> : vector<2x128xf32>
      %35 = tpu.matmul %33, %34, %cst_23 {dimension_numbers = #tpu.dot_dimension_numbers<[1], [0], [0], [1], [0, 0, 1, 1], [], []>} : vector<2x512xf32>, vector<512x128xf32>, vector<2x128xf32> -> vector<2x128xf32>
      %c0_24 = arith.constant 0 : index
      %c0_25 = arith.constant 0 : index
      %36 = vector.load %arg7[%c0_24, %c0_25] : memref<1x128xf32, #tpu.memory_space<vmem>>, vector<1x128xf32>
      %37 = vector.broadcast %36 : vector<1x128xf32> to vector<2x128xf32>
      %38 = arith.addf %35, %37 : vector<2x128xf32>
      %c0_26 = arith.constant 0 : index
      %c0_27 = arith.constant 0 : index
      %39 = vector.load %arg8[%c0_26, %c0_27] : memref<2x128xf32, #tpu.memory_space<vmem>>, vector<2x128xf32>
      tpu.vector_store %arg8[%c0_26, %c0_27], %38 {strides = array<i32>} : memref<2x128xf32, #tpu.memory_space<vmem>>, vector<2x128xf32>,
    } else {
    }
    return
  }
  func.func @transform_0(%arg0: i32) -> (i32, i32) {
    %c0_i32 = arith.constant 0 : i32
    %c0_i32_0 = arith.constant 0 : i32
    return %c0_i32, %arg0 : i32, i32
  }
  func.func @transform_1(%arg0: i32) -> (i32, i32) {
    %c0_i32 = arith.constant 0 : i32
    %c0_i32_0 = arith.constant 0 : i32
    return %arg0, %c0_i32 : i32, i32
  }
  func.func @transform_2(%arg0: i32) -> (i32, i32) {
    %c0_i32 = arith.constant 0 : i32
    %c0_i32_0 = arith.constant 0 : i32
    %c0_i32_1 = arith.constant 0 : i32
    return %c0_i32, %c0_i32_0 : i32, i32
  }
  func.func @transform_3(%arg0: i32) -> (i32, i32) {
    %c0_i32 = arith.constant 0 : i32
    %c0_i32_0 = arith.constant 0 : i32
    %c0_i32_1 = arith.constant 0 : i32
    return %c0_i32, %c0_i32_0 : i32, i32
  }
  func.func @transform_4(%arg0: i32) -> (i32, i32) {
    %c0_i32 = arith.constant 0 : i32
    %c0_i32_0 = arith.constant 0 : i32
    %c0_i32_1 = arith.constant 0 : i32
    return %c0_i32, %c0_i32_0 : i32, i32
  }
  func.func @transform_5(%arg0: i32) -> (i32, i32) {
    %c0_i32 = arith.constant 0 : i32
    %c0_i32_0 = arith.constant 0 : i32
    %c0_i32_1 = arith.constant 0 : i32
    return %c0_i32, %c0_i32_0 : i32, i32
  }
  func.func @transform_6(%arg0: i32) -> (i32, i32) {
    %c0_i32 = arith.constant 0 : i32
    %c0_i32_0 = arith.constant 0 : i32
    %c0_i32_1 = arith.constant 0 : i32
    return %c0_i32, %c0_i32_0 : i32, i32
  }
  func.func @transform_7(%arg0: i32) -> (i32, i32) {
    %c0_i32 = arith.constant 0 : i32
    %c0_i32_0 = arith.constant 0 : i32
    %c0_i32_1 = arith.constant 0 : i32
    return %c0_i32, %c0_i32_0 : i32, i32
  }
}

</mosaic_0001>

<bundles_post_ra>
// kernel: neural_network_forward.1
= control target key start
LH: loop header
LB: loop body
LE: loop exit
PB: predicated region body
PF: predicated region fallthrough
CT: control target
= control target key end

     0   :  { %12 = vsyncpa [#allocation4], 0  ;;  %s24587_s0 = inlined_call_operand.vmem [shape: f32[2,30000], index: 0, kind: input, shape index: {}]   ;;  %s24588_s1 = inlined_call_operand.hbm [shape: bf16[30208,512], index: 1, kind: input, shape index: {}]   ;;  %s24589_s2 = inlined_call_operand.hbm [shape: f32[1,512], index: 2, kind: input, shape index: {}]   ;;  %s24590_s3 = inlined_call_operand.hbm [shape: f32[512,512], index: 3, kind: input, shape index: {}]   ;;  %s24591_s4 = inlined_call_operand.hbm [shape: f32[1,512], index: 4, kind: input, shape index: {}]   ;;  %s24592_s5 = inlined_call_operand.hbm [shape: f32[512,128], index: 5, kind: input, shape index: {}]   ;;  %s24593_s6 = inlined_call_operand.hbm [shape: f32[1,128], index: 6, kind: input, shape index: {}]   ;;  %s24594_s7 = inlined_call_operand.hbm [shape: f32[2,128], index: 7, kind: output, shape index: {}]  }
   0x1   :  { %14 = vsyncpa [#allocation4 + $0x1], 0 }
   0x2   :  { %15 = vsyncpa [#allocation7], 0 }
   0x3   :  { %16 = vsyncpa [#allocation10], 0 }
   0x4   :  { %17 = vsyncpa [#allocation13], 0 }
   0x5   :  { %18 = vsyncpa [#allocation5], 0  ;;  %s21974_s24 = smov 0   ;;  %s21976_s25 = smov 0  }
   0x6   :  { %s21978_s26 = smov 0   ;;  %s21980_s27 = smov 0  }
   0x7 LB: > { %s21918_s28 = smov [#allocation6]   ;;  %s21995_s30 = sadd.s32 4294967295, %s21916_s27   ;;  %s21916_s27 = sphi %s21980_s27, %s24614_s27   ;;  %s21912_s26 = sphi %s21978_s26, %s24613_s26   ;;  %s21908_s25 = sphi %s21976_s25, %s24612_s25   ;;  %s21904_s24 = sphi %s21974_s24, %s24611_s24  }
   0x8   : > { %s220_s29 = sshll.u32 %s21918_s28, 4  ;;  %p15817_p0 = scmp.ge.s32.totalorder %s21916_s27, 1  ;;  %s221_s29 = int_to_ptr.vmem [resolvable:$true] %s220_s29 }
   0x9   : > { %p24595_p1 = scmp.eq.s32.totalorder %s21995_s30, 0  ;;  %p207_p2 = scmp.lt.s32.totalorder %s21916_s27, 5 }
   0xa   : > { %s21919_s9 = smov [#allocation9]   ;;  %s21920_s11 = smov [#allocation8]  }
   0xb   : > { %p22001_p4 = pnand %p15817_p0, %p207_p2  ;;  %s244_s10 = sshll.u32 %s21919_s9, 4  ;;  %s22007_s10 = int_to_ptr.vmem [resolvable:$true] %s244_s10 }
   0xc   : > { %s230_s12 = sshll.u32 %s21920_s11, 4  ;;  %s21670_s16 = scalar_lea.hbm %s24589_s2, 64  ;;  %s22015_s12 = int_to_ptr.vmem [resolvable:$true] %s230_s12 }
   0xd   : > { %s24597_s8 = scalar_select %p22001_p4, 1, 0 }
   0xe   : > { %p18743_p5 = pneg %p22001_p4  ;;  %p21671_p7 = scmp.ne.s32.totalorder %s24589_s2, %s21670_s16 }
   0xf   : > { %p21677_p11 = scmp.lt.u32.totalorder %s21670_s16, %s24589_s2 }
  0x10   : > { %p22011_p6 = pnand %p18743_p5, %p24595_p1 }
  0x12   : > { %p22025_p8 = pneg %p22011_p6 }
  0x14   : > { %p21673_p9 = pnand %p22025_p8, %p21671_p7 }
  0x16   : > { %p21674_p10 = pneg %p21673_p9 }
  0x18   : > { %p21679_p12 = pnand %p21677_p11, %p21674_p10 }
  0x1a   : > { %21682 = shalt.err (!%p21679_p12)
}
  0x1b   : > { %s21683_s22 = scalar_lea.vmem %s221_s29, 64  ;;  %p21691_p5 = scmp.lt.s32.totalorder %s221_s29, %s221_s29 }
  0x1c   : > { %p21684_p13 = scmp.ne.s32.totalorder %s221_s29, %s21683_s22  ;;  %p21692_p3 = scmp.lt.s32.totalorder %s21683_s22, %s21683_s22 }
  0x1e   : > { %p21686_p0 = pnand %p21684_p13, %p22025_p8  ;;  %p21693_p1 = por %p21692_p3, %p21691_p5 }
  0x20   : > { %p21687_p2 = pneg %p21686_p0 }
  0x22   : > { %p21694_p4 = pnand %p21693_p1, %p21687_p2 }
  0x24   : > { %21697 = shalt.err (!%p21694_p4)
}
  0x25   : > { %18746 = dma.hbm_to_vmem [thread:$0]  (!%p22011_p6), %s24589_s2, 64, %s221_s29, [#allocation7]  }
  0x26   : > { %s21698_s14 = scalar_lea.hbm %s24591_s4, 64 }
  0x27   : > { %p21699_p7 = scmp.ne.s32.totalorder %s24591_s4, %s21698_s14  ;;  %p21705_p1 = scmp.lt.u32.totalorder %s21698_s14, %s24591_s4 }
  0x29   : > { %p21701_p9 = pnand %p21699_p7, %p22025_p8 }
  0x2b   : > { %p21702_p3 = pneg %p21701_p9 }
  0x2d   : > { %p21707_p4 = pnand %p21705_p1, %p21702_p3 }
  0x2f   : > { %21710 = shalt.err (!%p21707_p4)
}
  0x30   : > { %s21711_s29 = scalar_lea.vmem %s22007_s10, 64  ;;  %p21719_p13 = scmp.lt.s32.totalorder %s22007_s10, %s22007_s10 }
  0x31   : > { %p21712_p10 = scmp.ne.s32.totalorder %s22007_s10, %s21711_s29  ;;  %p21720_p0 = scmp.lt.s32.totalorder %s21711_s29, %s21711_s29 }
  0x33   : > { %p21714_p11 = pnand %p21712_p10, %p22025_p8  ;;  %p21721_p2 = por %p21720_p0, %p21719_p13 }
  0x35   : > { %p21715_p12 = pneg %p21714_p11 }
  0x37   : > { %p21722_p5 = pnand %p21721_p2, %p21715_p12 }
  0x39   : > { %21725 = shalt.err (!%p21722_p5)
}
  0x3a   : > { %18752 = dma.hbm_to_vmem [thread:$0]  (!%p22011_p6), %s24591_s4, 64, %s22007_s10, [#allocation10]  }
  0x3b   : > { %s21726_s28 = scalar_lea.hbm %s24590_s3, 32768 }
  0x3c   : > { %p21727_p7 = scmp.ne.s32.totalorder %s24590_s3, %s21726_s28  ;;  %p21733_p1 = scmp.lt.u32.totalorder %s21726_s28, %s24590_s3 }
  0x3e   : > { %p21729_p9 = pnand %p21727_p7, %p22025_p8 }
  0x40   : > { %p21730_p3 = pneg %p21729_p9 }
  0x42   : > { %p21735_p4 = pnand %p21733_p1, %p21730_p3 }
  0x44   : > { %21738 = shalt.err (!%p21735_p4)
}
  0x45   : > { %s21739_s10 = scalar_lea.vmem %s22015_s12, 32768  ;;  %p21747_p13 = scmp.lt.s32.totalorder %s22015_s12, %s22015_s12 }
  0x46   : > { %p21740_p10 = scmp.ne.s32.totalorder %s22015_s12, %s21739_s10  ;;  %p21748_p0 = scmp.lt.s32.totalorder %s21739_s10, %s21739_s10 }
  0x48   : > { %p21742_p11 = pnand %p21740_p10, %p22025_p8  ;;  %p21749_p2 = por %p21748_p0, %p21747_p13 }
  0x4a   : > { %p21743_p12 = pneg %p21742_p11 }
  0x4c   : > { %p21750_p5 = pnand %p21749_p2, %p21743_p12 }
  0x4e   : > { %21753 = shalt.err (!%p21750_p5)
}
  0x4f   : > { %s21921_s16 = smov 512   ;;  %s21922_s17 = smov 32  }
  0x50   : > { %18749 = dma.hbm_to_vmem [thread:$0]  (!%p22011_p6), %s24590_s3, 32768, %s22015_s12, [#allocation7], %s21921_s16, %s21921_s16, %s21922_s17  }
  0x51   : > { %s21923_s20 = smov [#allocation11]   ;;  %s21754_s28 = scalar_lea.hbm %s24592_s5, 8192 }
  0x52   : > { %s254_s21 = sshll.u32 %s21923_s20, 4  ;;  %p21755_p7 = scmp.ne.s32.totalorder %s24592_s5, %s21754_s28  ;;  %s255_s21 = int_to_ptr.vmem [resolvable:$true] %s254_s21 }
  0x53   : > { %p21761_p1 = scmp.lt.u32.totalorder %s21754_s28, %s24592_s5 }
  0x54   : > { %p21757_p9 = pnand %p21755_p7, %p22025_p8 }
  0x56   : > { %p21758_p3 = pneg %p21757_p9 }
  0x58   : > { %p21763_p4 = pnand %p21761_p1, %p21758_p3 }
  0x5a   : > { %21766 = shalt.err (!%p21763_p4)
}
  0x5b   : > { %s21767_s12 = scalar_lea.vmem %s255_s21, 8192  ;;  %p21775_p13 = scmp.lt.s32.totalorder %s255_s21, %s255_s21 }
  0x5c   : > { %p21768_p10 = scmp.ne.s32.totalorder %s255_s21, %s21767_s12  ;;  %p21776_p0 = scmp.lt.s32.totalorder %s21767_s12, %s21767_s12 }
  0x5e   : > { %p21770_p11 = pnand %p21768_p10, %p22025_p8  ;;  %p21777_p2 = por %p21776_p0, %p21775_p13 }
  0x60   : > { %p21771_p12 = pneg %p21770_p11 }
  0x62   : > { %p21778_p5 = pnand %p21777_p2, %p21771_p12 }
  0x64   : > { %21781 = shalt.err (!%p21778_p5)
}
  0x65   : > { %s21924_s10 = smov 128   ;;  %s21925_s16 = smov 8  }
  0x66   : > { %18755 = dma.hbm_to_vmem [thread:$0]  (!%p22011_p6), %s24592_s5, 8192, %s255_s21, [#allocation10], %s21924_s10, %s21924_s10, %s21925_s16  }
  0x67   : > { %s21926_s29 = smov [#allocation12]   ;;  %s21782_s28 = scalar_lea.hbm %s24593_s6, 16 }
  0x68   : > { %s268_s20 = sshll.u32 %s21926_s29, 4  ;;  %p21783_p7 = scmp.ne.s32.totalorder %s24593_s6, %s21782_s28  ;;  %s269_s20 = int_to_ptr.vmem [resolvable:$true] %s268_s20 }
  0x69   : > { %p21789_p1 = scmp.lt.u32.totalorder %s21782_s28, %s24593_s6 }
  0x6a   : > { %p21785_p9 = pnand %p21783_p7, %p22025_p8 }
  0x6c   : > { %p21786_p3 = pneg %p21785_p9 }
  0x6e   : > { %p21791_p4 = pnand %p21789_p1, %p21786_p3 }
  0x70   : > { %21794 = shalt.err (!%p21791_p4)
}
  0x71   : > { %s21795_s21 = scalar_lea.vmem %s269_s20, 16  ;;  %s21802_s12 = scalar_lea.vmem %s269_s20, 32 }
  0x72   : > { %p21796_p10 = scmp.ne.s32.totalorder %s269_s20, %s21795_s21  ;;  %p21803_p13 = scmp.lt.s32.totalorder %s269_s20, %s269_s20 }
  0x73   : > { %p21804_p0 = scmp.lt.s32.totalorder %s21802_s12, %s21795_s21 }
  0x74   : > { %p21798_p11 = pnand %p21796_p10, %p22025_p8 }
  0x75   : > { %p21805_p2 = por %p21804_p0, %p21803_p13 }
  0x76   : > { %p21799_p12 = pneg %p21798_p11 }
  0x78   : > { %p21806_p5 = pnand %p21805_p2, %p21799_p12 }
  0x7a   : > { %21809 = shalt.err (!%p21806_p5)
}
  0x7b   : > { %18758 = dma.hbm_to_vmem [thread:$0]  (!%p22011_p6), %s24593_s6, 16, %s269_s20, [#allocation13]  }
  0x7c   : > { %s22124_s19 = sadd.s32 1, %s21916_s27   ;;  %s57_s17 = sadd.s32 1, %s21912_s26 }
  0x7d   : > { %s54_s13 = ssub.s32 %s21916_s27, %s22124_s19  ;;  %p64_p7 = scmp.ne.s32.totalorder %s21912_s26, %s21908_s25 }
  0x7e   : > { %p55_p8 = scmp.eq.s32.totalorder %s54_s13, 0  ;;  %p65_p9 = scmp.eq.s32.totalorder %s21916_s27, 0 }
  0x7f   : > { %p70_p3 = scmp.ne.s32.totalorder %s21908_s25, %s21904_s24  ;;  %p24600_p4 = scmp.eq.s32.totalorder %s21995_s30, 0 }
  0x80   : > { %s22135_s18 = scalar_select %p55_p8, %s21912_s26, %s57_s17  }
  0x81   : > { %p66_p1 = por %p65_p9, %p64_p7  ;;  %p22139_p10 = por %p24600_p4, %p70_p3 }
  0x82   : > { %p18768_p11 = scmp.lt.s32.totalorder %s21916_s27, 4  ;;  %s296_s22 = sand.u32 1, %s21912_s26  }
  0x83   : > { %s18715_s20 = smul.u32 15104, %s296_s22  ;;  %s21815_s16 = scalar_lea.hbm %s24588_s1, 966656 }
  0x84   : > { %s18084_s23 = smul.u32 241664, %s21916_s27  ;;  %p22146_p6 = pnand %p18768_p11, %p66_p1 }
  0x85   : > { %s300_s14 = scalar_lea.vmem [#allocation3], %s18715_s20  ;;  %s22157_s27 = scalar_lea.sflag [#allocation4], %s296_s22 }
  0x86   : > { %s22153_s24 = scalar_lea.hbm %s24588_s1, %s18084_s23  ;;  %s308_s15 = sshll.u32 %s300_s14, 4  ;;  %s22155_s15 = int_to_ptr.vmem [resolvable:$true] %s308_s15 }
  0x87   : > { %s21810_s21 = scalar_lea.hbm %s22153_s24, 241664  ;;  %p21812_p13 = pneg %p22146_p6 }
  0x88   : > { %p21811_p12 = scmp.ne.s32.totalorder %s22153_s24, %s21810_s21  ;;  %p21816_p5 = scmp.lt.u32.totalorder %s22153_s24, %s24588_s1 }
  0x89   : > { %p21817_p8 = scmp.lt.u32.totalorder %s21815_s16, %s21810_s21  ;;  %p21819_p9 = scmp.lt.u32.totalorder %s21810_s21, %s22153_s24 }
  0x8a   : > { %p21813_p0 = pnand %p21812_p13, %p21811_p12 }
  0x8b   : > { %p21818_p7 = por %p21817_p8, %p21816_p5 }
  0x8c   : > { %p21814_p2 = pneg %p21813_p0 }
  0x8d   : > { %p21820_p3 = por %p21819_p9, %p21818_p7 }
  0x8f   : > { %p21821_p1 = pnand %p21820_p3, %p21814_p2 }
  0x91   : > { %21824 = shalt.err (!%p21821_p1)
}
  0x92   : > { %s21825_s22 = scalar_lea.vmem %s22155_s15, 241664  ;;  %s21927_s20 = smov [#allocation3]  }
  0x93   : > { %p21826_p4 = scmp.ne.s32.totalorder %s22155_s15, %s21825_s22  ;;  %s21830_s23 = sshll.u32 %s21927_s20, 4  ;;  %s21831_s23 = int_to_ptr.vmem [resolvable:$false] %s21830_s23 }
  0x94   : > { %s21832_s9 = scalar_lea.vmem %s21831_s23, 483328  ;;  %p21833_p0 = scmp.lt.s32.totalorder %s22155_s15, %s21831_s23 }
  0x95   : > { %p21828_p11 = pnand %p21826_p4, %p21812_p13  ;;  %p21834_p5 = scmp.lt.s32.totalorder %s21832_s9, %s21825_s22 }
  0x97   : > { %p21829_p12 = pneg %p21828_p11  ;;  %p21835_p8 = por %p21834_p5, %p21833_p0 }
  0x99   : > { %p21836_p7 = pnand %p21835_p8, %p21829_p12 }
  0x9b   : > { %21839 = shalt.err (!%p21836_p7)
}
  0x9c   : > { %s21928_s11 = smov 256   ;;  %s21929_s14 = smov 16  }
  0x9d   : > { %18762 = dma.hbm_to_vmem [thread:$0]  (!%p22146_p6), %s22153_s24, 241664, %s22155_s15, %s22157_s27, %s21928_s11, %s21928_s11, %s21929_s14  }
  0x9e   : > { %p24603_p13 = scmp.ne.s32.totalorder %s24597_s8, 0 }
  0x9f   : > { %s322_s21 = sand.u32 (!%p24603_p13), 1, %s21908_s25  }
  0xa0   : > { %320 = sbr.rel (%p24603_p13) target bundleno = 2868 (0xb34), region = 48  ;;  %s323_s10 = scalar_lea.sflag (!%p24603_p13), [#allocation4], %s322_s21 }
  0xa1   : > { %s18716_s12 = smul.u32 (!%p24603_p13), 15104, %s322_s21 }
  0xa3   : > { %s22188_s16 = scalar_lea.vmem (!%p24603_p13), [#allocation3], %s18716_s12 }
  0xa7   : > { %21883 = dma.done.wait (%p22139_p10), %s323_s10, 241664  }
  0xa8   : > { %21885 = vsyncadd (%p22139_p10), %s323_s10, 4294725632  ;;  %p24604_p2 = scmp.eq.s32.totalorder %s21995_s30, 0 }
  0xaa   : > { %21887 = dma.done.wait (%p24604_p2), [#allocation7], 32832   ;;  %p24605_p6 = pmov %p24604_p2 }
  0xab   : > { %p24606_p9 = pmov %p24604_p2 }
  0xac   : > { %21889 = vsyncadd (%p24605_p6), [#allocation7], 4294934464 }
  0xad   : > { %21891 = dma.done.wait (%p24606_p9), [#allocation10], 8256   ;;  %p24607_p3 = pmov %p24604_p2 }
  0xae   : > { %p24608_p1 = pmov %p24604_p2 }
  0xaf   : > { %21893 = vsyncadd (%p24607_p3), [#allocation10], 4294959040 }
  0xb0   : > { %21895 = dma.done.wait (%p24608_p1), [#allocation13], 16   ;;  %p24609_p4 = pmov %p24608_p1 }
  0xb1   : > { %s381_s8 = smul.u32 59, %s21995_s30  ;;  %p24610_p11 = scmp.ne.s32.totalorder %s21995_s30, 0 }
  0xb2   : > { %21897 = vsyncadd (%p24609_p4), [#allocation13], 4294967280  ;;  %v21930_v0 = vmov (!%p24610_p11), 0.0  }
  0xb3   : > { %p386_p10 = scmp.lt.s32.totalorder %s381_s8, 234  ;;  %400 = sbr.rel (%p24610_p11) target bundleno = 186 (0xba), region = 76  ;;  %401 = vst [vmem:[#allocation2] sm:$0xff] (!%p24610_p11), %v21930_v0 }
  0xb5   : > { %s24616_s8 = smov (!%p386_p10, %s381_s8), 234 }
  0xb6   : > { %s15832_s29 = sshll.u32 %s24616_s8, 1 }
  0xb7   : > { %s22210_s15 = scalar_lea.vmem %s24587_s0, %s15832_s29 }
  0xba PF: > { %v18823_v1 = vld [vmem:[%s22188_s16 + $0x4] ss:$16 sps:$4 sm:$0xff]   ;;  %v18825_v2 = vld [vmem:[%s22188_s16 + $0xc] ss:$16 sps:$4 sm:$0xff]   ;;  %v18827_v3 = vld [vmem:[%s22188_s16] ss:$16 sps:$4 sm:$0xff]   ;;  %v403_v35 = vlaneseq }
  0xbb   : > { %12372 = vmatprep.subr.bf16.mxu0 %v18823_v1  ;;  %v18828_v4 = vld [vmem:[%s22188_s16 + $0x8] ss:$16 sps:$4 sm:$0xff]   ;;  %13602 = vmatprep.subr.bf16.mxu1 %v18825_v2  ;;  %v18829_v5 = vld [vmem:[%s22188_s16 + $0x24] ss:$16 sps:$4 sm:$0xff]   ;;  %v18831_v6 = vld [vmem:[%s22188_s16 + $0x2c] ss:$16 sps:$4 sm:$0xff]  }
  0xbc   : > { %12373 = vmatpush1.bf16.msra.mxu0 %v18827_v3  ;;  %13603 = vmatpush1.bf16.msra.mxu1 %v18828_v4  ;;  %v18833_v7 = vld [vmem:[%s22188_s16 + $0x20] ss:$16 sps:$4 sm:$0xff]   ;;  %v18834_v8 = vld [vmem:[%s22188_s16 + $0x28] ss:$16 sps:$4 sm:$0xff]   ;;  %v18835_v9 = vld [vmem:[%s22188_s16 + $0x44] ss:$16 sps:$4 sm:$0xff]  }
  0xbd   : > { %12374 = vmatprep.subr.bf16.mxu0 %v18829_v5  ;;  %13604 = vmatprep.subr.bf16.mxu1 %v18831_v6  ;;  %v18837_v10 = vld [vmem:[%s22188_s16 + $0x4c] ss:$16 sps:$4 sm:$0xff]   ;;  %v18839_v11 = vld [vmem:[%s22188_s16 + $0x40] ss:$16 sps:$4 sm:$0xff]   ;;  %v18840_v12 = vld [vmem:[%s22188_s16 + $0x48] ss:$16 sps:$4 sm:$0xff]  }
  0xbe   : > { %v18841_v13 = vld [vmem:[%s22188_s16 + $0x64] ss:$16 sps:$4 sm:$0xff]   ;;  %v18843_v14 = vld [vmem:[%s22188_s16 + $0x6c] ss:$16 sps:$4 sm:$0xff]   ;;  %v18845_v15 = vld [vmem:[%s22188_s16 + $0x60] ss:$16 sps:$4 sm:$0xff]  }
  0xbf   : > { %v18846_v16 = vld [vmem:[%s22188_s16 + $0x68] ss:$16 sps:$4 sm:$0xff]   ;;  %v18847_v17 = vld [vmem:[%s22188_s16 + $0x84] ss:$16 sps:$4 sm:$0xff]   ;;  %v18849_v18 = vld [vmem:[%s22188_s16 + $0x8c] ss:$16 sps:$4 sm:$0xff]  }
  0xc0   : > { %12375 = vmatpush1.bf16.msra.mxu0 %v18833_v7  ;;  %13605 = vmatpush1.bf16.msra.mxu1 %v18834_v8  ;;  %v18851_v19 = vld [vmem:[%s22188_s16 + $0x80] ss:$16 sps:$4 sm:$0xff]   ;;  %v18852_v20 = vld [vmem:[%s22188_s16 + $0x88] ss:$16 sps:$4 sm:$0xff]   ;;  %v18853_v21 = vld [vmem:[%s22188_s16 + $0xa4] ss:$16 sps:$4 sm:$0xff]  }
  0xc1   : > { %12376 = vmatprep.subr.bf16.mxu0 %v18835_v9  ;;  %13606 = vmatprep.subr.bf16.mxu1 %v18837_v10  ;;  %v18855_v22 = vld [vmem:[%s22188_s16 + $0xac] ss:$16 sps:$4 sm:$0xff]   ;;  %v18857_v23 = vld [vmem:[%s22188_s16 + $0xa0] ss:$16 sps:$4 sm:$0xff]   ;;  %v18858_v24 = vld [vmem:[%s22188_s16 + $0xa8] ss:$16 sps:$4 sm:$0xff]  }
  0xc2   : > { %v18859_v25 = vld [vmem:[%s22188_s16 + $0xc4] ss:$16 sps:$4 sm:$0xff]   ;;  %v18861_v26 = vld [vmem:[%s22188_s16 + $0xcc] ss:$16 sps:$4 sm:$0xff]   ;;  %v18863_v27 = vld [vmem:[%s22188_s16 + $0xc0] ss:$16 sps:$4 sm:$0xff]  }
  0xc3   : > { %v18864_v28 = vld [vmem:[%s22188_s16 + $0xc8] ss:$16 sps:$4 sm:$0xff]   ;;  %v18865_v29 = vld [vmem:[%s22188_s16 + $0xe4] ss:$16 sps:$4 sm:$0xff]   ;;  %v18867_v30 = vld [vmem:[%s22188_s16 + $0xec] ss:$16 sps:$4 sm:$0xff]  }
  0xc4   : > { %12377 = vmatpush1.bf16.msra.mxu0 %v18839_v11  ;;  %13607 = vmatpush1.bf16.msra.mxu1 %v18840_v12  ;;  %v18869_v31 = vld [vmem:[%s22188_s16 + $0xe0] ss:$16 sps:$4 sm:$0xff]   ;;  %v18870_v32 = vld [vmem:[%s22188_s16 + $0xe8] ss:$16 sps:$4 sm:$0xff]   ;;  %v18871_v33 = vld [vmem:[%s22188_s16 + $0x104] ss:$16 sps:$4 sm:$0xff]  }
  0xc5   : > { %12378 = vmatprep.subr.bf16.mxu0 %v18841_v13  ;;  %13608 = vmatprep.subr.bf16.mxu1 %v18843_v14  ;;  %v18873_v34 = vld [vmem:[%s22188_s16 + $0x10c] ss:$16 sps:$4 sm:$0xff]   ;;  %v18875_v36 = vld [vmem:[%s22188_s16 + $0x100] ss:$16 sps:$4 sm:$0xff]   ;;  %v18876_v37 = vld [vmem:[%s22188_s16 + $0x108] ss:$16 sps:$4 sm:$0xff]  }
  0xc6   : > { %v21931_v38 = vmov 1983009808   ;;  %v18877_v40 = vld [vmem:[%s22188_s16 + $0x124] ss:$16 sps:$4 sm:$0xff]   ;;  %v22251_v41 = vand.u32 127, %v403_v35  ;;  %s402_s27 = smul.u32 7552, %s21995_s30 }
  0xc7   : > { %v614_v39 = vunpack.c.l.s4 %v21931_v38  ;;  %v18879_v42 = vld [vmem:[%s22188_s16 + $0x12c] ss:$16 sps:$4 sm:$0xff]   ;;  %v18881_v43 = vld [vmem:[%s22188_s16 + $0x120] ss:$16 sps:$4 sm:$0xff]   ;;  %v22256_v45 = vshrl.u32 %v403_v35, 7  ;;  %p18076_p12 = scmp.ne.s32.totalorder %s21995_s30, 3 }
  0xc8   : > { %12379 = vmatpush1.bf16.msra.mxu0 %v18845_v15  ;;  %13609 = vmatpush1.bf16.msra.mxu1 %v18846_v16  ;;  %v18882_v46 = vld [vmem:[%s22188_s16 + $0x128] ss:$16 sps:$4 sm:$0xff]   ;;  %v18883_v47 = vld [vmem:[%s22188_s16 + $0x144] ss:$16 sps:$4 sm:$0xff]   ;;  %v405_v48 = vadd.s32 128, %v22251_v41  ;;  %v22262_v50 = vstv %s402_s27 }
  0xc9   : > { %12380 = vmatprep.subr.bf16.mxu0 %v18847_v17  ;;  %13610 = vmatprep.subr.bf16.mxu1 %v18849_v18  ;;  %v615_v44 = vunpack.c.0.s8 %v614_v39  ;;  %v18885_v49 = vld [vmem:[%s22188_s16 + $0x14c] ss:$16 sps:$4 sm:$0xff]   ;;  %v18887_v51 = vld [vmem:[%s22188_s16 + $0x140] ss:$16 sps:$4 sm:$0xff]   ;;  %v18888_v52 = vld [vmem:[%s22188_s16 + $0x148] ss:$16 sps:$4 sm:$0xff]   ;;  %v464_v13 = vadd.s32 %v22262_v50, %v22251_v41 }
  0xca   : > { %v18889_v54 = vld [vmem:[%s22188_s16 + $0x164] ss:$16 sps:$4 sm:$0xff]   ;;  %v465_v55 = vadd.s32 %v22262_v50, %v405_v48  ;;  %v18891_v56 = vld [vmem:[%s22188_s16 + $0x16c] ss:$16 sps:$4 sm:$0xff]   ;;  %v18893_v59 = vld [vmem:[%s22188_s16 + $0x160] ss:$16 sps:$4 sm:$0xff]  }
  0xcb   : > { %v22267_v53 = vsub.s32 %v615_v44, %v22256_v45  ;;  %v22273_v57 = vld [vmem:[%s22210_s15] sm:$0xff]  ;;  %v18895_v61 = vld [vmem:[%s22188_s16 + $0x184] ss:$16 sps:$4 sm:$0xff]   ;;  %v18899_v0 = vld [vmem:[%s22188_s16 + $0x180] ss:$16 sps:$4 sm:$0xff]   ;;  %vm523_vm2 = vcmp.lt.s32.totalorder %v464_v13, 30000 }
  0xcc   : > { %12381 = vmatpush1.bf16.msra.mxu0 %v18851_v19  ;;  %13611 = vmatpush1.bf16.msra.mxu1 %v18852_v20  ;;  %v18894_v60 = vld [vmem:[%s22188_s16 + $0x168] ss:$16 sps:$4 sm:$0xff]   ;;  %vm524_vm0 = vcmp.lt.s32.totalorder %v465_v55, 30000  ;;  %v18897_v62 = vld [vmem:[%s22188_s16 + $0x18c] ss:$16 sps:$4 sm:$0xff]   ;;  %vm17725_vm3 = vmpackc.low %vm523_vm2, %vm523_vm2 }
  0xcd   : > { %12382 = vmatprep.subr.bf16.mxu0 %v18853_v21  ;;  %13612 = vmatprep.subr.bf16.mxu1 %v18855_v22  ;;  %v619_v58 = vrot.slane %v22273_v57, %v22267_v53  ;;  %vm17722_vm1 = vmpackc.low %vm524_vm0, %vm524_vm0  ;;  %v18900_v2 = vld [vmem:[%s22188_s16 + $0x188] ss:$16 sps:$4 sm:$0xff]   ;;  %v18901_v3 = vld [vmem:[%s22188_s16 + $0x1a4] ss:$16 sps:$4 sm:$0xff]  }
  0xce   : > { %v18903_v4 = vld [vmem:[%s22188_s16 + $0x1ac] ss:$16 sps:$4 sm:$0xff]   ;;  %v18905_v5 = vld [vmem:[%s22188_s16 + $0x1a0] ss:$16 sps:$4 sm:$0xff]   ;;  %v18906_v6 = vld [vmem:[%s22188_s16 + $0x1a8] ss:$16 sps:$4 sm:$0xff]  }
  0xcf   : > { %v627_v63 = vcombine.high %v619_v58, %v619_v58  ;;  %v18907_v7 = vld [vmem:[%s22188_s16 + $0x1c4] ss:$16 sps:$4 sm:$0xff]   ;;  %v18909_v8 = vld [vmem:[%s22188_s16 + $0x1cc] ss:$16 sps:$4 sm:$0xff]   ;;  %v18911_v9 = vld [vmem:[%s22188_s16 + $0x1c0] ss:$16 sps:$4 sm:$0xff]   ;;  %v17726_v18 = vpack.c.bf16 %v619_v58, %v619_v58 }
  0xd0   : > { %12383 = vmatpush1.bf16.msra.mxu0 %v18857_v23  ;;  %13613 = vmatpush1.bf16.msra.mxu1 %v18858_v24  ;;  %v18912_v10 = vld [vmem:[%s22188_s16 + $0x1c8] ss:$16 sps:$4 sm:$0xff]   ;;  %v18913_v11 = vld [vmem:[%s22188_s16 + $0x1e4] ss:$16 sps:$4 sm:$0xff]   ;;  %v18915_v12 = vld [vmem:[%s22188_s16 + $0x1ec] ss:$16 sps:$4 sm:$0xff]  }
  0xd1   : > { %12384 = vmatprep.subr.bf16.mxu0 %v18859_v25  ;;  %13614 = vmatprep.subr.bf16.mxu1 %v18861_v26  ;;  %v17723_v1 = vpack.c.bf16 %v627_v63, %v627_v63  ;;  %v18917_v14 = vld [vmem:[%s22188_s16 + $0x1e0] ss:$16 sps:$4 sm:$0xff]   ;;  %v18918_v15 = vld [vmem:[%s22188_s16 + $0x1e8] ss:$16 sps:$4 sm:$0xff]   ;;  %v18922_v16 = vld [vmem:[%s22188_s16 + $0x204] ss:$16 sps:$4 sm:$0xff]  }
  0xd2   : > { %v18925_v17 = vld [vmem:[%s22188_s16 + $0x20c] ss:$16 sps:$4 sm:$0xff]   ;;  %v18920_v19 = vld [vmem:[%s22188_s16 + $0x200] ss:$16 sps:$4 sm:$0xff]   ;;  %v18923_v20 = vld [vmem:[%s22188_s16 + $0x208] ss:$16 sps:$4 sm:$0xff]  }
  0xd3   : > { %17724 = vmatprep.mubr.msk.bf16.mxu0 %vm17722_vm1, %v17723_v1  ;;  %17901 = vmatprep.mubr.msk.bf16.mxu1 %vm17722_vm1, %v17723_v1  ;;  %v18928_v21 = vld [vmem:[%s22188_s16 + $0x224] ss:$16 sps:$4 sm:$0xff]   ;;  %v18931_v22 = vld [vmem:[%s22188_s16 + $0x22c] ss:$16 sps:$4 sm:$0xff]   ;;  %v18926_v23 = vld [vmem:[%s22188_s16 + $0x220] ss:$16 sps:$4 sm:$0xff]  }
  0xd4   : > { %12385 = vmatpush1.bf16.msra.mxu0 %v18863_v27  ;;  %13615 = vmatpush1.bf16.msra.mxu1 %v18864_v28  ;;  %v18929_v24 = vld [vmem:[%s22188_s16 + $0x228] ss:$16 sps:$4 sm:$0xff]   ;;  %v18934_v25 = vld [vmem:[%s22188_s16 + $0x244] ss:$16 sps:$4 sm:$0xff]   ;;  %v18937_v26 = vld [vmem:[%s22188_s16 + $0x24c] ss:$16 sps:$4 sm:$0xff]   ;;  %v612_v27 = vcombine.high %v22273_v57, %v22273_v57 }
  0xd5   : > { %12386 = vmatprep.subr.bf16.mxu0 %v18865_v29  ;;  %13616 = vmatprep.subr.bf16.mxu1 %v18867_v30  ;;  %v18932_v28 = vld [vmem:[%s22188_s16 + $0x240] ss:$16 sps:$4 sm:$0xff]   ;;  %v18935_v29 = vld [vmem:[%s22188_s16 + $0x248] ss:$16 sps:$4 sm:$0xff]   ;;  %v18940_v30 = vld [vmem:[%s22188_s16 + $0x264] ss:$16 sps:$4 sm:$0xff]  }
  0xd6   : > { %v18941_v35 = vld [vmem:[%s22188_s16 + $0x268] ss:$16 sps:$4 sm:$0xff]   ;;  %v18944_v38 = vld [vmem:[%s22188_s16 + $0x280] ss:$16 sps:$4 sm:$0xff]   ;;  %v18955_v44 = vld [vmem:[%s22188_s16 + $0x2ac] ss:$16 sps:$4 sm:$0xff]  }
  0xd7   : > { %v18953_v48 = vld [vmem:[%s22188_s16 + $0x2a8] ss:$16 sps:$4 sm:$0xff]   ;;  %v18964_v55 = vld [vmem:[%s22188_s16 + $0x2e4] ss:$16 sps:$4 sm:$0xff]   ;;  %v18962_v57 = vld [vmem:[%s22188_s16 + $0x2e0] ss:$16 sps:$4 sm:$0xff]  }
  0xd8   : > { %12387 = vmatpush1.bf16.msra.mxu0 %v18869_v31  ;;  %13617 = vmatpush1.bf16.msra.mxu1 %v18870_v32  ;;  %v18943_v31 = vld [vmem:[%s22188_s16 + $0x26c] ss:$16 sps:$4 sm:$0xff]   ;;  %v22314_v32 = vrot.slane %v612_v27, %v22267_v53  ;;  %v18965_v58 = vld [vmem:[%s22188_s16 + $0x2e8] ss:$16 sps:$4 sm:$0xff]   ;;  %v18976_v63 = vld [vmem:[%s22188_s16 + $0x324] ss:$16 sps:$4 sm:$0xff]  }
  0xd9   : > { %12388 = vmatprep.subr.bf16.mxu0 %v18871_v33  ;;  %13618 = vmatprep.subr.bf16.mxu1 %v18873_v34  ;;  %v18938_v33 = vld [vmem:[%s22188_s16 + $0x260] ss:$16 sps:$4 sm:$0xff]   ;;  %v407_v34 = vadd.s32 384, %v22251_v41 }
  0xda   : > { %v18974_v1 = vld [vmem:[%s22188_s16 + $0x320] ss:$16 sps:$4 sm:$0xff]  }
  0xdb   : > { %v467_v39 = vadd.s32 %v22262_v50, %v407_v34  ;;  %v18992_v13 = vld [vmem:[%s22188_s16 + $0x380] ss:$16 sps:$4 sm:$0xff]   ;;  %v17732_v34 = vpack.c.bf16 %v22314_v32, %v22314_v32 }
  0xdc   : > { %12389 = vmatpush1.bf16.msra.mxu0 %v18875_v36  ;;  %13619 = vmatpush1.bf16.msra.mxu1 %v18876_v37  ;;  %v18946_v36 = vld [vmem:[%s22188_s16 + $0x284] ss:$16 sps:$4 sm:$0xff]   ;;  %v18949_v37 = vld [vmem:[%s22188_s16 + $0x28c] ss:$16 sps:$4 sm:$0xff]   ;;  %v19010_v27 = vld [vmem:[%s22188_s16 + $0x3e0] ss:$16 sps:$4 sm:$0xff]  }
  0xdd   : > { %12390 = vmatprep.subr.bf16.mxu0 %v18877_v40  ;;  %13620 = vmatprep.subr.bf16.mxu1 %v18879_v42  ;;  %v628_v40 = vcombine.high %v22314_v32, %v22314_v32  ;;  %v18947_v42 = vld [vmem:[%s22188_s16 + $0x288] ss:$16 sps:$4 sm:$0xff]   ;;  %vm526_vm4 = vcmp.lt.s32.totalorder %v467_v39, 30000  ;;  %v22383_v39 = vld [vmem:[%s22210_s15 + $0x8] sm:$0xff] }
  0xde   : > { %vm17728_vm5 = vmpackc.low %vm526_vm4, %vm526_vm4  ;;  %v22387_v32 = vrot.slane %v22383_v39, %v22267_v53 }
  0xe0   : > { %12391 = vmatpush1.bf16.msra.mxu0 %v18881_v43  ;;  %13621 = vmatpush1.bf16.msra.mxu1 %v18882_v46  ;;  %v18952_v43 = vld [vmem:[%s22188_s16 + $0x2a4] ss:$16 sps:$4 sm:$0xff]   ;;  %v18950_v46 = vld [vmem:[%s22188_s16 + $0x2a0] ss:$16 sps:$4 sm:$0xff]  }
  0xe1   : > { %12392 = vmatprep.subr.bf16.mxu0 %v18883_v47  ;;  %13622 = vmatprep.subr.bf16.mxu1 %v18885_v49  ;;  %v17729_v47 = vpack.c.bf16 %v628_v40, %v628_v40  ;;  %v18958_v49 = vld [vmem:[%s22188_s16 + $0x2c4] ss:$16 sps:$4 sm:$0xff]   ;;  %v19022_v40 = vld [vmem:[%s22188_s16 + $0x420] ss:$16 sps:$4 sm:$0xff]  }
  0xe4   : > { %12393 = vmatpush1.bf16.msra.mxu0 %v18887_v51  ;;  %13623 = vmatpush1.bf16.msra.mxu1 %v18888_v52  ;;  %v18961_v51 = vld [vmem:[%s22188_s16 + $0x2cc] ss:$16 sps:$4 sm:$0xff]   ;;  %v18956_v52 = vld [vmem:[%s22188_s16 + $0x2c0] ss:$16 sps:$4 sm:$0xff]  }
  0xe5   : > { %12394 = vmatprep.subr.bf16.mxu0 %v18889_v54  ;;  %13624 = vmatprep.subr.bf16.mxu1 %v18891_v56  ;;  %v18959_v54 = vld [vmem:[%s22188_s16 + $0x2c8] ss:$16 sps:$4 sm:$0xff]   ;;  %v18967_v56 = vld [vmem:[%s22188_s16 + $0x2ec] ss:$16 sps:$4 sm:$0xff]  }
  0xe8   : > { %12395 = vmatpush1.bf16.msra.mxu0 %v18893_v59  ;;  %13625 = vmatpush1.bf16.msra.mxu1 %v18894_v60  ;;  %v18970_v59 = vld [vmem:[%s22188_s16 + $0x304] ss:$16 sps:$4 sm:$0xff]   ;;  %v18973_v60 = vld [vmem:[%s22188_s16 + $0x30c] ss:$16 sps:$4 sm:$0xff]  }
  0xe9   : > { %12396 = vmatprep.subr.bf16.mxu0 %v18895_v61  ;;  %13626 = vmatprep.subr.bf16.mxu1 %v18897_v62  ;;  %v18968_v61 = vld [vmem:[%s22188_s16 + $0x300] ss:$16 sps:$4 sm:$0xff]   ;;  %v18971_v62 = vld [vmem:[%s22188_s16 + $0x308] ss:$16 sps:$4 sm:$0xff]  }
  0xec   : > { %12397 = vmatpush1.bf16.msra.mxu0 %v18899_v0  ;;  %13627 = vmatpush1.bf16.msra.mxu1 %v18900_v2  ;;  %v18979_v0 = vld [vmem:[%s22188_s16 + $0x32c] ss:$16 sps:$4 sm:$0xff]   ;;  %v18977_v2 = vld [vmem:[%s22188_s16 + $0x328] ss:$16 sps:$4 sm:$0xff]  }
  0xed   : > { %12398 = vmatprep.subr.bf16.mxu0 %v18901_v3  ;;  %13628 = vmatprep.subr.bf16.mxu1 %v18903_v4  ;;  %v18982_v3 = vld [vmem:[%s22188_s16 + $0x344] ss:$16 sps:$4 sm:$0xff]   ;;  %v18985_v4 = vld [vmem:[%s22188_s16 + $0x34c] ss:$16 sps:$4 sm:$0xff]  }
  0xf0   : > { %12399 = vmatpush1.bf16.msra.mxu0 %v18905_v5  ;;  %13629 = vmatpush1.bf16.msra.mxu1 %v18906_v6  ;;  %v18980_v5 = vld [vmem:[%s22188_s16 + $0x340] ss:$16 sps:$4 sm:$0xff]   ;;  %v18983_v6 = vld [vmem:[%s22188_s16 + $0x348] ss:$16 sps:$4 sm:$0xff]  }
  0xf1   : > { %12400 = vmatprep.subr.bf16.mxu0 %v18907_v7  ;;  %13630 = vmatprep.subr.bf16.mxu1 %v18909_v8  ;;  %v18988_v7 = vld [vmem:[%s22188_s16 + $0x364] ss:$16 sps:$4 sm:$0xff]   ;;  %v18991_v8 = vld [vmem:[%s22188_s16 + $0x36c] ss:$16 sps:$4 sm:$0xff]  }
  0xf4   : > { %12401 = vmatpush1.bf16.msra.mxu0 %v18911_v9  ;;  %13631 = vmatpush1.bf16.msra.mxu1 %v18912_v10  ;;  %v18986_v9 = vld [vmem:[%s22188_s16 + $0x360] ss:$16 sps:$4 sm:$0xff]   ;;  %v18989_v10 = vld [vmem:[%s22188_s16 + $0x368] ss:$16 sps:$4 sm:$0xff]  }
  0xf5   : > { %12402 = vmatprep.subr.bf16.mxu0 %v18913_v11  ;;  %13632 = vmatprep.subr.bf16.mxu1 %v18915_v12  ;;  %v18994_v11 = vld [vmem:[%s22188_s16 + $0x384] ss:$16 sps:$4 sm:$0xff]   ;;  %v18997_v12 = vld [vmem:[%s22188_s16 + $0x38c] ss:$16 sps:$4 sm:$0xff]  }
  0xf8   : > { %12403 = vmatpush1.bf16.msra.mxu0 %v18917_v14  ;;  %13633 = vmatpush1.bf16.msra.mxu1 %v18918_v15  ;;  %v18995_v14 = vld [vmem:[%s22188_s16 + $0x388] ss:$16 sps:$4 sm:$0xff]   ;;  %v19000_v15 = vld [vmem:[%s22188_s16 + $0x3a4] ss:$16 sps:$4 sm:$0xff]  }
  0xf9   : > { %12413 = vmatprep.subr.bf16.mxu0 %v18922_v16  ;;  %13643 = vmatprep.subr.bf16.mxu1 %v18925_v17  ;;  %v19003_v16 = vld [vmem:[%s22188_s16 + $0x3ac] ss:$16 sps:$4 sm:$0xff]   ;;  %v18998_v17 = vld [vmem:[%s22188_s16 + $0x3a0] ss:$16 sps:$4 sm:$0xff]  }
  0xfb   : > { %17727 = vmatmul.mubr.msk.bf16.vlgmr.msra.gmra.mrb[0].mxu0 %vm17725_vm3, %v17726_v18  ;;  %17904 = vmatmul.mubr.msk.bf16.vlgmr.msra.gmra.mrb[0].mxu1 %vm17725_vm3, %v17726_v18  ;;  %v19001_v18 = vld [vmem:[%s22188_s16 + $0x3a8] ss:$16 sps:$4 sm:$0xff]  }
  0xfc   : > { %12414 = vmatpush1.bf16.msra.mxu0 %v18920_v19  ;;  %13644 = vmatpush1.bf16.msra.mxu1 %v18923_v20  ;;  %v19006_v19 = vld [vmem:[%s22188_s16 + $0x3c4] ss:$16 sps:$4 sm:$0xff]   ;;  %v19009_v20 = vld [vmem:[%s22188_s16 + $0x3cc] ss:$16 sps:$4 sm:$0xff]  }
  0xfd   : > { %12415 = vmatprep.subr.bf16.mxu0 %v18928_v21  ;;  %13645 = vmatprep.subr.bf16.mxu1 %v18931_v22  ;;  %v406_v21 = vadd.s32 256, %v22251_v41  ;;  %v19004_v22 = vld [vmem:[%s22188_s16 + $0x3c0] ss:$16 sps:$4 sm:$0xff]  }
  0xfe   : > { %17730 = vmatprep.mubr.msk.bf16.mxu0 %vm17728_vm5, %v17729_v47  ;;  %17907 = vmatprep.mubr.msk.bf16.mxu1 %vm17728_vm5, %v17729_v47  ;;  %v19028_v47 = vld [vmem:[%s22188_s16 + $0x440] ss:$16 sps:$4 sm:$0xff]  }
 0x100   : > { %12416 = vmatpush1.bf16.msra.mxu0 %v18926_v23  ;;  %13646 = vmatpush1.bf16.msra.mxu1 %v18929_v24  ;;  %v19007_v23 = vld [vmem:[%s22188_s16 + $0x3c8] ss:$16 sps:$4 sm:$0xff]   ;;  %v19012_v24 = vld [vmem:[%s22188_s16 + $0x3e4] ss:$16 sps:$4 sm:$0xff]  }
 0x101   : > { %12417 = vmatprep.subr.bf16.mxu0 %v18934_v25  ;;  %13647 = vmatprep.subr.bf16.mxu1 %v18937_v26  ;;  %v19015_v25 = vld [vmem:[%s22188_s16 + $0x3ec] ss:$16 sps:$4 sm:$0xff]   ;;  %v466_v26 = vadd.s32 %v22262_v50, %v406_v21 }
 0x102   : > { %v19087_v21 = vld [vmem:[%s22188_s16 + $0x56c] ss:$16 sps:$4 sm:$0xff]  }
 0x103   : > { %vm525_vm6 = vcmp.lt.s32.totalorder %v466_v26, 30000  ;;  %v19088_v26 = vld [vmem:[%s22188_s16 + $0x580] ss:$16 sps:$4 sm:$0xff]  }
 0x104   : > { %12418 = vmatpush1.bf16.msra.mxu0 %v18932_v28  ;;  %13648 = vmatpush1.bf16.msra.mxu1 %v18935_v29  ;;  %v19013_v28 = vld [vmem:[%s22188_s16 + $0x3e8] ss:$16 sps:$4 sm:$0xff]   ;;  %v409_v29 = vadd.s32 640, %v22251_v41  ;;  %vm17731_vm7 = vmpackc.low %vm525_vm6, %vm525_vm6 }
 0x105   : > { %12419 = vmatprep.subr.bf16.mxu0 %v18940_v30  ;;  %13649 = vmatprep.subr.bf16.mxu1 %v18943_v31  ;;  %v19018_v30 = vld [vmem:[%s22188_s16 + $0x404] ss:$16 sps:$4 sm:$0xff]   ;;  %v19021_v31 = vld [vmem:[%s22188_s16 + $0x40c] ss:$16 sps:$4 sm:$0xff]  }
 0x108   : > { %12420 = vmatpush1.bf16.msra.mxu0 %v18938_v33  ;;  %13650 = vmatpush1.bf16.msra.mxu1 %v18941_v35  ;;  %v19016_v33 = vld [vmem:[%s22188_s16 + $0x400] ss:$16 sps:$4 sm:$0xff]   ;;  %v19019_v35 = vld [vmem:[%s22188_s16 + $0x408] ss:$16 sps:$4 sm:$0xff]  }
 0x109   : > { %12421 = vmatprep.subr.bf16.mxu0 %v18946_v36  ;;  %13651 = vmatprep.subr.bf16.mxu1 %v18949_v37  ;;  %v469_v36 = vadd.s32 %v22262_v50, %v409_v29  ;;  %v19024_v37 = vld [vmem:[%s22188_s16 + $0x424] ss:$16 sps:$4 sm:$0xff]   ;;  %v19099_v29 = vld [vmem:[%s22188_s16 + $0x5ac] ss:$16 sps:$4 sm:$0xff]  }
 0x10b   : > { %vm528_vm8 = vcmp.lt.s32.totalorder %v469_v36, 30000  ;;  %v629_v36 = vcombine.high %v22383_v39, %v22383_v39  ;;  %v19106_v39 = vld [vmem:[%s22188_s16 + $0x5e0] ss:$16 sps:$4 sm:$0xff]  }
 0x10c   : > { %12422 = vmatpush1.bf16.msra.mxu0 %v18944_v38  ;;  %13652 = vmatpush1.bf16.msra.mxu1 %v18947_v42  ;;  %v19027_v38 = vld [vmem:[%s22188_s16 + $0x42c] ss:$16 sps:$4 sm:$0xff]   ;;  %v19025_v42 = vld [vmem:[%s22188_s16 + $0x428] ss:$16 sps:$4 sm:$0xff]   ;;  %vm17734_vm9 = vmpackc.low %vm528_vm8, %vm528_vm8 }
 0x10d   : > { %12423 = vmatprep.subr.bf16.mxu0 %v18952_v43  ;;  %13653 = vmatprep.subr.bf16.mxu1 %v18955_v44  ;;  %v19030_v43 = vld [vmem:[%s22188_s16 + $0x444] ss:$16 sps:$4 sm:$0xff]   ;;  %v644_v44 = vcombine.high %v22387_v32, %v22387_v32 }
 0x110   : > { %12424 = vmatpush1.bf16.msra.mxu0 %v18950_v46  ;;  %13654 = vmatpush1.bf16.msra.mxu1 %v18953_v48  ;;  %v19033_v46 = vld [vmem:[%s22188_s16 + $0x44c] ss:$16 sps:$4 sm:$0xff]   ;;  %v17735_v48 = vpack.c.bf16 %v644_v44, %v644_v44 }
 0x111   : > { %12425 = vmatprep.subr.bf16.mxu0 %v18958_v49  ;;  %13655 = vmatprep.subr.bf16.mxu1 %v18961_v51  ;;  %v19031_v49 = vld [vmem:[%s22188_s16 + $0x448] ss:$16 sps:$4 sm:$0xff]   ;;  %v19036_v51 = vld [vmem:[%s22188_s16 + $0x464] ss:$16 sps:$4 sm:$0xff]  }
 0x114   : > { %12426 = vmatpush1.bf16.msra.mxu0 %v18956_v52  ;;  %13656 = vmatpush1.bf16.msra.mxu1 %v18959_v54  ;;  %v19039_v52 = vld [vmem:[%s22188_s16 + $0x46c] ss:$16 sps:$4 sm:$0xff]   ;;  %v19034_v54 = vld [vmem:[%s22188_s16 + $0x460] ss:$16 sps:$4 sm:$0xff]  }
 0x115   : > { %12427 = vmatprep.subr.bf16.mxu0 %v18964_v55  ;;  %13657 = vmatprep.subr.bf16.mxu1 %v18967_v56  ;;  %v19037_v55 = vld [vmem:[%s22188_s16 + $0x468] ss:$16 sps:$4 sm:$0xff]   ;;  %v19042_v56 = vld [vmem:[%s22188_s16 + $0x484] ss:$16 sps:$4 sm:$0xff]  }
 0x118   : > { %12428 = vmatpush1.bf16.msra.mxu0 %v18962_v57  ;;  %13658 = vmatpush1.bf16.msra.mxu1 %v18965_v58  ;;  %v19045_v57 = vld [vmem:[%s22188_s16 + $0x48c] ss:$16 sps:$4 sm:$0xff]   ;;  %v19040_v58 = vld [vmem:[%s22188_s16 + $0x480] ss:$16 sps:$4 sm:$0xff]  }
 0x119   : > { %12429 = vmatprep.subr.bf16.mxu0 %v18970_v59  ;;  %13659 = vmatprep.subr.bf16.mxu1 %v18973_v60  ;;  %v19043_v59 = vld [vmem:[%s22188_s16 + $0x488] ss:$16 sps:$4 sm:$0xff]   ;;  %v19048_v60 = vld [vmem:[%s22188_s16 + $0x4a4] ss:$16 sps:$4 sm:$0xff]  }
 0x11c   : > { %12430 = vmatpush1.bf16.msra.mxu0 %v18968_v61  ;;  %13660 = vmatpush1.bf16.msra.mxu1 %v18971_v62  ;;  %v19051_v61 = vld [vmem:[%s22188_s16 + $0x4ac] ss:$16 sps:$4 sm:$0xff]   ;;  %v19046_v62 = vld [vmem:[%s22188_s16 + $0x4a0] ss:$16 sps:$4 sm:$0xff]  }
 0x11d   : > { %12431 = vmatprep.subr.bf16.mxu0 %v18976_v63  ;;  %13661 = vmatprep.subr.bf16.mxu1 %v18979_v0  ;;  %v19049_v63 = vld [vmem:[%s22188_s16 + $0x4a8] ss:$16 sps:$4 sm:$0xff]   ;;  %v19054_v0 = vld [vmem:[%s22188_s16 + $0x4c4] ss:$16 sps:$4 sm:$0xff]  }
 0x120   : > { %12432 = vmatpush1.bf16.msra.mxu0 %v18974_v1  ;;  %13662 = vmatpush1.bf16.msra.mxu1 %v18977_v2  ;;  %v19057_v1 = vld [vmem:[%s22188_s16 + $0x4cc] ss:$16 sps:$4 sm:$0xff]   ;;  %v19052_v2 = vld [vmem:[%s22188_s16 + $0x4c0] ss:$16 sps:$4 sm:$0xff]  }
 0x121   : > { %12433 = vmatprep.subr.bf16.mxu0 %v18982_v3  ;;  %13663 = vmatprep.subr.bf16.mxu1 %v18985_v4  ;;  %v19055_v3 = vld [vmem:[%s22188_s16 + $0x4c8] ss:$16 sps:$4 sm:$0xff]   ;;  %v19060_v4 = vld [vmem:[%s22188_s16 + $0x4e4] ss:$16 sps:$4 sm:$0xff]  }
 0x124   : > { %12434 = vmatpush1.bf16.msra.mxu0 %v18980_v5  ;;  %13664 = vmatpush1.bf16.msra.mxu1 %v18983_v6  ;;  %v19063_v5 = vld [vmem:[%s22188_s16 + $0x4ec] ss:$16 sps:$4 sm:$0xff]   ;;  %v19058_v6 = vld [vmem:[%s22188_s16 + $0x4e0] ss:$16 sps:$4 sm:$0xff]  }
 0x125   : > { %12435 = vmatprep.subr.bf16.mxu0 %v18988_v7  ;;  %13665 = vmatprep.subr.bf16.mxu1 %v18991_v8  ;;  %v19061_v7 = vld [vmem:[%s22188_s16 + $0x4e8] ss:$16 sps:$4 sm:$0xff]   ;;  %v19066_v8 = vld [vmem:[%s22188_s16 + $0x504] ss:$16 sps:$4 sm:$0xff]  }
 0x128   : > { %12436 = vmatpush1.bf16.msra.mxu0 %v18986_v9  ;;  %13666 = vmatpush1.bf16.msra.mxu1 %v18989_v10  ;;  %v19069_v9 = vld [vmem:[%s22188_s16 + $0x50c] ss:$16 sps:$4 sm:$0xff]   ;;  %v19064_v10 = vld [vmem:[%s22188_s16 + $0x500] ss:$16 sps:$4 sm:$0xff]  }
 0x129   : > { %12437 = vmatprep.subr.bf16.mxu0 %v18994_v11  ;;  %13667 = vmatprep.subr.bf16.mxu1 %v18997_v12  ;;  %v19067_v11 = vld [vmem:[%s22188_s16 + $0x508] ss:$16 sps:$4 sm:$0xff]   ;;  %v19072_v12 = vld [vmem:[%s22188_s16 + $0x524] ss:$16 sps:$4 sm:$0xff]  }
 0x12c   : > { %12438 = vmatpush1.bf16.msra.mxu0 %v18992_v13  ;;  %13668 = vmatpush1.bf16.msra.mxu1 %v18995_v14  ;;  %v19075_v13 = vld [vmem:[%s22188_s16 + $0x52c] ss:$16 sps:$4 sm:$0xff]   ;;  %v19070_v14 = vld [vmem:[%s22188_s16 + $0x520] ss:$16 sps:$4 sm:$0xff]  }
 0x12d   : > { %12439 = vmatprep.subr.bf16.mxu0 %v19000_v15  ;;  %13669 = vmatprep.subr.bf16.mxu1 %v19003_v16  ;;  %v19073_v15 = vld [vmem:[%s22188_s16 + $0x528] ss:$16 sps:$4 sm:$0xff]   ;;  %v19078_v16 = vld [vmem:[%s22188_s16 + $0x544] ss:$16 sps:$4 sm:$0xff]  }
 0x130   : > { %12440 = vmatpush1.bf16.msra.mxu0 %v18998_v17  ;;  %13670 = vmatpush1.bf16.msra.mxu1 %v19001_v18  ;;  %v19081_v17 = vld [vmem:[%s22188_s16 + $0x54c] ss:$16 sps:$4 sm:$0xff]   ;;  %v19076_v18 = vld [vmem:[%s22188_s16 + $0x540] ss:$16 sps:$4 sm:$0xff]  }
 0x131   : > { %12441 = vmatprep.subr.bf16.mxu0 %v19006_v19  ;;  %13671 = vmatprep.subr.bf16.mxu1 %v19009_v20  ;;  %v19079_v19 = vld [vmem:[%s22188_s16 + $0x548] ss:$16 sps:$4 sm:$0xff]   ;;  %v19084_v20 = vld [vmem:[%s22188_s16 + $0x564] ss:$16 sps:$4 sm:$0xff]  }
 0x134   : > { %12442 = vmatpush1.bf16.msra.mxu0 %v19004_v22  ;;  %13672 = vmatpush1.bf16.msra.mxu1 %v19007_v23  ;;  %v19082_v22 = vld [vmem:[%s22188_s16 + $0x560] ss:$16 sps:$4 sm:$0xff]   ;;  %v19085_v23 = vld [vmem:[%s22188_s16 + $0x568] ss:$16 sps:$4 sm:$0xff]  }
 0x135   : > { %12443 = vmatprep.subr.bf16.mxu0 %v19012_v24  ;;  %13673 = vmatprep.subr.bf16.mxu1 %v19015_v25  ;;  %v19090_v24 = vld [vmem:[%s22188_s16 + $0x584] ss:$16 sps:$4 sm:$0xff]   ;;  %v19093_v25 = vld [vmem:[%s22188_s16 + $0x58c] ss:$16 sps:$4 sm:$0xff]  }
 0x138   : > { %12444 = vmatpush1.bf16.msra.mxu0 %v19010_v27  ;;  %13674 = vmatpush1.bf16.msra.mxu1 %v19013_v28  ;;  %v19091_v27 = vld [vmem:[%s22188_s16 + $0x588] ss:$16 sps:$4 sm:$0xff]   ;;  %v19096_v28 = vld [vmem:[%s22188_s16 + $0x5a4] ss:$16 sps:$4 sm:$0xff]  }
 0x139   : > { %12454 = vmatprep.subr.bf16.mxu0 %v19018_v30  ;;  %13684 = vmatprep.subr.bf16.mxu1 %v19021_v31  ;;  %v19094_v30 = vld [vmem:[%s22188_s16 + $0x5a0] ss:$16 sps:$4 sm:$0xff]   ;;  %v19097_v31 = vld [vmem:[%s22188_s16 + $0x5a8] ss:$16 sps:$4 sm:$0xff]  }
 0x13b   : > { %17733 = vmatmul.mubr.msk.bf16.vlgmr.msra.gmra.mrb[0].mxu0 %vm17731_vm7, %v17732_v34  ;;  %17910 = vmatmul.mubr.msk.bf16.vlgmr.msra.gmra.mrb[0].mxu1 %vm17731_vm7, %v17732_v34  ;;  %v19105_v34 = vld [vmem:[%s22188_s16 + $0x5cc] ss:$16 sps:$4 sm:$0xff]  }
 0x13c   : > { %12455 = vmatpush1.bf16.msra.mxu0 %v19016_v33  ;;  %13685 = vmatpush1.bf16.msra.mxu1 %v19019_v35  ;;  %v19102_v33 = vld [vmem:[%s22188_s16 + $0x5c4] ss:$16 sps:$4 sm:$0xff]   ;;  %v408_v35 = vadd.s32 512, %v22251_v41 }
 0x13d   : > { %12456 = vmatprep.subr.bf16.mxu0 %v19024_v37  ;;  %13686 = vmatprep.subr.bf16.mxu1 %v19027_v38  ;;  %v19100_v37 = vld [vmem:[%s22188_s16 + $0x5c0] ss:$16 sps:$4 sm:$0xff]   ;;  %v19103_v38 = vld [vmem:[%s22188_s16 + $0x5c8] ss:$16 sps:$4 sm:$0xff]  }
 0x13e   : > { %17736 = vmatprep.mubr.msk.bf16.mxu0 %vm17734_vm9, %v17735_v48  ;;  %17913 = vmatprep.mubr.msk.bf16.mxu1 %vm17734_vm9, %v17735_v48  ;;  %v468_v44 = vadd.s32 %v22262_v50, %v408_v35  ;;  %v19183_v35 = vld [vmem:[%s22188_s16 + $0x76c] ss:$16 sps:$4 sm:$0xff]  }
 0x140   : > { %12457 = vmatpush1.bf16.msra.mxu0 %v19022_v40  ;;  %13687 = vmatpush1.bf16.msra.mxu1 %v19025_v42  ;;  %v411_v40 = vadd.s32 896, %v22251_v41  ;;  %v19108_v42 = vld [vmem:[%s22188_s16 + $0x5e4] ss:$16 sps:$4 sm:$0xff]   ;;  %vm527_vm10 = vcmp.lt.s32.totalorder %v468_v44, 30000 }
 0x141   : > { %12458 = vmatprep.subr.bf16.mxu0 %v19030_v43  ;;  %13688 = vmatprep.subr.bf16.mxu1 %v19033_v46  ;;  %v19111_v43 = vld [vmem:[%s22188_s16 + $0x5ec] ss:$16 sps:$4 sm:$0xff]   ;;  %v22453_v46 = vrot.slane %v629_v36, %v22267_v53  ;;  %vm17737_vm11 = vmpackc.low %vm527_vm10, %vm527_vm10  ;;  %v19178_v36 = vld [vmem:[%s22188_s16 + $0x760] ss:$16 sps:$4 sm:$0xff]  }
 0x142   : > { %v471_v48 = vadd.s32 %v22262_v50, %v411_v40  ;;  %v19189_v40 = vld [vmem:[%s22188_s16 + $0x78c] ss:$16 sps:$4 sm:$0xff]   ;;  %v19192_v44 = vld [vmem:[%s22188_s16 + $0x7a4] ss:$16 sps:$4 sm:$0xff]  }
 0x144   : > { %12459 = vmatpush1.bf16.msra.mxu0 %v19028_v47  ;;  %13689 = vmatpush1.bf16.msra.mxu1 %v19031_v49  ;;  %v19109_v47 = vld [vmem:[%s22188_s16 + $0x5e8] ss:$16 sps:$4 sm:$0xff]   ;;  %v19114_v49 = vld [vmem:[%s22188_s16 + $0x604] ss:$16 sps:$4 sm:$0xff]   ;;  %vm530_vm12 = vcmp.lt.s32.totalorder %v471_v48, 30000 }
 0x145   : > { %12460 = vmatprep.subr.bf16.mxu0 %v19036_v51  ;;  %13690 = vmatprep.subr.bf16.mxu1 %v19039_v52  ;;  %v19117_v51 = vld [vmem:[%s22188_s16 + $0x60c] ss:$16 sps:$4 sm:$0xff]   ;;  %v645_v52 = vcombine.high %v22453_v46, %v22453_v46  ;;  %vm17740_vm13 = vmpackc.low %vm530_vm12, %vm530_vm12  ;;  %v19193_v48 = vld [vmem:[%s22188_s16 + $0x7a8] ss:$16 sps:$4 sm:$0xff]  }
 0x148   : > { %12461 = vmatpush1.bf16.msra.mxu0 %v19034_v54  ;;  %13691 = vmatpush1.bf16.msra.mxu1 %v19037_v55  ;;  %v19112_v54 = vld [vmem:[%s22188_s16 + $0x600] ss:$16 sps:$4 sm:$0xff]   ;;  %v17738_v55 = vpack.c.bf16 %v22387_v32, %v22387_v32 }
 0x149   : > { %12462 = vmatprep.subr.bf16.mxu0 %v19042_v56  ;;  %13692 = vmatprep.subr.bf16.mxu1 %v19045_v57  ;;  %v19115_v56 = vld [vmem:[%s22188_s16 + $0x608] ss:$16 sps:$4 sm:$0xff]   ;;  %v19120_v57 = vld [vmem:[%s22188_s16 + $0x624] ss:$16 sps:$4 sm:$0xff]   ;;  %v19118_v32 = vld [vmem:[%s22188_s16 + $0x620] ss:$16 sps:$4 sm:$0xff]  }
 0x14c   : > { %12463 = vmatpush1.bf16.msra.mxu0 %v19040_v58  ;;  %13693 = vmatpush1.bf16.msra.mxu1 %v19043_v59  ;;  %v19123_v58 = vld [vmem:[%s22188_s16 + $0x62c] ss:$16 sps:$4 sm:$0xff]   ;;  %v17741_v59 = vpack.c.bf16 %v645_v52, %v645_v52  ;;  %v410_v52 = vadd.s32 768, %v22251_v41 }
 0x14d   : > { %12464 = vmatprep.subr.bf16.mxu0 %v19048_v60  ;;  %13694 = vmatprep.subr.bf16.mxu1 %v19051_v61  ;;  %v19121_v60 = vld [vmem:[%s22188_s16 + $0x628] ss:$16 sps:$4 sm:$0xff]   ;;  %v19126_v61 = vld [vmem:[%s22188_s16 + $0x644] ss:$16 sps:$4 sm:$0xff]  }
 0x150   : > { %12465 = vmatpush1.bf16.msra.mxu0 %v19046_v62  ;;  %13695 = vmatpush1.bf16.msra.mxu1 %v19049_v63  ;;  %v19129_v62 = vld [vmem:[%s22188_s16 + $0x64c] ss:$16 sps:$4 sm:$0xff]   ;;  %v19124_v63 = vld [vmem:[%s22188_s16 + $0x640] ss:$16 sps:$4 sm:$0xff]  }
 0x151   : > { %12466 = vmatprep.subr.bf16.mxu0 %v19054_v0  ;;  %13696 = vmatprep.subr.bf16.mxu1 %v19057_v1  ;;  %v19127_v0 = vld [vmem:[%s22188_s16 + $0x648] ss:$16 sps:$4 sm:$0xff]   ;;  %v19132_v1 = vld [vmem:[%s22188_s16 + $0x664] ss:$16 sps:$4 sm:$0xff]  }
 0x154   : > { %12467 = vmatpush1.bf16.msra.mxu0 %v19052_v2  ;;  %13697 = vmatpush1.bf16.msra.mxu1 %v19055_v3  ;;  %v19135_v2 = vld [vmem:[%s22188_s16 + $0x66c] ss:$16 sps:$4 sm:$0xff]   ;;  %v19130_v3 = vld [vmem:[%s22188_s16 + $0x660] ss:$16 sps:$4 sm:$0xff]  }
 0x155   : > { %12468 = vmatprep.subr.bf16.mxu0 %v19060_v4  ;;  %13698 = vmatprep.subr.bf16.mxu1 %v19063_v5  ;;  %v19133_v4 = vld [vmem:[%s22188_s16 + $0x668] ss:$16 sps:$4 sm:$0xff]   ;;  %v19138_v5 = vld [vmem:[%s22188_s16 + $0x684] ss:$16 sps:$4 sm:$0xff]  }
 0x158   : > { %12469 = vmatpush1.bf16.msra.mxu0 %v19058_v6  ;;  %13699 = vmatpush1.bf16.msra.mxu1 %v19061_v7  ;;  %v19141_v6 = vld [vmem:[%s22188_s16 + $0x68c] ss:$16 sps:$4 sm:$0xff]   ;;  %v19136_v7 = vld [vmem:[%s22188_s16 + $0x680] ss:$16 sps:$4 sm:$0xff]  }
 0x159   : > { %12470 = vmatprep.subr.bf16.mxu0 %v19066_v8  ;;  %13700 = vmatprep.subr.bf16.mxu1 %v19069_v9  ;;  %v19139_v8 = vld [vmem:[%s22188_s16 + $0x688] ss:$16 sps:$4 sm:$0xff]   ;;  %v19144_v9 = vld [vmem:[%s22188_s16 + $0x6a4] ss:$16 sps:$4 sm:$0xff]  }
 0x15c   : > { %12471 = vmatpush1.bf16.msra.mxu0 %v19064_v10  ;;  %13701 = vmatpush1.bf16.msra.mxu1 %v19067_v11  ;;  %v19147_v10 = vld [vmem:[%s22188_s16 + $0x6ac] ss:$16 sps:$4 sm:$0xff]   ;;  %v19142_v11 = vld [vmem:[%s22188_s16 + $0x6a0] ss:$16 sps:$4 sm:$0xff]  }
 0x15d   : > { %12472 = vmatprep.subr.bf16.mxu0 %v19072_v12  ;;  %13702 = vmatprep.subr.bf16.mxu1 %v19075_v13  ;;  %v19145_v12 = vld [vmem:[%s22188_s16 + $0x6a8] ss:$16 sps:$4 sm:$0xff]   ;;  %v19150_v13 = vld [vmem:[%s22188_s16 + $0x6c4] ss:$16 sps:$4 sm:$0xff]  }
 0x160   : > { %12473 = vmatpush1.bf16.msra.mxu0 %v19070_v14  ;;  %13703 = vmatpush1.bf16.msra.mxu1 %v19073_v15  ;;  %v19153_v14 = vld [vmem:[%s22188_s16 + $0x6cc] ss:$16 sps:$4 sm:$0xff]   ;;  %v19148_v15 = vld [vmem:[%s22188_s16 + $0x6c0] ss:$16 sps:$4 sm:$0xff]  }
 0x161   : > { %12474 = vmatprep.subr.bf16.mxu0 %v19078_v16  ;;  %13704 = vmatprep.subr.bf16.mxu1 %v19081_v17  ;;  %v19151_v16 = vld [vmem:[%s22188_s16 + $0x6c8] ss:$16 sps:$4 sm:$0xff]   ;;  %v19156_v17 = vld [vmem:[%s22188_s16 + $0x6e4] ss:$16 sps:$4 sm:$0xff]  }
 0x164   : > { %12475 = vmatpush1.bf16.msra.mxu0 %v19076_v18  ;;  %13705 = vmatpush1.bf16.msra.mxu1 %v19079_v19  ;;  %v19159_v18 = vld [vmem:[%s22188_s16 + $0x6ec] ss:$16 sps:$4 sm:$0xff]   ;;  %v19154_v19 = vld [vmem:[%s22188_s16 + $0x6e0] ss:$16 sps:$4 sm:$0xff]  }
 0x165   : > { %12476 = vmatprep.subr.bf16.mxu0 %v19084_v20  ;;  %13706 = vmatprep.subr.bf16.mxu1 %v19087_v21  ;;  %v19157_v20 = vld [vmem:[%s22188_s16 + $0x6e8] ss:$16 sps:$4 sm:$0xff]   ;;  %v19162_v21 = vld [vmem:[%s22188_s16 + $0x704] ss:$16 sps:$4 sm:$0xff]  }
 0x168   : > { %12477 = vmatpush1.bf16.msra.mxu0 %v19082_v22  ;;  %13707 = vmatpush1.bf16.msra.mxu1 %v19085_v23  ;;  %v19165_v22 = vld [vmem:[%s22188_s16 + $0x70c] ss:$16 sps:$4 sm:$0xff]   ;;  %v19160_v23 = vld [vmem:[%s22188_s16 + $0x700] ss:$16 sps:$4 sm:$0xff]  }
 0x169   : > { %12478 = vmatprep.subr.bf16.mxu0 %v19090_v24  ;;  %13708 = vmatprep.subr.bf16.mxu1 %v19093_v25  ;;  %v19163_v24 = vld [vmem:[%s22188_s16 + $0x708] ss:$16 sps:$4 sm:$0xff]   ;;  %v19168_v25 = vld [vmem:[%s22188_s16 + $0x724] ss:$16 sps:$4 sm:$0xff]  }
 0x16c   : > { %12479 = vmatpush1.bf16.msra.mxu0 %v19088_v26  ;;  %13709 = vmatpush1.bf16.msra.mxu1 %v19091_v27  ;;  %v19171_v26 = vld [vmem:[%s22188_s16 + $0x72c] ss:$16 sps:$4 sm:$0xff]   ;;  %v19166_v27 = vld [vmem:[%s22188_s16 + $0x720] ss:$16 sps:$4 sm:$0xff]  }
 0x16d   : > { %12480 = vmatprep.subr.bf16.mxu0 %v19096_v28  ;;  %13710 = vmatprep.subr.bf16.mxu1 %v19099_v29  ;;  %v19169_v28 = vld [vmem:[%s22188_s16 + $0x728] ss:$16 sps:$4 sm:$0xff]   ;;  %v19174_v29 = vld [vmem:[%s22188_s16 + $0x744] ss:$16 sps:$4 sm:$0xff]  }
 0x170   : > { %12481 = vmatpush1.bf16.msra.mxu0 %v19094_v30  ;;  %13711 = vmatpush1.bf16.msra.mxu1 %v19097_v31  ;;  %v19177_v30 = vld [vmem:[%s22188_s16 + $0x74c] ss:$16 sps:$4 sm:$0xff]   ;;  %v19172_v31 = vld [vmem:[%s22188_s16 + $0x740] ss:$16 sps:$4 sm:$0xff]  }
 0x171   : > { %12482 = vmatprep.subr.bf16.mxu0 %v19102_v33  ;;  %13712 = vmatprep.subr.bf16.mxu1 %v19105_v34  ;;  %v19175_v33 = vld [vmem:[%s22188_s16 + $0x748] ss:$16 sps:$4 sm:$0xff]   ;;  %v19180_v34 = vld [vmem:[%s22188_s16 + $0x764] ss:$16 sps:$4 sm:$0xff]  }
 0x174   : > { %12483 = vmatpush1.bf16.msra.mxu0 %v19100_v37  ;;  %13713 = vmatpush1.bf16.msra.mxu1 %v19103_v38  ;;  %v19181_v37 = vld [vmem:[%s22188_s16 + $0x768] ss:$16 sps:$4 sm:$0xff]   ;;  %v19186_v38 = vld [vmem:[%s22188_s16 + $0x784] ss:$16 sps:$4 sm:$0xff]  }
 0x175   : > { %12484 = vmatprep.subr.bf16.mxu0 %v19108_v42  ;;  %13714 = vmatprep.subr.bf16.mxu1 %v19111_v43  ;;  %v19184_v42 = vld [vmem:[%s22188_s16 + $0x780] ss:$16 sps:$4 sm:$0xff]   ;;  %v19187_v43 = vld [vmem:[%s22188_s16 + $0x788] ss:$16 sps:$4 sm:$0xff]  }
 0x178   : > { %12485 = vmatpush1.bf16.msra.mxu0 %v19106_v39  ;;  %13715 = vmatpush1.bf16.msra.mxu1 %v19109_v47  ;;  %v19195_v39 = vld [vmem:[%s22188_s16 + $0x7ac] ss:$16 sps:$4 sm:$0xff]   ;;  %v19190_v47 = vld [vmem:[%s22188_s16 + $0x7a0] ss:$16 sps:$4 sm:$0xff]  }
 0x179   : > { %12495 = vmatprep.subr.bf16.mxu0 %v19114_v49  ;;  %13725 = vmatprep.subr.bf16.mxu1 %v19117_v51  ;;  %v19198_v49 = vld [vmem:[%s22188_s16 + $0x7c4] ss:$16 sps:$4 sm:$0xff]   ;;  %v19201_v51 = vld [vmem:[%s22188_s16 + $0x7cc] ss:$16 sps:$4 sm:$0xff]  }
 0x17b   : > { %17739 = vmatmul.mubr.msk.bf16.vlgmr.msra.gmra.mrb[0].mxu0 %vm17737_vm11, %v17738_v55  ;;  %17916 = vmatmul.mubr.msk.bf16.vlgmr.msra.gmra.mrb[0].mxu1 %vm17737_vm11, %v17738_v55  ;;  %v22523_v55 = vld [vmem:[%s22210_s15 + $0x10] sm:$0xff] }
 0x17c   : > { %12496 = vmatpush1.bf16.msra.mxu0 %v19112_v54  ;;  %13726 = vmatpush1.bf16.msra.mxu1 %v19115_v56  ;;  %v19196_v54 = vld [vmem:[%s22188_s16 + $0x7c0] ss:$16 sps:$4 sm:$0xff]   ;;  %v19199_v56 = vld [vmem:[%s22188_s16 + $0x7c8] ss:$16 sps:$4 sm:$0xff]  }
 0x17d   : > { %12497 = vmatprep.subr.bf16.mxu0 %v19120_v57  ;;  %13727 = vmatprep.subr.bf16.mxu1 %v19123_v58  ;;  %v413_v57 = vadd.s32 1152, %v22251_v41  ;;  %v19204_v58 = vld [vmem:[%s22188_s16 + $0x7e4] ss:$16 sps:$4 sm:$0xff]  }
 0x17e   : > { %17742 = vmatprep.mubr.msk.bf16.mxu0 %vm17740_vm13, %v17741_v59  ;;  %17919 = vmatprep.mubr.msk.bf16.mxu1 %vm17740_vm13, %v17741_v59  ;;  %v19207_v59 = vld [vmem:[%s22188_s16 + $0x7ec] ss:$16 sps:$4 sm:$0xff]  }
 0x180   : > { %12498 = vmatpush1.bf16.msra.mxu0 %v19118_v32  ;;  %13728 = vmatpush1.bf16.msra.mxu1 %v19121_v60  ;;  %v470_v32 = vadd.s32 %v22262_v50, %v410_v52  ;;  %v22532_v60 = vrot.slane %v22523_v55, %v22267_v53  ;;  %v19280_v52 = vld [vmem:[%s22188_s16 + $0x96c] ss:$16 sps:$4 sm:$0xff]  }
 0x181   : > { %12499 = vmatprep.subr.bf16.mxu0 %v19126_v61  ;;  %13729 = vmatprep.subr.bf16.mxu1 %v19129_v62  ;;  %v19202_v61 = vld [vmem:[%s22188_s16 + $0x7e0] ss:$16 sps:$4 sm:$0xff]   ;;  %v19205_v62 = vld [vmem:[%s22188_s16 + $0x7e8] ss:$16 sps:$4 sm:$0xff]  }
 0x182   : > { %vm529_vm14 = vcmp.lt.s32.totalorder %v470_v32, 30000  ;;  %v19284_v32 = vld [vmem:[%s22188_s16 + $0x988] ss:$16 sps:$4 sm:$0xff]  }
 0x183   : > { %vm17743_vm15 = vmpackc.low %vm529_vm14, %vm529_vm14 }
 0x184   : > { %12500 = vmatpush1.bf16.msra.mxu0 %v19124_v63  ;;  %13730 = vmatpush1.bf16.msra.mxu1 %v19127_v0  ;;  %v473_v63 = vadd.s32 %v22262_v50, %v413_v57  ;;  %v19211_v0 = vld [vmem:[%s22188_s16 + $0x804] ss:$16 sps:$4 sm:$0xff]  }
 0x185   : > { %12501 = vmatprep.subr.bf16.mxu0 %v19132_v1  ;;  %13731 = vmatprep.subr.bf16.mxu1 %v19135_v2  ;;  %v19214_v1 = vld [vmem:[%s22188_s16 + $0x80c] ss:$16 sps:$4 sm:$0xff]   ;;  %v19209_v2 = vld [vmem:[%s22188_s16 + $0x800] ss:$16 sps:$4 sm:$0xff]   ;;  %v19283_v57 = vld [vmem:[%s22188_s16 + $0x984] ss:$16 sps:$4 sm:$0xff]  }
 0x186   : > { %vm532_vm0 = vcmp.lt.s32.totalorder %v473_v63, 30000  ;;  %v19287_v63 = vld [vmem:[%s22188_s16 + $0x9a0] ss:$16 sps:$4 sm:$0xff]  }
 0x187   : > { %vm17746_vm1 = vmpackc.low %vm532_vm0, %vm532_vm0 }
 0x188   : > { %12502 = vmatpush1.bf16.msra.mxu0 %v19130_v3  ;;  %13732 = vmatpush1.bf16.msra.mxu1 %v19133_v4  ;;  %v661_v3 = vcombine.high %v22532_v60, %v22532_v60  ;;  %v19212_v4 = vld [vmem:[%s22188_s16 + $0x808] ss:$16 sps:$4 sm:$0xff]  }
 0x189   : > { %12503 = vmatprep.subr.bf16.mxu0 %v19138_v5  ;;  %13733 = vmatprep.subr.bf16.mxu1 %v19141_v6  ;;  %v17744_v5 = vpack.c.bf16 %v22453_v46, %v22453_v46  ;;  %v19217_v6 = vld [vmem:[%s22188_s16 + $0x824] ss:$16 sps:$4 sm:$0xff]   ;;  %v19215_v46 = vld [vmem:[%s22188_s16 + $0x820] ss:$16 sps:$4 sm:$0xff]  }
 0x18c   : > { %12504 = vmatpush1.bf16.msra.mxu0 %v19136_v7  ;;  %13734 = vmatpush1.bf16.msra.mxu1 %v19139_v8  ;;  %v19220_v7 = vld [vmem:[%s22188_s16 + $0x82c] ss:$16 sps:$4 sm:$0xff]   ;;  %v17747_v8 = vpack.c.bf16 %v661_v3, %v661_v3  ;;  %v412_v3 = vadd.s32 1024, %v22251_v41 }
 0x18d   : > { %12505 = vmatprep.subr.bf16.mxu0 %v19144_v9  ;;  %13735 = vmatprep.subr.bf16.mxu1 %v19147_v10  ;;  %v19218_v9 = vld [vmem:[%s22188_s16 + $0x828] ss:$16 sps:$4 sm:$0xff]   ;;  %v19223_v10 = vld [vmem:[%s22188_s16 + $0x844] ss:$16 sps:$4 sm:$0xff]  }
 0x190   : > { %12506 = vmatpush1.bf16.msra.mxu0 %v19142_v11  ;;  %13736 = vmatpush1.bf16.msra.mxu1 %v19145_v12  ;;  %v19226_v11 = vld [vmem:[%s22188_s16 + $0x84c] ss:$16 sps:$4 sm:$0xff]   ;;  %v19221_v12 = vld [vmem:[%s22188_s16 + $0x840] ss:$16 sps:$4 sm:$0xff]  }
 0x191   : > { %12507 = vmatprep.subr.bf16.mxu0 %v19150_v13  ;;  %13737 = vmatprep.subr.bf16.mxu1 %v19153_v14  ;;  %v19224_v13 = vld [vmem:[%s22188_s16 + $0x848] ss:$16 sps:$4 sm:$0xff]   ;;  %v19229_v14 = vld [vmem:[%s22188_s16 + $0x864] ss:$16 sps:$4 sm:$0xff]  }
 0x194   : > { %12508 = vmatpush1.bf16.msra.mxu0 %v19148_v15  ;;  %13738 = vmatpush1.bf16.msra.mxu1 %v19151_v16  ;;  %v19232_v15 = vld [vmem:[%s22188_s16 + $0x86c] ss:$16 sps:$4 sm:$0xff]   ;;  %v19227_v16 = vld [vmem:[%s22188_s16 + $0x860] ss:$16 sps:$4 sm:$0xff]  }
 0x195   : > { %12509 = vmatprep.subr.bf16.mxu0 %v19156_v17  ;;  %13739 = vmatprep.subr.bf16.mxu1 %v19159_v18  ;;  %v19230_v17 = vld [vmem:[%s22188_s16 + $0x868] ss:$16 sps:$4 sm:$0xff]   ;;  %v19235_v18 = vld [vmem:[%s22188_s16 + $0x884] ss:$16 sps:$4 sm:$0xff]  }
 0x198   : > { %12510 = vmatpush1.bf16.msra.mxu0 %v19154_v19  ;;  %13740 = vmatpush1.bf16.msra.mxu1 %v19157_v20  ;;  %v19238_v19 = vld [vmem:[%s22188_s16 + $0x88c] ss:$16 sps:$4 sm:$0xff]   ;;  %v19233_v20 = vld [vmem:[%s22188_s16 + $0x880] ss:$16 sps:$4 sm:$0xff]  }
 0x199   : > { %12511 = vmatprep.subr.bf16.mxu0 %v19162_v21  ;;  %13741 = vmatprep.subr.bf16.mxu1 %v19165_v22  ;;  %v19236_v21 = vld [vmem:[%s22188_s16 + $0x888] ss:$16 sps:$4 sm:$0xff]   ;;  %v19241_v22 = vld [vmem:[%s22188_s16 + $0x8a4] ss:$16 sps:$4 sm:$0xff]  }
 0x19c   : > { %12512 = vmatpush1.bf16.msra.mxu0 %v19160_v23  ;;  %13742 = vmatpush1.bf16.msra.mxu1 %v19163_v24  ;;  %v19244_v23 = vld [vmem:[%s22188_s16 + $0x8ac] ss:$16 sps:$4 sm:$0xff]   ;;  %v19239_v24 = vld [vmem:[%s22188_s16 + $0x8a0] ss:$16 sps:$4 sm:$0xff]  }
 0x19d   : > { %12513 = vmatprep.subr.bf16.mxu0 %v19168_v25  ;;  %13743 = vmatprep.subr.bf16.mxu1 %v19171_v26  ;;  %v19242_v25 = vld [vmem:[%s22188_s16 + $0x8a8] ss:$16 sps:$4 sm:$0xff]   ;;  %v19247_v26 = vld [vmem:[%s22188_s16 + $0x8c4] ss:$16 sps:$4 sm:$0xff]  }
 0x1a0   : > { %12514 = vmatpush1.bf16.msra.mxu0 %v19166_v27  ;;  %13744 = vmatpush1.bf16.msra.mxu1 %v19169_v28  ;;  %v19250_v27 = vld [vmem:[%s22188_s16 + $0x8cc] ss:$16 sps:$4 sm:$0xff]   ;;  %v19245_v28 = vld [vmem:[%s22188_s16 + $0x8c0] ss:$16 sps:$4 sm:$0xff]  }
 0x1a1   : > { %12515 = vmatprep.subr.bf16.mxu0 %v19174_v29  ;;  %13745 = vmatprep.subr.bf16.mxu1 %v19177_v30  ;;  %v19248_v29 = vld [vmem:[%s22188_s16 + $0x8c8] ss:$16 sps:$4 sm:$0xff]   ;;  %v19253_v30 = vld [vmem:[%s22188_s16 + $0x8e4] ss:$16 sps:$4 sm:$0xff]  }
 0x1a4   : > { %12516 = vmatpush1.bf16.msra.mxu0 %v19172_v31  ;;  %13746 = vmatpush1.bf16.msra.mxu1 %v19175_v33  ;;  %v19256_v31 = vld [vmem:[%s22188_s16 + $0x8ec] ss:$16 sps:$4 sm:$0xff]   ;;  %v19251_v33 = vld [vmem:[%s22188_s16 + $0x8e0] ss:$16 sps:$4 sm:$0xff]  }
 0x1a5   : > { %12517 = vmatprep.subr.bf16.mxu0 %v19180_v34  ;;  %13747 = vmatprep.subr.bf16.mxu1 %v19183_v35  ;;  %v19254_v34 = vld [vmem:[%s22188_s16 + $0x8e8] ss:$16 sps:$4 sm:$0xff]   ;;  %v19259_v35 = vld [vmem:[%s22188_s16 + $0x904] ss:$16 sps:$4 sm:$0xff]  }
 0x1a8   : > { %12518 = vmatpush1.bf16.msra.mxu0 %v19178_v36  ;;  %13748 = vmatpush1.bf16.msra.mxu1 %v19181_v37  ;;  %v19262_v36 = vld [vmem:[%s22188_s16 + $0x90c] ss:$16 sps:$4 sm:$0xff]   ;;  %v19257_v37 = vld [vmem:[%s22188_s16 + $0x900] ss:$16 sps:$4 sm:$0xff]  }
 0x1a9   : > { %12519 = vmatprep.subr.bf16.mxu0 %v19186_v38  ;;  %13749 = vmatprep.subr.bf16.mxu1 %v19189_v40  ;;  %v19260_v38 = vld [vmem:[%s22188_s16 + $0x908] ss:$16 sps:$4 sm:$0xff]   ;;  %v19265_v40 = vld [vmem:[%s22188_s16 + $0x924] ss:$16 sps:$4 sm:$0xff]  }
 0x1ac   : > { %12520 = vmatpush1.bf16.msra.mxu0 %v19184_v42  ;;  %13750 = vmatpush1.bf16.msra.mxu1 %v19187_v43  ;;  %v19268_v42 = vld [vmem:[%s22188_s16 + $0x92c] ss:$16 sps:$4 sm:$0xff]   ;;  %v19263_v43 = vld [vmem:[%s22188_s16 + $0x920] ss:$16 sps:$4 sm:$0xff]  }
 0x1ad   : > { %12521 = vmatprep.subr.bf16.mxu0 %v19192_v44  ;;  %13751 = vmatprep.subr.bf16.mxu1 %v19195_v39  ;;  %v19266_v44 = vld [vmem:[%s22188_s16 + $0x928] ss:$16 sps:$4 sm:$0xff]   ;;  %v19271_v39 = vld [vmem:[%s22188_s16 + $0x944] ss:$16 sps:$4 sm:$0xff]  }
 0x1b0   : > { %12522 = vmatpush1.bf16.msra.mxu0 %v19190_v47  ;;  %13752 = vmatpush1.bf16.msra.mxu1 %v19193_v48  ;;  %v19274_v47 = vld [vmem:[%s22188_s16 + $0x94c] ss:$16 sps:$4 sm:$0xff]   ;;  %v19269_v48 = vld [vmem:[%s22188_s16 + $0x940] ss:$16 sps:$4 sm:$0xff]  }
 0x1b1   : > { %12523 = vmatprep.subr.bf16.mxu0 %v19198_v49  ;;  %13753 = vmatprep.subr.bf16.mxu1 %v19201_v51  ;;  %v19272_v49 = vld [vmem:[%s22188_s16 + $0x948] ss:$16 sps:$4 sm:$0xff]   ;;  %v19277_v51 = vld [vmem:[%s22188_s16 + $0x964] ss:$16 sps:$4 sm:$0xff]  }
 0x1b4   : > { %12524 = vmatpush1.bf16.msra.mxu0 %v19196_v54  ;;  %13754 = vmatpush1.bf16.msra.mxu1 %v19199_v56  ;;  %v19275_v54 = vld [vmem:[%s22188_s16 + $0x960] ss:$16 sps:$4 sm:$0xff]   ;;  %v19278_v56 = vld [vmem:[%s22188_s16 + $0x968] ss:$16 sps:$4 sm:$0xff]  }
 0x1b5   : > { %12525 = vmatprep.subr.bf16.mxu0 %v19204_v58  ;;  %13755 = vmatprep.subr.bf16.mxu1 %v19207_v59  ;;  %v19286_v58 = vld [vmem:[%s22188_s16 + $0x98c] ss:$16 sps:$4 sm:$0xff]   ;;  %v19281_v59 = vld [vmem:[%s22188_s16 + $0x980] ss:$16 sps:$4 sm:$0xff]  }
 0x1b8   : > { %12526 = vmatpush1.bf16.msra.mxu0 %v19202_v61  ;;  %13756 = vmatpush1.bf16.msra.mxu1 %v19205_v62  ;;  %v19289_v61 = vld [vmem:[%s22188_s16 + $0x9a4] ss:$16 sps:$4 sm:$0xff]   ;;  %v19292_v62 = vld [vmem:[%s22188_s16 + $0x9ac] ss:$16 sps:$4 sm:$0xff]  }
 0x1b9   : > { %12536 = vmatprep.subr.bf16.mxu0 %v19211_v0  ;;  %13766 = vmatprep.subr.bf16.mxu1 %v19214_v1  ;;  %v19290_v0 = vld [vmem:[%s22188_s16 + $0x9a8] ss:$16 sps:$4 sm:$0xff]   ;;  %v19295_v1 = vld [vmem:[%s22188_s16 + $0x9c4] ss:$16 sps:$4 sm:$0xff]  }
 0x1bb   : > { %17745 = vmatmul.mubr.msk.bf16.vlgmr.msra.gmra.mrb[0].mxu0 %vm17743_vm15, %v17744_v5  ;;  %17922 = vmatmul.mubr.msk.bf16.vlgmr.msra.gmra.mrb[0].mxu1 %vm17743_vm15, %v17744_v5  ;;  %v19293_v5 = vld [vmem:[%s22188_s16 + $0x9c0] ss:$16 sps:$4 sm:$0xff]  }
 0x1bc   : > { %12537 = vmatpush1.bf16.msra.mxu0 %v19209_v2  ;;  %13767 = vmatpush1.bf16.msra.mxu1 %v19212_v4  ;;  %v19298_v2 = vld [vmem:[%s22188_s16 + $0x9cc] ss:$16 sps:$4 sm:$0xff]   ;;  %v646_v4 = vcombine.high %v22523_v55, %v22523_v55  ;;  %v19299_v55 = vld [vmem:[%s22188_s16 + $0x9e0] ss:$16 sps:$4 sm:$0xff]  }
 0x1bd   : > { %12538 = vmatprep.subr.bf16.mxu0 %v19217_v6  ;;  %13768 = vmatprep.subr.bf16.mxu1 %v19220_v7  ;;  %v19296_v6 = vld [vmem:[%s22188_s16 + $0x9c8] ss:$16 sps:$4 sm:$0xff]   ;;  %v415_v7 = vadd.s32 1408, %v22251_v41 }
 0x1be   : > { %17748 = vmatprep.mubr.msk.bf16.mxu0 %vm17746_vm1, %v17747_v8  ;;  %17925 = vmatprep.mubr.msk.bf16.mxu1 %vm17746_vm1, %v17747_v8  ;;  %v19301_v8 = vld [vmem:[%s22188_s16 + $0x9e4] ss:$16 sps:$4 sm:$0xff]  }
 0x1c0   : > { %12539 = vmatpush1.bf16.msra.mxu0 %v19215_v46  ;;  %13769 = vmatpush1.bf16.msra.mxu1 %v19218_v9  ;;  %v19304_v46 = vld [vmem:[%s22188_s16 + $0x9ec] ss:$16 sps:$4 sm:$0xff]   ;;  %v472_v9 = vadd.s32 %v22262_v50, %v412_v3 }
 0x1c1   : > { %12540 = vmatprep.subr.bf16.mxu0 %v19223_v10  ;;  %13770 = vmatprep.subr.bf16.mxu1 %v19226_v11  ;;  %v22609_v10 = vrot.slane %v646_v4, %v22267_v53  ;;  %v19302_v11 = vld [vmem:[%s22188_s16 + $0x9e8] ss:$16 sps:$4 sm:$0xff]   ;;  %v19376_v3 = vld [vmem:[%s22188_s16 + $0xb6c] ss:$16 sps:$4 sm:$0xff]   ;;  %v19371_v4 = vld [vmem:[%s22188_s16 + $0xb60] ss:$16 sps:$4 sm:$0xff]  }
 0x1c2   : > { %vm531_vm2 = vcmp.lt.s32.totalorder %v472_v9, 30000  ;;  %v19385_v9 = vld [vmem:[%s22188_s16 + $0xba4] ss:$16 sps:$4 sm:$0xff]  }
 0x1c3   : > { %vm17749_vm3 = vmpackc.low %vm531_vm2, %vm531_vm2 }
 0x1c4   : > { %12541 = vmatpush1.bf16.msra.mxu0 %v19221_v12  ;;  %13771 = vmatpush1.bf16.msra.mxu1 %v19224_v13  ;;  %v475_v12 = vadd.s32 %v22262_v50, %v415_v7  ;;  %v19307_v13 = vld [vmem:[%s22188_s16 + $0xa04] ss:$16 sps:$4 sm:$0xff]   ;;  %v19382_v7 = vld [vmem:[%s22188_s16 + $0xb8c] ss:$16 sps:$4 sm:$0xff]  }
 0x1c5   : > { %12542 = vmatprep.subr.bf16.mxu0 %v19229_v14  ;;  %13772 = vmatprep.subr.bf16.mxu1 %v19232_v15  ;;  %v19310_v14 = vld [vmem:[%s22188_s16 + $0xa0c] ss:$16 sps:$4 sm:$0xff]   ;;  %v19305_v15 = vld [vmem:[%s22188_s16 + $0xa00] ss:$16 sps:$4 sm:$0xff]  }
 0x1c6   : > { %vm534_vm4 = vcmp.lt.s32.totalorder %v475_v12, 30000  ;;  %v19386_v12 = vld [vmem:[%s22188_s16 + $0xba8] ss:$16 sps:$4 sm:$0xff]  }
 0x1c7   : > { %vm17752_vm5 = vmpackc.low %vm534_vm4, %vm534_vm4 }
 0x1c8   : > { %12543 = vmatpush1.bf16.msra.mxu0 %v19227_v16  ;;  %13773 = vmatpush1.bf16.msra.mxu1 %v19230_v17  ;;  %v662_v16 = vcombine.high %v22609_v10, %v22609_v10  ;;  %v17750_v17 = vpack.c.bf16 %v22532_v60, %v22532_v60  ;;  %v19311_v60 = vld [vmem:[%s22188_s16 + $0xa20] ss:$16 sps:$4 sm:$0xff]  }
 0x1c9   : > { %12544 = vmatprep.subr.bf16.mxu0 %v19235_v18  ;;  %13774 = vmatprep.subr.bf16.mxu1 %v19238_v19  ;;  %v19308_v18 = vld [vmem:[%s22188_s16 + $0xa08] ss:$16 sps:$4 sm:$0xff]   ;;  %v19313_v19 = vld [vmem:[%s22188_s16 + $0xa24] ss:$16 sps:$4 sm:$0xff]  }
 0x1cc   : > { %12545 = vmatpush1.bf16.msra.mxu0 %v19233_v20  ;;  %13775 = vmatpush1.bf16.msra.mxu1 %v19236_v21  ;;  %v19316_v20 = vld [vmem:[%s22188_s16 + $0xa2c] ss:$16 sps:$4 sm:$0xff]   ;;  %v17753_v21 = vpack.c.bf16 %v662_v16, %v662_v16  ;;  %v22678_v16 = vld [vmem:[%s22210_s15 + $0x18] sm:$0xff] }
 0x1cd   : > { %12546 = vmatprep.subr.bf16.mxu0 %v19241_v22  ;;  %13776 = vmatprep.subr.bf16.mxu1 %v19244_v23  ;;  %v19314_v22 = vld [vmem:[%s22188_s16 + $0xa28] ss:$16 sps:$4 sm:$0xff]   ;;  %v19319_v23 = vld [vmem:[%s22188_s16 + $0xa44] ss:$16 sps:$4 sm:$0xff]  }
 0x1d0   : > { %12547 = vmatpush1.bf16.msra.mxu0 %v19239_v24  ;;  %13777 = vmatpush1.bf16.msra.mxu1 %v19242_v25  ;;  %v19322_v24 = vld [vmem:[%s22188_s16 + $0xa4c] ss:$16 sps:$4 sm:$0xff]   ;;  %v19317_v25 = vld [vmem:[%s22188_s16 + $0xa40] ss:$16 sps:$4 sm:$0xff]  }
 0x1d1   : > { %12548 = vmatprep.subr.bf16.mxu0 %v19247_v26  ;;  %13778 = vmatprep.subr.bf16.mxu1 %v19250_v27  ;;  %v19320_v26 = vld [vmem:[%s22188_s16 + $0xa48] ss:$16 sps:$4 sm:$0xff]   ;;  %v19325_v27 = vld [vmem:[%s22188_s16 + $0xa64] ss:$16 sps:$4 sm:$0xff]  }
 0x1d4   : > { %12549 = vmatpush1.bf16.msra.mxu0 %v19245_v28  ;;  %13779 = vmatpush1.bf16.msra.mxu1 %v19248_v29  ;;  %v19328_v28 = vld [vmem:[%s22188_s16 + $0xa6c] ss:$16 sps:$4 sm:$0xff]   ;;  %v19323_v29 = vld [vmem:[%s22188_s16 + $0xa60] ss:$16 sps:$4 sm:$0xff]  }
 0x1d5   : > { %12550 = vmatprep.subr.bf16.mxu0 %v19253_v30  ;;  %13780 = vmatprep.subr.bf16.mxu1 %v19256_v31  ;;  %v19326_v30 = vld [vmem:[%s22188_s16 + $0xa68] ss:$16 sps:$4 sm:$0xff]   ;;  %v19331_v31 = vld [vmem:[%s22188_s16 + $0xa84] ss:$16 sps:$4 sm:$0xff]  }
 0x1d8   : > { %12551 = vmatpush1.bf16.msra.mxu0 %v19251_v33  ;;  %13781 = vmatpush1.bf16.msra.mxu1 %v19254_v34  ;;  %v19334_v33 = vld [vmem:[%s22188_s16 + $0xa8c] ss:$16 sps:$4 sm:$0xff]   ;;  %v19329_v34 = vld [vmem:[%s22188_s16 + $0xa80] ss:$16 sps:$4 sm:$0xff]  }
 0x1d9   : > { %12552 = vmatprep.subr.bf16.mxu0 %v19259_v35  ;;  %13782 = vmatprep.subr.bf16.mxu1 %v19262_v36  ;;  %v19332_v35 = vld [vmem:[%s22188_s16 + $0xa88] ss:$16 sps:$4 sm:$0xff]   ;;  %v19337_v36 = vld [vmem:[%s22188_s16 + $0xaa4] ss:$16 sps:$4 sm:$0xff]  }
 0x1dc   : > { %12553 = vmatpush1.bf16.msra.mxu0 %v19257_v37  ;;  %13783 = vmatpush1.bf16.msra.mxu1 %v19260_v38  ;;  %v19340_v37 = vld [vmem:[%s22188_s16 + $0xaac] ss:$16 sps:$4 sm:$0xff]   ;;  %v19335_v38 = vld [vmem:[%s22188_s16 + $0xaa0] ss:$16 sps:$4 sm:$0xff]  }
 0x1dd   : > { %12554 = vmatprep.subr.bf16.mxu0 %v19265_v40  ;;  %13784 = vmatprep.subr.bf16.mxu1 %v19268_v42  ;;  %v19338_v40 = vld [vmem:[%s22188_s16 + $0xaa8] ss:$16 sps:$4 sm:$0xff]   ;;  %v19343_v42 = vld [vmem:[%s22188_s16 + $0xac4] ss:$16 sps:$4 sm:$0xff]  }
 0x1e0   : > { %12555 = vmatpush1.bf16.msra.mxu0 %v19263_v43  ;;  %13785 = vmatpush1.bf16.msra.mxu1 %v19266_v44  ;;  %v19346_v43 = vld [vmem:[%s22188_s16 + $0xacc] ss:$16 sps:$4 sm:$0xff]   ;;  %v19341_v44 = vld [vmem:[%s22188_s16 + $0xac0] ss:$16 sps:$4 sm:$0xff]  }
 0x1e1   : > { %12556 = vmatprep.subr.bf16.mxu0 %v19271_v39  ;;  %13786 = vmatprep.subr.bf16.mxu1 %v19274_v47  ;;  %v19344_v39 = vld [vmem:[%s22188_s16 + $0xac8] ss:$16 sps:$4 sm:$0xff]   ;;  %v19349_v47 = vld [vmem:[%s22188_s16 + $0xae4] ss:$16 sps:$4 sm:$0xff]  }
 0x1e4   : > { %12557 = vmatpush1.bf16.msra.mxu0 %v19269_v48  ;;  %13787 = vmatpush1.bf16.msra.mxu1 %v19272_v49  ;;  %v19352_v48 = vld [vmem:[%s22188_s16 + $0xaec] ss:$16 sps:$4 sm:$0xff]   ;;  %v19347_v49 = vld [vmem:[%s22188_s16 + $0xae0] ss:$16 sps:$4 sm:$0xff]  }
 0x1e5   : > { %12558 = vmatprep.subr.bf16.mxu0 %v19277_v51  ;;  %13788 = vmatprep.subr.bf16.mxu1 %v19280_v52  ;;  %v19350_v51 = vld [vmem:[%s22188_s16 + $0xae8] ss:$16 sps:$4 sm:$0xff]   ;;  %v19355_v52 = vld [vmem:[%s22188_s16 + $0xb04] ss:$16 sps:$4 sm:$0xff]  }
 0x1e8   : > { %12559 = vmatpush1.bf16.msra.mxu0 %v19275_v54  ;;  %13789 = vmatpush1.bf16.msra.mxu1 %v19278_v56  ;;  %v19358_v54 = vld [vmem:[%s22188_s16 + $0xb0c] ss:$16 sps:$4 sm:$0xff]   ;;  %v19353_v56 = vld [vmem:[%s22188_s16 + $0xb00] ss:$16 sps:$4 sm:$0xff]  }
 0x1e9   : > { %12560 = vmatprep.subr.bf16.mxu0 %v19283_v57  ;;  %13790 = vmatprep.subr.bf16.mxu1 %v19286_v58  ;;  %v19356_v57 = vld [vmem:[%s22188_s16 + $0xb08] ss:$16 sps:$4 sm:$0xff]   ;;  %v19361_v58 = vld [vmem:[%s22188_s16 + $0xb24] ss:$16 sps:$4 sm:$0xff]  }
 0x1ec   : > { %12561 = vmatpush1.bf16.msra.mxu0 %v19281_v59  ;;  %13791 = vmatpush1.bf16.msra.mxu1 %v19284_v32  ;;  %v19364_v59 = vld [vmem:[%s22188_s16 + $0xb2c] ss:$16 sps:$4 sm:$0xff]   ;;  %v19359_v32 = vld [vmem:[%s22188_s16 + $0xb20] ss:$16 sps:$4 sm:$0xff]  }
 0x1ed   : > { %12562 = vmatprep.subr.bf16.mxu0 %v19289_v61  ;;  %13792 = vmatprep.subr.bf16.mxu1 %v19292_v62  ;;  %v19362_v61 = vld [vmem:[%s22188_s16 + $0xb28] ss:$16 sps:$4 sm:$0xff]   ;;  %v19367_v62 = vld [vmem:[%s22188_s16 + $0xb44] ss:$16 sps:$4 sm:$0xff]  }
 0x1f0   : > { %12563 = vmatpush1.bf16.msra.mxu0 %v19287_v63  ;;  %13793 = vmatpush1.bf16.msra.mxu1 %v19290_v0  ;;  %v19370_v63 = vld [vmem:[%s22188_s16 + $0xb4c] ss:$16 sps:$4 sm:$0xff]   ;;  %v19365_v0 = vld [vmem:[%s22188_s16 + $0xb40] ss:$16 sps:$4 sm:$0xff]  }
 0x1f1   : > { %12564 = vmatprep.subr.bf16.mxu0 %v19295_v1  ;;  %13794 = vmatprep.subr.bf16.mxu1 %v19298_v2  ;;  %v19368_v1 = vld [vmem:[%s22188_s16 + $0xb48] ss:$16 sps:$4 sm:$0xff]   ;;  %v19373_v2 = vld [vmem:[%s22188_s16 + $0xb64] ss:$16 sps:$4 sm:$0xff]  }
 0x1f4   : > { %12565 = vmatpush1.bf16.msra.mxu0 %v19293_v5  ;;  %13795 = vmatpush1.bf16.msra.mxu1 %v19296_v6  ;;  %v19374_v5 = vld [vmem:[%s22188_s16 + $0xb68] ss:$16 sps:$4 sm:$0xff]   ;;  %v19379_v6 = vld [vmem:[%s22188_s16 + $0xb84] ss:$16 sps:$4 sm:$0xff]  }
 0x1f5   : > { %12566 = vmatprep.subr.bf16.mxu0 %v19301_v8  ;;  %13796 = vmatprep.subr.bf16.mxu1 %v19304_v46  ;;  %v19377_v8 = vld [vmem:[%s22188_s16 + $0xb80] ss:$16 sps:$4 sm:$0xff]   ;;  %v19380_v46 = vld [vmem:[%s22188_s16 + $0xb88] ss:$16 sps:$4 sm:$0xff]  }
 0x1f8   : > { %12567 = vmatpush1.bf16.msra.mxu0 %v19299_v55  ;;  %13797 = vmatpush1.bf16.msra.mxu1 %v19302_v11  ;;  %v19388_v55 = vld [vmem:[%s22188_s16 + $0xbac] ss:$16 sps:$4 sm:$0xff]   ;;  %v19383_v11 = vld [vmem:[%s22188_s16 + $0xba0] ss:$16 sps:$4 sm:$0xff]  }
 0x1f9   : > { %12577 = vmatprep.subr.bf16.mxu0 %v19307_v13  ;;  %13807 = vmatprep.subr.bf16.mxu1 %v19310_v14  ;;  %v19391_v13 = vld [vmem:[%s22188_s16 + $0xbc4] ss:$16 sps:$4 sm:$0xff]   ;;  %v19394_v14 = vld [vmem:[%s22188_s16 + $0xbcc] ss:$16 sps:$4 sm:$0xff]  }
 0x1fb   : > { %17751 = vmatmul.mubr.msk.bf16.vlgmr.msra.gmra.mrb[0].mxu0 %vm17749_vm3, %v17750_v17  ;;  %17928 = vmatmul.mubr.msk.bf16.vlgmr.msra.gmra.mrb[0].mxu1 %vm17749_vm3, %v17750_v17  ;;  %v19389_v17 = vld [vmem:[%s22188_s16 + $0xbc0] ss:$16 sps:$4 sm:$0xff]  }
 0x1fc   : > { %12578 = vmatpush1.bf16.msra.mxu0 %v19305_v15  ;;  %13808 = vmatpush1.bf16.msra.mxu1 %v19308_v18  ;;  %v414_v15 = vadd.s32 1280, %v22251_v41  ;;  %v19392_v18 = vld [vmem:[%s22188_s16 + $0xbc8] ss:$16 sps:$4 sm:$0xff]  }
 0x1fd   : > { %12579 = vmatprep.subr.bf16.mxu0 %v19313_v19  ;;  %13809 = vmatprep.subr.bf16.mxu1 %v19316_v20  ;;  %v417_v19 = vadd.s32 1664, %v22251_v41  ;;  %v19397_v20 = vld [vmem:[%s22188_s16 + $0xbe4] ss:$16 sps:$4 sm:$0xff]  }
 0x1fe   : > { %17754 = vmatprep.mubr.msk.bf16.mxu0 %vm17752_vm5, %v17753_v21  ;;  %17931 = vmatprep.mubr.msk.bf16.mxu1 %vm17752_vm5, %v17753_v21  ;;  %v19400_v21 = vld [vmem:[%s22188_s16 + $0xbec] ss:$16 sps:$4 sm:$0xff]  }
 0x200   : > { %12580 = vmatpush1.bf16.msra.mxu0 %v19311_v60  ;;  %13810 = vmatpush1.bf16.msra.mxu1 %v19314_v22  ;;  %v474_v60 = vadd.s32 %v22262_v50, %v414_v15  ;;  %v22688_v22 = vrot.slane %v22678_v16, %v22267_v53  ;;  %v19473_v15 = vld [vmem:[%s22188_s16 + $0xd6c] ss:$16 sps:$4 sm:$0xff]  }
 0x201   : > { %12581 = vmatprep.subr.bf16.mxu0 %v19319_v23  ;;  %13811 = vmatprep.subr.bf16.mxu1 %v19322_v24  ;;  %v19395_v23 = vld [vmem:[%s22188_s16 + $0xbe0] ss:$16 sps:$4 sm:$0xff]   ;;  %v19398_v24 = vld [vmem:[%s22188_s16 + $0xbe8] ss:$16 sps:$4 sm:$0xff]  }
 0x202   : > { %vm533_vm6 = vcmp.lt.s32.totalorder %v474_v60, 30000  ;;  %v19477_v60 = vld [vmem:[%s22188_s16 + $0xd88] ss:$16 sps:$4 sm:$0xff]  }
 0x203   : > { %vm17755_vm7 = vmpackc.low %vm533_vm6, %vm533_vm6 }
 0x204   : > { %12582 = vmatpush1.bf16.msra.mxu0 %v19317_v25  ;;  %13812 = vmatpush1.bf16.msra.mxu1 %v19320_v26  ;;  %v477_v25 = vadd.s32 %v22262_v50, %v417_v19  ;;  %v19404_v26 = vld [vmem:[%s22188_s16 + $0xc04] ss:$16 sps:$4 sm:$0xff]  }
 0x205   : > { %12583 = vmatprep.subr.bf16.mxu0 %v19325_v27  ;;  %13813 = vmatprep.subr.bf16.mxu1 %v19328_v28  ;;  %v19407_v27 = vld [vmem:[%s22188_s16 + $0xc0c] ss:$16 sps:$4 sm:$0xff]   ;;  %v19402_v28 = vld [vmem:[%s22188_s16 + $0xc00] ss:$16 sps:$4 sm:$0xff]   ;;  %v19476_v19 = vld [vmem:[%s22188_s16 + $0xd84] ss:$16 sps:$4 sm:$0xff]  }
 0x206   : > { %vm536_vm8 = vcmp.lt.s32.totalorder %v477_v25, 30000  ;;  %v19480_v25 = vld [vmem:[%s22188_s16 + $0xda0] ss:$16 sps:$4 sm:$0xff]  }
 0x207   : > { %vm17758_vm9 = vmpackc.low %vm536_vm8, %vm536_vm8 }
 0x208   : > { %12584 = vmatpush1.bf16.msra.mxu0 %v19323_v29  ;;  %13814 = vmatpush1.bf16.msra.mxu1 %v19326_v30  ;;  %v678_v29 = vcombine.high %v22688_v22, %v22688_v22  ;;  %v17756_v30 = vpack.c.bf16 %v22609_v10, %v22609_v10  ;;  %v19408_v10 = vld [vmem:[%s22188_s16 + $0xc20] ss:$16 sps:$4 sm:$0xff]  }
 0x209   : > { %12585 = vmatprep.subr.bf16.mxu0 %v19331_v31  ;;  %13815 = vmatprep.subr.bf16.mxu1 %v19334_v33  ;;  %v19405_v31 = vld [vmem:[%s22188_s16 + $0xc08] ss:$16 sps:$4 sm:$0xff]   ;;  %v19410_v33 = vld [vmem:[%s22188_s16 + $0xc24] ss:$16 sps:$4 sm:$0xff]  }
 0x20c   : > { %12586 = vmatpush1.bf16.msra.mxu0 %v19329_v34  ;;  %13816 = vmatpush1.bf16.msra.mxu1 %v19332_v35  ;;  %v19413_v34 = vld [vmem:[%s22188_s16 + $0xc2c] ss:$16 sps:$4 sm:$0xff]   ;;  %v17759_v35 = vpack.c.bf16 %v678_v29, %v678_v29  ;;  %v416_v29 = vadd.s32 1536, %v22251_v41 }
 0x20d   : > { %12587 = vmatprep.subr.bf16.mxu0 %v19337_v36  ;;  %13817 = vmatprep.subr.bf16.mxu1 %v19340_v37  ;;  %v19411_v36 = vld [vmem:[%s22188_s16 + $0xc28] ss:$16 sps:$4 sm:$0xff]   ;;  %v19416_v37 = vld [vmem:[%s22188_s16 + $0xc44] ss:$16 sps:$4 sm:$0xff]  }
 0x210   : > { %12588 = vmatpush1.bf16.msra.mxu0 %v19335_v38  ;;  %13818 = vmatpush1.bf16.msra.mxu1 %v19338_v40  ;;  %v19419_v38 = vld [vmem:[%s22188_s16 + $0xc4c] ss:$16 sps:$4 sm:$0xff]   ;;  %v19414_v40 = vld [vmem:[%s22188_s16 + $0xc40] ss:$16 sps:$4 sm:$0xff]  }
 0x211   : > { %12589 = vmatprep.subr.bf16.mxu0 %v19343_v42  ;;  %13819 = vmatprep.subr.bf16.mxu1 %v19346_v43  ;;  %v19417_v42 = vld [vmem:[%s22188_s16 + $0xc48] ss:$16 sps:$4 sm:$0xff]   ;;  %v19422_v43 = vld [vmem:[%s22188_s16 + $0xc64] ss:$16 sps:$4 sm:$0xff]  }
 0x214   : > { %12590 = vmatpush1.bf16.msra.mxu0 %v19341_v44  ;;  %13820 = vmatpush1.bf16.msra.mxu1 %v19344_v39  ;;  %v19425_v44 = vld [vmem:[%s22188_s16 + $0xc6c] ss:$16 sps:$4 sm:$0xff]   ;;  %v19420_v39 = vld [vmem:[%s22188_s16 + $0xc60] ss:$16 sps:$4 sm:$0xff]  }
 0x215   : > { %12591 = vmatprep.subr.bf16.mxu0 %v19349_v47  ;;  %13821 = vmatprep.subr.bf16.mxu1 %v19352_v48  ;;  %v19423_v47 = vld [vmem:[%s22188_s16 + $0xc68] ss:$16 sps:$4 sm:$0xff]   ;;  %v19428_v48 = vld [vmem:[%s22188_s16 + $0xc84] ss:$16 sps:$4 sm:$0xff]  }
 0x218   : > { %12592 = vmatpush1.bf16.msra.mxu0 %v19347_v49  ;;  %13822 = vmatpush1.bf16.msra.mxu1 %v19350_v51  ;;  %v19431_v49 = vld [vmem:[%s22188_s16 + $0xc8c] ss:$16 sps:$4 sm:$0xff]   ;;  %v19426_v51 = vld [vmem:[%s22188_s16 + $0xc80] ss:$16 sps:$4 sm:$0xff]  }
 0x219   : > { %12593 = vmatprep.subr.bf16.mxu0 %v19355_v52  ;;  %13823 = vmatprep.subr.bf16.mxu1 %v19358_v54  ;;  %v19429_v52 = vld [vmem:[%s22188_s16 + $0xc88] ss:$16 sps:$4 sm:$0xff]   ;;  %v19434_v54 = vld [vmem:[%s22188_s16 + $0xca4] ss:$16 sps:$4 sm:$0xff]  }
 0x21c   : > { %12594 = vmatpush1.bf16.msra.mxu0 %v19353_v56  ;;  %13824 = vmatpush1.bf16.msra.mxu1 %v19356_v57  ;;  %v19437_v56 = vld [vmem:[%s22188_s16 + $0xcac] ss:$16 sps:$4 sm:$0xff]   ;;  %v19432_v57 = vld [vmem:[%s22188_s16 + $0xca0] ss:$16 sps:$4 sm:$0xff]  }
 0x21d   : > { %12595 = vmatprep.subr.bf16.mxu0 %v19361_v58  ;;  %13825 = vmatprep.subr.bf16.mxu1 %v19364_v59  ;;  %v19435_v58 = vld [vmem:[%s22188_s16 + $0xca8] ss:$16 sps:$4 sm:$0xff]   ;;  %v19440_v59 = vld [vmem:[%s22188_s16 + $0xcc4] ss:$16 sps:$4 sm:$0xff]  }
 0x220   : > { %12596 = vmatpush1.bf16.msra.mxu0 %v19359_v32  ;;  %13826 = vmatpush1.bf16.msra.mxu1 %v19362_v61  ;;  %v19443_v32 = vld [vmem:[%s22188_s16 + $0xccc] ss:$16 sps:$4 sm:$0xff]   ;;  %v19438_v61 = vld [vmem:[%s22188_s16 + $0xcc0] ss:$16 sps:$4 sm:$0xff]  }
 0x221   : > { %12597 = vmatprep.subr.bf16.mxu0 %v19367_v62  ;;  %13827 = vmatprep.subr.bf16.mxu1 %v19370_v63  ;;  %v19441_v62 = vld [vmem:[%s22188_s16 + $0xcc8] ss:$16 sps:$4 sm:$0xff]   ;;  %v19446_v63 = vld [vmem:[%s22188_s16 + $0xce4] ss:$16 sps:$4 sm:$0xff]  }
 0x224   : > { %12598 = vmatpush1.bf16.msra.mxu0 %v19365_v0  ;;  %13828 = vmatpush1.bf16.msra.mxu1 %v19368_v1  ;;  %v19449_v0 = vld [vmem:[%s22188_s16 + $0xcec] ss:$16 sps:$4 sm:$0xff]   ;;  %v19444_v1 = vld [vmem:[%s22188_s16 + $0xce0] ss:$16 sps:$4 sm:$0xff]  }
 0x225   : > { %12599 = vmatprep.subr.bf16.mxu0 %v19373_v2  ;;  %13829 = vmatprep.subr.bf16.mxu1 %v19376_v3  ;;  %v19447_v2 = vld [vmem:[%s22188_s16 + $0xce8] ss:$16 sps:$4 sm:$0xff]   ;;  %v19452_v3 = vld [vmem:[%s22188_s16 + $0xd04] ss:$16 sps:$4 sm:$0xff]  }
 0x228   : > { %12600 = vmatpush1.bf16.msra.mxu0 %v19371_v4  ;;  %13830 = vmatpush1.bf16.msra.mxu1 %v19374_v5  ;;  %v19455_v4 = vld [vmem:[%s22188_s16 + $0xd0c] ss:$16 sps:$4 sm:$0xff]   ;;  %v19450_v5 = vld [vmem:[%s22188_s16 + $0xd00] ss:$16 sps:$4 sm:$0xff]  }
 0x229   : > { %12601 = vmatprep.subr.bf16.mxu0 %v19379_v6  ;;  %13831 = vmatprep.subr.bf16.mxu1 %v19382_v7  ;;  %v19453_v6 = vld [vmem:[%s22188_s16 + $0xd08] ss:$16 sps:$4 sm:$0xff]   ;;  %v19458_v7 = vld [vmem:[%s22188_s16 + $0xd24] ss:$16 sps:$4 sm:$0xff]  }
 0x22c   : > { %12602 = vmatpush1.bf16.msra.mxu0 %v19377_v8  ;;  %13832 = vmatpush1.bf16.msra.mxu1 %v19380_v46  ;;  %v19461_v8 = vld [vmem:[%s22188_s16 + $0xd2c] ss:$16 sps:$4 sm:$0xff]   ;;  %v19456_v46 = vld [vmem:[%s22188_s16 + $0xd20] ss:$16 sps:$4 sm:$0xff]  }
 0x22d   : > { %12603 = vmatprep.subr.bf16.mxu0 %v19385_v9  ;;  %13833 = vmatprep.subr.bf16.mxu1 %v19388_v55  ;;  %v19459_v9 = vld [vmem:[%s22188_s16 + $0xd28] ss:$16 sps:$4 sm:$0xff]   ;;  %v19464_v55 = vld [vmem:[%s22188_s16 + $0xd44] ss:$16 sps:$4 sm:$0xff]  }
 0x230   : > { %12604 = vmatpush1.bf16.msra.mxu0 %v19383_v11  ;;  %13834 = vmatpush1.bf16.msra.mxu1 %v19386_v12  ;;  %v19467_v11 = vld [vmem:[%s22188_s16 + $0xd4c] ss:$16 sps:$4 sm:$0xff]   ;;  %v19462_v12 = vld [vmem:[%s22188_s16 + $0xd40] ss:$16 sps:$4 sm:$0xff]  }
 0x231   : > { %12605 = vmatprep.subr.bf16.mxu0 %v19391_v13  ;;  %13835 = vmatprep.subr.bf16.mxu1 %v19394_v14  ;;  %v19465_v13 = vld [vmem:[%s22188_s16 + $0xd48] ss:$16 sps:$4 sm:$0xff]   ;;  %v19470_v14 = vld [vmem:[%s22188_s16 + $0xd64] ss:$16 sps:$4 sm:$0xff]  }
 0x234   : > { %12606 = vmatpush1.bf16.msra.mxu0 %v19389_v17  ;;  %13836 = vmatpush1.bf16.msra.mxu1 %v19392_v18  ;;  %v19468_v17 = vld [vmem:[%s22188_s16 + $0xd60] ss:$16 sps:$4 sm:$0xff]   ;;  %v19471_v18 = vld [vmem:[%s22188_s16 + $0xd68] ss:$16 sps:$4 sm:$0xff]  }
 0x235   : > { %12607 = vmatprep.subr.bf16.mxu0 %v19397_v20  ;;  %13837 = vmatprep.subr.bf16.mxu1 %v19400_v21  ;;  %v19479_v20 = vld [vmem:[%s22188_s16 + $0xd8c] ss:$16 sps:$4 sm:$0xff]   ;;  %v19474_v21 = vld [vmem:[%s22188_s16 + $0xd80] ss:$16 sps:$4 sm:$0xff]  }
 0x238   : > { %12608 = vmatpush1.bf16.msra.mxu0 %v19395_v23  ;;  %13838 = vmatpush1.bf16.msra.mxu1 %v19398_v24  ;;  %v19482_v23 = vld [vmem:[%s22188_s16 + $0xda4] ss:$16 sps:$4 sm:$0xff]   ;;  %v19485_v24 = vld [vmem:[%s22188_s16 + $0xdac] ss:$16 sps:$4 sm:$0xff]  }
 0x239   : > { %12618 = vmatprep.subr.bf16.mxu0 %v19404_v26  ;;  %13848 = vmatprep.subr.bf16.mxu1 %v19407_v27  ;;  %v19483_v26 = vld [vmem:[%s22188_s16 + $0xda8] ss:$16 sps:$4 sm:$0xff]   ;;  %v19488_v27 = vld [vmem:[%s22188_s16 + $0xdc4] ss:$16 sps:$4 sm:$0xff]  }
 0x23b   : > { %17757 = vmatmul.mubr.msk.bf16.vlgmr.msra.gmra.mrb[0].mxu0 %vm17755_vm7, %v17756_v30  ;;  %17934 = vmatmul.mubr.msk.bf16.vlgmr.msra.gmra.mrb[0].mxu1 %vm17755_vm7, %v17756_v30  ;;  %v663_v30 = vcombine.high %v22678_v16, %v22678_v16  ;;  %v19492_v16 = vld [vmem:[%s22188_s16 + $0xde0] ss:$16 sps:$4 sm:$0xff]  }
 0x23c   : > { %12619 = vmatpush1.bf16.msra.mxu0 %v19402_v28  ;;  %13849 = vmatpush1.bf16.msra.mxu1 %v19405_v31  ;;  %v19491_v28 = vld [vmem:[%s22188_s16 + $0xdcc] ss:$16 sps:$4 sm:$0xff]   ;;  %v19486_v31 = vld [vmem:[%s22188_s16 + $0xdc0] ss:$16 sps:$4 sm:$0xff]  }
 0x23d   : > { %12620 = vmatprep.subr.bf16.mxu0 %v19410_v33  ;;  %13850 = vmatprep.subr.bf16.mxu1 %v19413_v34  ;;  %v19489_v33 = vld [vmem:[%s22188_s16 + $0xdc8] ss:$16 sps:$4 sm:$0xff]   ;;  %v419_v34 = vadd.s32 1920, %v22251_v41 }
 0x23e   : > { %17760 = vmatprep.mubr.msk.bf16.mxu0 %vm17758_vm9, %v17759_v35  ;;  %17937 = vmatprep.mubr.msk.bf16.mxu1 %vm17758_vm9, %v17759_v35  ;;  %v19494_v35 = vld [vmem:[%s22188_s16 + $0xde4] ss:$16 sps:$4 sm:$0xff]  }
 0x240   : > { %12621 = vmatpush1.bf16.msra.mxu0 %v19408_v10  ;;  %13851 = vmatpush1.bf16.msra.mxu1 %v19411_v36  ;;  %v19497_v10 = vld [vmem:[%s22188_s16 + $0xdec] ss:$16 sps:$4 sm:$0xff]   ;;  %v476_v36 = vadd.s32 %v22262_v50, %v416_v29 }
 0x241   : > { %12622 = vmatprep.subr.bf16.mxu0 %v19416_v37  ;;  %13852 = vmatprep.subr.bf16.mxu1 %v19419_v38  ;;  %v22765_v37 = vrot.slane %v663_v30, %v22267_v53  ;;  %v19495_v38 = vld [vmem:[%s22188_s16 + $0xde8] ss:$16 sps:$4 sm:$0xff]   ;;  %v19569_v29 = vld [vmem:[%s22188_s16 + $0xf6c] ss:$16 sps:$4 sm:$0xff]   ;;  %v19564_v30 = vld [vmem:[%s22188_s16 + $0xf60] ss:$16 sps:$4 sm:$0xff]  }
 0x242   : > { %vm535_vm10 = vcmp.lt.s32.totalorder %v476_v36, 30000  ;;  %v19578_v36 = vld [vmem:[%s22188_s16 + $0xfa4] ss:$16 sps:$4 sm:$0xff]  }
 0x243   : > { %vm17761_vm11 = vmpackc.low %vm535_vm10, %vm535_vm10 }
 0x244   : > { %12623 = vmatpush1.bf16.msra.mxu0 %v19414_v40  ;;  %13853 = vmatpush1.bf16.msra.mxu1 %v19417_v42  ;;  %v479_v40 = vadd.s32 %v22262_v50, %v419_v34  ;;  %v19500_v42 = vld [vmem:[%s22188_s16 + $0xe04] ss:$16 sps:$4 sm:$0xff]   ;;  %v19575_v34 = vld [vmem:[%s22188_s16 + $0xf8c] ss:$16 sps:$4 sm:$0xff]  }
 0x245   : > { %12624 = vmatprep.subr.bf16.mxu0 %v19422_v43  ;;  %13854 = vmatprep.subr.bf16.mxu1 %v19425_v44  ;;  %v19503_v43 = vld [vmem:[%s22188_s16 + $0xe0c] ss:$16 sps:$4 sm:$0xff]   ;;  %v19498_v44 = vld [vmem:[%s22188_s16 + $0xe00] ss:$16 sps:$4 sm:$0xff]  }
 0x246   : > { %vm538_vm12 = vcmp.lt.s32.totalorder %v479_v40, 30000  ;;  %v19579_v40 = vld [vmem:[%s22188_s16 + $0xfa8] ss:$16 sps:$4 sm:$0xff]  }
 0x247   : > { %vm17764_vm13 = vmpackc.low %vm538_vm12, %vm538_vm12 }
 0x248   : > { %12625 = vmatpush1.bf16.msra.mxu0 %v19420_v39  ;;  %13855 = vmatpush1.bf16.msra.mxu1 %v19423_v47  ;;  %v679_v39 = vcombine.high %v22765_v37, %v22765_v37  ;;  %v17762_v47 = vpack.c.bf16 %v22688_v22, %v22688_v22  ;;  %v19504_v22 = vld [vmem:[%s22188_s16 + $0xe20] ss:$16 sps:$4 sm:$0xff]  }
 0x249   : > { %12626 = vmatprep.subr.bf16.mxu0 %v19428_v48  ;;  %13856 = vmatprep.subr.bf16.mxu1 %v19431_v49  ;;  %v19501_v48 = vld [vmem:[%s22188_s16 + $0xe08] ss:$16 sps:$4 sm:$0xff]   ;;  %v19506_v49 = vld [vmem:[%s22188_s16 + $0xe24] ss:$16 sps:$4 sm:$0xff]  }
 0x24c   : > { %12627 = vmatpush1.bf16.msra.mxu0 %v19426_v51  ;;  %13857 = vmatpush1.bf16.msra.mxu1 %v19429_v52  ;;  %v19509_v51 = vld [vmem:[%s22188_s16 + $0xe2c] ss:$16 sps:$4 sm:$0xff]   ;;  %v17765_v52 = vpack.c.bf16 %v679_v39, %v679_v39 }
 0x24d   : > { %12628 = vmatprep.subr.bf16.mxu0 %v19434_v54  ;;  %13858 = vmatprep.subr.bf16.mxu1 %v19437_v56  ;;  %v19507_v54 = vld [vmem:[%s22188_s16 + $0xe28] ss:$16 sps:$4 sm:$0xff]   ;;  %v19512_v56 = vld [vmem:[%s22188_s16 + $0xe44] ss:$16 sps:$4 sm:$0xff]  }
 0x24e   : > { %v22834_v39 = vld [vmem:[%s22210_s15 + $0x20] sm:$0xff] }
 0x250   : > { %12629 = vmatpush1.bf16.msra.mxu0 %v19432_v57  ;;  %13859 = vmatpush1.bf16.msra.mxu1 %v19435_v58  ;;  %v19515_v57 = vld [vmem:[%s22188_s16 + $0xe4c] ss:$16 sps:$4 sm:$0xff]   ;;  %v19510_v58 = vld [vmem:[%s22188_s16 + $0xe40] ss:$16 sps:$4 sm:$0xff]  }
 0x251   : > { %12630 = vmatprep.subr.bf16.mxu0 %v19440_v59  ;;  %13860 = vmatprep.subr.bf16.mxu1 %v19443_v32  ;;  %v19513_v59 = vld [vmem:[%s22188_s16 + $0xe48] ss:$16 sps:$4 sm:$0xff]   ;;  %v19518_v32 = vld [vmem:[%s22188_s16 + $0xe64] ss:$16 sps:$4 sm:$0xff]  }
 0x254   : > { %12631 = vmatpush1.bf16.msra.mxu0 %v19438_v61  ;;  %13861 = vmatpush1.bf16.msra.mxu1 %v19441_v62  ;;  %v19521_v61 = vld [vmem:[%s22188_s16 + $0xe6c] ss:$16 sps:$4 sm:$0xff]   ;;  %v19516_v62 = vld [vmem:[%s22188_s16 + $0xe60] ss:$16 sps:$4 sm:$0xff]  }
 0x255   : > { %12632 = vmatprep.subr.bf16.mxu0 %v19446_v63  ;;  %13862 = vmatprep.subr.bf16.mxu1 %v19449_v0  ;;  %v19519_v63 = vld [vmem:[%s22188_s16 + $0xe68] ss:$16 sps:$4 sm:$0xff]   ;;  %v19524_v0 = vld [vmem:[%s22188_s16 + $0xe84] ss:$16 sps:$4 sm:$0xff]  }
 0x258   : > { %12633 = vmatpush1.bf16.msra.mxu0 %v19444_v1  ;;  %13863 = vmatpush1.bf16.msra.mxu1 %v19447_v2  ;;  %v19527_v1 = vld [vmem:[%s22188_s16 + $0xe8c] ss:$16 sps:$4 sm:$0xff]   ;;  %v19522_v2 = vld [vmem:[%s22188_s16 + $0xe80] ss:$16 sps:$4 sm:$0xff]  }
 0x259   : > { %12634 = vmatprep.subr.bf16.mxu0 %v19452_v3  ;;  %13864 = vmatprep.subr.bf16.mxu1 %v19455_v4  ;;  %v19525_v3 = vld [vmem:[%s22188_s16 + $0xe88] ss:$16 sps:$4 sm:$0xff]   ;;  %v19530_v4 = vld [vmem:[%s22188_s16 + $0xea4] ss:$16 sps:$4 sm:$0xff]  }
 0x25c   : > { %12635 = vmatpush1.bf16.msra.mxu0 %v19450_v5  ;;  %13865 = vmatpush1.bf16.msra.mxu1 %v19453_v6  ;;  %v19533_v5 = vld [vmem:[%s22188_s16 + $0xeac] ss:$16 sps:$4 sm:$0xff]   ;;  %v19528_v6 = vld [vmem:[%s22188_s16 + $0xea0] ss:$16 sps:$4 sm:$0xff]  }
 0x25d   : > { %12636 = vmatprep.subr.bf16.mxu0 %v19458_v7  ;;  %13866 = vmatprep.subr.bf16.mxu1 %v19461_v8  ;;  %v19531_v7 = vld [vmem:[%s22188_s16 + $0xea8] ss:$16 sps:$4 sm:$0xff]   ;;  %v19536_v8 = vld [vmem:[%s22188_s16 + $0xec4] ss:$16 sps:$4 sm:$0xff]  }
 0x260   : > { %12637 = vmatpush1.bf16.msra.mxu0 %v19456_v46  ;;  %13867 = vmatpush1.bf16.msra.mxu1 %v19459_v9  ;;  %v19539_v46 = vld [vmem:[%s22188_s16 + $0xecc] ss:$16 sps:$4 sm:$0xff]   ;;  %v19534_v9 = vld [vmem:[%s22188_s16 + $0xec0] ss:$16 sps:$4 sm:$0xff]  }
 0x261   : > { %12638 = vmatprep.subr.bf16.mxu0 %v19464_v55  ;;  %13868 = vmatprep.subr.bf16.mxu1 %v19467_v11  ;;  %v19537_v55 = vld [vmem:[%s22188_s16 + $0xec8] ss:$16 sps:$4 sm:$0xff]   ;;  %v19542_v11 = vld [vmem:[%s22188_s16 + $0xee4] ss:$16 sps:$4 sm:$0xff]  }
 0x264   : > { %12639 = vmatpush1.bf16.msra.mxu0 %v19462_v12  ;;  %13869 = vmatpush1.bf16.msra.mxu1 %v19465_v13  ;;  %v19545_v12 = vld [vmem:[%s22188_s16 + $0xeec] ss:$16 sps:$4 sm:$0xff]   ;;  %v19540_v13 = vld [vmem:[%s22188_s16 + $0xee0] ss:$16 sps:$4 sm:$0xff]  }
 0x265   : > { %12640 = vmatprep.subr.bf16.mxu0 %v19470_v14  ;;  %13870 = vmatprep.subr.bf16.mxu1 %v19473_v15  ;;  %v19543_v14 = vld [vmem:[%s22188_s16 + $0xee8] ss:$16 sps:$4 sm:$0xff]   ;;  %v19548_v15 = vld [vmem:[%s22188_s16 + $0xf04] ss:$16 sps:$4 sm:$0xff]  }
 0x268   : > { %12641 = vmatpush1.bf16.msra.mxu0 %v19468_v17  ;;  %13871 = vmatpush1.bf16.msra.mxu1 %v19471_v18  ;;  %v19551_v17 = vld [vmem:[%s22188_s16 + $0xf0c] ss:$16 sps:$4 sm:$0xff]   ;;  %v19546_v18 = vld [vmem:[%s22188_s16 + $0xf00] ss:$16 sps:$4 sm:$0xff]  }
 0x269   : > { %12642 = vmatprep.subr.bf16.mxu0 %v19476_v19  ;;  %13872 = vmatprep.subr.bf16.mxu1 %v19479_v20  ;;  %v19549_v19 = vld [vmem:[%s22188_s16 + $0xf08] ss:$16 sps:$4 sm:$0xff]   ;;  %v19554_v20 = vld [vmem:[%s22188_s16 + $0xf24] ss:$16 sps:$4 sm:$0xff]  }
 0x26c   : > { %12643 = vmatpush1.bf16.msra.mxu0 %v19474_v21  ;;  %13873 = vmatpush1.bf16.msra.mxu1 %v19477_v60  ;;  %v19557_v21 = vld [vmem:[%s22188_s16 + $0xf2c] ss:$16 sps:$4 sm:$0xff]   ;;  %v19552_v60 = vld [vmem:[%s22188_s16 + $0xf20] ss:$16 sps:$4 sm:$0xff]  }
 0x26d   : > { %12644 = vmatprep.subr.bf16.mxu0 %v19482_v23  ;;  %13874 = vmatprep.subr.bf16.mxu1 %v19485_v24  ;;  %v19555_v23 = vld [vmem:[%s22188_s16 + $0xf28] ss:$16 sps:$4 sm:$0xff]   ;;  %v19560_v24 = vld [vmem:[%s22188_s16 + $0xf44] ss:$16 sps:$4 sm:$0xff]  }
 0x270   : > { %12645 = vmatpush1.bf16.msra.mxu0 %v19480_v25  ;;  %13875 = vmatpush1.bf16.msra.mxu1 %v19483_v26  ;;  %v19563_v25 = vld [vmem:[%s22188_s16 + $0xf4c] ss:$16 sps:$4 sm:$0xff]   ;;  %v19558_v26 = vld [vmem:[%s22188_s16 + $0xf40] ss:$16 sps:$4 sm:$0xff]  }
 0x271   : > { %12646 = vmatprep.subr.bf16.mxu0 %v19488_v27  ;;  %13876 = vmatprep.subr.bf16.mxu1 %v19491_v28  ;;  %v19561_v27 = vld [vmem:[%s22188_s16 + $0xf48] ss:$16 sps:$4 sm:$0xff]   ;;  %v19566_v28 = vld [vmem:[%s22188_s16 + $0xf64] ss:$16 sps:$4 sm:$0xff]  }
 0x274   : > { %12647 = vmatpush1.bf16.msra.mxu0 %v19486_v31  ;;  %13877 = vmatpush1.bf16.msra.mxu1 %v19489_v33  ;;  %v19567_v31 = vld [vmem:[%s22188_s16 + $0xf68] ss:$16 sps:$4 sm:$0xff]   ;;  %v19572_v33 = vld [vmem:[%s22188_s16 + $0xf84] ss:$16 sps:$4 sm:$0xff]  }
 0x275   : > { %12648 = vmatprep.subr.bf16.mxu0 %v19494_v35  ;;  %13878 = vmatprep.subr.bf16.mxu1 %v19497_v10  ;;  %v19570_v35 = vld [vmem:[%s22188_s16 + $0xf80] ss:$16 sps:$4 sm:$0xff]   ;;  %v19573_v10 = vld [vmem:[%s22188_s16 + $0xf88] ss:$16 sps:$4 sm:$0xff]  }
 0x278   : > { %12649 = vmatpush1.bf16.msra.mxu0 %v19492_v16  ;;  %13879 = vmatpush1.bf16.msra.mxu1 %v19495_v38  ;;  %v19581_v16 = vld [vmem:[%s22188_s16 + $0xfac] ss:$16 sps:$4 sm:$0xff]   ;;  %v19576_v38 = vld [vmem:[%s22188_s16 + $0xfa0] ss:$16 sps:$4 sm:$0xff]  }
 0x279   : > { %12659 = vmatprep.subr.bf16.mxu0 %v19500_v42  ;;  %13889 = vmatprep.subr.bf16.mxu1 %v19503_v43  ;;  %v19584_v42 = vld [vmem:[%s22188_s16 + $0xfc4] ss:$16 sps:$4 sm:$0xff]   ;;  %v19587_v43 = vld [vmem:[%s22188_s16 + $0xfcc] ss:$16 sps:$4 sm:$0xff]  }
 0x27b   : > { %17763 = vmatmul.mubr.msk.bf16.vlgmr.msra.gmra.mrb[0].mxu0 %vm17761_vm11, %v17762_v47  ;;  %17940 = vmatmul.mubr.msk.bf16.vlgmr.msra.gmra.mrb[0].mxu1 %vm17761_vm11, %v17762_v47  ;;  %v19582_v47 = vld [vmem:[%s22188_s16 + $0xfc0] ss:$16 sps:$4 sm:$0xff]  }
 0x27c   : > { %12660 = vmatpush1.bf16.msra.mxu0 %v19498_v44  ;;  %13890 = vmatpush1.bf16.msra.mxu1 %v19501_v48  ;;  %v418_v44 = vadd.s32 1792, %v22251_v41  ;;  %v19585_v48 = vld [vmem:[%s22188_s16 + $0xfc8] ss:$16 sps:$4 sm:$0xff]  }
 0x27d   : > { %12661 = vmatprep.subr.bf16.mxu0 %v19506_v49  ;;  %13891 = vmatprep.subr.bf16.mxu1 %v19509_v51  ;;  %v421_v49 = vadd.s32 2176, %v22251_v41  ;;  %v19590_v51 = vld [vmem:[%s22188_s16 + $0xfe4] ss:$16 sps:$4 sm:$0xff]  }
 0x27e   : > { %17766 = vmatprep.mubr.msk.bf16.mxu0 %vm17764_vm13, %v17765_v52  ;;  %17943 = vmatprep.mubr.msk.bf16.mxu1 %vm17764_vm13, %v17765_v52  ;;  %v19593_v52 = vld [vmem:[%s22188_s16 + $0xfec] ss:$16 sps:$4 sm:$0xff]  }
 0x280   : > { %12662 = vmatpush1.bf16.msra.mxu0 %v19504_v22  ;;  %13892 = vmatpush1.bf16.msra.mxu1 %v19507_v54  ;;  %v478_v22 = vadd.s32 %v22262_v50, %v418_v44  ;;  %v22844_v54 = vrot.slane %v22834_v39, %v22267_v53  ;;  %v19666_v44 = vld [vmem:[%s22188_s16 + $0x116c] ss:$16 sps:$4 sm:$0xff]  }
 0x281   : > { %12663 = vmatprep.subr.bf16.mxu0 %v19512_v56  ;;  %13893 = vmatprep.subr.bf16.mxu1 %v19515_v57  ;;  %v19588_v56 = vld [vmem:[%s22188_s16 + $0xfe0] ss:$16 sps:$4 sm:$0xff]   ;;  %v19591_v57 = vld [vmem:[%s22188_s16 + $0xfe8] ss:$16 sps:$4 sm:$0xff]  }
 0x282   : > { %vm537_vm14 = vcmp.lt.s32.totalorder %v478_v22, 30000  ;;  %v19670_v22 = vld [vmem:[%s22188_s16 + $0x1188] ss:$16 sps:$4 sm:$0xff]  }
 0x283   : > { %vm17767_vm15 = vmpackc.low %vm537_vm14, %vm537_vm14 }
 0x284   : > { %12664 = vmatpush1.bf16.msra.mxu0 %v19510_v58  ;;  %13894 = vmatpush1.bf16.msra.mxu1 %v19513_v59  ;;  %v481_v58 = vadd.s32 %v22262_v50, %v421_v49  ;;  %v19597_v59 = vld [vmem:[%s22188_s16 + $0x1004] ss:$16 sps:$4 sm:$0xff]  }
 0x285   : > { %12665 = vmatprep.subr.bf16.mxu0 %v19518_v32  ;;  %13895 = vmatprep.subr.bf16.mxu1 %v19521_v61  ;;  %v19600_v32 = vld [vmem:[%s22188_s16 + $0x100c] ss:$16 sps:$4 sm:$0xff]   ;;  %v19595_v61 = vld [vmem:[%s22188_s16 + $0x1000] ss:$16 sps:$4 sm:$0xff]   ;;  %v19669_v49 = vld [vmem:[%s22188_s16 + $0x1184] ss:$16 sps:$4 sm:$0xff]  }
 0x286   : > { %vm540_vm0 = vcmp.lt.s32.totalorder %v481_v58, 30000  ;;  %v19673_v58 = vld [vmem:[%s22188_s16 + $0x11a0] ss:$16 sps:$4 sm:$0xff]  }
 0x287   : > { %vm17770_vm1 = vmpackc.low %vm540_vm0, %vm540_vm0 }
 0x288   : > { %12666 = vmatpush1.bf16.msra.mxu0 %v19516_v62  ;;  %13896 = vmatpush1.bf16.msra.mxu1 %v19519_v63  ;;  %v695_v62 = vcombine.high %v22844_v54, %v22844_v54  ;;  %v17768_v63 = vpack.c.bf16 %v22765_v37, %v22765_v37  ;;  %v19601_v37 = vld [vmem:[%s22188_s16 + $0x1020] ss:$16 sps:$4 sm:$0xff]  }
 0x289   : > { %12667 = vmatprep.subr.bf16.mxu0 %v19524_v0  ;;  %13897 = vmatprep.subr.bf16.mxu1 %v19527_v1  ;;  %v19598_v0 = vld [vmem:[%s22188_s16 + $0x1008] ss:$16 sps:$4 sm:$0xff]   ;;  %v19603_v1 = vld [vmem:[%s22188_s16 + $0x1024] ss:$16 sps:$4 sm:$0xff]  }
 0x28c   : > { %12668 = vmatpush1.bf16.msra.mxu0 %v19522_v2  ;;  %13898 = vmatpush1.bf16.msra.mxu1 %v19525_v3  ;;  %v19606_v2 = vld [vmem:[%s22188_s16 + $0x102c] ss:$16 sps:$4 sm:$0xff]   ;;  %v17771_v3 = vpack.c.bf16 %v695_v62, %v695_v62  ;;  %v420_v62 = vadd.s32 2048, %v22251_v41 }
 0x28d   : > { %12669 = vmatprep.subr.bf16.mxu0 %v19530_v4  ;;  %13899 = vmatprep.subr.bf16.mxu1 %v19533_v5  ;;  %v19604_v4 = vld [vmem:[%s22188_s16 + $0x1028] ss:$16 sps:$4 sm:$0xff]   ;;  %v19609_v5 = vld [vmem:[%s22188_s16 + $0x1044] ss:$16 sps:$4 sm:$0xff]  }
 0x290   : > { %12670 = vmatpush1.bf16.msra.mxu0 %v19528_v6  ;;  %13900 = vmatpush1.bf16.msra.mxu1 %v19531_v7  ;;  %v19612_v6 = vld [vmem:[%s22188_s16 + $0x104c] ss:$16 sps:$4 sm:$0xff]   ;;  %v19607_v7 = vld [vmem:[%s22188_s16 + $0x1040] ss:$16 sps:$4 sm:$0xff]  }
 0x291   : > { %12671 = vmatprep.subr.bf16.mxu0 %v19536_v8  ;;  %13901 = vmatprep.subr.bf16.mxu1 %v19539_v46  ;;  %v19610_v8 = vld [vmem:[%s22188_s16 + $0x1048] ss:$16 sps:$4 sm:$0xff]   ;;  %v19615_v46 = vld [vmem:[%s22188_s16 + $0x1064] ss:$16 sps:$4 sm:$0xff]  }
 0x294   : > { %12672 = vmatpush1.bf16.msra.mxu0 %v19534_v9  ;;  %13902 = vmatpush1.bf16.msra.mxu1 %v19537_v55  ;;  %v19618_v9 = vld [vmem:[%s22188_s16 + $0x106c] ss:$16 sps:$4 sm:$0xff]   ;;  %v19613_v55 = vld [vmem:[%s22188_s16 + $0x1060] ss:$16 sps:$4 sm:$0xff]  }
 0x295   : > { %12673 = vmatprep.subr.bf16.mxu0 %v19542_v11  ;;  %13903 = vmatprep.subr.bf16.mxu1 %v19545_v12  ;;  %v19616_v11 = vld [vmem:[%s22188_s16 + $0x1068] ss:$16 sps:$4 sm:$0xff]   ;;  %v19621_v12 = vld [vmem:[%s22188_s16 + $0x1084] ss:$16 sps:$4 sm:$0xff]  }
 0x298   : > { %12674 = vmatpush1.bf16.msra.mxu0 %v19540_v13  ;;  %13904 = vmatpush1.bf16.msra.mxu1 %v19543_v14  ;;  %v19624_v13 = vld [vmem:[%s22188_s16 + $0x108c] ss:$16 sps:$4 sm:$0xff]   ;;  %v19619_v14 = vld [vmem:[%s22188_s16 + $0x1080] ss:$16 sps:$4 sm:$0xff]  }
 0x299   : > { %12675 = vmatprep.subr.bf16.mxu0 %v19548_v15  ;;  %13905 = vmatprep.subr.bf16.mxu1 %v19551_v17  ;;  %v19622_v15 = vld [vmem:[%s22188_s16 + $0x1088] ss:$16 sps:$4 sm:$0xff]   ;;  %v19627_v17 = vld [vmem:[%s22188_s16 + $0x10a4] ss:$16 sps:$4 sm:$0xff]  }
 0x29c   : > { %12676 = vmatpush1.bf16.msra.mxu0 %v19546_v18  ;;  %13906 = vmatpush1.bf16.msra.mxu1 %v19549_v19  ;;  %v19630_v18 = vld [vmem:[%s22188_s16 + $0x10ac] ss:$16 sps:$4 sm:$0xff]   ;;  %v19625_v19 = vld [vmem:[%s22188_s16 + $0x10a0] ss:$16 sps:$4 sm:$0xff]  }
 0x29d   : > { %12677 = vmatprep.subr.bf16.mxu0 %v19554_v20  ;;  %13907 = vmatprep.subr.bf16.mxu1 %v19557_v21  ;;  %v19628_v20 = vld [vmem:[%s22188_s16 + $0x10a8] ss:$16 sps:$4 sm:$0xff]   ;;  %v19633_v21 = vld [vmem:[%s22188_s16 + $0x10c4] ss:$16 sps:$4 sm:$0xff]  }
 0x2a0   : > { %12678 = vmatpush1.bf16.msra.mxu0 %v19552_v60  ;;  %13908 = vmatpush1.bf16.msra.mxu1 %v19555_v23  ;;  %v19636_v60 = vld [vmem:[%s22188_s16 + $0x10cc] ss:$16 sps:$4 sm:$0xff]   ;;  %v19631_v23 = vld [vmem:[%s22188_s16 + $0x10c0] ss:$16 sps:$4 sm:$0xff]  }
 0x2a1   : > { %12679 = vmatprep.subr.bf16.mxu0 %v19560_v24  ;;  %13909 = vmatprep.subr.bf16.mxu1 %v19563_v25  ;;  %v19634_v24 = vld [vmem:[%s22188_s16 + $0x10c8] ss:$16 sps:$4 sm:$0xff]   ;;  %v19639_v25 = vld [vmem:[%s22188_s16 + $0x10e4] ss:$16 sps:$4 sm:$0xff]  }
 0x2a4   : > { %12680 = vmatpush1.bf16.msra.mxu0 %v19558_v26  ;;  %13910 = vmatpush1.bf16.msra.mxu1 %v19561_v27  ;;  %v19642_v26 = vld [vmem:[%s22188_s16 + $0x10ec] ss:$16 sps:$4 sm:$0xff]   ;;  %v19637_v27 = vld [vmem:[%s22188_s16 + $0x10e0] ss:$16 sps:$4 sm:$0xff]  }
 0x2a5   : > { %12681 = vmatprep.subr.bf16.mxu0 %v19566_v28  ;;  %13911 = vmatprep.subr.bf16.mxu1 %v19569_v29  ;;  %v19640_v28 = vld [vmem:[%s22188_s16 + $0x10e8] ss:$16 sps:$4 sm:$0xff]   ;;  %v19645_v29 = vld [vmem:[%s22188_s16 + $0x1104] ss:$16 sps:$4 sm:$0xff]  }
 0x2a8   : > { %12682 = vmatpush1.bf16.msra.mxu0 %v19564_v30  ;;  %13912 = vmatpush1.bf16.msra.mxu1 %v19567_v31  ;;  %v19648_v30 = vld [vmem:[%s22188_s16 + $0x110c] ss:$16 sps:$4 sm:$0xff]   ;;  %v19643_v31 = vld [vmem:[%s22188_s16 + $0x1100] ss:$16 sps:$4 sm:$0xff]  }
 0x2a9   : > { %12683 = vmatprep.subr.bf16.mxu0 %v19572_v33  ;;  %13913 = vmatprep.subr.bf16.mxu1 %v19575_v34  ;;  %v19646_v33 = vld [vmem:[%s22188_s16 + $0x1108] ss:$16 sps:$4 sm:$0xff]   ;;  %v19651_v34 = vld [vmem:[%s22188_s16 + $0x1124] ss:$16 sps:$4 sm:$0xff]  }
 0x2ac   : > { %12684 = vmatpush1.bf16.msra.mxu0 %v19570_v35  ;;  %13914 = vmatpush1.bf16.msra.mxu1 %v19573_v10  ;;  %v19654_v35 = vld [vmem:[%s22188_s16 + $0x112c] ss:$16 sps:$4 sm:$0xff]   ;;  %v19649_v10 = vld [vmem:[%s22188_s16 + $0x1120] ss:$16 sps:$4 sm:$0xff]  }
 0x2ad   : > { %12685 = vmatprep.subr.bf16.mxu0 %v19578_v36  ;;  %13915 = vmatprep.subr.bf16.mxu1 %v19581_v16  ;;  %v19652_v36 = vld [vmem:[%s22188_s16 + $0x1128] ss:$16 sps:$4 sm:$0xff]   ;;  %v19657_v16 = vld [vmem:[%s22188_s16 + $0x1144] ss:$16 sps:$4 sm:$0xff]  }
 0x2b0   : > { %12686 = vmatpush1.bf16.msra.mxu0 %v19576_v38  ;;  %13916 = vmatpush1.bf16.msra.mxu1 %v19579_v40  ;;  %v19660_v38 = vld [vmem:[%s22188_s16 + $0x114c] ss:$16 sps:$4 sm:$0xff]   ;;  %v19655_v40 = vld [vmem:[%s22188_s16 + $0x1140] ss:$16 sps:$4 sm:$0xff]  }
 0x2b1   : > { %12687 = vmatprep.subr.bf16.mxu0 %v19584_v42  ;;  %13917 = vmatprep.subr.bf16.mxu1 %v19587_v43  ;;  %v19658_v42 = vld [vmem:[%s22188_s16 + $0x1148] ss:$16 sps:$4 sm:$0xff]   ;;  %v19663_v43 = vld [vmem:[%s22188_s16 + $0x1164] ss:$16 sps:$4 sm:$0xff]  }
 0x2b4   : > { %12688 = vmatpush1.bf16.msra.mxu0 %v19582_v47  ;;  %13918 = vmatpush1.bf16.msra.mxu1 %v19585_v48  ;;  %v19661_v47 = vld [vmem:[%s22188_s16 + $0x1160] ss:$16 sps:$4 sm:$0xff]   ;;  %v19664_v48 = vld [vmem:[%s22188_s16 + $0x1168] ss:$16 sps:$4 sm:$0xff]  }
 0x2b5   : > { %12689 = vmatprep.subr.bf16.mxu0 %v19590_v51  ;;  %13919 = vmatprep.subr.bf16.mxu1 %v19593_v52  ;;  %v19672_v51 = vld [vmem:[%s22188_s16 + $0x118c] ss:$16 sps:$4 sm:$0xff]   ;;  %v19667_v52 = vld [vmem:[%s22188_s16 + $0x1180] ss:$16 sps:$4 sm:$0xff]  }
 0x2b8   : > { %12690 = vmatpush1.bf16.msra.mxu0 %v19588_v56  ;;  %13920 = vmatpush1.bf16.msra.mxu1 %v19591_v57  ;;  %v19675_v56 = vld [vmem:[%s22188_s16 + $0x11a4] ss:$16 sps:$4 sm:$0xff]   ;;  %v19678_v57 = vld [vmem:[%s22188_s16 + $0x11ac] ss:$16 sps:$4 sm:$0xff]  }
 0x2b9   : > { %12700 = vmatprep.subr.bf16.mxu0 %v19597_v59  ;;  %13930 = vmatprep.subr.bf16.mxu1 %v19600_v32  ;;  %v19676_v59 = vld [vmem:[%s22188_s16 + $0x11a8] ss:$16 sps:$4 sm:$0xff]   ;;  %v19681_v32 = vld [vmem:[%s22188_s16 + $0x11c4] ss:$16 sps:$4 sm:$0xff]  }
 0x2bb   : > { %17769 = vmatmul.mubr.msk.bf16.vlgmr.msra.gmra.mrb[0].mxu0 %vm17767_vm15, %v17768_v63  ;;  %17946 = vmatmul.mubr.msk.bf16.vlgmr.msra.gmra.mrb[0].mxu1 %vm17767_vm15, %v17768_v63  ;;  %v680_v63 = vcombine.high %v22834_v39, %v22834_v39  ;;  %v19685_v39 = vld [vmem:[%s22188_s16 + $0x11e0] ss:$16 sps:$4 sm:$0xff]  }
 0x2bc   : > { %12701 = vmatpush1.bf16.msra.mxu0 %v19595_v61  ;;  %13931 = vmatpush1.bf16.msra.mxu1 %v19598_v0  ;;  %v19684_v61 = vld [vmem:[%s22188_s16 + $0x11cc] ss:$16 sps:$4 sm:$0xff]   ;;  %v19679_v0 = vld [vmem:[%s22188_s16 + $0x11c0] ss:$16 sps:$4 sm:$0xff]  }
 0x2bd   : > { %12702 = vmatprep.subr.bf16.mxu0 %v19603_v1  ;;  %13932 = vmatprep.subr.bf16.mxu1 %v19606_v2  ;;  %v19682_v1 = vld [vmem:[%s22188_s16 + $0x11c8] ss:$16 sps:$4 sm:$0xff]   ;;  %v423_v2 = vadd.s32 2432, %v22251_v41 }
 0x2be   : > { %17772 = vmatprep.mubr.msk.bf16.mxu0 %vm17770_vm1, %v17771_v3  ;;  %17949 = vmatprep.mubr.msk.bf16.mxu1 %vm17770_vm1, %v17771_v3  ;;  %v19687_v3 = vld [vmem:[%s22188_s16 + $0x11e4] ss:$16 sps:$4 sm:$0xff]  }
 0x2c0   : > { %12703 = vmatpush1.bf16.msra.mxu0 %v19601_v37  ;;  %13933 = vmatpush1.bf16.msra.mxu1 %v19604_v4  ;;  %v19690_v37 = vld [vmem:[%s22188_s16 + $0x11ec] ss:$16 sps:$4 sm:$0xff]   ;;  %v480_v4 = vadd.s32 %v22262_v50, %v420_v62 }
 0x2c1   : > { %12704 = vmatprep.subr.bf16.mxu0 %v19609_v5  ;;  %13934 = vmatprep.subr.bf16.mxu1 %v19612_v6  ;;  %v22921_v5 = vrot.slane %v680_v63, %v22267_v53  ;;  %v19688_v6 = vld [vmem:[%s22188_s16 + $0x11e8] ss:$16 sps:$4 sm:$0xff]   ;;  %v19762_v62 = vld [vmem:[%s22188_s16 + $0x136c] ss:$16 sps:$4 sm:$0xff]   ;;  %v19757_v63 = vld [vmem:[%s22188_s16 + $0x1360] ss:$16 sps:$4 sm:$0xff]  }
 0x2c2   : > { %vm539_vm2 = vcmp.lt.s32.totalorder %v480_v4, 30000  ;;  %v19771_v4 = vld [vmem:[%s22188_s16 + $0x13a4] ss:$16 sps:$4 sm:$0xff]  }
 0x2c3   : > { %vm17773_vm3 = vmpackc.low %vm539_vm2, %vm539_vm2 }
 0x2c4   : > { %12705 = vmatpush1.bf16.msra.mxu0 %v19607_v7  ;;  %13935 = vmatpush1.bf16.msra.mxu1 %v19610_v8  ;;  %v483_v7 = vadd.s32 %v22262_v50, %v423_v2  ;;  %v19693_v8 = vld [vmem:[%s22188_s16 + $0x1204] ss:$16 sps:$4 sm:$0xff]   ;;  %v19768_v2 = vld [vmem:[%s22188_s16 + $0x138c] ss:$16 sps:$4 sm:$0xff]  }
 0x2c5   : > { %12706 = vmatprep.subr.bf16.mxu0 %v19615_v46  ;;  %13936 = vmatprep.subr.bf16.mxu1 %v19618_v9  ;;  %v19696_v46 = vld [vmem:[%s22188_s16 + $0x120c] ss:$16 sps:$4 sm:$0xff]   ;;  %v19691_v9 = vld [vmem:[%s22188_s16 + $0x1200] ss:$16 sps:$4 sm:$0xff]  }
 0x2c6   : > { %vm542_vm4 = vcmp.lt.s32.totalorder %v483_v7, 30000  ;;  %v19772_v7 = vld [vmem:[%s22188_s16 + $0x13a8] ss:$16 sps:$4 sm:$0xff]  }
 0x2c7   : > { %vm17776_vm5 = vmpackc.low %vm542_vm4, %vm542_vm4 }
 0x2c8   : > { %12707 = vmatpush1.bf16.msra.mxu0 %v19613_v55  ;;  %13937 = vmatpush1.bf16.msra.mxu1 %v19616_v11  ;;  %v696_v55 = vcombine.high %v22921_v5, %v22921_v5  ;;  %v17774_v11 = vpack.c.bf16 %v22844_v54, %v22844_v54  ;;  %v19697_v54 = vld [vmem:[%s22188_s16 + $0x1220] ss:$16 sps:$4 sm:$0xff]  }
 0x2c9   : > { %12708 = vmatprep.subr.bf16.mxu0 %v19621_v12  ;;  %13938 = vmatprep.subr.bf16.mxu1 %v19624_v13  ;;  %v19694_v12 = vld [vmem:[%s22188_s16 + $0x1208] ss:$16 sps:$4 sm:$0xff]   ;;  %v19699_v13 = vld [vmem:[%s22188_s16 + $0x1224] ss:$16 sps:$4 sm:$0xff]  }
 0x2cc   : > { %12709 = vmatpush1.bf16.msra.mxu0 %v19619_v14  ;;  %13939 = vmatpush1.bf16.msra.mxu1 %v19622_v15  ;;  %v19702_v14 = vld [vmem:[%s22188_s16 + $0x122c] ss:$16 sps:$4 sm:$0xff]   ;;  %v17777_v15 = vpack.c.bf16 %v696_v55, %v696_v55  ;;  %v22990_v55 = vld [vmem:[%s22210_s15 + $0x28] sm:$0xff] }
 0x2cd   : > { %12710 = vmatprep.subr.bf16.mxu0 %v19627_v17  ;;  %13940 = vmatprep.subr.bf16.mxu1 %v19630_v18  ;;  %v19700_v17 = vld [vmem:[%s22188_s16 + $0x1228] ss:$16 sps:$4 sm:$0xff]   ;;  %v19705_v18 = vld [vmem:[%s22188_s16 + $0x1244] ss:$16 sps:$4 sm:$0xff]  }
 0x2d0   : > { %12711 = vmatpush1.bf16.msra.mxu0 %v19625_v19  ;;  %13941 = vmatpush1.bf16.msra.mxu1 %v19628_v20  ;;  %v19708_v19 = vld [vmem:[%s22188_s16 + $0x124c] ss:$16 sps:$4 sm:$0xff]   ;;  %v19703_v20 = vld [vmem:[%s22188_s16 + $0x1240] ss:$16 sps:$4 sm:$0xff]  }
 0x2d1   : > { %12712 = vmatprep.subr.bf16.mxu0 %v19633_v21  ;;  %13942 = vmatprep.subr.bf16.mxu1 %v19636_v60  ;;  %v19706_v21 = vld [vmem:[%s22188_s16 + $0x1248] ss:$16 sps:$4 sm:$0xff]   ;;  %v19711_v60 = vld [vmem:[%s22188_s16 + $0x1264] ss:$16 sps:$4 sm:$0xff]  }
 0x2d4   : > { %12713 = vmatpush1.bf16.msra.mxu0 %v19631_v23  ;;  %13943 = vmatpush1.bf16.msra.mxu1 %v19634_v24  ;;  %v19714_v23 = vld [vmem:[%s22188_s16 + $0x126c] ss:$16 sps:$4 sm:$0xff]   ;;  %v19709_v24 = vld [vmem:[%s22188_s16 + $0x1260] ss:$16 sps:$4 sm:$0xff]  }
 0x2d5   : > { %12714 = vmatprep.subr.bf16.mxu0 %v19639_v25  ;;  %13944 = vmatprep.subr.bf16.mxu1 %v19642_v26  ;;  %v19712_v25 = vld [vmem:[%s22188_s16 + $0x1268] ss:$16 sps:$4 sm:$0xff]   ;;  %v19717_v26 = vld [vmem:[%s22188_s16 + $0x1284] ss:$16 sps:$4 sm:$0xff]  }
 0x2d8   : > { %12715 = vmatpush1.bf16.msra.mxu0 %v19637_v27  ;;  %13945 = vmatpush1.bf16.msra.mxu1 %v19640_v28  ;;  %v19720_v27 = vld [vmem:[%s22188_s16 + $0x128c] ss:$16 sps:$4 sm:$0xff]   ;;  %v19715_v28 = vld [vmem:[%s22188_s16 + $0x1280] ss:$16 sps:$4 sm:$0xff]  }
 0x2d9   : > { %12716 = vmatprep.subr.bf16.mxu0 %v19645_v29  ;;  %13946 = vmatprep.subr.bf16.mxu1 %v19648_v30  ;;  %v19718_v29 = vld [vmem:[%s22188_s16 + $0x1288] ss:$16 sps:$4 sm:$0xff]   ;;  %v19723_v30 = vld [vmem:[%s22188_s16 + $0x12a4] ss:$16 sps:$4 sm:$0xff]  }
 0x2dc   : > { %12717 = vmatpush1.bf16.msra.mxu0 %v19643_v31  ;;  %13947 = vmatpush1.bf16.msra.mxu1 %v19646_v33  ;;  %v19726_v31 = vld [vmem:[%s22188_s16 + $0x12ac] ss:$16 sps:$4 sm:$0xff]   ;;  %v19721_v33 = vld [vmem:[%s22188_s16 + $0x12a0] ss:$16 sps:$4 sm:$0xff]  }
 0x2dd   : > { %12718 = vmatprep.subr.bf16.mxu0 %v19651_v34  ;;  %13948 = vmatprep.subr.bf16.mxu1 %v19654_v35  ;;  %v19724_v34 = vld [vmem:[%s22188_s16 + $0x12a8] ss:$16 sps:$4 sm:$0xff]   ;;  %v19729_v35 = vld [vmem:[%s22188_s16 + $0x12c4] ss:$16 sps:$4 sm:$0xff]  }
 0x2e0   : > { %12719 = vmatpush1.bf16.msra.mxu0 %v19649_v10  ;;  %13949 = vmatpush1.bf16.msra.mxu1 %v19652_v36  ;;  %v19732_v10 = vld [vmem:[%s22188_s16 + $0x12cc] ss:$16 sps:$4 sm:$0xff]   ;;  %v19727_v36 = vld [vmem:[%s22188_s16 + $0x12c0] ss:$16 sps:$4 sm:$0xff]  }
 0x2e1   : > { %12720 = vmatprep.subr.bf16.mxu0 %v19657_v16  ;;  %13950 = vmatprep.subr.bf16.mxu1 %v19660_v38  ;;  %v19730_v16 = vld [vmem:[%s22188_s16 + $0x12c8] ss:$16 sps:$4 sm:$0xff]   ;;  %v19735_v38 = vld [vmem:[%s22188_s16 + $0x12e4] ss:$16 sps:$4 sm:$0xff]  }
 0x2e4   : > { %12721 = vmatpush1.bf16.msra.mxu0 %v19655_v40  ;;  %13951 = vmatpush1.bf16.msra.mxu1 %v19658_v42  ;;  %v19738_v40 = vld [vmem:[%s22188_s16 + $0x12ec] ss:$16 sps:$4 sm:$0xff]   ;;  %v19733_v42 = vld [vmem:[%s22188_s16 + $0x12e0] ss:$16 sps:$4 sm:$0xff]  }
 0x2e5   : > { %12722 = vmatprep.subr.bf16.mxu0 %v19663_v43  ;;  %13952 = vmatprep.subr.bf16.mxu1 %v19666_v44  ;;  %v19736_v43 = vld [vmem:[%s22188_s16 + $0x12e8] ss:$16 sps:$4 sm:$0xff]   ;;  %v19741_v44 = vld [vmem:[%s22188_s16 + $0x1304] ss:$16 sps:$4 sm:$0xff]  }
 0x2e8   : > { %12723 = vmatpush1.bf16.msra.mxu0 %v19661_v47  ;;  %13953 = vmatpush1.bf16.msra.mxu1 %v19664_v48  ;;  %v19744_v47 = vld [vmem:[%s22188_s16 + $0x130c] ss:$16 sps:$4 sm:$0xff]   ;;  %v19739_v48 = vld [vmem:[%s22188_s16 + $0x1300] ss:$16 sps:$4 sm:$0xff]  }
 0x2e9   : > { %12724 = vmatprep.subr.bf16.mxu0 %v19669_v49  ;;  %13954 = vmatprep.subr.bf16.mxu1 %v19672_v51  ;;  %v19742_v49 = vld [vmem:[%s22188_s16 + $0x1308] ss:$16 sps:$4 sm:$0xff]   ;;  %v19747_v51 = vld [vmem:[%s22188_s16 + $0x1324] ss:$16 sps:$4 sm:$0xff]  }
 0x2ec   : > { %12725 = vmatpush1.bf16.msra.mxu0 %v19667_v52  ;;  %13955 = vmatpush1.bf16.msra.mxu1 %v19670_v22  ;;  %v19750_v52 = vld [vmem:[%s22188_s16 + $0x132c] ss:$16 sps:$4 sm:$0xff]   ;;  %v19745_v22 = vld [vmem:[%s22188_s16 + $0x1320] ss:$16 sps:$4 sm:$0xff]  }
 0x2ed   : > { %12726 = vmatprep.subr.bf16.mxu0 %v19675_v56  ;;  %13956 = vmatprep.subr.bf16.mxu1 %v19678_v57  ;;  %v19748_v56 = vld [vmem:[%s22188_s16 + $0x1328] ss:$16 sps:$4 sm:$0xff]   ;;  %v19753_v57 = vld [vmem:[%s22188_s16 + $0x1344] ss:$16 sps:$4 sm:$0xff]  }
 0x2f0   : > { %12727 = vmatpush1.bf16.msra.mxu0 %v19673_v58  ;;  %13957 = vmatpush1.bf16.msra.mxu1 %v19676_v59  ;;  %v19756_v58 = vld [vmem:[%s22188_s16 + $0x134c] ss:$16 sps:$4 sm:$0xff]   ;;  %v19751_v59 = vld [vmem:[%s22188_s16 + $0x1340] ss:$16 sps:$4 sm:$0xff]  }
 0x2f1   : > { %12728 = vmatprep.subr.bf16.mxu0 %v19681_v32  ;;  %13958 = vmatprep.subr.bf16.mxu1 %v19684_v61  ;;  %v19754_v32 = vld [vmem:[%s22188_s16 + $0x1348] ss:$16 sps:$4 sm:$0xff]   ;;  %v19759_v61 = vld [vmem:[%s22188_s16 + $0x1364] ss:$16 sps:$4 sm:$0xff]  }
 0x2f4   : > { %12729 = vmatpush1.bf16.msra.mxu0 %v19679_v0  ;;  %13959 = vmatpush1.bf16.msra.mxu1 %v19682_v1  ;;  %v19760_v0 = vld [vmem:[%s22188_s16 + $0x1368] ss:$16 sps:$4 sm:$0xff]   ;;  %v19765_v1 = vld [vmem:[%s22188_s16 + $0x1384] ss:$16 sps:$4 sm:$0xff]  }
 0x2f5   : > { %12730 = vmatprep.subr.bf16.mxu0 %v19687_v3  ;;  %13960 = vmatprep.subr.bf16.mxu1 %v19690_v37  ;;  %v19763_v3 = vld [vmem:[%s22188_s16 + $0x1380] ss:$16 sps:$4 sm:$0xff]   ;;  %v19766_v37 = vld [vmem:[%s22188_s16 + $0x1388] ss:$16 sps:$4 sm:$0xff]  }
 0x2f8   : > { %12731 = vmatpush1.bf16.msra.mxu0 %v19685_v39  ;;  %13961 = vmatpush1.bf16.msra.mxu1 %v19688_v6  ;;  %v19774_v39 = vld [vmem:[%s22188_s16 + $0x13ac] ss:$16 sps:$4 sm:$0xff]   ;;  %v19769_v6 = vld [vmem:[%s22188_s16 + $0x13a0] ss:$16 sps:$4 sm:$0xff]  }
 0x2f9   : > { %12741 = vmatprep.subr.bf16.mxu0 %v19693_v8  ;;  %13971 = vmatprep.subr.bf16.mxu1 %v19696_v46  ;;  %v19777_v8 = vld [vmem:[%s22188_s16 + $0x13c4] ss:$16 sps:$4 sm:$0xff]   ;;  %v19780_v46 = vld [vmem:[%s22188_s16 + $0x13cc] ss:$16 sps:$4 sm:$0xff]  }
 0x2fb   : > { %17775 = vmatmul.mubr.msk.bf16.vlgmr.msra.gmra.mrb[0].mxu0 %vm17773_vm3, %v17774_v11  ;;  %17952 = vmatmul.mubr.msk.bf16.vlgmr.msra.gmra.mrb[0].mxu1 %vm17773_vm3, %v17774_v11  ;;  %v19775_v11 = vld [vmem:[%s22188_s16 + $0x13c0] ss:$16 sps:$4 sm:$0xff]  }
 0x2fc   : > { %12742 = vmatpush1.bf16.msra.mxu0 %v19691_v9  ;;  %13972 = vmatpush1.bf16.msra.mxu1 %v19694_v12  ;;  %v422_v9 = vadd.s32 2304, %v22251_v41  ;;  %v19778_v12 = vld [vmem:[%s22188_s16 + $0x13c8] ss:$16 sps:$4 sm:$0xff]  }
 0x2fd   : > { %12743 = vmatprep.subr.bf16.mxu0 %v19699_v13  ;;  %13973 = vmatprep.subr.bf16.mxu1 %v19702_v14  ;;  %v425_v13 = vadd.s32 2688, %v22251_v41  ;;  %v19783_v14 = vld [vmem:[%s22188_s16 + $0x13e4] ss:$16 sps:$4 sm:$0xff]  }
 0x2fe   : > { %17778 = vmatprep.mubr.msk.bf16.mxu0 %vm17776_vm5, %v17777_v15  ;;  %17955 = vmatprep.mubr.msk.bf16.mxu1 %vm17776_vm5, %v17777_v15  ;;  %v19786_v15 = vld [vmem:[%s22188_s16 + $0x13ec] ss:$16 sps:$4 sm:$0xff]  }
 0x300   : > { %12744 = vmatpush1.bf16.msra.mxu0 %v19697_v54  ;;  %13974 = vmatpush1.bf16.msra.mxu1 %v19700_v17  ;;  %v482_v54 = vadd.s32 %v22262_v50, %v422_v9  ;;  %v23000_v17 = vrot.slane %v22990_v55, %v22267_v53  ;;  %v19859_v9 = vld [vmem:[%s22188_s16 + $0x156c] ss:$16 sps:$4 sm:$0xff]  }
 0x301   : > { %12745 = vmatprep.subr.bf16.mxu0 %v19705_v18  ;;  %13975 = vmatprep.subr.bf16.mxu1 %v19708_v19  ;;  %v19781_v18 = vld [vmem:[%s22188_s16 + $0x13e0] ss:$16 sps:$4 sm:$0xff]   ;;  %v19784_v19 = vld [vmem:[%s22188_s16 + $0x13e8] ss:$16 sps:$4 sm:$0xff]  }
 0x302   : > { %vm541_vm6 = vcmp.lt.s32.totalorder %v482_v54, 30000  ;;  %v19863_v54 = vld [vmem:[%s22188_s16 + $0x1588] ss:$16 sps:$4 sm:$0xff]  }
 0x303   : > { %vm17779_vm7 = vmpackc.low %vm541_vm6, %vm541_vm6 }
 0x304   : > { %12746 = vmatpush1.bf16.msra.mxu0 %v19703_v20  ;;  %13976 = vmatpush1.bf16.msra.mxu1 %v19706_v21  ;;  %v485_v20 = vadd.s32 %v22262_v50, %v425_v13  ;;  %v19790_v21 = vld [vmem:[%s22188_s16 + $0x1404] ss:$16 sps:$4 sm:$0xff]  }
 0x305   : > { %12747 = vmatprep.subr.bf16.mxu0 %v19711_v60  ;;  %13977 = vmatprep.subr.bf16.mxu1 %v19714_v23  ;;  %v19793_v60 = vld [vmem:[%s22188_s16 + $0x140c] ss:$16 sps:$4 sm:$0xff]   ;;  %v19788_v23 = vld [vmem:[%s22188_s16 + $0x1400] ss:$16 sps:$4 sm:$0xff]   ;;  %v19862_v13 = vld [vmem:[%s22188_s16 + $0x1584] ss:$16 sps:$4 sm:$0xff]  }
 0x306   : > { %vm544_vm8 = vcmp.lt.s32.totalorder %v485_v20, 30000  ;;  %v19866_v20 = vld [vmem:[%s22188_s16 + $0x15a0] ss:$16 sps:$4 sm:$0xff]  }
 0x307   : > { %vm17782_vm9 = vmpackc.low %vm544_vm8, %vm544_vm8 }
 0x308   : > { %12748 = vmatpush1.bf16.msra.mxu0 %v19709_v24  ;;  %13978 = vmatpush1.bf16.msra.mxu1 %v19712_v25  ;;  %v712_v24 = vcombine.high %v23000_v17, %v23000_v17  ;;  %v17780_v25 = vpack.c.bf16 %v22921_v5, %v22921_v5  ;;  %v19794_v5 = vld [vmem:[%s22188_s16 + $0x1420] ss:$16 sps:$4 sm:$0xff]  }
 0x309   : > { %12749 = vmatprep.subr.bf16.mxu0 %v19717_v26  ;;  %13979 = vmatprep.subr.bf16.mxu1 %v19720_v27  ;;  %v19791_v26 = vld [vmem:[%s22188_s16 + $0x1408] ss:$16 sps:$4 sm:$0xff]   ;;  %v19796_v27 = vld [vmem:[%s22188_s16 + $0x1424] ss:$16 sps:$4 sm:$0xff]  }
 0x30c   : > { %12750 = vmatpush1.bf16.msra.mxu0 %v19715_v28  ;;  %13980 = vmatpush1.bf16.msra.mxu1 %v19718_v29  ;;  %v19799_v28 = vld [vmem:[%s22188_s16 + $0x142c] ss:$16 sps:$4 sm:$0xff]   ;;  %v17783_v29 = vpack.c.bf16 %v712_v24, %v712_v24  ;;  %v424_v24 = vadd.s32 2560, %v22251_v41 }
 0x30d   : > { %12751 = vmatprep.subr.bf16.mxu0 %v19723_v30  ;;  %13981 = vmatprep.subr.bf16.mxu1 %v19726_v31  ;;  %v19797_v30 = vld [vmem:[%s22188_s16 + $0x1428] ss:$16 sps:$4 sm:$0xff]   ;;  %v19802_v31 = vld [vmem:[%s22188_s16 + $0x1444] ss:$16 sps:$4 sm:$0xff]  }
 0x310   : > { %12752 = vmatpush1.bf16.msra.mxu0 %v19721_v33  ;;  %13982 = vmatpush1.bf16.msra.mxu1 %v19724_v34  ;;  %v19805_v33 = vld [vmem:[%s22188_s16 + $0x144c] ss:$16 sps:$4 sm:$0xff]   ;;  %v19800_v34 = vld [vmem:[%s22188_s16 + $0x1440] ss:$16 sps:$4 sm:$0xff]  }
 0x311   : > { %12753 = vmatprep.subr.bf16.mxu0 %v19729_v35  ;;  %13983 = vmatprep.subr.bf16.mxu1 %v19732_v10  ;;  %v19803_v35 = vld [vmem:[%s22188_s16 + $0x1448] ss:$16 sps:$4 sm:$0xff]   ;;  %v19808_v10 = vld [vmem:[%s22188_s16 + $0x1464] ss:$16 sps:$4 sm:$0xff]  }
 0x314   : > { %12754 = vmatpush1.bf16.msra.mxu0 %v19727_v36  ;;  %13984 = vmatpush1.bf16.msra.mxu1 %v19730_v16  ;;  %v19811_v36 = vld [vmem:[%s22188_s16 + $0x146c] ss:$16 sps:$4 sm:$0xff]   ;;  %v19806_v16 = vld [vmem:[%s22188_s16 + $0x1460] ss:$16 sps:$4 sm:$0xff]  }
 0x315   : > { %12755 = vmatprep.subr.bf16.mxu0 %v19735_v38  ;;  %13985 = vmatprep.subr.bf16.mxu1 %v19738_v40  ;;  %v19809_v38 = vld [vmem:[%s22188_s16 + $0x1468] ss:$16 sps:$4 sm:$0xff]   ;;  %v19814_v40 = vld [vmem:[%s22188_s16 + $0x1484] ss:$16 sps:$4 sm:$0xff]  }
 0x318   : > { %12756 = vmatpush1.bf16.msra.mxu0 %v19733_v42  ;;  %13986 = vmatpush1.bf16.msra.mxu1 %v19736_v43  ;;  %v19817_v42 = vld [vmem:[%s22188_s16 + $0x148c] ss:$16 sps:$4 sm:$0xff]   ;;  %v19812_v43 = vld [vmem:[%s22188_s16 + $0x1480] ss:$16 sps:$4 sm:$0xff]  }
 0x319   : > { %12757 = vmatprep.subr.bf16.mxu0 %v19741_v44  ;;  %13987 = vmatprep.subr.bf16.mxu1 %v19744_v47  ;;  %v19815_v44 = vld [vmem:[%s22188_s16 + $0x1488] ss:$16 sps:$4 sm:$0xff]   ;;  %v19820_v47 = vld [vmem:[%s22188_s16 + $0x14a4] ss:$16 sps:$4 sm:$0xff]  }
 0x31c   : > { %12758 = vmatpush1.bf16.msra.mxu0 %v19739_v48  ;;  %13988 = vmatpush1.bf16.msra.mxu1 %v19742_v49  ;;  %v19823_v48 = vld [vmem:[%s22188_s16 + $0x14ac] ss:$16 sps:$4 sm:$0xff]   ;;  %v19818_v49 = vld [vmem:[%s22188_s16 + $0x14a0] ss:$16 sps:$4 sm:$0xff]  }
 0x31d   : > { %12759 = vmatprep.subr.bf16.mxu0 %v19747_v51  ;;  %13989 = vmatprep.subr.bf16.mxu1 %v19750_v52  ;;  %v19821_v51 = vld [vmem:[%s22188_s16 + $0x14a8] ss:$16 sps:$4 sm:$0xff]   ;;  %v19826_v52 = vld [vmem:[%s22188_s16 + $0x14c4] ss:$16 sps:$4 sm:$0xff]  }
 0x320   : > { %12760 = vmatpush1.bf16.msra.mxu0 %v19745_v22  ;;  %13990 = vmatpush1.bf16.msra.mxu1 %v19748_v56  ;;  %v19829_v22 = vld [vmem:[%s22188_s16 + $0x14cc] ss:$16 sps:$4 sm:$0xff]   ;;  %v19824_v56 = vld [vmem:[%s22188_s16 + $0x14c0] ss:$16 sps:$4 sm:$0xff]  }
 0x321   : > { %12761 = vmatprep.subr.bf16.mxu0 %v19753_v57  ;;  %13991 = vmatprep.subr.bf16.mxu1 %v19756_v58  ;;  %v19827_v57 = vld [vmem:[%s22188_s16 + $0x14c8] ss:$16 sps:$4 sm:$0xff]   ;;  %v19832_v58 = vld [vmem:[%s22188_s16 + $0x14e4] ss:$16 sps:$4 sm:$0xff]  }
 0x324   : > { %12762 = vmatpush1.bf16.msra.mxu0 %v19751_v59  ;;  %13992 = vmatpush1.bf16.msra.mxu1 %v19754_v32  ;;  %v19835_v59 = vld [vmem:[%s22188_s16 + $0x14ec] ss:$16 sps:$4 sm:$0xff]   ;;  %v19830_v32 = vld [vmem:[%s22188_s16 + $0x14e0] ss:$16 sps:$4 sm:$0xff]  }
 0x325   : > { %12763 = vmatprep.subr.bf16.mxu0 %v19759_v61  ;;  %13993 = vmatprep.subr.bf16.mxu1 %v19762_v62  ;;  %v19833_v61 = vld [vmem:[%s22188_s16 + $0x14e8] ss:$16 sps:$4 sm:$0xff]   ;;  %v19838_v62 = vld [vmem:[%s22188_s16 + $0x1504] ss:$16 sps:$4 sm:$0xff]  }
 0x328   : > { %12764 = vmatpush1.bf16.msra.mxu0 %v19757_v63  ;;  %13994 = vmatpush1.bf16.msra.mxu1 %v19760_v0  ;;  %v19841_v63 = vld [vmem:[%s22188_s16 + $0x150c] ss:$16 sps:$4 sm:$0xff]   ;;  %v19836_v0 = vld [vmem:[%s22188_s16 + $0x1500] ss:$16 sps:$4 sm:$0xff]  }
 0x329   : > { %12765 = vmatprep.subr.bf16.mxu0 %v19765_v1  ;;  %13995 = vmatprep.subr.bf16.mxu1 %v19768_v2  ;;  %v19839_v1 = vld [vmem:[%s22188_s16 + $0x1508] ss:$16 sps:$4 sm:$0xff]   ;;  %v19844_v2 = vld [vmem:[%s22188_s16 + $0x1524] ss:$16 sps:$4 sm:$0xff]  }
 0x32c   : > { %12766 = vmatpush1.bf16.msra.mxu0 %v19763_v3  ;;  %13996 = vmatpush1.bf16.msra.mxu1 %v19766_v37  ;;  %v19847_v3 = vld [vmem:[%s22188_s16 + $0x152c] ss:$16 sps:$4 sm:$0xff]   ;;  %v19842_v37 = vld [vmem:[%s22188_s16 + $0x1520] ss:$16 sps:$4 sm:$0xff]  }
 0x32d   : > { %12767 = vmatprep.subr.bf16.mxu0 %v19771_v4  ;;  %13997 = vmatprep.subr.bf16.mxu1 %v19774_v39  ;;  %v19845_v4 = vld [vmem:[%s22188_s16 + $0x1528] ss:$16 sps:$4 sm:$0xff]   ;;  %v19850_v39 = vld [vmem:[%s22188_s16 + $0x1544] ss:$16 sps:$4 sm:$0xff]  }
 0x330   : > { %12768 = vmatpush1.bf16.msra.mxu0 %v19769_v6  ;;  %13998 = vmatpush1.bf16.msra.mxu1 %v19772_v7  ;;  %v19853_v6 = vld [vmem:[%s22188_s16 + $0x154c] ss:$16 sps:$4 sm:$0xff]   ;;  %v19848_v7 = vld [vmem:[%s22188_s16 + $0x1540] ss:$16 sps:$4 sm:$0xff]  }
 0x331   : > { %12769 = vmatprep.subr.bf16.mxu0 %v19777_v8  ;;  %13999 = vmatprep.subr.bf16.mxu1 %v19780_v46  ;;  %v19851_v8 = vld [vmem:[%s22188_s16 + $0x1548] ss:$16 sps:$4 sm:$0xff]   ;;  %v19856_v46 = vld [vmem:[%s22188_s16 + $0x1564] ss:$16 sps:$4 sm:$0xff]  }
 0x334   : > { %12770 = vmatpush1.bf16.msra.mxu0 %v19775_v11  ;;  %14000 = vmatpush1.bf16.msra.mxu1 %v19778_v12  ;;  %v19854_v11 = vld [vmem:[%s22188_s16 + $0x1560] ss:$16 sps:$4 sm:$0xff]   ;;  %v19857_v12 = vld [vmem:[%s22188_s16 + $0x1568] ss:$16 sps:$4 sm:$0xff]  }
 0x335   : > { %12771 = vmatprep.subr.bf16.mxu0 %v19783_v14  ;;  %14001 = vmatprep.subr.bf16.mxu1 %v19786_v15  ;;  %v19865_v14 = vld [vmem:[%s22188_s16 + $0x158c] ss:$16 sps:$4 sm:$0xff]   ;;  %v19860_v15 = vld [vmem:[%s22188_s16 + $0x1580] ss:$16 sps:$4 sm:$0xff]  }
 0x338   : > { %12772 = vmatpush1.bf16.msra.mxu0 %v19781_v18  ;;  %14002 = vmatpush1.bf16.msra.mxu1 %v19784_v19  ;;  %v19868_v18 = vld [vmem:[%s22188_s16 + $0x15a4] ss:$16 sps:$4 sm:$0xff]   ;;  %v19871_v19 = vld [vmem:[%s22188_s16 + $0x15ac] ss:$16 sps:$4 sm:$0xff]  }
 0x339   : > { %12782 = vmatprep.subr.bf16.mxu0 %v19790_v21  ;;  %14012 = vmatprep.subr.bf16.mxu1 %v19793_v60  ;;  %v19869_v21 = vld [vmem:[%s22188_s16 + $0x15a8] ss:$16 sps:$4 sm:$0xff]   ;;  %v19874_v60 = vld [vmem:[%s22188_s16 + $0x15c4] ss:$16 sps:$4 sm:$0xff]  }
 0x33b   : > { %17781 = vmatmul.mubr.msk.bf16.vlgmr.msra.gmra.mrb[0].mxu0 %vm17779_vm7, %v17780_v25  ;;  %17958 = vmatmul.mubr.msk.bf16.vlgmr.msra.gmra.mrb[0].mxu1 %vm17779_vm7, %v17780_v25  ;;  %v697_v25 = vcombine.high %v22990_v55, %v22990_v55  ;;  %v19878_v55 = vld [vmem:[%s22188_s16 + $0x15e0] ss:$16 sps:$4 sm:$0xff]  }
 0x33c   : > { %12783 = vmatpush1.bf16.msra.mxu0 %v19788_v23  ;;  %14013 = vmatpush1.bf16.msra.mxu1 %v19791_v26  ;;  %v19877_v23 = vld [vmem:[%s22188_s16 + $0x15cc] ss:$16 sps:$4 sm:$0xff]   ;;  %v19872_v26 = vld [vmem:[%s22188_s16 + $0x15c0] ss:$16 sps:$4 sm:$0xff]  }
 0x33d   : > { %12784 = vmatprep.subr.bf16.mxu0 %v19796_v27  ;;  %14014 = vmatprep.subr.bf16.mxu1 %v19799_v28  ;;  %v19875_v27 = vld [vmem:[%s22188_s16 + $0x15c8] ss:$16 sps:$4 sm:$0xff]   ;;  %v427_v28 = vadd.s32 2944, %v22251_v41 }
 0x33e   : > { %17784 = vmatprep.mubr.msk.bf16.mxu0 %vm17782_vm9, %v17783_v29  ;;  %17961 = vmatprep.mubr.msk.bf16.mxu1 %vm17782_vm9, %v17783_v29  ;;  %v19880_v29 = vld [vmem:[%s22188_s16 + $0x15e4] ss:$16 sps:$4 sm:$0xff]  }
 0x340   : > { %12785 = vmatpush1.bf16.msra.mxu0 %v19794_v5  ;;  %14015 = vmatpush1.bf16.msra.mxu1 %v19797_v30  ;;  %v19883_v5 = vld [vmem:[%s22188_s16 + $0x15ec] ss:$16 sps:$4 sm:$0xff]   ;;  %v484_v30 = vadd.s32 %v22262_v50, %v424_v24 }
 0x341   : > { %12786 = vmatprep.subr.bf16.mxu0 %v19802_v31  ;;  %14016 = vmatprep.subr.bf16.mxu1 %v19805_v33  ;;  %v23077_v31 = vrot.slane %v697_v25, %v22267_v53  ;;  %v19881_v33 = vld [vmem:[%s22188_s16 + $0x15e8] ss:$16 sps:$4 sm:$0xff]   ;;  %v19955_v24 = vld [vmem:[%s22188_s16 + $0x176c] ss:$16 sps:$4 sm:$0xff]   ;;  %v19950_v25 = vld [vmem:[%s22188_s16 + $0x1760] ss:$16 sps:$4 sm:$0xff]  }
 0x342   : > { %vm543_vm10 = vcmp.lt.s32.totalorder %v484_v30, 30000  ;;  %v19964_v30 = vld [vmem:[%s22188_s16 + $0x17a4] ss:$16 sps:$4 sm:$0xff]  }
 0x343   : > { %vm17785_vm11 = vmpackc.low %vm543_vm10, %vm543_vm10 }
 0x344   : > { %12787 = vmatpush1.bf16.msra.mxu0 %v19800_v34  ;;  %14017 = vmatpush1.bf16.msra.mxu1 %v19803_v35  ;;  %v487_v34 = vadd.s32 %v22262_v50, %v427_v28  ;;  %v19886_v35 = vld [vmem:[%s22188_s16 + $0x1604] ss:$16 sps:$4 sm:$0xff]   ;;  %v19961_v28 = vld [vmem:[%s22188_s16 + $0x178c] ss:$16 sps:$4 sm:$0xff]  }
 0x345   : > { %12788 = vmatprep.subr.bf16.mxu0 %v19808_v10  ;;  %14018 = vmatprep.subr.bf16.mxu1 %v19811_v36  ;;  %v19889_v10 = vld [vmem:[%s22188_s16 + $0x160c] ss:$16 sps:$4 sm:$0xff]   ;;  %v19884_v36 = vld [vmem:[%s22188_s16 + $0x1600] ss:$16 sps:$4 sm:$0xff]  }
 0x346   : > { %vm546_vm12 = vcmp.lt.s32.totalorder %v487_v34, 30000  ;;  %v19965_v34 = vld [vmem:[%s22188_s16 + $0x17a8] ss:$16 sps:$4 sm:$0xff]  }
 0x347   : > { %vm17788_vm13 = vmpackc.low %vm546_vm12, %vm546_vm12 }
 0x348   : > { %12789 = vmatpush1.bf16.msra.mxu0 %v19806_v16  ;;  %14019 = vmatpush1.bf16.msra.mxu1 %v19809_v38  ;;  %v713_v16 = vcombine.high %v23077_v31, %v23077_v31  ;;  %v17786_v38 = vpack.c.bf16 %v23000_v17, %v23000_v17  ;;  %v19890_v17 = vld [vmem:[%s22188_s16 + $0x1620] ss:$16 sps:$4 sm:$0xff]  }
 0x349   : > { %12790 = vmatprep.subr.bf16.mxu0 %v19814_v40  ;;  %14020 = vmatprep.subr.bf16.mxu1 %v19817_v42  ;;  %v19887_v40 = vld [vmem:[%s22188_s16 + $0x1608] ss:$16 sps:$4 sm:$0xff]   ;;  %v19892_v42 = vld [vmem:[%s22188_s16 + $0x1624] ss:$16 sps:$4 sm:$0xff]  }
 0x34c   : > { %12791 = vmatpush1.bf16.msra.mxu0 %v19812_v43  ;;  %14021 = vmatpush1.bf16.msra.mxu1 %v19815_v44  ;;  %v19895_v43 = vld [vmem:[%s22188_s16 + $0x162c] ss:$16 sps:$4 sm:$0xff]   ;;  %v17789_v44 = vpack.c.bf16 %v713_v16, %v713_v16 }
 0x34d   : > { %12792 = vmatprep.subr.bf16.mxu0 %v19820_v47  ;;  %14022 = vmatprep.subr.bf16.mxu1 %v19823_v48  ;;  %v19893_v47 = vld [vmem:[%s22188_s16 + $0x1628] ss:$16 sps:$4 sm:$0xff]   ;;  %v19898_v48 = vld [vmem:[%s22188_s16 + $0x1644] ss:$16 sps:$4 sm:$0xff]  }
 0x34e   : > { %v23146_v16 = vld [vmem:[%s22210_s15 + $0x30] sm:$0xff] }
 0x350   : > { %12793 = vmatpush1.bf16.msra.mxu0 %v19818_v49  ;;  %14023 = vmatpush1.bf16.msra.mxu1 %v19821_v51  ;;  %v19901_v49 = vld [vmem:[%s22188_s16 + $0x164c] ss:$16 sps:$4 sm:$0xff]   ;;  %v19896_v51 = vld [vmem:[%s22188_s16 + $0x1640] ss:$16 sps:$4 sm:$0xff]  }
 0x351   : > { %12794 = vmatprep.subr.bf16.mxu0 %v19826_v52  ;;  %14024 = vmatprep.subr.bf16.mxu1 %v19829_v22  ;;  %v19899_v52 = vld [vmem:[%s22188_s16 + $0x1648] ss:$16 sps:$4 sm:$0xff]   ;;  %v19904_v22 = vld [vmem:[%s22188_s16 + $0x1664] ss:$16 sps:$4 sm:$0xff]  }
 0x354   : > { %12795 = vmatpush1.bf16.msra.mxu0 %v19824_v56  ;;  %14025 = vmatpush1.bf16.msra.mxu1 %v19827_v57  ;;  %v19907_v56 = vld [vmem:[%s22188_s16 + $0x166c] ss:$16 sps:$4 sm:$0xff]   ;;  %v19902_v57 = vld [vmem:[%s22188_s16 + $0x1660] ss:$16 sps:$4 sm:$0xff]  }
 0x355   : > { %12796 = vmatprep.subr.bf16.mxu0 %v19832_v58  ;;  %14026 = vmatprep.subr.bf16.mxu1 %v19835_v59  ;;  %v19905_v58 = vld [vmem:[%s22188_s16 + $0x1668] ss:$16 sps:$4 sm:$0xff]   ;;  %v19910_v59 = vld [vmem:[%s22188_s16 + $0x1684] ss:$16 sps:$4 sm:$0xff]  }
 0x358   : > { %12797 = vmatpush1.bf16.msra.mxu0 %v19830_v32  ;;  %14027 = vmatpush1.bf16.msra.mxu1 %v19833_v61  ;;  %v19913_v32 = vld [vmem:[%s22188_s16 + $0x168c] ss:$16 sps:$4 sm:$0xff]   ;;  %v19908_v61 = vld [vmem:[%s22188_s16 + $0x1680] ss:$16 sps:$4 sm:$0xff]  }
 0x359   : > { %12798 = vmatprep.subr.bf16.mxu0 %v19838_v62  ;;  %14028 = vmatprep.subr.bf16.mxu1 %v19841_v63  ;;  %v19911_v62 = vld [vmem:[%s22188_s16 + $0x1688] ss:$16 sps:$4 sm:$0xff]   ;;  %v19916_v63 = vld [vmem:[%s22188_s16 + $0x16a4] ss:$16 sps:$4 sm:$0xff]  }
 0x35c   : > { %12799 = vmatpush1.bf16.msra.mxu0 %v19836_v0  ;;  %14029 = vmatpush1.bf16.msra.mxu1 %v19839_v1  ;;  %v19919_v0 = vld [vmem:[%s22188_s16 + $0x16ac] ss:$16 sps:$4 sm:$0xff]   ;;  %v19914_v1 = vld [vmem:[%s22188_s16 + $0x16a0] ss:$16 sps:$4 sm:$0xff]  }
 0x35d   : > { %12800 = vmatprep.subr.bf16.mxu0 %v19844_v2  ;;  %14030 = vmatprep.subr.bf16.mxu1 %v19847_v3  ;;  %v19917_v2 = vld [vmem:[%s22188_s16 + $0x16a8] ss:$16 sps:$4 sm:$0xff]   ;;  %v19922_v3 = vld [vmem:[%s22188_s16 + $0x16c4] ss:$16 sps:$4 sm:$0xff]  }
 0x360   : > { %12801 = vmatpush1.bf16.msra.mxu0 %v19842_v37  ;;  %14031 = vmatpush1.bf16.msra.mxu1 %v19845_v4  ;;  %v19925_v37 = vld [vmem:[%s22188_s16 + $0x16cc] ss:$16 sps:$4 sm:$0xff]   ;;  %v19920_v4 = vld [vmem:[%s22188_s16 + $0x16c0] ss:$16 sps:$4 sm:$0xff]  }
 0x361   : > { %12802 = vmatprep.subr.bf16.mxu0 %v19850_v39  ;;  %14032 = vmatprep.subr.bf16.mxu1 %v19853_v6  ;;  %v19923_v39 = vld [vmem:[%s22188_s16 + $0x16c8] ss:$16 sps:$4 sm:$0xff]   ;;  %v19928_v6 = vld [vmem:[%s22188_s16 + $0x16e4] ss:$16 sps:$4 sm:$0xff]  }
 0x364   : > { %12803 = vmatpush1.bf16.msra.mxu0 %v19848_v7  ;;  %14033 = vmatpush1.bf16.msra.mxu1 %v19851_v8  ;;  %v19931_v7 = vld [vmem:[%s22188_s16 + $0x16ec] ss:$16 sps:$4 sm:$0xff]   ;;  %v19926_v8 = vld [vmem:[%s22188_s16 + $0x16e0] ss:$16 sps:$4 sm:$0xff]  }
 0x365   : > { %12804 = vmatprep.subr.bf16.mxu0 %v19856_v46  ;;  %14034 = vmatprep.subr.bf16.mxu1 %v19859_v9  ;;  %v19929_v46 = vld [vmem:[%s22188_s16 + $0x16e8] ss:$16 sps:$4 sm:$0xff]   ;;  %v19934_v9 = vld [vmem:[%s22188_s16 + $0x1704] ss:$16 sps:$4 sm:$0xff]  }
 0x368   : > { %12805 = vmatpush1.bf16.msra.mxu0 %v19854_v11  ;;  %14035 = vmatpush1.bf16.msra.mxu1 %v19857_v12  ;;  %v19937_v11 = vld [vmem:[%s22188_s16 + $0x170c] ss:$16 sps:$4 sm:$0xff]   ;;  %v19932_v12 = vld [vmem:[%s22188_s16 + $0x1700] ss:$16 sps:$4 sm:$0xff]  }
 0x369   : > { %12806 = vmatprep.subr.bf16.mxu0 %v19862_v13  ;;  %14036 = vmatprep.subr.bf16.mxu1 %v19865_v14  ;;  %v19935_v13 = vld [vmem:[%s22188_s16 + $0x1708] ss:$16 sps:$4 sm:$0xff]   ;;  %v19940_v14 = vld [vmem:[%s22188_s16 + $0x1724] ss:$16 sps:$4 sm:$0xff]  }
 0x36c   : > { %12807 = vmatpush1.bf16.msra.mxu0 %v19860_v15  ;;  %14037 = vmatpush1.bf16.msra.mxu1 %v19863_v54  ;;  %v19943_v15 = vld [vmem:[%s22188_s16 + $0x172c] ss:$16 sps:$4 sm:$0xff]   ;;  %v19938_v54 = vld [vmem:[%s22188_s16 + $0x1720] ss:$16 sps:$4 sm:$0xff]  }
 0x36d   : > { %12808 = vmatprep.subr.bf16.mxu0 %v19868_v18  ;;  %14038 = vmatprep.subr.bf16.mxu1 %v19871_v19  ;;  %v19941_v18 = vld [vmem:[%s22188_s16 + $0x1728] ss:$16 sps:$4 sm:$0xff]   ;;  %v19946_v19 = vld [vmem:[%s22188_s16 + $0x1744] ss:$16 sps:$4 sm:$0xff]  }
 0x370   : > { %12809 = vmatpush1.bf16.msra.mxu0 %v19866_v20  ;;  %14039 = vmatpush1.bf16.msra.mxu1 %v19869_v21  ;;  %v19949_v20 = vld [vmem:[%s22188_s16 + $0x174c] ss:$16 sps:$4 sm:$0xff]   ;;  %v19944_v21 = vld [vmem:[%s22188_s16 + $0x1740] ss:$16 sps:$4 sm:$0xff]  }
 0x371   : > { %12810 = vmatprep.subr.bf16.mxu0 %v19874_v60  ;;  %14040 = vmatprep.subr.bf16.mxu1 %v19877_v23  ;;  %v19947_v60 = vld [vmem:[%s22188_s16 + $0x1748] ss:$16 sps:$4 sm:$0xff]   ;;  %v19952_v23 = vld [vmem:[%s22188_s16 + $0x1764] ss:$16 sps:$4 sm:$0xff]  }
 0x374   : > { %12811 = vmatpush1.bf16.msra.mxu0 %v19872_v26  ;;  %14041 = vmatpush1.bf16.msra.mxu1 %v19875_v27  ;;  %v19953_v26 = vld [vmem:[%s22188_s16 + $0x1768] ss:$16 sps:$4 sm:$0xff]   ;;  %v19958_v27 = vld [vmem:[%s22188_s16 + $0x1784] ss:$16 sps:$4 sm:$0xff]  }
 0x375   : > { %12812 = vmatprep.subr.bf16.mxu0 %v19880_v29  ;;  %14042 = vmatprep.subr.bf16.mxu1 %v19883_v5  ;;  %v19956_v29 = vld [vmem:[%s22188_s16 + $0x1780] ss:$16 sps:$4 sm:$0xff]   ;;  %v19959_v5 = vld [vmem:[%s22188_s16 + $0x1788] ss:$16 sps:$4 sm:$0xff]  }
 0x378   : > { %12813 = vmatpush1.bf16.msra.mxu0 %v19878_v55  ;;  %14043 = vmatpush1.bf16.msra.mxu1 %v19881_v33  ;;  %v19967_v55 = vld [vmem:[%s22188_s16 + $0x17ac] ss:$16 sps:$4 sm:$0xff]   ;;  %v19962_v33 = vld [vmem:[%s22188_s16 + $0x17a0] ss:$16 sps:$4 sm:$0xff]  }
 0x379   : > { %12823 = vmatprep.subr.bf16.mxu0 %v19886_v35  ;;  %14053 = vmatprep.subr.bf16.mxu1 %v19889_v10  ;;  %v19970_v35 = vld [vmem:[%s22188_s16 + $0x17c4] ss:$16 sps:$4 sm:$0xff]   ;;  %v19973_v10 = vld [vmem:[%s22188_s16 + $0x17cc] ss:$16 sps:$4 sm:$0xff]  }
 0x37b   : > { %17787 = vmatmul.mubr.msk.bf16.vlgmr.msra.gmra.mrb[0].mxu0 %vm17785_vm11, %v17786_v38  ;;  %17964 = vmatmul.mubr.msk.bf16.vlgmr.msra.gmra.mrb[0].mxu1 %vm17785_vm11, %v17786_v38  ;;  %v19968_v38 = vld [vmem:[%s22188_s16 + $0x17c0] ss:$16 sps:$4 sm:$0xff]  }
 0x37c   : > { %12824 = vmatpush1.bf16.msra.mxu0 %v19884_v36  ;;  %14054 = vmatpush1.bf16.msra.mxu1 %v19887_v40  ;;  %v426_v36 = vadd.s32 2816, %v22251_v41  ;;  %v19971_v40 = vld [vmem:[%s22188_s16 + $0x17c8] ss:$16 sps:$4 sm:$0xff]  }
 0x37d   : > { %12825 = vmatprep.subr.bf16.mxu0 %v19892_v42  ;;  %14055 = vmatprep.subr.bf16.mxu1 %v19895_v43  ;;  %v429_v42 = vadd.s32 3200, %v22251_v41  ;;  %v19976_v43 = vld [vmem:[%s22188_s16 + $0x17e4] ss:$16 sps:$4 sm:$0xff]  }
 0x37e   : > { %17790 = vmatprep.mubr.msk.bf16.mxu0 %vm17788_vm13, %v17789_v44  ;;  %17967 = vmatprep.mubr.msk.bf16.mxu1 %vm17788_vm13, %v17789_v44  ;;  %v19979_v44 = vld [vmem:[%s22188_s16 + $0x17ec] ss:$16 sps:$4 sm:$0xff]  }
 0x380   : > { %12826 = vmatpush1.bf16.msra.mxu0 %v19890_v17  ;;  %14056 = vmatpush1.bf16.msra.mxu1 %v19893_v47  ;;  %v486_v17 = vadd.s32 %v22262_v50, %v426_v36  ;;  %v23156_v47 = vrot.slane %v23146_v16, %v22267_v53  ;;  %v20052_v36 = vld [vmem:[%s22188_s16 + $0x196c] ss:$16 sps:$4 sm:$0xff]  }
 0x381   : > { %12827 = vmatprep.subr.bf16.mxu0 %v19898_v48  ;;  %14057 = vmatprep.subr.bf16.mxu1 %v19901_v49  ;;  %v19974_v48 = vld [vmem:[%s22188_s16 + $0x17e0] ss:$16 sps:$4 sm:$0xff]   ;;  %v19977_v49 = vld [vmem:[%s22188_s16 + $0x17e8] ss:$16 sps:$4 sm:$0xff]  }
 0x382   : > { %vm545_vm14 = vcmp.lt.s32.totalorder %v486_v17, 30000  ;;  %v20056_v17 = vld [vmem:[%s22188_s16 + $0x1988] ss:$16 sps:$4 sm:$0xff]  }
 0x383   : > { %vm17791_vm15 = vmpackc.low %vm545_vm14, %vm545_vm14 }
 0x384   : > { %12828 = vmatpush1.bf16.msra.mxu0 %v19896_v51  ;;  %14058 = vmatpush1.bf16.msra.mxu1 %v19899_v52  ;;  %v489_v51 = vadd.s32 %v22262_v50, %v429_v42  ;;  %v19983_v52 = vld [vmem:[%s22188_s16 + $0x1804] ss:$16 sps:$4 sm:$0xff]  }
 0x385   : > { %12829 = vmatprep.subr.bf16.mxu0 %v19904_v22  ;;  %14059 = vmatprep.subr.bf16.mxu1 %v19907_v56  ;;  %v19986_v22 = vld [vmem:[%s22188_s16 + $0x180c] ss:$16 sps:$4 sm:$0xff]   ;;  %v19981_v56 = vld [vmem:[%s22188_s16 + $0x1800] ss:$16 sps:$4 sm:$0xff]   ;;  %v20055_v42 = vld [vmem:[%s22188_s16 + $0x1984] ss:$16 sps:$4 sm:$0xff]  }
 0x386   : > { %vm548_vm0 = vcmp.lt.s32.totalorder %v489_v51, 30000  ;;  %v20059_v51 = vld [vmem:[%s22188_s16 + $0x19a0] ss:$16 sps:$4 sm:$0xff]  }
 0x387   : > { %vm17794_vm1 = vmpackc.low %vm548_vm0, %vm548_vm0 }
 0x388   : > { %12830 = vmatpush1.bf16.msra.mxu0 %v19902_v57  ;;  %14060 = vmatpush1.bf16.msra.mxu1 %v19905_v58  ;;  %v729_v57 = vcombine.high %v23156_v47, %v23156_v47  ;;  %v17792_v58 = vpack.c.bf16 %v23077_v31, %v23077_v31  ;;  %v19987_v31 = vld [vmem:[%s22188_s16 + $0x1820] ss:$16 sps:$4 sm:$0xff]  }
 0x389   : > { %12831 = vmatprep.subr.bf16.mxu0 %v19910_v59  ;;  %14061 = vmatprep.subr.bf16.mxu1 %v19913_v32  ;;  %v19984_v59 = vld [vmem:[%s22188_s16 + $0x1808] ss:$16 sps:$4 sm:$0xff]   ;;  %v19989_v32 = vld [vmem:[%s22188_s16 + $0x1824] ss:$16 sps:$4 sm:$0xff]  }
 0x38c   : > { %12832 = vmatpush1.bf16.msra.mxu0 %v19908_v61  ;;  %14062 = vmatpush1.bf16.msra.mxu1 %v19911_v62  ;;  %v19992_v61 = vld [vmem:[%s22188_s16 + $0x182c] ss:$16 sps:$4 sm:$0xff]   ;;  %v17795_v62 = vpack.c.bf16 %v729_v57, %v729_v57  ;;  %v428_v57 = vadd.s32 3072, %v22251_v41 }
 0x38d   : > { %12833 = vmatprep.subr.bf16.mxu0 %v19916_v63  ;;  %14063 = vmatprep.subr.bf16.mxu1 %v19919_v0  ;;  %v19990_v63 = vld [vmem:[%s22188_s16 + $0x1828] ss:$16 sps:$4 sm:$0xff]   ;;  %v19995_v0 = vld [vmem:[%s22188_s16 + $0x1844] ss:$16 sps:$4 sm:$0xff]  }
 0x390   : > { %12834 = vmatpush1.bf16.msra.mxu0 %v19914_v1  ;;  %14064 = vmatpush1.bf16.msra.mxu1 %v19917_v2  ;;  %v19998_v1 = vld [vmem:[%s22188_s16 + $0x184c] ss:$16 sps:$4 sm:$0xff]   ;;  %v19993_v2 = vld [vmem:[%s22188_s16 + $0x1840] ss:$16 sps:$4 sm:$0xff]  }
 0x391   : > { %12835 = vmatprep.subr.bf16.mxu0 %v19922_v3  ;;  %14065 = vmatprep.subr.bf16.mxu1 %v19925_v37  ;;  %v19996_v3 = vld [vmem:[%s22188_s16 + $0x1848] ss:$16 sps:$4 sm:$0xff]   ;;  %v20001_v37 = vld [vmem:[%s22188_s16 + $0x1864] ss:$16 sps:$4 sm:$0xff]  }
 0x394   : > { %12836 = vmatpush1.bf16.msra.mxu0 %v19920_v4  ;;  %14066 = vmatpush1.bf16.msra.mxu1 %v19923_v39  ;;  %v20004_v4 = vld [vmem:[%s22188_s16 + $0x186c] ss:$16 sps:$4 sm:$0xff]   ;;  %v19999_v39 = vld [vmem:[%s22188_s16 + $0x1860] ss:$16 sps:$4 sm:$0xff]  }
 0x395   : > { %12837 = vmatprep.subr.bf16.mxu0 %v19928_v6  ;;  %14067 = vmatprep.subr.bf16.mxu1 %v19931_v7  ;;  %v20002_v6 = vld [vmem:[%s22188_s16 + $0x1868] ss:$16 sps:$4 sm:$0xff]   ;;  %v20007_v7 = vld [vmem:[%s22188_s16 + $0x1884] ss:$16 sps:$4 sm:$0xff]  }
 0x398   : > { %12838 = vmatpush1.bf16.msra.mxu0 %v19926_v8  ;;  %14068 = vmatpush1.bf16.msra.mxu1 %v19929_v46  ;;  %v20010_v8 = vld [vmem:[%s22188_s16 + $0x188c] ss:$16 sps:$4 sm:$0xff]   ;;  %v20005_v46 = vld [vmem:[%s22188_s16 + $0x1880] ss:$16 sps:$4 sm:$0xff]  }
 0x399   : > { %12839 = vmatprep.subr.bf16.mxu0 %v19934_v9  ;;  %14069 = vmatprep.subr.bf16.mxu1 %v19937_v11  ;;  %v20008_v9 = vld [vmem:[%s22188_s16 + $0x1888] ss:$16 sps:$4 sm:$0xff]   ;;  %v20013_v11 = vld [vmem:[%s22188_s16 + $0x18a4] ss:$16 sps:$4 sm:$0xff]  }
 0x39c   : > { %12840 = vmatpush1.bf16.msra.mxu0 %v19932_v12  ;;  %14070 = vmatpush1.bf16.msra.mxu1 %v19935_v13  ;;  %v20016_v12 = vld [vmem:[%s22188_s16 + $0x18ac] ss:$16 sps:$4 sm:$0xff]   ;;  %v20011_v13 = vld [vmem:[%s22188_s16 + $0x18a0] ss:$16 sps:$4 sm:$0xff]  }
 0x39d   : > { %12841 = vmatprep.subr.bf16.mxu0 %v19940_v14  ;;  %14071 = vmatprep.subr.bf16.mxu1 %v19943_v15  ;;  %v20014_v14 = vld [vmem:[%s22188_s16 + $0x18a8] ss:$16 sps:$4 sm:$0xff]   ;;  %v20019_v15 = vld [vmem:[%s22188_s16 + $0x18c4] ss:$16 sps:$4 sm:$0xff]  }
 0x3a0   : > { %12842 = vmatpush1.bf16.msra.mxu0 %v19938_v54  ;;  %14072 = vmatpush1.bf16.msra.mxu1 %v19941_v18  ;;  %v20022_v54 = vld [vmem:[%s22188_s16 + $0x18cc] ss:$16 sps:$4 sm:$0xff]   ;;  %v20017_v18 = vld [vmem:[%s22188_s16 + $0x18c0] ss:$16 sps:$4 sm:$0xff]  }
 0x3a1   : > { %12843 = vmatprep.subr.bf16.mxu0 %v19946_v19  ;;  %14073 = vmatprep.subr.bf16.mxu1 %v19949_v20  ;;  %v20020_v19 = vld [vmem:[%s22188_s16 + $0x18c8] ss:$16 sps:$4 sm:$0xff]   ;;  %v20025_v20 = vld [vmem:[%s22188_s16 + $0x18e4] ss:$16 sps:$4 sm:$0xff]  }
 0x3a4   : > { %12844 = vmatpush1.bf16.msra.mxu0 %v19944_v21  ;;  %14074 = vmatpush1.bf16.msra.mxu1 %v19947_v60  ;;  %v20028_v21 = vld [vmem:[%s22188_s16 + $0x18ec] ss:$16 sps:$4 sm:$0xff]   ;;  %v20023_v60 = vld [vmem:[%s22188_s16 + $0x18e0] ss:$16 sps:$4 sm:$0xff]  }
 0x3a5   : > { %12845 = vmatprep.subr.bf16.mxu0 %v19952_v23  ;;  %14075 = vmatprep.subr.bf16.mxu1 %v19955_v24  ;;  %v20026_v23 = vld [vmem:[%s22188_s16 + $0x18e8] ss:$16 sps:$4 sm:$0xff]   ;;  %v20031_v24 = vld [vmem:[%s22188_s16 + $0x1904] ss:$16 sps:$4 sm:$0xff]  }
 0x3a8   : > { %12846 = vmatpush1.bf16.msra.mxu0 %v19950_v25  ;;  %14076 = vmatpush1.bf16.msra.mxu1 %v19953_v26  ;;  %v20034_v25 = vld [vmem:[%s22188_s16 + $0x190c] ss:$16 sps:$4 sm:$0xff]   ;;  %v20029_v26 = vld [vmem:[%s22188_s16 + $0x1900] ss:$16 sps:$4 sm:$0xff]  }
 0x3a9   : > { %12847 = vmatprep.subr.bf16.mxu0 %v19958_v27  ;;  %14077 = vmatprep.subr.bf16.mxu1 %v19961_v28  ;;  %v20032_v27 = vld [vmem:[%s22188_s16 + $0x1908] ss:$16 sps:$4 sm:$0xff]   ;;  %v20037_v28 = vld [vmem:[%s22188_s16 + $0x1924] ss:$16 sps:$4 sm:$0xff]  }
 0x3ac   : > { %12848 = vmatpush1.bf16.msra.mxu0 %v19956_v29  ;;  %14078 = vmatpush1.bf16.msra.mxu1 %v19959_v5  ;;  %v20040_v29 = vld [vmem:[%s22188_s16 + $0x192c] ss:$16 sps:$4 sm:$0xff]   ;;  %v20035_v5 = vld [vmem:[%s22188_s16 + $0x1920] ss:$16 sps:$4 sm:$0xff]  }
 0x3ad   : > { %12849 = vmatprep.subr.bf16.mxu0 %v19964_v30  ;;  %14079 = vmatprep.subr.bf16.mxu1 %v19967_v55  ;;  %v20038_v30 = vld [vmem:[%s22188_s16 + $0x1928] ss:$16 sps:$4 sm:$0xff]   ;;  %v20043_v55 = vld [vmem:[%s22188_s16 + $0x1944] ss:$16 sps:$4 sm:$0xff]  }
 0x3b0   : > { %12850 = vmatpush1.bf16.msra.mxu0 %v19962_v33  ;;  %14080 = vmatpush1.bf16.msra.mxu1 %v19965_v34  ;;  %v20046_v33 = vld [vmem:[%s22188_s16 + $0x194c] ss:$16 sps:$4 sm:$0xff]   ;;  %v20041_v34 = vld [vmem:[%s22188_s16 + $0x1940] ss:$16 sps:$4 sm:$0xff]  }
 0x3b1   : > { %12851 = vmatprep.subr.bf16.mxu0 %v19970_v35  ;;  %14081 = vmatprep.subr.bf16.mxu1 %v19973_v10  ;;  %v20044_v35 = vld [vmem:[%s22188_s16 + $0x1948] ss:$16 sps:$4 sm:$0xff]   ;;  %v20049_v10 = vld [vmem:[%s22188_s16 + $0x1964] ss:$16 sps:$4 sm:$0xff]  }
 0x3b4   : > { %12852 = vmatpush1.bf16.msra.mxu0 %v19968_v38  ;;  %14082 = vmatpush1.bf16.msra.mxu1 %v19971_v40  ;;  %v20047_v38 = vld [vmem:[%s22188_s16 + $0x1960] ss:$16 sps:$4 sm:$0xff]   ;;  %v20050_v40 = vld [vmem:[%s22188_s16 + $0x1968] ss:$16 sps:$4 sm:$0xff]  }
 0x3b5   : > { %12853 = vmatprep.subr.bf16.mxu0 %v19976_v43  ;;  %14083 = vmatprep.subr.bf16.mxu1 %v19979_v44  ;;  %v20058_v43 = vld [vmem:[%s22188_s16 + $0x198c] ss:$16 sps:$4 sm:$0xff]   ;;  %v20053_v44 = vld [vmem:[%s22188_s16 + $0x1980] ss:$16 sps:$4 sm:$0xff]  }
 0x3b8   : > { %12854 = vmatpush1.bf16.msra.mxu0 %v19974_v48  ;;  %14084 = vmatpush1.bf16.msra.mxu1 %v19977_v49  ;;  %v20061_v48 = vld [vmem:[%s22188_s16 + $0x19a4] ss:$16 sps:$4 sm:$0xff]   ;;  %v20064_v49 = vld [vmem:[%s22188_s16 + $0x19ac] ss:$16 sps:$4 sm:$0xff]  }
 0x3b9   : > { %12864 = vmatprep.subr.bf16.mxu0 %v19983_v52  ;;  %14094 = vmatprep.subr.bf16.mxu1 %v19986_v22  ;;  %v20062_v52 = vld [vmem:[%s22188_s16 + $0x19a8] ss:$16 sps:$4 sm:$0xff]   ;;  %v20067_v22 = vld [vmem:[%s22188_s16 + $0x19c4] ss:$16 sps:$4 sm:$0xff]  }
 0x3bb   : > { %17793 = vmatmul.mubr.msk.bf16.vlgmr.msra.gmra.mrb[0].mxu0 %vm17791_vm15, %v17792_v58  ;;  %17970 = vmatmul.mubr.msk.bf16.vlgmr.msra.gmra.mrb[0].mxu1 %vm17791_vm15, %v17792_v58  ;;  %v714_v58 = vcombine.high %v23146_v16, %v23146_v16  ;;  %v20071_v16 = vld [vmem:[%s22188_s16 + $0x19e0] ss:$16 sps:$4 sm:$0xff]  }
 0x3bc   : > { %12865 = vmatpush1.bf16.msra.mxu0 %v19981_v56  ;;  %14095 = vmatpush1.bf16.msra.mxu1 %v19984_v59  ;;  %v20070_v56 = vld [vmem:[%s22188_s16 + $0x19cc] ss:$16 sps:$4 sm:$0xff]   ;;  %v20065_v59 = vld [vmem:[%s22188_s16 + $0x19c0] ss:$16 sps:$4 sm:$0xff]  }
 0x3bd   : > { %12866 = vmatprep.subr.bf16.mxu0 %v19989_v32  ;;  %14096 = vmatprep.subr.bf16.mxu1 %v19992_v61  ;;  %v20068_v32 = vld [vmem:[%s22188_s16 + $0x19c8] ss:$16 sps:$4 sm:$0xff]   ;;  %v431_v61 = vadd.s32 3456, %v22251_v41 }
 0x3be   : > { %17796 = vmatprep.mubr.msk.bf16.mxu0 %vm17794_vm1, %v17795_v62  ;;  %17973 = vmatprep.mubr.msk.bf16.mxu1 %vm17794_vm1, %v17795_v62  ;;  %v20073_v62 = vld [vmem:[%s22188_s16 + $0x19e4] ss:$16 sps:$4 sm:$0xff]  }
 0x3c0   : > { %12867 = vmatpush1.bf16.msra.mxu0 %v19987_v31  ;;  %14097 = vmatpush1.bf16.msra.mxu1 %v19990_v63  ;;  %v20076_v31 = vld [vmem:[%s22188_s16 + $0x19ec] ss:$16 sps:$4 sm:$0xff]   ;;  %v488_v63 = vadd.s32 %v22262_v50, %v428_v57 }
 0x3c1   : > { %12868 = vmatprep.subr.bf16.mxu0 %v19995_v0  ;;  %14098 = vmatprep.subr.bf16.mxu1 %v19998_v1  ;;  %v23233_v0 = vrot.slane %v714_v58, %v22267_v53  ;;  %v20074_v1 = vld [vmem:[%s22188_s16 + $0x19e8] ss:$16 sps:$4 sm:$0xff]   ;;  %v20148_v57 = vld [vmem:[%s22188_s16 + $0x1b6c] ss:$16 sps:$4 sm:$0xff]   ;;  %v20143_v58 = vld [vmem:[%s22188_s16 + $0x1b60] ss:$16 sps:$4 sm:$0xff]  }
 0x3c2   : > { %vm547_vm2 = vcmp.lt.s32.totalorder %v488_v63, 30000  ;;  %v20157_v63 = vld [vmem:[%s22188_s16 + $0x1ba4] ss:$16 sps:$4 sm:$0xff]  }
 0x3c3   : > { %vm17797_vm3 = vmpackc.low %vm547_vm2, %vm547_vm2 }
 0x3c4   : > { %12869 = vmatpush1.bf16.msra.mxu0 %v19993_v2  ;;  %14099 = vmatpush1.bf16.msra.mxu1 %v19996_v3  ;;  %v491_v2 = vadd.s32 %v22262_v50, %v431_v61  ;;  %v20079_v3 = vld [vmem:[%s22188_s16 + $0x1a04] ss:$16 sps:$4 sm:$0xff]   ;;  %v20154_v61 = vld [vmem:[%s22188_s16 + $0x1b8c] ss:$16 sps:$4 sm:$0xff]  }
 0x3c5   : > { %12870 = vmatprep.subr.bf16.mxu0 %v20001_v37  ;;  %14100 = vmatprep.subr.bf16.mxu1 %v20004_v4  ;;  %v20082_v37 = vld [vmem:[%s22188_s16 + $0x1a0c] ss:$16 sps:$4 sm:$0xff]   ;;  %v20077_v4 = vld [vmem:[%s22188_s16 + $0x1a00] ss:$16 sps:$4 sm:$0xff]  }
 0x3c6   : > { %vm550_vm4 = vcmp.lt.s32.totalorder %v491_v2, 30000  ;;  %v20158_v2 = vld [vmem:[%s22188_s16 + $0x1ba8] ss:$16 sps:$4 sm:$0xff]  }
 0x3c7   : > { %vm17800_vm5 = vmpackc.low %vm550_vm4, %vm550_vm4 }
 0x3c8   : > { %12871 = vmatpush1.bf16.msra.mxu0 %v19999_v39  ;;  %14101 = vmatpush1.bf16.msra.mxu1 %v20002_v6  ;;  %v730_v39 = vcombine.high %v23233_v0, %v23233_v0  ;;  %v17798_v6 = vpack.c.bf16 %v23156_v47, %v23156_v47  ;;  %v20083_v47 = vld [vmem:[%s22188_s16 + $0x1a20] ss:$16 sps:$4 sm:$0xff]  }
 0x3c9   : > { %12872 = vmatprep.subr.bf16.mxu0 %v20007_v7  ;;  %14102 = vmatprep.subr.bf16.mxu1 %v20010_v8  ;;  %v20080_v7 = vld [vmem:[%s22188_s16 + $0x1a08] ss:$16 sps:$4 sm:$0xff]   ;;  %v20085_v8 = vld [vmem:[%s22188_s16 + $0x1a24] ss:$16 sps:$4 sm:$0xff]  }
 0x3cc   : > { %12873 = vmatpush1.bf16.msra.mxu0 %v20005_v46  ;;  %14103 = vmatpush1.bf16.msra.mxu1 %v20008_v9  ;;  %v20088_v46 = vld [vmem:[%s22188_s16 + $0x1a2c] ss:$16 sps:$4 sm:$0xff]   ;;  %v17801_v9 = vpack.c.bf16 %v730_v39, %v730_v39  ;;  %v23302_v39 = vld [vmem:[%s22210_s15 + $0x38] sm:$0xff] }
 0x3cd   : > { %12874 = vmatprep.subr.bf16.mxu0 %v20013_v11  ;;  %14104 = vmatprep.subr.bf16.mxu1 %v20016_v12  ;;  %v20086_v11 = vld [vmem:[%s22188_s16 + $0x1a28] ss:$16 sps:$4 sm:$0xff]   ;;  %v20091_v12 = vld [vmem:[%s22188_s16 + $0x1a44] ss:$16 sps:$4 sm:$0xff]  }
 0x3d0   : > { %12875 = vmatpush1.bf16.msra.mxu0 %v20011_v13  ;;  %14105 = vmatpush1.bf16.msra.mxu1 %v20014_v14  ;;  %v20094_v13 = vld [vmem:[%s22188_s16 + $0x1a4c] ss:$16 sps:$4 sm:$0xff]   ;;  %v20089_v14 = vld [vmem:[%s22188_s16 + $0x1a40] ss:$16 sps:$4 sm:$0xff]  }
 0x3d1   : > { %12876 = vmatprep.subr.bf16.mxu0 %v20019_v15  ;;  %14106 = vmatprep.subr.bf16.mxu1 %v20022_v54  ;;  %v20092_v15 = vld [vmem:[%s22188_s16 + $0x1a48] ss:$16 sps:$4 sm:$0xff]   ;;  %v20097_v54 = vld [vmem:[%s22188_s16 + $0x1a64] ss:$16 sps:$4 sm:$0xff]  }
 0x3d4   : > { %12877 = vmatpush1.bf16.msra.mxu0 %v20017_v18  ;;  %14107 = vmatpush1.bf16.msra.mxu1 %v20020_v19  ;;  %v20100_v18 = vld [vmem:[%s22188_s16 + $0x1a6c] ss:$16 sps:$4 sm:$0xff]   ;;  %v20095_v19 = vld [vmem:[%s22188_s16 + $0x1a60] ss:$16 sps:$4 sm:$0xff]  }
 0x3d5   : > { %12878 = vmatprep.subr.bf16.mxu0 %v20025_v20  ;;  %14108 = vmatprep.subr.bf16.mxu1 %v20028_v21  ;;  %v20098_v20 = vld [vmem:[%s22188_s16 + $0x1a68] ss:$16 sps:$4 sm:$0xff]   ;;  %v20103_v21 = vld [vmem:[%s22188_s16 + $0x1a84] ss:$16 sps:$4 sm:$0xff]  }
 0x3d8   : > { %12879 = vmatpush1.bf16.msra.mxu0 %v20023_v60  ;;  %14109 = vmatpush1.bf16.msra.mxu1 %v20026_v23  ;;  %v20106_v60 = vld [vmem:[%s22188_s16 + $0x1a8c] ss:$16 sps:$4 sm:$0xff]   ;;  %v20101_v23 = vld [vmem:[%s22188_s16 + $0x1a80] ss:$16 sps:$4 sm:$0xff]  }
 0x3d9   : > { %12880 = vmatprep.subr.bf16.mxu0 %v20031_v24  ;;  %14110 = vmatprep.subr.bf16.mxu1 %v20034_v25  ;;  %v20104_v24 = vld [vmem:[%s22188_s16 + $0x1a88] ss:$16 sps:$4 sm:$0xff]   ;;  %v20109_v25 = vld [vmem:[%s22188_s16 + $0x1aa4] ss:$16 sps:$4 sm:$0xff]  }
 0x3dc   : > { %12881 = vmatpush1.bf16.msra.mxu0 %v20029_v26  ;;  %14111 = vmatpush1.bf16.msra.mxu1 %v20032_v27  ;;  %v20112_v26 = vld [vmem:[%s22188_s16 + $0x1aac] ss:$16 sps:$4 sm:$0xff]   ;;  %v20107_v27 = vld [vmem:[%s22188_s16 + $0x1aa0] ss:$16 sps:$4 sm:$0xff]  }
 0x3dd   : > { %12882 = vmatprep.subr.bf16.mxu0 %v20037_v28  ;;  %14112 = vmatprep.subr.bf16.mxu1 %v20040_v29  ;;  %v20110_v28 = vld [vmem:[%s22188_s16 + $0x1aa8] ss:$16 sps:$4 sm:$0xff]   ;;  %v20115_v29 = vld [vmem:[%s22188_s16 + $0x1ac4] ss:$16 sps:$4 sm:$0xff]  }
 0x3e0   : > { %12883 = vmatpush1.bf16.msra.mxu0 %v20035_v5  ;;  %14113 = vmatpush1.bf16.msra.mxu1 %v20038_v30  ;;  %v20118_v5 = vld [vmem:[%s22188_s16 + $0x1acc] ss:$16 sps:$4 sm:$0xff]   ;;  %v20113_v30 = vld [vmem:[%s22188_s16 + $0x1ac0] ss:$16 sps:$4 sm:$0xff]  }
 0x3e1   : > { %12884 = vmatprep.subr.bf16.mxu0 %v20043_v55  ;;  %14114 = vmatprep.subr.bf16.mxu1 %v20046_v33  ;;  %v20116_v55 = vld [vmem:[%s22188_s16 + $0x1ac8] ss:$16 sps:$4 sm:$0xff]   ;;  %v20121_v33 = vld [vmem:[%s22188_s16 + $0x1ae4] ss:$16 sps:$4 sm:$0xff]  }
 0x3e4   : > { %12885 = vmatpush1.bf16.msra.mxu0 %v20041_v34  ;;  %14115 = vmatpush1.bf16.msra.mxu1 %v20044_v35  ;;  %v20124_v34 = vld [vmem:[%s22188_s16 + $0x1aec] ss:$16 sps:$4 sm:$0xff]   ;;  %v20119_v35 = vld [vmem:[%s22188_s16 + $0x1ae0] ss:$16 sps:$4 sm:$0xff]  }
 0x3e5   : > { %12886 = vmatprep.subr.bf16.mxu0 %v20049_v10  ;;  %14116 = vmatprep.subr.bf16.mxu1 %v20052_v36  ;;  %v20122_v10 = vld [vmem:[%s22188_s16 + $0x1ae8] ss:$16 sps:$4 sm:$0xff]   ;;  %v20127_v36 = vld [vmem:[%s22188_s16 + $0x1b04] ss:$16 sps:$4 sm:$0xff]  }
 0x3e8   : > { %12887 = vmatpush1.bf16.msra.mxu0 %v20047_v38  ;;  %14117 = vmatpush1.bf16.msra.mxu1 %v20050_v40  ;;  %v20130_v38 = vld [vmem:[%s22188_s16 + $0x1b0c] ss:$16 sps:$4 sm:$0xff]   ;;  %v20125_v40 = vld [vmem:[%s22188_s16 + $0x1b00] ss:$16 sps:$4 sm:$0xff]  }
 0x3e9   : > { %12888 = vmatprep.subr.bf16.mxu0 %v20055_v42  ;;  %14118 = vmatprep.subr.bf16.mxu1 %v20058_v43  ;;  %v20128_v42 = vld [vmem:[%s22188_s16 + $0x1b08] ss:$16 sps:$4 sm:$0xff]   ;;  %v20133_v43 = vld [vmem:[%s22188_s16 + $0x1b24] ss:$16 sps:$4 sm:$0xff]  }
 0x3ec   : > { %12889 = vmatpush1.bf16.msra.mxu0 %v20053_v44  ;;  %14119 = vmatpush1.bf16.msra.mxu1 %v20056_v17  ;;  %v20136_v44 = vld [vmem:[%s22188_s16 + $0x1b2c] ss:$16 sps:$4 sm:$0xff]   ;;  %v20131_v17 = vld [vmem:[%s22188_s16 + $0x1b20] ss:$16 sps:$4 sm:$0xff]  }
 0x3ed   : > { %12890 = vmatprep.subr.bf16.mxu0 %v20061_v48  ;;  %14120 = vmatprep.subr.bf16.mxu1 %v20064_v49  ;;  %v20134_v48 = vld [vmem:[%s22188_s16 + $0x1b28] ss:$16 sps:$4 sm:$0xff]   ;;  %v20139_v49 = vld [vmem:[%s22188_s16 + $0x1b44] ss:$16 sps:$4 sm:$0xff]  }
 0x3f0   : > { %12891 = vmatpush1.bf16.msra.mxu0 %v20059_v51  ;;  %14121 = vmatpush1.bf16.msra.mxu1 %v20062_v52  ;;  %v20142_v51 = vld [vmem:[%s22188_s16 + $0x1b4c] ss:$16 sps:$4 sm:$0xff]   ;;  %v20137_v52 = vld [vmem:[%s22188_s16 + $0x1b40] ss:$16 sps:$4 sm:$0xff]  }
 0x3f1   : > { %12892 = vmatprep.subr.bf16.mxu0 %v20067_v22  ;;  %14122 = vmatprep.subr.bf16.mxu1 %v20070_v56  ;;  %v20140_v22 = vld [vmem:[%s22188_s16 + $0x1b48] ss:$16 sps:$4 sm:$0xff]   ;;  %v20145_v56 = vld [vmem:[%s22188_s16 + $0x1b64] ss:$16 sps:$4 sm:$0xff]  }
 0x3f4   : > { %12893 = vmatpush1.bf16.msra.mxu0 %v20065_v59  ;;  %14123 = vmatpush1.bf16.msra.mxu1 %v20068_v32  ;;  %v20146_v59 = vld [vmem:[%s22188_s16 + $0x1b68] ss:$16 sps:$4 sm:$0xff]   ;;  %v20151_v32 = vld [vmem:[%s22188_s16 + $0x1b84] ss:$16 sps:$4 sm:$0xff]  }
 0x3f5   : > { %12894 = vmatprep.subr.bf16.mxu0 %v20073_v62  ;;  %14124 = vmatprep.subr.bf16.mxu1 %v20076_v31  ;;  %v20149_v62 = vld [vmem:[%s22188_s16 + $0x1b80] ss:$16 sps:$4 sm:$0xff]   ;;  %v20152_v31 = vld [vmem:[%s22188_s16 + $0x1b88] ss:$16 sps:$4 sm:$0xff]  }
 0x3f8   : > { %12895 = vmatpush1.bf16.msra.mxu0 %v20071_v16  ;;  %14125 = vmatpush1.bf16.msra.mxu1 %v20074_v1  ;;  %v20160_v16 = vld [vmem:[%s22188_s16 + $0x1bac] ss:$16 sps:$4 sm:$0xff]   ;;  %v20155_v1 = vld [vmem:[%s22188_s16 + $0x1ba0] ss:$16 sps:$4 sm:$0xff]  }
 0x3f9   : > { %12905 = vmatprep.subr.bf16.mxu0 %v20079_v3  ;;  %14135 = vmatprep.subr.bf16.mxu1 %v20082_v37  ;;  %v20163_v3 = vld [vmem:[%s22188_s16 + $0x1bc4] ss:$16 sps:$4 sm:$0xff]   ;;  %v20166_v37 = vld [vmem:[%s22188_s16 + $0x1bcc] ss:$16 sps:$4 sm:$0xff]  }
 0x3fb   : > { %17799 = vmatmul.mubr.msk.bf16.vlgmr.msra.gmra.mrb[0].mxu0 %vm17797_vm3, %v17798_v6  ;;  %17976 = vmatmul.mubr.msk.bf16.vlgmr.msra.gmra.mrb[0].mxu1 %vm17797_vm3, %v17798_v6  ;;  %v20161_v6 = vld [vmem:[%s22188_s16 + $0x1bc0] ss:$16 sps:$4 sm:$0xff]  }
 0x3fc   : > { %12906 = vmatpush1.bf16.msra.mxu0 %v20077_v4  ;;  %14136 = vmatpush1.bf16.msra.mxu1 %v20080_v7  ;;  %v430_v4 = vadd.s32 3328, %v22251_v41  ;;  %v20164_v7 = vld [vmem:[%s22188_s16 + $0x1bc8] ss:$16 sps:$4 sm:$0xff]  }
 0x3fd   : > { %12907 = vmatprep.subr.bf16.mxu0 %v20085_v8  ;;  %14137 = vmatprep.subr.bf16.mxu1 %v20088_v46  ;;  %v433_v8 = vadd.s32 3712, %v22251_v41  ;;  %v20169_v46 = vld [vmem:[%s22188_s16 + $0x1be4] ss:$16 sps:$4 sm:$0xff]  }
 0x3fe   : > { %17802 = vmatprep.mubr.msk.bf16.mxu0 %vm17800_vm5, %v17801_v9  ;;  %17979 = vmatprep.mubr.msk.bf16.mxu1 %vm17800_vm5, %v17801_v9  ;;  %v20172_v9 = vld [vmem:[%s22188_s16 + $0x1bec] ss:$16 sps:$4 sm:$0xff]  }
 0x400   : > { %12908 = vmatpush1.bf16.msra.mxu0 %v20083_v47  ;;  %14138 = vmatpush1.bf16.msra.mxu1 %v20086_v11  ;;  %v490_v47 = vadd.s32 %v22262_v50, %v430_v4  ;;  %v23312_v11 = vrot.slane %v23302_v39, %v22267_v53  ;;  %v20245_v4 = vld [vmem:[%s22188_s16 + $0x1d6c] ss:$16 sps:$4 sm:$0xff]  }
 0x401   : > { %12909 = vmatprep.subr.bf16.mxu0 %v20091_v12  ;;  %14139 = vmatprep.subr.bf16.mxu1 %v20094_v13  ;;  %v20167_v12 = vld [vmem:[%s22188_s16 + $0x1be0] ss:$16 sps:$4 sm:$0xff]   ;;  %v20170_v13 = vld [vmem:[%s22188_s16 + $0x1be8] ss:$16 sps:$4 sm:$0xff]  }
 0x402   : > { %vm549_vm6 = vcmp.lt.s32.totalorder %v490_v47, 30000  ;;  %v20249_v47 = vld [vmem:[%s22188_s16 + $0x1d88] ss:$16 sps:$4 sm:$0xff]  }
 0x403   : > { %vm17803_vm7 = vmpackc.low %vm549_vm6, %vm549_vm6 }
 0x404   : > { %12910 = vmatpush1.bf16.msra.mxu0 %v20089_v14  ;;  %14140 = vmatpush1.bf16.msra.mxu1 %v20092_v15  ;;  %v493_v14 = vadd.s32 %v22262_v50, %v433_v8  ;;  %v20176_v15 = vld [vmem:[%s22188_s16 + $0x1c04] ss:$16 sps:$4 sm:$0xff]  }
 0x405   : > { %12911 = vmatprep.subr.bf16.mxu0 %v20097_v54  ;;  %14141 = vmatprep.subr.bf16.mxu1 %v20100_v18  ;;  %v20179_v54 = vld [vmem:[%s22188_s16 + $0x1c0c] ss:$16 sps:$4 sm:$0xff]   ;;  %v20174_v18 = vld [vmem:[%s22188_s16 + $0x1c00] ss:$16 sps:$4 sm:$0xff]   ;;  %v20248_v8 = vld [vmem:[%s22188_s16 + $0x1d84] ss:$16 sps:$4 sm:$0xff]  }
 0x406   : > { %vm552_vm8 = vcmp.lt.s32.totalorder %v493_v14, 30000  ;;  %v20252_v14 = vld [vmem:[%s22188_s16 + $0x1da0] ss:$16 sps:$4 sm:$0xff]  }
 0x407   : > { %vm17806_vm9 = vmpackc.low %vm552_vm8, %vm552_vm8 }
 0x408   : > { %12912 = vmatpush1.bf16.msra.mxu0 %v20095_v19  ;;  %14142 = vmatpush1.bf16.msra.mxu1 %v20098_v20  ;;  %v746_v19 = vcombine.high %v23312_v11, %v23312_v11  ;;  %v17804_v20 = vpack.c.bf16 %v23233_v0, %v23233_v0  ;;  %v20180_v0 = vld [vmem:[%s22188_s16 + $0x1c20] ss:$16 sps:$4 sm:$0xff]  }
 0x409   : > { %12913 = vmatprep.subr.bf16.mxu0 %v20103_v21  ;;  %14143 = vmatprep.subr.bf16.mxu1 %v20106_v60  ;;  %v20177_v21 = vld [vmem:[%s22188_s16 + $0x1c08] ss:$16 sps:$4 sm:$0xff]   ;;  %v20182_v60 = vld [vmem:[%s22188_s16 + $0x1c24] ss:$16 sps:$4 sm:$0xff]  }
 0x40c   : > { %12914 = vmatpush1.bf16.msra.mxu0 %v20101_v23  ;;  %14144 = vmatpush1.bf16.msra.mxu1 %v20104_v24  ;;  %v20185_v23 = vld [vmem:[%s22188_s16 + $0x1c2c] ss:$16 sps:$4 sm:$0xff]   ;;  %v17807_v24 = vpack.c.bf16 %v746_v19, %v746_v19  ;;  %v432_v19 = vadd.s32 3584, %v22251_v41 }
 0x40d   : > { %12915 = vmatprep.subr.bf16.mxu0 %v20109_v25  ;;  %14145 = vmatprep.subr.bf16.mxu1 %v20112_v26  ;;  %v20183_v25 = vld [vmem:[%s22188_s16 + $0x1c28] ss:$16 sps:$4 sm:$0xff]   ;;  %v20188_v26 = vld [vmem:[%s22188_s16 + $0x1c44] ss:$16 sps:$4 sm:$0xff]  }
 0x410   : > { %12916 = vmatpush1.bf16.msra.mxu0 %v20107_v27  ;;  %14146 = vmatpush1.bf16.msra.mxu1 %v20110_v28  ;;  %v20191_v27 = vld [vmem:[%s22188_s16 + $0x1c4c] ss:$16 sps:$4 sm:$0xff]   ;;  %v20186_v28 = vld [vmem:[%s22188_s16 + $0x1c40] ss:$16 sps:$4 sm:$0xff]  }
 0x411   : > { %12917 = vmatprep.subr.bf16.mxu0 %v20115_v29  ;;  %14147 = vmatprep.subr.bf16.mxu1 %v20118_v5  ;;  %v20189_v29 = vld [vmem:[%s22188_s16 + $0x1c48] ss:$16 sps:$4 sm:$0xff]   ;;  %v20194_v5 = vld [vmem:[%s22188_s16 + $0x1c64] ss:$16 sps:$4 sm:$0xff]  }
 0x414   : > { %12918 = vmatpush1.bf16.msra.mxu0 %v20113_v30  ;;  %14148 = vmatpush1.bf16.msra.mxu1 %v20116_v55  ;;  %v20197_v30 = vld [vmem:[%s22188_s16 + $0x1c6c] ss:$16 sps:$4 sm:$0xff]   ;;  %v20192_v55 = vld [vmem:[%s22188_s16 + $0x1c60] ss:$16 sps:$4 sm:$0xff]  }
 0x415   : > { %12919 = vmatprep.subr.bf16.mxu0 %v20121_v33  ;;  %14149 = vmatprep.subr.bf16.mxu1 %v20124_v34  ;;  %v20195_v33 = vld [vmem:[%s22188_s16 + $0x1c68] ss:$16 sps:$4 sm:$0xff]   ;;  %v20200_v34 = vld [vmem:[%s22188_s16 + $0x1c84] ss:$16 sps:$4 sm:$0xff]  }
 0x418   : > { %12920 = vmatpush1.bf16.msra.mxu0 %v20119_v35  ;;  %14150 = vmatpush1.bf16.msra.mxu1 %v20122_v10  ;;  %v20203_v35 = vld [vmem:[%s22188_s16 + $0x1c8c] ss:$16 sps:$4 sm:$0xff]   ;;  %v20198_v10 = vld [vmem:[%s22188_s16 + $0x1c80] ss:$16 sps:$4 sm:$0xff]  }
 0x419   : > { %12921 = vmatprep.subr.bf16.mxu0 %v20127_v36  ;;  %14151 = vmatprep.subr.bf16.mxu1 %v20130_v38  ;;  %v20201_v36 = vld [vmem:[%s22188_s16 + $0x1c88] ss:$16 sps:$4 sm:$0xff]   ;;  %v20206_v38 = vld [vmem:[%s22188_s16 + $0x1ca4] ss:$16 sps:$4 sm:$0xff]  }
 0x41c   : > { %12922 = vmatpush1.bf16.msra.mxu0 %v20125_v40  ;;  %14152 = vmatpush1.bf16.msra.mxu1 %v20128_v42  ;;  %v20209_v40 = vld [vmem:[%s22188_s16 + $0x1cac] ss:$16 sps:$4 sm:$0xff]   ;;  %v20204_v42 = vld [vmem:[%s22188_s16 + $0x1ca0] ss:$16 sps:$4 sm:$0xff]  }
 0x41d   : > { %12923 = vmatprep.subr.bf16.mxu0 %v20133_v43  ;;  %14153 = vmatprep.subr.bf16.mxu1 %v20136_v44  ;;  %v20207_v43 = vld [vmem:[%s22188_s16 + $0x1ca8] ss:$16 sps:$4 sm:$0xff]   ;;  %v20212_v44 = vld [vmem:[%s22188_s16 + $0x1cc4] ss:$16 sps:$4 sm:$0xff]  }
 0x420   : > { %12924 = vmatpush1.bf16.msra.mxu0 %v20131_v17  ;;  %14154 = vmatpush1.bf16.msra.mxu1 %v20134_v48  ;;  %v20215_v17 = vld [vmem:[%s22188_s16 + $0x1ccc] ss:$16 sps:$4 sm:$0xff]   ;;  %v20210_v48 = vld [vmem:[%s22188_s16 + $0x1cc0] ss:$16 sps:$4 sm:$0xff]  }
 0x421   : > { %12925 = vmatprep.subr.bf16.mxu0 %v20139_v49  ;;  %14155 = vmatprep.subr.bf16.mxu1 %v20142_v51  ;;  %v20213_v49 = vld [vmem:[%s22188_s16 + $0x1cc8] ss:$16 sps:$4 sm:$0xff]   ;;  %v20218_v51 = vld [vmem:[%s22188_s16 + $0x1ce4] ss:$16 sps:$4 sm:$0xff]  }
 0x424   : > { %12926 = vmatpush1.bf16.msra.mxu0 %v20137_v52  ;;  %14156 = vmatpush1.bf16.msra.mxu1 %v20140_v22  ;;  %v20221_v52 = vld [vmem:[%s22188_s16 + $0x1cec] ss:$16 sps:$4 sm:$0xff]   ;;  %v20216_v22 = vld [vmem:[%s22188_s16 + $0x1ce0] ss:$16 sps:$4 sm:$0xff]  }
 0x425   : > { %12927 = vmatprep.subr.bf16.mxu0 %v20145_v56  ;;  %14157 = vmatprep.subr.bf16.mxu1 %v20148_v57  ;;  %v20219_v56 = vld [vmem:[%s22188_s16 + $0x1ce8] ss:$16 sps:$4 sm:$0xff]   ;;  %v20224_v57 = vld [vmem:[%s22188_s16 + $0x1d04] ss:$16 sps:$4 sm:$0xff]  }
 0x428   : > { %12928 = vmatpush1.bf16.msra.mxu0 %v20143_v58  ;;  %14158 = vmatpush1.bf16.msra.mxu1 %v20146_v59  ;;  %v20227_v58 = vld [vmem:[%s22188_s16 + $0x1d0c] ss:$16 sps:$4 sm:$0xff]   ;;  %v20222_v59 = vld [vmem:[%s22188_s16 + $0x1d00] ss:$16 sps:$4 sm:$0xff]  }
 0x429   : > { %12929 = vmatprep.subr.bf16.mxu0 %v20151_v32  ;;  %14159 = vmatprep.subr.bf16.mxu1 %v20154_v61  ;;  %v20225_v32 = vld [vmem:[%s22188_s16 + $0x1d08] ss:$16 sps:$4 sm:$0xff]   ;;  %v20230_v61 = vld [vmem:[%s22188_s16 + $0x1d24] ss:$16 sps:$4 sm:$0xff]  }
 0x42c   : > { %12930 = vmatpush1.bf16.msra.mxu0 %v20149_v62  ;;  %14160 = vmatpush1.bf16.msra.mxu1 %v20152_v31  ;;  %v20233_v62 = vld [vmem:[%s22188_s16 + $0x1d2c] ss:$16 sps:$4 sm:$0xff]   ;;  %v20228_v31 = vld [vmem:[%s22188_s16 + $0x1d20] ss:$16 sps:$4 sm:$0xff]  }
 0x42d   : > { %12931 = vmatprep.subr.bf16.mxu0 %v20157_v63  ;;  %14161 = vmatprep.subr.bf16.mxu1 %v20160_v16  ;;  %v20231_v63 = vld [vmem:[%s22188_s16 + $0x1d28] ss:$16 sps:$4 sm:$0xff]   ;;  %v20236_v16 = vld [vmem:[%s22188_s16 + $0x1d44] ss:$16 sps:$4 sm:$0xff]  }
 0x430   : > { %12932 = vmatpush1.bf16.msra.mxu0 %v20155_v1  ;;  %14162 = vmatpush1.bf16.msra.mxu1 %v20158_v2  ;;  %v20239_v1 = vld [vmem:[%s22188_s16 + $0x1d4c] ss:$16 sps:$4 sm:$0xff]   ;;  %v20234_v2 = vld [vmem:[%s22188_s16 + $0x1d40] ss:$16 sps:$4 sm:$0xff]  }
 0x431   : > { %12933 = vmatprep.subr.bf16.mxu0 %v20163_v3  ;;  %14163 = vmatprep.subr.bf16.mxu1 %v20166_v37  ;;  %v20237_v3 = vld [vmem:[%s22188_s16 + $0x1d48] ss:$16 sps:$4 sm:$0xff]   ;;  %v20242_v37 = vld [vmem:[%s22188_s16 + $0x1d64] ss:$16 sps:$4 sm:$0xff]  }
 0x434   : > { %12934 = vmatpush1.bf16.msra.mxu0 %v20161_v6  ;;  %14164 = vmatpush1.bf16.msra.mxu1 %v20164_v7  ;;  %v20240_v6 = vld [vmem:[%s22188_s16 + $0x1d60] ss:$16 sps:$4 sm:$0xff]   ;;  %v20243_v7 = vld [vmem:[%s22188_s16 + $0x1d68] ss:$16 sps:$4 sm:$0xff]  }
 0x435   : > { %12935 = vmatprep.subr.bf16.mxu0 %v20169_v46  ;;  %14165 = vmatprep.subr.bf16.mxu1 %v20172_v9  ;;  %v20251_v46 = vld [vmem:[%s22188_s16 + $0x1d8c] ss:$16 sps:$4 sm:$0xff]   ;;  %v20246_v9 = vld [vmem:[%s22188_s16 + $0x1d80] ss:$16 sps:$4 sm:$0xff]  }
 0x438   : > { %12936 = vmatpush1.bf16.msra.mxu0 %v20167_v12  ;;  %14166 = vmatpush1.bf16.msra.mxu1 %v20170_v13  ;;  %v20254_v12 = vld [vmem:[%s22188_s16 + $0x1da4] ss:$16 sps:$4 sm:$0xff]   ;;  %v20257_v13 = vld [vmem:[%s22188_s16 + $0x1dac] ss:$16 sps:$4 sm:$0xff]  }
 0x439   : > { %12946 = vmatprep.subr.bf16.mxu0 %v20176_v15  ;;  %14176 = vmatprep.subr.bf16.mxu1 %v20179_v54  ;;  %v20255_v15 = vld [vmem:[%s22188_s16 + $0x1da8] ss:$16 sps:$4 sm:$0xff]   ;;  %v20260_v54 = vld [vmem:[%s22188_s16 + $0x1dc4] ss:$16 sps:$4 sm:$0xff]  }
 0x43b   : > { %17805 = vmatmul.mubr.msk.bf16.vlgmr.msra.gmra.mrb[0].mxu0 %vm17803_vm7, %v17804_v20  ;;  %17982 = vmatmul.mubr.msk.bf16.vlgmr.msra.gmra.mrb[0].mxu1 %vm17803_vm7, %v17804_v20  ;;  %v731_v20 = vcombine.high %v23302_v39, %v23302_v39  ;;  %v20264_v39 = vld [vmem:[%s22188_s16 + $0x1de0] ss:$16 sps:$4 sm:$0xff]  }
 0x43c   : > { %12947 = vmatpush1.bf16.msra.mxu0 %v20174_v18  ;;  %14177 = vmatpush1.bf16.msra.mxu1 %v20177_v21  ;;  %v20263_v18 = vld [vmem:[%s22188_s16 + $0x1dcc] ss:$16 sps:$4 sm:$0xff]   ;;  %v20258_v21 = vld [vmem:[%s22188_s16 + $0x1dc0] ss:$16 sps:$4 sm:$0xff]  }
 0x43d   : > { %12948 = vmatprep.subr.bf16.mxu0 %v20182_v60  ;;  %14178 = vmatprep.subr.bf16.mxu1 %v20185_v23  ;;  %v20261_v60 = vld [vmem:[%s22188_s16 + $0x1dc8] ss:$16 sps:$4 sm:$0xff]   ;;  %v435_v23 = vadd.s32 3968, %v22251_v41 }
 0x43e   : > { %17808 = vmatprep.mubr.msk.bf16.mxu0 %vm17806_vm9, %v17807_v24  ;;  %17985 = vmatprep.mubr.msk.bf16.mxu1 %vm17806_vm9, %v17807_v24  ;;  %v20266_v24 = vld [vmem:[%s22188_s16 + $0x1de4] ss:$16 sps:$4 sm:$0xff]  }
 0x440   : > { %12949 = vmatpush1.bf16.msra.mxu0 %v20180_v0  ;;  %14179 = vmatpush1.bf16.msra.mxu1 %v20183_v25  ;;  %v20269_v0 = vld [vmem:[%s22188_s16 + $0x1dec] ss:$16 sps:$4 sm:$0xff]   ;;  %v492_v25 = vadd.s32 %v22262_v50, %v432_v19 }
 0x441   : > { %12950 = vmatprep.subr.bf16.mxu0 %v20188_v26  ;;  %14180 = vmatprep.subr.bf16.mxu1 %v20191_v27  ;;  %v23389_v26 = vrot.slane %v731_v20, %v22267_v53  ;;  %v20267_v27 = vld [vmem:[%s22188_s16 + $0x1de8] ss:$16 sps:$4 sm:$0xff]   ;;  %v20341_v19 = vld [vmem:[%s22188_s16 + $0x1f6c] ss:$16 sps:$4 sm:$0xff]   ;;  %v20336_v20 = vld [vmem:[%s22188_s16 + $0x1f60] ss:$16 sps:$4 sm:$0xff]  }
 0x442   : > { %vm551_vm10 = vcmp.lt.s32.totalorder %v492_v25, 30000  ;;  %v20350_v25 = vld [vmem:[%s22188_s16 + $0x1fa4] ss:$16 sps:$4 sm:$0xff]  }
 0x443   : > { %vm17809_vm11 = vmpackc.low %vm551_vm10, %vm551_vm10 }
 0x444   : > { %12951 = vmatpush1.bf16.msra.mxu0 %v20186_v28  ;;  %14181 = vmatpush1.bf16.msra.mxu1 %v20189_v29  ;;  %v495_v28 = vadd.s32 %v22262_v50, %v435_v23  ;;  %v20272_v29 = vld [vmem:[%s22188_s16 + $0x1e04] ss:$16 sps:$4 sm:$0xff]   ;;  %v20347_v23 = vld [vmem:[%s22188_s16 + $0x1f8c] ss:$16 sps:$4 sm:$0xff]  }
 0x445   : > { %12952 = vmatprep.subr.bf16.mxu0 %v20194_v5  ;;  %14182 = vmatprep.subr.bf16.mxu1 %v20197_v30  ;;  %v20275_v5 = vld [vmem:[%s22188_s16 + $0x1e0c] ss:$16 sps:$4 sm:$0xff]   ;;  %v20270_v30 = vld [vmem:[%s22188_s16 + $0x1e00] ss:$16 sps:$4 sm:$0xff]  }
 0x446   : > { %vm554_vm12 = vcmp.lt.s32.totalorder %v495_v28, 30000  ;;  %v20351_v28 = vld [vmem:[%s22188_s16 + $0x1fa8] ss:$16 sps:$4 sm:$0xff]  }
 0x447   : > { %vm17812_vm13 = vmpackc.low %vm554_vm12, %vm554_vm12 }
 0x448   : > { %12953 = vmatpush1.bf16.msra.mxu0 %v20192_v55  ;;  %14183 = vmatpush1.bf16.msra.mxu1 %v20195_v33  ;;  %v747_v55 = vcombine.high %v23389_v26, %v23389_v26  ;;  %v17810_v33 = vpack.c.bf16 %v23312_v11, %v23312_v11  ;;  %v20276_v11 = vld [vmem:[%s22188_s16 + $0x1e20] ss:$16 sps:$4 sm:$0xff]  }
 0x449   : > { %12954 = vmatprep.subr.bf16.mxu0 %v20200_v34  ;;  %14184 = vmatprep.subr.bf16.mxu1 %v20203_v35  ;;  %v20273_v34 = vld [vmem:[%s22188_s16 + $0x1e08] ss:$16 sps:$4 sm:$0xff]   ;;  %v20278_v35 = vld [vmem:[%s22188_s16 + $0x1e24] ss:$16 sps:$4 sm:$0xff]  }
 0x44c   : > { %12955 = vmatpush1.bf16.msra.mxu0 %v20198_v10  ;;  %14185 = vmatpush1.bf16.msra.mxu1 %v20201_v36  ;;  %v20281_v10 = vld [vmem:[%s22188_s16 + $0x1e2c] ss:$16 sps:$4 sm:$0xff]   ;;  %v17813_v36 = vpack.c.bf16 %v747_v55, %v747_v55 }
 0x44d   : > { %12956 = vmatprep.subr.bf16.mxu0 %v20206_v38  ;;  %14186 = vmatprep.subr.bf16.mxu1 %v20209_v40  ;;  %v20279_v38 = vld [vmem:[%s22188_s16 + $0x1e28] ss:$16 sps:$4 sm:$0xff]   ;;  %v20284_v40 = vld [vmem:[%s22188_s16 + $0x1e44] ss:$16 sps:$4 sm:$0xff]  }
 0x44e   : > { %v23458_v55 = vld [vmem:[%s22210_s15 + $0x40] sm:$0xff] }
 0x450   : > { %12957 = vmatpush1.bf16.msra.mxu0 %v20204_v42  ;;  %14187 = vmatpush1.bf16.msra.mxu1 %v20207_v43  ;;  %v20287_v42 = vld [vmem:[%s22188_s16 + $0x1e4c] ss:$16 sps:$4 sm:$0xff]   ;;  %v20282_v43 = vld [vmem:[%s22188_s16 + $0x1e40] ss:$16 sps:$4 sm:$0xff]  }
 0x451   : > { %12958 = vmatprep.subr.bf16.mxu0 %v20212_v44  ;;  %14188 = vmatprep.subr.bf16.mxu1 %v20215_v17  ;;  %v20285_v44 = vld [vmem:[%s22188_s16 + $0x1e48] ss:$16 sps:$4 sm:$0xff]   ;;  %v20290_v17 = vld [vmem:[%s22188_s16 + $0x1e64] ss:$16 sps:$4 sm:$0xff]  }
 0x454   : > { %12959 = vmatpush1.bf16.msra.mxu0 %v20210_v48  ;;  %14189 = vmatpush1.bf16.msra.mxu1 %v20213_v49  ;;  %v20293_v48 = vld [vmem:[%s22188_s16 + $0x1e6c] ss:$16 sps:$4 sm:$0xff]   ;;  %v20288_v49 = vld [vmem:[%s22188_s16 + $0x1e60] ss:$16 sps:$4 sm:$0xff]  }
 0x455   : > { %12960 = vmatprep.subr.bf16.mxu0 %v20218_v51  ;;  %14190 = vmatprep.subr.bf16.mxu1 %v20221_v52  ;;  %v20291_v51 = vld [vmem:[%s22188_s16 + $0x1e68] ss:$16 sps:$4 sm:$0xff]   ;;  %v20296_v52 = vld [vmem:[%s22188_s16 + $0x1e84] ss:$16 sps:$4 sm:$0xff]  }
 0x458   : > { %12961 = vmatpush1.bf16.msra.mxu0 %v20216_v22  ;;  %14191 = vmatpush1.bf16.msra.mxu1 %v20219_v56  ;;  %v20299_v22 = vld [vmem:[%s22188_s16 + $0x1e8c] ss:$16 sps:$4 sm:$0xff]   ;;  %v20294_v56 = vld [vmem:[%s22188_s16 + $0x1e80] ss:$16 sps:$4 sm:$0xff]  }
 0x459   : > { %12962 = vmatprep.subr.bf16.mxu0 %v20224_v57  ;;  %14192 = vmatprep.subr.bf16.mxu1 %v20227_v58  ;;  %v20297_v57 = vld [vmem:[%s22188_s16 + $0x1e88] ss:$16 sps:$4 sm:$0xff]   ;;  %v20302_v58 = vld [vmem:[%s22188_s16 + $0x1ea4] ss:$16 sps:$4 sm:$0xff]  }
 0x45c   : > { %12963 = vmatpush1.bf16.msra.mxu0 %v20222_v59  ;;  %14193 = vmatpush1.bf16.msra.mxu1 %v20225_v32  ;;  %v20305_v59 = vld [vmem:[%s22188_s16 + $0x1eac] ss:$16 sps:$4 sm:$0xff]   ;;  %v20300_v32 = vld [vmem:[%s22188_s16 + $0x1ea0] ss:$16 sps:$4 sm:$0xff]  }
 0x45d   : > { %12964 = vmatprep.subr.bf16.mxu0 %v20230_v61  ;;  %14194 = vmatprep.subr.bf16.mxu1 %v20233_v62  ;;  %v20303_v61 = vld [vmem:[%s22188_s16 + $0x1ea8] ss:$16 sps:$4 sm:$0xff]   ;;  %v20308_v62 = vld [vmem:[%s22188_s16 + $0x1ec4] ss:$16 sps:$4 sm:$0xff]  }
 0x460   : > { %12965 = vmatpush1.bf16.msra.mxu0 %v20228_v31  ;;  %14195 = vmatpush1.bf16.msra.mxu1 %v20231_v63  ;;  %v20311_v31 = vld [vmem:[%s22188_s16 + $0x1ecc] ss:$16 sps:$4 sm:$0xff]   ;;  %v20306_v63 = vld [vmem:[%s22188_s16 + $0x1ec0] ss:$16 sps:$4 sm:$0xff]  }
 0x461   : > { %12966 = vmatprep.subr.bf16.mxu0 %v20236_v16  ;;  %14196 = vmatprep.subr.bf16.mxu1 %v20239_v1  ;;  %v20309_v16 = vld [vmem:[%s22188_s16 + $0x1ec8] ss:$16 sps:$4 sm:$0xff]   ;;  %v20314_v1 = vld [vmem:[%s22188_s16 + $0x1ee4] ss:$16 sps:$4 sm:$0xff]  }
 0x464   : > { %12967 = vmatpush1.bf16.msra.mxu0 %v20234_v2  ;;  %14197 = vmatpush1.bf16.msra.mxu1 %v20237_v3  ;;  %v20317_v2 = vld [vmem:[%s22188_s16 + $0x1eec] ss:$16 sps:$4 sm:$0xff]   ;;  %v20312_v3 = vld [vmem:[%s22188_s16 + $0x1ee0] ss:$16 sps:$4 sm:$0xff]  }
 0x465   : > { %12968 = vmatprep.subr.bf16.mxu0 %v20242_v37  ;;  %14198 = vmatprep.subr.bf16.mxu1 %v20245_v4  ;;  %v20315_v37 = vld [vmem:[%s22188_s16 + $0x1ee8] ss:$16 sps:$4 sm:$0xff]   ;;  %v20320_v4 = vld [vmem:[%s22188_s16 + $0x1f04] ss:$16 sps:$4 sm:$0xff]  }
 0x468   : > { %12969 = vmatpush1.bf16.msra.mxu0 %v20240_v6  ;;  %14199 = vmatpush1.bf16.msra.mxu1 %v20243_v7  ;;  %v20323_v6 = vld [vmem:[%s22188_s16 + $0x1f0c] ss:$16 sps:$4 sm:$0xff]   ;;  %v20318_v7 = vld [vmem:[%s22188_s16 + $0x1f00] ss:$16 sps:$4 sm:$0xff]  }
 0x469   : > { %12970 = vmatprep.subr.bf16.mxu0 %v20248_v8  ;;  %14200 = vmatprep.subr.bf16.mxu1 %v20251_v46  ;;  %v20321_v8 = vld [vmem:[%s22188_s16 + $0x1f08] ss:$16 sps:$4 sm:$0xff]   ;;  %v20326_v46 = vld [vmem:[%s22188_s16 + $0x1f24] ss:$16 sps:$4 sm:$0xff]  }
 0x46c   : > { %12971 = vmatpush1.bf16.msra.mxu0 %v20246_v9  ;;  %14201 = vmatpush1.bf16.msra.mxu1 %v20249_v47  ;;  %v20329_v9 = vld [vmem:[%s22188_s16 + $0x1f2c] ss:$16 sps:$4 sm:$0xff]   ;;  %v20324_v47 = vld [vmem:[%s22188_s16 + $0x1f20] ss:$16 sps:$4 sm:$0xff]  }
 0x46d   : > { %12972 = vmatprep.subr.bf16.mxu0 %v20254_v12  ;;  %14202 = vmatprep.subr.bf16.mxu1 %v20257_v13  ;;  %v20327_v12 = vld [vmem:[%s22188_s16 + $0x1f28] ss:$16 sps:$4 sm:$0xff]   ;;  %v20332_v13 = vld [vmem:[%s22188_s16 + $0x1f44] ss:$16 sps:$4 sm:$0xff]  }
 0x470   : > { %12973 = vmatpush1.bf16.msra.mxu0 %v20252_v14  ;;  %14203 = vmatpush1.bf16.msra.mxu1 %v20255_v15  ;;  %v20335_v14 = vld [vmem:[%s22188_s16 + $0x1f4c] ss:$16 sps:$4 sm:$0xff]   ;;  %v20330_v15 = vld [vmem:[%s22188_s16 + $0x1f40] ss:$16 sps:$4 sm:$0xff]  }
 0x471   : > { %12974 = vmatprep.subr.bf16.mxu0 %v20260_v54  ;;  %14204 = vmatprep.subr.bf16.mxu1 %v20263_v18  ;;  %v20333_v54 = vld [vmem:[%s22188_s16 + $0x1f48] ss:$16 sps:$4 sm:$0xff]   ;;  %v20338_v18 = vld [vmem:[%s22188_s16 + $0x1f64] ss:$16 sps:$4 sm:$0xff]  }
 0x474   : > { %12975 = vmatpush1.bf16.msra.mxu0 %v20258_v21  ;;  %14205 = vmatpush1.bf16.msra.mxu1 %v20261_v60  ;;  %v20339_v21 = vld [vmem:[%s22188_s16 + $0x1f68] ss:$16 sps:$4 sm:$0xff]   ;;  %v20344_v60 = vld [vmem:[%s22188_s16 + $0x1f84] ss:$16 sps:$4 sm:$0xff]  }
 0x475   : > { %12976 = vmatprep.subr.bf16.mxu0 %v20266_v24  ;;  %14206 = vmatprep.subr.bf16.mxu1 %v20269_v0  ;;  %v20342_v24 = vld [vmem:[%s22188_s16 + $0x1f80] ss:$16 sps:$4 sm:$0xff]   ;;  %v20345_v0 = vld [vmem:[%s22188_s16 + $0x1f88] ss:$16 sps:$4 sm:$0xff]  }
 0x478   : > { %12977 = vmatpush1.bf16.msra.mxu0 %v20264_v39  ;;  %14207 = vmatpush1.bf16.msra.mxu1 %v20267_v27  ;;  %v20353_v39 = vld [vmem:[%s22188_s16 + $0x1fac] ss:$16 sps:$4 sm:$0xff]   ;;  %v20348_v27 = vld [vmem:[%s22188_s16 + $0x1fa0] ss:$16 sps:$4 sm:$0xff]  }
 0x479   : > { %12987 = vmatprep.subr.bf16.mxu0 %v20272_v29  ;;  %14217 = vmatprep.subr.bf16.mxu1 %v20275_v5  ;;  %v20356_v29 = vld [vmem:[%s22188_s16 + $0x1fc4] ss:$16 sps:$4 sm:$0xff]   ;;  %v20359_v5 = vld [vmem:[%s22188_s16 + $0x1fcc] ss:$16 sps:$4 sm:$0xff]  }
 0x47b   : > { %17811 = vmatmul.mubr.msk.bf16.vlgmr.msra.gmra.mrb[0].mxu0 %vm17809_vm11, %v17810_v33  ;;  %17988 = vmatmul.mubr.msk.bf16.vlgmr.msra.gmra.mrb[0].mxu1 %vm17809_vm11, %v17810_v33  ;;  %v20354_v33 = vld [vmem:[%s22188_s16 + $0x1fc0] ss:$16 sps:$4 sm:$0xff]  }
 0x47c   : > { %12988 = vmatpush1.bf16.msra.mxu0 %v20270_v30  ;;  %14218 = vmatpush1.bf16.msra.mxu1 %v20273_v34  ;;  %v434_v30 = vadd.s32 3840, %v22251_v41  ;;  %v20357_v34 = vld [vmem:[%s22188_s16 + $0x1fc8] ss:$16 sps:$4 sm:$0xff]  }
 0x47d   : > { %12989 = vmatprep.subr.bf16.mxu0 %v20278_v35  ;;  %14219 = vmatprep.subr.bf16.mxu1 %v20281_v10  ;;  %v437_v35 = vadd.s32 4224, %v22251_v41  ;;  %v20362_v10 = vld [vmem:[%s22188_s16 + $0x1fe4] ss:$16 sps:$4 sm:$0xff]  }
 0x47e   : > { %17814 = vmatprep.mubr.msk.bf16.mxu0 %vm17812_vm13, %v17813_v36  ;;  %17991 = vmatprep.mubr.msk.bf16.mxu1 %vm17812_vm13, %v17813_v36  ;;  %v20365_v36 = vld [vmem:[%s22188_s16 + $0x1fec] ss:$16 sps:$4 sm:$0xff]  }
 0x480   : > { %12990 = vmatpush1.bf16.msra.mxu0 %v20276_v11  ;;  %14220 = vmatpush1.bf16.msra.mxu1 %v20279_v38  ;;  %v494_v11 = vadd.s32 %v22262_v50, %v434_v30  ;;  %v23468_v38 = vrot.slane %v23458_v55, %v22267_v53  ;;  %v20438_v30 = vld [vmem:[%s22188_s16 + $0x216c] ss:$16 sps:$4 sm:$0xff]  }
 0x481   : > { %12991 = vmatprep.subr.bf16.mxu0 %v20284_v40  ;;  %14221 = vmatprep.subr.bf16.mxu1 %v20287_v42  ;;  %v20360_v40 = vld [vmem:[%s22188_s16 + $0x1fe0] ss:$16 sps:$4 sm:$0xff]   ;;  %v20363_v42 = vld [vmem:[%s22188_s16 + $0x1fe8] ss:$16 sps:$4 sm:$0xff]  }
 0x482   : > { %vm553_vm14 = vcmp.lt.s32.totalorder %v494_v11, 30000  ;;  %v20442_v11 = vld [vmem:[%s22188_s16 + $0x2188] ss:$16 sps:$4 sm:$0xff]  }
 0x483   : > { %vm17815_vm15 = vmpackc.low %vm553_vm14, %vm553_vm14 }
 0x484   : > { %12992 = vmatpush1.bf16.msra.mxu0 %v20282_v43  ;;  %14222 = vmatpush1.bf16.msra.mxu1 %v20285_v44  ;;  %v497_v43 = vadd.s32 %v22262_v50, %v437_v35  ;;  %v20369_v44 = vld [vmem:[%s22188_s16 + $0x2004] ss:$16 sps:$4 sm:$0xff]  }
 0x485   : > { %12993 = vmatprep.subr.bf16.mxu0 %v20290_v17  ;;  %14223 = vmatprep.subr.bf16.mxu1 %v20293_v48  ;;  %v20372_v17 = vld [vmem:[%s22188_s16 + $0x200c] ss:$16 sps:$4 sm:$0xff]   ;;  %v20367_v48 = vld [vmem:[%s22188_s16 + $0x2000] ss:$16 sps:$4 sm:$0xff]   ;;  %v20441_v35 = vld [vmem:[%s22188_s16 + $0x2184] ss:$16 sps:$4 sm:$0xff]  }
 0x486   : > { %vm556_vm0 = vcmp.lt.s32.totalorder %v497_v43, 30000  ;;  %v20445_v43 = vld [vmem:[%s22188_s16 + $0x21a0] ss:$16 sps:$4 sm:$0xff]  }
 0x487   : > { %vm17818_vm1 = vmpackc.low %vm556_vm0, %vm556_vm0 }
 0x488   : > { %12994 = vmatpush1.bf16.msra.mxu0 %v20288_v49  ;;  %14224 = vmatpush1.bf16.msra.mxu1 %v20291_v51  ;;  %v763_v49 = vcombine.high %v23468_v38, %v23468_v38  ;;  %v17816_v51 = vpack.c.bf16 %v23389_v26, %v23389_v26  ;;  %v20373_v26 = vld [vmem:[%s22188_s16 + $0x2020] ss:$16 sps:$4 sm:$0xff]  }
 0x489   : > { %12995 = vmatprep.subr.bf16.mxu0 %v20296_v52  ;;  %14225 = vmatprep.subr.bf16.mxu1 %v20299_v22  ;;  %v20370_v52 = vld [vmem:[%s22188_s16 + $0x2008] ss:$16 sps:$4 sm:$0xff]   ;;  %v20375_v22 = vld [vmem:[%s22188_s16 + $0x2024] ss:$16 sps:$4 sm:$0xff]  }
 0x48c   : > { %12996 = vmatpush1.bf16.msra.mxu0 %v20294_v56  ;;  %14226 = vmatpush1.bf16.msra.mxu1 %v20297_v57  ;;  %v20378_v56 = vld [vmem:[%s22188_s16 + $0x202c] ss:$16 sps:$4 sm:$0xff]   ;;  %v17819_v57 = vpack.c.bf16 %v763_v49, %v763_v49  ;;  %v436_v49 = vadd.s32 4096, %v22251_v41 }
 0x48d   : > { %12997 = vmatprep.subr.bf16.mxu0 %v20302_v58  ;;  %14227 = vmatprep.subr.bf16.mxu1 %v20305_v59  ;;  %v20376_v58 = vld [vmem:[%s22188_s16 + $0x2028] ss:$16 sps:$4 sm:$0xff]   ;;  %v20381_v59 = vld [vmem:[%s22188_s16 + $0x2044] ss:$16 sps:$4 sm:$0xff]  }
 0x490   : > { %12998 = vmatpush1.bf16.msra.mxu0 %v20300_v32  ;;  %14228 = vmatpush1.bf16.msra.mxu1 %v20303_v61  ;;  %v20384_v32 = vld [vmem:[%s22188_s16 + $0x204c] ss:$16 sps:$4 sm:$0xff]   ;;  %v20379_v61 = vld [vmem:[%s22188_s16 + $0x2040] ss:$16 sps:$4 sm:$0xff]  }
 0x491   : > { %12999 = vmatprep.subr.bf16.mxu0 %v20308_v62  ;;  %14229 = vmatprep.subr.bf16.mxu1 %v20311_v31  ;;  %v20382_v62 = vld [vmem:[%s22188_s16 + $0x2048] ss:$16 sps:$4 sm:$0xff]   ;;  %v20387_v31 = vld [vmem:[%s22188_s16 + $0x2064] ss:$16 sps:$4 sm:$0xff]  }
 0x494   : > { %13000 = vmatpush1.bf16.msra.mxu0 %v20306_v63  ;;  %14230 = vmatpush1.bf16.msra.mxu1 %v20309_v16  ;;  %v20390_v63 = vld [vmem:[%s22188_s16 + $0x206c] ss:$16 sps:$4 sm:$0xff]   ;;  %v20385_v16 = vld [vmem:[%s22188_s16 + $0x2060] ss:$16 sps:$4 sm:$0xff]  }
 0x495   : > { %13001 = vmatprep.subr.bf16.mxu0 %v20314_v1  ;;  %14231 = vmatprep.subr.bf16.mxu1 %v20317_v2  ;;  %v20388_v1 = vld [vmem:[%s22188_s16 + $0x2068] ss:$16 sps:$4 sm:$0xff]   ;;  %v20393_v2 = vld [vmem:[%s22188_s16 + $0x2084] ss:$16 sps:$4 sm:$0xff]  }
 0x498   : > { %13002 = vmatpush1.bf16.msra.mxu0 %v20312_v3  ;;  %14232 = vmatpush1.bf16.msra.mxu1 %v20315_v37  ;;  %v20396_v3 = vld [vmem:[%s22188_s16 + $0x208c] ss:$16 sps:$4 sm:$0xff]   ;;  %v20391_v37 = vld [vmem:[%s22188_s16 + $0x2080] ss:$16 sps:$4 sm:$0xff]  }
 0x499   : > { %13003 = vmatprep.subr.bf16.mxu0 %v20320_v4  ;;  %14233 = vmatprep.subr.bf16.mxu1 %v20323_v6  ;;  %v20394_v4 = vld [vmem:[%s22188_s16 + $0x2088] ss:$16 sps:$4 sm:$0xff]   ;;  %v20399_v6 = vld [vmem:[%s22188_s16 + $0x20a4] ss:$16 sps:$4 sm:$0xff]  }
 0x49c   : > { %13004 = vmatpush1.bf16.msra.mxu0 %v20318_v7  ;;  %14234 = vmatpush1.bf16.msra.mxu1 %v20321_v8  ;;  %v20402_v7 = vld [vmem:[%s22188_s16 + $0x20ac] ss:$16 sps:$4 sm:$0xff]   ;;  %v20397_v8 = vld [vmem:[%s22188_s16 + $0x20a0] ss:$16 sps:$4 sm:$0xff]  }
 0x49d   : > { %13005 = vmatprep.subr.bf16.mxu0 %v20326_v46  ;;  %14235 = vmatprep.subr.bf16.mxu1 %v20329_v9  ;;  %v20400_v46 = vld [vmem:[%s22188_s16 + $0x20a8] ss:$16 sps:$4 sm:$0xff]   ;;  %v20405_v9 = vld [vmem:[%s22188_s16 + $0x20c4] ss:$16 sps:$4 sm:$0xff]  }
 0x4a0   : > { %13006 = vmatpush1.bf16.msra.mxu0 %v20324_v47  ;;  %14236 = vmatpush1.bf16.msra.mxu1 %v20327_v12  ;;  %v20408_v47 = vld [vmem:[%s22188_s16 + $0x20cc] ss:$16 sps:$4 sm:$0xff]   ;;  %v20403_v12 = vld [vmem:[%s22188_s16 + $0x20c0] ss:$16 sps:$4 sm:$0xff]  }
 0x4a1   : > { %13007 = vmatprep.subr.bf16.mxu0 %v20332_v13  ;;  %14237 = vmatprep.subr.bf16.mxu1 %v20335_v14  ;;  %v20406_v13 = vld [vmem:[%s22188_s16 + $0x20c8] ss:$16 sps:$4 sm:$0xff]   ;;  %v20411_v14 = vld [vmem:[%s22188_s16 + $0x20e4] ss:$16 sps:$4 sm:$0xff]  }
 0x4a4   : > { %13008 = vmatpush1.bf16.msra.mxu0 %v20330_v15  ;;  %14238 = vmatpush1.bf16.msra.mxu1 %v20333_v54  ;;  %v20414_v15 = vld [vmem:[%s22188_s16 + $0x20ec] ss:$16 sps:$4 sm:$0xff]   ;;  %v20409_v54 = vld [vmem:[%s22188_s16 + $0x20e0] ss:$16 sps:$4 sm:$0xff]  }
 0x4a5   : > { %13009 = vmatprep.subr.bf16.mxu0 %v20338_v18  ;;  %14239 = vmatprep.subr.bf16.mxu1 %v20341_v19  ;;  %v20412_v18 = vld [vmem:[%s22188_s16 + $0x20e8] ss:$16 sps:$4 sm:$0xff]   ;;  %v20417_v19 = vld [vmem:[%s22188_s16 + $0x2104] ss:$16 sps:$4 sm:$0xff]  }
 0x4a8   : > { %13010 = vmatpush1.bf16.msra.mxu0 %v20336_v20  ;;  %14240 = vmatpush1.bf16.msra.mxu1 %v20339_v21  ;;  %v20420_v20 = vld [vmem:[%s22188_s16 + $0x210c] ss:$16 sps:$4 sm:$0xff]   ;;  %v20415_v21 = vld [vmem:[%s22188_s16 + $0x2100] ss:$16 sps:$4 sm:$0xff]  }
 0x4a9   : > { %13011 = vmatprep.subr.bf16.mxu0 %v20344_v60  ;;  %14241 = vmatprep.subr.bf16.mxu1 %v20347_v23  ;;  %v20418_v60 = vld [vmem:[%s22188_s16 + $0x2108] ss:$16 sps:$4 sm:$0xff]   ;;  %v20423_v23 = vld [vmem:[%s22188_s16 + $0x2124] ss:$16 sps:$4 sm:$0xff]  }
 0x4ac   : > { %13012 = vmatpush1.bf16.msra.mxu0 %v20342_v24  ;;  %14242 = vmatpush1.bf16.msra.mxu1 %v20345_v0  ;;  %v20426_v24 = vld [vmem:[%s22188_s16 + $0x212c] ss:$16 sps:$4 sm:$0xff]   ;;  %v20421_v0 = vld [vmem:[%s22188_s16 + $0x2120] ss:$16 sps:$4 sm:$0xff]  }
 0x4ad   : > { %13013 = vmatprep.subr.bf16.mxu0 %v20350_v25  ;;  %14243 = vmatprep.subr.bf16.mxu1 %v20353_v39  ;;  %v20424_v25 = vld [vmem:[%s22188_s16 + $0x2128] ss:$16 sps:$4 sm:$0xff]   ;;  %v20429_v39 = vld [vmem:[%s22188_s16 + $0x2144] ss:$16 sps:$4 sm:$0xff]  }
 0x4b0   : > { %13014 = vmatpush1.bf16.msra.mxu0 %v20348_v27  ;;  %14244 = vmatpush1.bf16.msra.mxu1 %v20351_v28  ;;  %v20432_v27 = vld [vmem:[%s22188_s16 + $0x214c] ss:$16 sps:$4 sm:$0xff]   ;;  %v20427_v28 = vld [vmem:[%s22188_s16 + $0x2140] ss:$16 sps:$4 sm:$0xff]  }
 0x4b1   : > { %13015 = vmatprep.subr.bf16.mxu0 %v20356_v29  ;;  %14245 = vmatprep.subr.bf16.mxu1 %v20359_v5  ;;  %v20430_v29 = vld [vmem:[%s22188_s16 + $0x2148] ss:$16 sps:$4 sm:$0xff]   ;;  %v20435_v5 = vld [vmem:[%s22188_s16 + $0x2164] ss:$16 sps:$4 sm:$0xff]  }
 0x4b4   : > { %13016 = vmatpush1.bf16.msra.mxu0 %v20354_v33  ;;  %14246 = vmatpush1.bf16.msra.mxu1 %v20357_v34  ;;  %v20433_v33 = vld [vmem:[%s22188_s16 + $0x2160] ss:$16 sps:$4 sm:$0xff]   ;;  %v20436_v34 = vld [vmem:[%s22188_s16 + $0x2168] ss:$16 sps:$4 sm:$0xff]  }
 0x4b5   : > { %13017 = vmatprep.subr.bf16.mxu0 %v20362_v10  ;;  %14247 = vmatprep.subr.bf16.mxu1 %v20365_v36  ;;  %v20444_v10 = vld [vmem:[%s22188_s16 + $0x218c] ss:$16 sps:$4 sm:$0xff]   ;;  %v20439_v36 = vld [vmem:[%s22188_s16 + $0x2180] ss:$16 sps:$4 sm:$0xff]  }
 0x4b8   : > { %13018 = vmatpush1.bf16.msra.mxu0 %v20360_v40  ;;  %14248 = vmatpush1.bf16.msra.mxu1 %v20363_v42  ;;  %v20447_v40 = vld [vmem:[%s22188_s16 + $0x21a4] ss:$16 sps:$4 sm:$0xff]   ;;  %v20450_v42 = vld [vmem:[%s22188_s16 + $0x21ac] ss:$16 sps:$4 sm:$0xff]  }
 0x4b9   : > { %13028 = vmatprep.subr.bf16.mxu0 %v20369_v44  ;;  %14258 = vmatprep.subr.bf16.mxu1 %v20372_v17  ;;  %v20448_v44 = vld [vmem:[%s22188_s16 + $0x21a8] ss:$16 sps:$4 sm:$0xff]   ;;  %v20453_v17 = vld [vmem:[%s22188_s16 + $0x21c4] ss:$16 sps:$4 sm:$0xff]  }
 0x4bb   : > { %17817 = vmatmul.mubr.msk.bf16.vlgmr.msra.gmra.mrb[0].mxu0 %vm17815_vm15, %v17816_v51  ;;  %17994 = vmatmul.mubr.msk.bf16.vlgmr.msra.gmra.mrb[0].mxu1 %vm17815_vm15, %v17816_v51  ;;  %v748_v51 = vcombine.high %v23458_v55, %v23458_v55  ;;  %v20457_v55 = vld [vmem:[%s22188_s16 + $0x21e0] ss:$16 sps:$4 sm:$0xff]  }
 0x4bc   : > { %13029 = vmatpush1.bf16.msra.mxu0 %v20367_v48  ;;  %14259 = vmatpush1.bf16.msra.mxu1 %v20370_v52  ;;  %v20456_v48 = vld [vmem:[%s22188_s16 + $0x21cc] ss:$16 sps:$4 sm:$0xff]   ;;  %v20451_v52 = vld [vmem:[%s22188_s16 + $0x21c0] ss:$16 sps:$4 sm:$0xff]  }
 0x4bd   : > { %13030 = vmatprep.subr.bf16.mxu0 %v20375_v22  ;;  %14260 = vmatprep.subr.bf16.mxu1 %v20378_v56  ;;  %v20454_v22 = vld [vmem:[%s22188_s16 + $0x21c8] ss:$16 sps:$4 sm:$0xff]   ;;  %v439_v56 = vadd.s32 4480, %v22251_v41 }
 0x4be   : > { %17820 = vmatprep.mubr.msk.bf16.mxu0 %vm17818_vm1, %v17819_v57  ;;  %17997 = vmatprep.mubr.msk.bf16.mxu1 %vm17818_vm1, %v17819_v57  ;;  %v20459_v57 = vld [vmem:[%s22188_s16 + $0x21e4] ss:$16 sps:$4 sm:$0xff]  }
 0x4c0   : > { %13031 = vmatpush1.bf16.msra.mxu0 %v20373_v26  ;;  %14261 = vmatpush1.bf16.msra.mxu1 %v20376_v58  ;;  %v20462_v26 = vld [vmem:[%s22188_s16 + $0x21ec] ss:$16 sps:$4 sm:$0xff]   ;;  %v496_v58 = vadd.s32 %v22262_v50, %v436_v49 }
 0x4c1   : > { %13032 = vmatprep.subr.bf16.mxu0 %v20381_v59  ;;  %14262 = vmatprep.subr.bf16.mxu1 %v20384_v32  ;;  %v23545_v59 = vrot.slane %v748_v51, %v22267_v53  ;;  %v20460_v32 = vld [vmem:[%s22188_s16 + $0x21e8] ss:$16 sps:$4 sm:$0xff]   ;;  %v20534_v49 = vld [vmem:[%s22188_s16 + $0x236c] ss:$16 sps:$4 sm:$0xff]   ;;  %v20529_v51 = vld [vmem:[%s22188_s16 + $0x2360] ss:$16 sps:$4 sm:$0xff]  }
 0x4c2   : > { %vm555_vm2 = vcmp.lt.s32.totalorder %v496_v58, 30000  ;;  %v20543_v58 = vld [vmem:[%s22188_s16 + $0x23a4] ss:$16 sps:$4 sm:$0xff]  }
 0x4c3   : > { %vm17821_vm3 = vmpackc.low %vm555_vm2, %vm555_vm2 }
 0x4c4   : > { %13033 = vmatpush1.bf16.msra.mxu0 %v20379_v61  ;;  %14263 = vmatpush1.bf16.msra.mxu1 %v20382_v62  ;;  %v499_v61 = vadd.s32 %v22262_v50, %v439_v56  ;;  %v20465_v62 = vld [vmem:[%s22188_s16 + $0x2204] ss:$16 sps:$4 sm:$0xff]   ;;  %v20540_v56 = vld [vmem:[%s22188_s16 + $0x238c] ss:$16 sps:$4 sm:$0xff]  }
 0x4c5   : > { %13034 = vmatprep.subr.bf16.mxu0 %v20387_v31  ;;  %14264 = vmatprep.subr.bf16.mxu1 %v20390_v63  ;;  %v20468_v31 = vld [vmem:[%s22188_s16 + $0x220c] ss:$16 sps:$4 sm:$0xff]   ;;  %v764_v63 = vcombine.high %v23545_v59, %v23545_v59 }
 0x4c6   : > { %vm558_vm4 = vcmp.lt.s32.totalorder %v499_v61, 30000  ;;  %v20544_v61 = vld [vmem:[%s22188_s16 + $0x23a8] ss:$16 sps:$4 sm:$0xff]  }
 0x4c7   : > { %vm17824_vm5 = vmpackc.low %vm558_vm4, %vm558_vm4 }
 0x4c8   : > { %13035 = vmatpush1.bf16.msra.mxu0 %v20385_v16  ;;  %14265 = vmatpush1.bf16.msra.mxu1 %v20388_v1  ;;  %v17822_v16 = vpack.c.bf16 %v23468_v38, %v23468_v38  ;;  %v20463_v1 = vld [vmem:[%s22188_s16 + $0x2200] ss:$16 sps:$4 sm:$0xff]  }
 0x4c9   : > { %13036 = vmatprep.subr.bf16.mxu0 %v20393_v2  ;;  %14266 = vmatprep.subr.bf16.mxu1 %v20396_v3  ;;  %v20466_v2 = vld [vmem:[%s22188_s16 + $0x2208] ss:$16 sps:$4 sm:$0xff]   ;;  %v20471_v3 = vld [vmem:[%s22188_s16 + $0x2224] ss:$16 sps:$4 sm:$0xff]   ;;  %v20469_v38 = vld [vmem:[%s22188_s16 + $0x2220] ss:$16 sps:$4 sm:$0xff]  }
 0x4cc   : > { %13037 = vmatpush1.bf16.msra.mxu0 %v20391_v37  ;;  %14267 = vmatpush1.bf16.msra.mxu1 %v20394_v4  ;;  %v20474_v37 = vld [vmem:[%s22188_s16 + $0x222c] ss:$16 sps:$4 sm:$0xff]   ;;  %v17825_v4 = vpack.c.bf16 %v764_v63, %v764_v63  ;;  %v438_v63 = vadd.s32 4352, %v22251_v41 }
 0x4cd   : > { %13038 = vmatprep.subr.bf16.mxu0 %v20399_v6  ;;  %14268 = vmatprep.subr.bf16.mxu1 %v20402_v7  ;;  %v20472_v6 = vld [vmem:[%s22188_s16 + $0x2228] ss:$16 sps:$4 sm:$0xff]   ;;  %v20477_v7 = vld [vmem:[%s22188_s16 + $0x2244] ss:$16 sps:$4 sm:$0xff]  }
 0x4d0   : > { %13039 = vmatpush1.bf16.msra.mxu0 %v20397_v8  ;;  %14269 = vmatpush1.bf16.msra.mxu1 %v20400_v46  ;;  %v20480_v8 = vld [vmem:[%s22188_s16 + $0x224c] ss:$16 sps:$4 sm:$0xff]   ;;  %v20475_v46 = vld [vmem:[%s22188_s16 + $0x2240] ss:$16 sps:$4 sm:$0xff]  }
 0x4d1   : > { %13040 = vmatprep.subr.bf16.mxu0 %v20405_v9  ;;  %14270 = vmatprep.subr.bf16.mxu1 %v20408_v47  ;;  %v20478_v9 = vld [vmem:[%s22188_s16 + $0x2248] ss:$16 sps:$4 sm:$0xff]   ;;  %v20483_v47 = vld [vmem:[%s22188_s16 + $0x2264] ss:$16 sps:$4 sm:$0xff]  }
 0x4d4   : > { %13041 = vmatpush1.bf16.msra.mxu0 %v20403_v12  ;;  %14271 = vmatpush1.bf16.msra.mxu1 %v20406_v13  ;;  %v20486_v12 = vld [vmem:[%s22188_s16 + $0x226c] ss:$16 sps:$4 sm:$0xff]   ;;  %v20481_v13 = vld [vmem:[%s22188_s16 + $0x2260] ss:$16 sps:$4 sm:$0xff]  }
 0x4d5   : > { %13042 = vmatprep.subr.bf16.mxu0 %v20411_v14  ;;  %14272 = vmatprep.subr.bf16.mxu1 %v20414_v15  ;;  %v20484_v14 = vld [vmem:[%s22188_s16 + $0x2268] ss:$16 sps:$4 sm:$0xff]   ;;  %v20489_v15 = vld [vmem:[%s22188_s16 + $0x2284] ss:$16 sps:$4 sm:$0xff]  }
 0x4d8   : > { %13043 = vmatpush1.bf16.msra.mxu0 %v20409_v54  ;;  %14273 = vmatpush1.bf16.msra.mxu1 %v20412_v18  ;;  %v20492_v54 = vld [vmem:[%s22188_s16 + $0x228c] ss:$16 sps:$4 sm:$0xff]   ;;  %v20487_v18 = vld [vmem:[%s22188_s16 + $0x2280] ss:$16 sps:$4 sm:$0xff]  }
 0x4d9   : > { %13044 = vmatprep.subr.bf16.mxu0 %v20417_v19  ;;  %14274 = vmatprep.subr.bf16.mxu1 %v20420_v20  ;;  %v20490_v19 = vld [vmem:[%s22188_s16 + $0x2288] ss:$16 sps:$4 sm:$0xff]   ;;  %v20495_v20 = vld [vmem:[%s22188_s16 + $0x22a4] ss:$16 sps:$4 sm:$0xff]  }
 0x4dc   : > { %13045 = vmatpush1.bf16.msra.mxu0 %v20415_v21  ;;  %14275 = vmatpush1.bf16.msra.mxu1 %v20418_v60  ;;  %v20498_v21 = vld [vmem:[%s22188_s16 + $0x22ac] ss:$16 sps:$4 sm:$0xff]   ;;  %v20493_v60 = vld [vmem:[%s22188_s16 + $0x22a0] ss:$16 sps:$4 sm:$0xff]  }
 0x4dd   : > { %13046 = vmatprep.subr.bf16.mxu0 %v20423_v23  ;;  %14276 = vmatprep.subr.bf16.mxu1 %v20426_v24  ;;  %v20496_v23 = vld [vmem:[%s22188_s16 + $0x22a8] ss:$16 sps:$4 sm:$0xff]   ;;  %v20501_v24 = vld [vmem:[%s22188_s16 + $0x22c4] ss:$16 sps:$4 sm:$0xff]  }
 0x4e0   : > { %13047 = vmatpush1.bf16.msra.mxu0 %v20421_v0  ;;  %14277 = vmatpush1.bf16.msra.mxu1 %v20424_v25  ;;  %v20504_v0 = vld [vmem:[%s22188_s16 + $0x22cc] ss:$16 sps:$4 sm:$0xff]   ;;  %v20499_v25 = vld [vmem:[%s22188_s16 + $0x22c0] ss:$16 sps:$4 sm:$0xff]  }
 0x4e1   : > { %13048 = vmatprep.subr.bf16.mxu0 %v20429_v39  ;;  %14278 = vmatprep.subr.bf16.mxu1 %v20432_v27  ;;  %v20502_v39 = vld [vmem:[%s22188_s16 + $0x22c8] ss:$16 sps:$4 sm:$0xff]   ;;  %v20507_v27 = vld [vmem:[%s22188_s16 + $0x22e4] ss:$16 sps:$4 sm:$0xff]  }
 0x4e4   : > { %13049 = vmatpush1.bf16.msra.mxu0 %v20427_v28  ;;  %14279 = vmatpush1.bf16.msra.mxu1 %v20430_v29  ;;  %v20510_v28 = vld [vmem:[%s22188_s16 + $0x22ec] ss:$16 sps:$4 sm:$0xff]   ;;  %v20505_v29 = vld [vmem:[%s22188_s16 + $0x22e0] ss:$16 sps:$4 sm:$0xff]  }
 0x4e5   : > { %13050 = vmatprep.subr.bf16.mxu0 %v20435_v5  ;;  %14280 = vmatprep.subr.bf16.mxu1 %v20438_v30  ;;  %v20508_v5 = vld [vmem:[%s22188_s16 + $0x22e8] ss:$16 sps:$4 sm:$0xff]   ;;  %v20513_v30 = vld [vmem:[%s22188_s16 + $0x2304] ss:$16 sps:$4 sm:$0xff]  }
 0x4e8   : > { %13051 = vmatpush1.bf16.msra.mxu0 %v20433_v33  ;;  %14281 = vmatpush1.bf16.msra.mxu1 %v20436_v34  ;;  %v20516_v33 = vld [vmem:[%s22188_s16 + $0x230c] ss:$16 sps:$4 sm:$0xff]   ;;  %v20511_v34 = vld [vmem:[%s22188_s16 + $0x2300] ss:$16 sps:$4 sm:$0xff]  }
 0x4e9   : > { %13052 = vmatprep.subr.bf16.mxu0 %v20441_v35  ;;  %14282 = vmatprep.subr.bf16.mxu1 %v20444_v10  ;;  %v20514_v35 = vld [vmem:[%s22188_s16 + $0x2308] ss:$16 sps:$4 sm:$0xff]   ;;  %v20519_v10 = vld [vmem:[%s22188_s16 + $0x2324] ss:$16 sps:$4 sm:$0xff]  }
 0x4ec   : > { %13053 = vmatpush1.bf16.msra.mxu0 %v20439_v36  ;;  %14283 = vmatpush1.bf16.msra.mxu1 %v20442_v11  ;;  %v20522_v36 = vld [vmem:[%s22188_s16 + $0x232c] ss:$16 sps:$4 sm:$0xff]   ;;  %v20517_v11 = vld [vmem:[%s22188_s16 + $0x2320] ss:$16 sps:$4 sm:$0xff]  }
 0x4ed   : > { %13054 = vmatprep.subr.bf16.mxu0 %v20447_v40  ;;  %14284 = vmatprep.subr.bf16.mxu1 %v20450_v42  ;;  %v20520_v40 = vld [vmem:[%s22188_s16 + $0x2328] ss:$16 sps:$4 sm:$0xff]   ;;  %v20525_v42 = vld [vmem:[%s22188_s16 + $0x2344] ss:$16 sps:$4 sm:$0xff]  }
 0x4f0   : > { %13055 = vmatpush1.bf16.msra.mxu0 %v20445_v43  ;;  %14285 = vmatpush1.bf16.msra.mxu1 %v20448_v44  ;;  %v20528_v43 = vld [vmem:[%s22188_s16 + $0x234c] ss:$16 sps:$4 sm:$0xff]   ;;  %v20523_v44 = vld [vmem:[%s22188_s16 + $0x2340] ss:$16 sps:$4 sm:$0xff]  }
 0x4f1   : > { %13056 = vmatprep.subr.bf16.mxu0 %v20453_v17  ;;  %14286 = vmatprep.subr.bf16.mxu1 %v20456_v48  ;;  %v20526_v17 = vld [vmem:[%s22188_s16 + $0x2348] ss:$16 sps:$4 sm:$0xff]   ;;  %v20531_v48 = vld [vmem:[%s22188_s16 + $0x2364] ss:$16 sps:$4 sm:$0xff]  }
 0x4f4   : > { %13057 = vmatpush1.bf16.msra.mxu0 %v20451_v52  ;;  %14287 = vmatpush1.bf16.msra.mxu1 %v20454_v22  ;;  %v20532_v52 = vld [vmem:[%s22188_s16 + $0x2368] ss:$16 sps:$4 sm:$0xff]   ;;  %v20537_v22 = vld [vmem:[%s22188_s16 + $0x2384] ss:$16 sps:$4 sm:$0xff]  }
 0x4f5   : > { %13058 = vmatprep.subr.bf16.mxu0 %v20459_v57  ;;  %14288 = vmatprep.subr.bf16.mxu1 %v20462_v26  ;;  %v20535_v57 = vld [vmem:[%s22188_s16 + $0x2380] ss:$16 sps:$4 sm:$0xff]   ;;  %v20538_v26 = vld [vmem:[%s22188_s16 + $0x2388] ss:$16 sps:$4 sm:$0xff]  }
 0x4f8   : > { %13059 = vmatpush1.bf16.msra.mxu0 %v20457_v55  ;;  %14289 = vmatpush1.bf16.msra.mxu1 %v20460_v32  ;;  %v20546_v55 = vld [vmem:[%s22188_s16 + $0x23ac] ss:$16 sps:$4 sm:$0xff]   ;;  %v20541_v32 = vld [vmem:[%s22188_s16 + $0x23a0] ss:$16 sps:$4 sm:$0xff]  }
 0x4f9   : > { %13069 = vmatprep.subr.bf16.mxu0 %v20465_v62  ;;  %14299 = vmatprep.subr.bf16.mxu1 %v20468_v31  ;;  %v20549_v62 = vld [vmem:[%s22188_s16 + $0x23c4] ss:$16 sps:$4 sm:$0xff]   ;;  %v20552_v31 = vld [vmem:[%s22188_s16 + $0x23cc] ss:$16 sps:$4 sm:$0xff]  }
 0x4fb   : > { %17823 = vmatmul.mubr.msk.bf16.vlgmr.msra.gmra.mrb[0].mxu0 %vm17821_vm3, %v17822_v16  ;;  %18000 = vmatmul.mubr.msk.bf16.vlgmr.msra.gmra.mrb[0].mxu1 %vm17821_vm3, %v17822_v16  ;;  %v23614_v16 = vld [vmem:[%s22210_s15 + $0x48] sm:$0xff] }
 0x4fc   : > { %13070 = vmatpush1.bf16.msra.mxu0 %v20463_v1  ;;  %14300 = vmatpush1.bf16.msra.mxu1 %v20466_v2  ;;  %v20547_v1 = vld [vmem:[%s22188_s16 + $0x23c0] ss:$16 sps:$4 sm:$0xff]   ;;  %v20550_v2 = vld [vmem:[%s22188_s16 + $0x23c8] ss:$16 sps:$4 sm:$0xff]  }
 0x4fd   : > { %13071 = vmatprep.subr.bf16.mxu0 %v20471_v3  ;;  %14301 = vmatprep.subr.bf16.mxu1 %v20474_v37  ;;  %v441_v3 = vadd.s32 4736, %v22251_v41  ;;  %v20555_v37 = vld [vmem:[%s22188_s16 + $0x23e4] ss:$16 sps:$4 sm:$0xff]  }
 0x4fe   : > { %17826 = vmatprep.mubr.msk.bf16.mxu0 %vm17824_vm5, %v17825_v4  ;;  %18003 = vmatprep.mubr.msk.bf16.mxu1 %vm17824_vm5, %v17825_v4  ;;  %v20558_v4 = vld [vmem:[%s22188_s16 + $0x23ec] ss:$16 sps:$4 sm:$0xff]  }
 0x500   : > { %13072 = vmatpush1.bf16.msra.mxu0 %v20469_v38  ;;  %14302 = vmatpush1.bf16.msra.mxu1 %v20472_v6  ;;  %v498_v38 = vadd.s32 %v22262_v50, %v438_v63  ;;  %v23624_v6 = vrot.slane %v23614_v16, %v22267_v53  ;;  %v20631_v63 = vld [vmem:[%s22188_s16 + $0x256c] ss:$16 sps:$4 sm:$0xff]  }
 0x501   : > { %13073 = vmatprep.subr.bf16.mxu0 %v20477_v7  ;;  %14303 = vmatprep.subr.bf16.mxu1 %v20480_v8  ;;  %v20553_v7 = vld [vmem:[%s22188_s16 + $0x23e0] ss:$16 sps:$4 sm:$0xff]   ;;  %v20556_v8 = vld [vmem:[%s22188_s16 + $0x23e8] ss:$16 sps:$4 sm:$0xff]  }
 0x502   : > { %vm557_vm6 = vcmp.lt.s32.totalorder %v498_v38, 30000  ;;  %v20635_v38 = vld [vmem:[%s22188_s16 + $0x2588] ss:$16 sps:$4 sm:$0xff]  }
 0x503   : > { %vm17827_vm7 = vmpackc.low %vm557_vm6, %vm557_vm6 }
 0x504   : > { %13074 = vmatpush1.bf16.msra.mxu0 %v20475_v46  ;;  %14304 = vmatpush1.bf16.msra.mxu1 %v20478_v9  ;;  %v501_v46 = vadd.s32 %v22262_v50, %v441_v3  ;;  %v20562_v9 = vld [vmem:[%s22188_s16 + $0x2404] ss:$16 sps:$4 sm:$0xff]  }
 0x505   : > { %13075 = vmatprep.subr.bf16.mxu0 %v20483_v47  ;;  %14305 = vmatprep.subr.bf16.mxu1 %v20486_v12  ;;  %v20565_v47 = vld [vmem:[%s22188_s16 + $0x240c] ss:$16 sps:$4 sm:$0xff]   ;;  %v780_v12 = vcombine.high %v23624_v6, %v23624_v6  ;;  %v20634_v3 = vld [vmem:[%s22188_s16 + $0x2584] ss:$16 sps:$4 sm:$0xff]  }
 0x506   : > { %vm560_vm8 = vcmp.lt.s32.totalorder %v501_v46, 30000  ;;  %v20638_v46 = vld [vmem:[%s22188_s16 + $0x25a0] ss:$16 sps:$4 sm:$0xff]  }
 0x507   : > { %vm17830_vm9 = vmpackc.low %vm560_vm8, %vm560_vm8 }
 0x508   : > { %13076 = vmatpush1.bf16.msra.mxu0 %v20481_v13  ;;  %14306 = vmatpush1.bf16.msra.mxu1 %v20484_v14  ;;  %v17828_v13 = vpack.c.bf16 %v23545_v59, %v23545_v59  ;;  %v20560_v14 = vld [vmem:[%s22188_s16 + $0x2400] ss:$16 sps:$4 sm:$0xff]  }
 0x509   : > { %13077 = vmatprep.subr.bf16.mxu0 %v20489_v15  ;;  %14307 = vmatprep.subr.bf16.mxu1 %v20492_v54  ;;  %v20563_v15 = vld [vmem:[%s22188_s16 + $0x2408] ss:$16 sps:$4 sm:$0xff]   ;;  %v20568_v54 = vld [vmem:[%s22188_s16 + $0x2424] ss:$16 sps:$4 sm:$0xff]   ;;  %v20566_v59 = vld [vmem:[%s22188_s16 + $0x2420] ss:$16 sps:$4 sm:$0xff]  }
 0x50c   : > { %13078 = vmatpush1.bf16.msra.mxu0 %v20487_v18  ;;  %14308 = vmatpush1.bf16.msra.mxu1 %v20490_v19  ;;  %v20571_v18 = vld [vmem:[%s22188_s16 + $0x242c] ss:$16 sps:$4 sm:$0xff]   ;;  %v17831_v19 = vpack.c.bf16 %v780_v12, %v780_v12 }
 0x50d   : > { %13079 = vmatprep.subr.bf16.mxu0 %v20495_v20  ;;  %14309 = vmatprep.subr.bf16.mxu1 %v20498_v21  ;;  %v20569_v20 = vld [vmem:[%s22188_s16 + $0x2428] ss:$16 sps:$4 sm:$0xff]   ;;  %v20574_v21 = vld [vmem:[%s22188_s16 + $0x2444] ss:$16 sps:$4 sm:$0xff]   ;;  %v20649_v12 = vld [vmem:[%s22188_s16 + $0x25cc] ss:$16 sps:$4 sm:$0xff]  }
 0x510   : > { %13080 = vmatpush1.bf16.msra.mxu0 %v20493_v60  ;;  %14310 = vmatpush1.bf16.msra.mxu1 %v20496_v23  ;;  %v20577_v60 = vld [vmem:[%s22188_s16 + $0x244c] ss:$16 sps:$4 sm:$0xff]   ;;  %v20572_v23 = vld [vmem:[%s22188_s16 + $0x2440] ss:$16 sps:$4 sm:$0xff]  }
 0x511   : > { %13081 = vmatprep.subr.bf16.mxu0 %v20501_v24  ;;  %14311 = vmatprep.subr.bf16.mxu1 %v20504_v0  ;;  %v20575_v24 = vld [vmem:[%s22188_s16 + $0x2448] ss:$16 sps:$4 sm:$0xff]   ;;  %v20580_v0 = vld [vmem:[%s22188_s16 + $0x2464] ss:$16 sps:$4 sm:$0xff]  }
 0x514   : > { %13082 = vmatpush1.bf16.msra.mxu0 %v20499_v25  ;;  %14312 = vmatpush1.bf16.msra.mxu1 %v20502_v39  ;;  %v20583_v25 = vld [vmem:[%s22188_s16 + $0x246c] ss:$16 sps:$4 sm:$0xff]   ;;  %v20578_v39 = vld [vmem:[%s22188_s16 + $0x2460] ss:$16 sps:$4 sm:$0xff]  }
 0x515   : > { %13083 = vmatprep.subr.bf16.mxu0 %v20507_v27  ;;  %14313 = vmatprep.subr.bf16.mxu1 %v20510_v28  ;;  %v20581_v27 = vld [vmem:[%s22188_s16 + $0x2468] ss:$16 sps:$4 sm:$0xff]   ;;  %v20586_v28 = vld [vmem:[%s22188_s16 + $0x2484] ss:$16 sps:$4 sm:$0xff]  }
 0x518   : > { %13084 = vmatpush1.bf16.msra.mxu0 %v20505_v29  ;;  %14314 = vmatpush1.bf16.msra.mxu1 %v20508_v5  ;;  %v20589_v29 = vld [vmem:[%s22188_s16 + $0x248c] ss:$16 sps:$4 sm:$0xff]   ;;  %v20584_v5 = vld [vmem:[%s22188_s16 + $0x2480] ss:$16 sps:$4 sm:$0xff]  }
 0x519   : > { %13085 = vmatprep.subr.bf16.mxu0 %v20513_v30  ;;  %14315 = vmatprep.subr.bf16.mxu1 %v20516_v33  ;;  %v20587_v30 = vld [vmem:[%s22188_s16 + $0x2488] ss:$16 sps:$4 sm:$0xff]   ;;  %v20592_v33 = vld [vmem:[%s22188_s16 + $0x24a4] ss:$16 sps:$4 sm:$0xff]  }
 0x51c   : > { %13086 = vmatpush1.bf16.msra.mxu0 %v20511_v34  ;;  %14316 = vmatpush1.bf16.msra.mxu1 %v20514_v35  ;;  %v20595_v34 = vld [vmem:[%s22188_s16 + $0x24ac] ss:$16 sps:$4 sm:$0xff]   ;;  %v20590_v35 = vld [vmem:[%s22188_s16 + $0x24a0] ss:$16 sps:$4 sm:$0xff]  }
 0x51d   : > { %13087 = vmatprep.subr.bf16.mxu0 %v20519_v10  ;;  %14317 = vmatprep.subr.bf16.mxu1 %v20522_v36  ;;  %v20593_v10 = vld [vmem:[%s22188_s16 + $0x24a8] ss:$16 sps:$4 sm:$0xff]   ;;  %v20598_v36 = vld [vmem:[%s22188_s16 + $0x24c4] ss:$16 sps:$4 sm:$0xff]  }
 0x520   : > { %13088 = vmatpush1.bf16.msra.mxu0 %v20517_v11  ;;  %14318 = vmatpush1.bf16.msra.mxu1 %v20520_v40  ;;  %v20601_v11 = vld [vmem:[%s22188_s16 + $0x24cc] ss:$16 sps:$4 sm:$0xff]   ;;  %v20596_v40 = vld [vmem:[%s22188_s16 + $0x24c0] ss:$16 sps:$4 sm:$0xff]  }
 0x521   : > { %13089 = vmatprep.subr.bf16.mxu0 %v20525_v42  ;;  %14319 = vmatprep.subr.bf16.mxu1 %v20528_v43  ;;  %v20599_v42 = vld [vmem:[%s22188_s16 + $0x24c8] ss:$16 sps:$4 sm:$0xff]   ;;  %v20604_v43 = vld [vmem:[%s22188_s16 + $0x24e4] ss:$16 sps:$4 sm:$0xff]  }
 0x524   : > { %13090 = vmatpush1.bf16.msra.mxu0 %v20523_v44  ;;  %14320 = vmatpush1.bf16.msra.mxu1 %v20526_v17  ;;  %v20607_v44 = vld [vmem:[%s22188_s16 + $0x24ec] ss:$16 sps:$4 sm:$0xff]   ;;  %v20602_v17 = vld [vmem:[%s22188_s16 + $0x24e0] ss:$16 sps:$4 sm:$0xff]  }
 0x525   : > { %13091 = vmatprep.subr.bf16.mxu0 %v20531_v48  ;;  %14321 = vmatprep.subr.bf16.mxu1 %v20534_v49  ;;  %v20605_v48 = vld [vmem:[%s22188_s16 + $0x24e8] ss:$16 sps:$4 sm:$0xff]   ;;  %v20610_v49 = vld [vmem:[%s22188_s16 + $0x2504] ss:$16 sps:$4 sm:$0xff]  }
 0x528   : > { %13092 = vmatpush1.bf16.msra.mxu0 %v20529_v51  ;;  %14322 = vmatpush1.bf16.msra.mxu1 %v20532_v52  ;;  %v20613_v51 = vld [vmem:[%s22188_s16 + $0x250c] ss:$16 sps:$4 sm:$0xff]   ;;  %v20608_v52 = vld [vmem:[%s22188_s16 + $0x2500] ss:$16 sps:$4 sm:$0xff]  }
 0x529   : > { %13093 = vmatprep.subr.bf16.mxu0 %v20537_v22  ;;  %14323 = vmatprep.subr.bf16.mxu1 %v20540_v56  ;;  %v20611_v22 = vld [vmem:[%s22188_s16 + $0x2508] ss:$16 sps:$4 sm:$0xff]   ;;  %v20616_v56 = vld [vmem:[%s22188_s16 + $0x2524] ss:$16 sps:$4 sm:$0xff]  }
 0x52c   : > { %13094 = vmatpush1.bf16.msra.mxu0 %v20535_v57  ;;  %14324 = vmatpush1.bf16.msra.mxu1 %v20538_v26  ;;  %v20619_v57 = vld [vmem:[%s22188_s16 + $0x252c] ss:$16 sps:$4 sm:$0xff]   ;;  %v20614_v26 = vld [vmem:[%s22188_s16 + $0x2520] ss:$16 sps:$4 sm:$0xff]  }
 0x52d   : > { %13095 = vmatprep.subr.bf16.mxu0 %v20543_v58  ;;  %14325 = vmatprep.subr.bf16.mxu1 %v20546_v55  ;;  %v20617_v58 = vld [vmem:[%s22188_s16 + $0x2528] ss:$16 sps:$4 sm:$0xff]   ;;  %v20622_v55 = vld [vmem:[%s22188_s16 + $0x2544] ss:$16 sps:$4 sm:$0xff]  }
 0x530   : > { %13096 = vmatpush1.bf16.msra.mxu0 %v20541_v32  ;;  %14326 = vmatpush1.bf16.msra.mxu1 %v20544_v61  ;;  %v20625_v32 = vld [vmem:[%s22188_s16 + $0x254c] ss:$16 sps:$4 sm:$0xff]   ;;  %v20620_v61 = vld [vmem:[%s22188_s16 + $0x2540] ss:$16 sps:$4 sm:$0xff]  }
 0x531   : > { %13097 = vmatprep.subr.bf16.mxu0 %v20549_v62  ;;  %14327 = vmatprep.subr.bf16.mxu1 %v20552_v31  ;;  %v20623_v62 = vld [vmem:[%s22188_s16 + $0x2548] ss:$16 sps:$4 sm:$0xff]   ;;  %v20628_v31 = vld [vmem:[%s22188_s16 + $0x2564] ss:$16 sps:$4 sm:$0xff]  }
 0x534   : > { %13098 = vmatpush1.bf16.msra.mxu0 %v20547_v1  ;;  %14328 = vmatpush1.bf16.msra.mxu1 %v20550_v2  ;;  %v20626_v1 = vld [vmem:[%s22188_s16 + $0x2560] ss:$16 sps:$4 sm:$0xff]   ;;  %v20629_v2 = vld [vmem:[%s22188_s16 + $0x2568] ss:$16 sps:$4 sm:$0xff]  }
 0x535   : > { %13099 = vmatprep.subr.bf16.mxu0 %v20555_v37  ;;  %14329 = vmatprep.subr.bf16.mxu1 %v20558_v4  ;;  %v20637_v37 = vld [vmem:[%s22188_s16 + $0x258c] ss:$16 sps:$4 sm:$0xff]   ;;  %v20632_v4 = vld [vmem:[%s22188_s16 + $0x2580] ss:$16 sps:$4 sm:$0xff]  }
 0x538   : > { %13100 = vmatpush1.bf16.msra.mxu0 %v20553_v7  ;;  %14330 = vmatpush1.bf16.msra.mxu1 %v20556_v8  ;;  %v20640_v7 = vld [vmem:[%s22188_s16 + $0x25a4] ss:$16 sps:$4 sm:$0xff]   ;;  %v20643_v8 = vld [vmem:[%s22188_s16 + $0x25ac] ss:$16 sps:$4 sm:$0xff]  }
 0x539   : > { %13110 = vmatprep.subr.bf16.mxu0 %v20562_v9  ;;  %14340 = vmatprep.subr.bf16.mxu1 %v20565_v47  ;;  %v20641_v9 = vld [vmem:[%s22188_s16 + $0x25a8] ss:$16 sps:$4 sm:$0xff]   ;;  %v20646_v47 = vld [vmem:[%s22188_s16 + $0x25c4] ss:$16 sps:$4 sm:$0xff]  }
 0x53b   : > { %17829 = vmatmul.mubr.msk.bf16.vlgmr.msra.gmra.mrb[0].mxu0 %vm17827_vm7, %v17828_v13  ;;  %18006 = vmatmul.mubr.msk.bf16.vlgmr.msra.gmra.mrb[0].mxu1 %vm17827_vm7, %v17828_v13  ;;  %v440_v13 = vadd.s32 4608, %v22251_v41 }
 0x53c   : > { %13111 = vmatpush1.bf16.msra.mxu0 %v20560_v14  ;;  %14341 = vmatpush1.bf16.msra.mxu1 %v20563_v15  ;;  %v765_v14 = vcombine.high %v23614_v16, %v23614_v16  ;;  %v20644_v15 = vld [vmem:[%s22188_s16 + $0x25c0] ss:$16 sps:$4 sm:$0xff]  }
 0x53d   : > { %13112 = vmatprep.subr.bf16.mxu0 %v20568_v54  ;;  %14342 = vmatprep.subr.bf16.mxu1 %v20571_v18  ;;  %v20647_v54 = vld [vmem:[%s22188_s16 + $0x25c8] ss:$16 sps:$4 sm:$0xff]   ;;  %v443_v18 = vadd.s32 4992, %v22251_v41  ;;  %v20650_v16 = vld [vmem:[%s22188_s16 + $0x25e0] ss:$16 sps:$4 sm:$0xff]  }
 0x53e   : > { %17832 = vmatprep.mubr.msk.bf16.mxu0 %vm17830_vm9, %v17831_v19  ;;  %18009 = vmatprep.mubr.msk.bf16.mxu1 %vm17830_vm9, %v17831_v19  ;;  %v20652_v19 = vld [vmem:[%s22188_s16 + $0x25e4] ss:$16 sps:$4 sm:$0xff]  }
 0x540   : > { %13113 = vmatpush1.bf16.msra.mxu0 %v20566_v59  ;;  %14343 = vmatpush1.bf16.msra.mxu1 %v20569_v20  ;;  %v20655_v59 = vld [vmem:[%s22188_s16 + $0x25ec] ss:$16 sps:$4 sm:$0xff]   ;;  %v500_v20 = vadd.s32 %v22262_v50, %v440_v13 }
 0x541   : > { %13114 = vmatprep.subr.bf16.mxu0 %v20574_v21  ;;  %14344 = vmatprep.subr.bf16.mxu1 %v20577_v60  ;;  %v23701_v21 = vrot.slane %v765_v14, %v22267_v53  ;;  %v20653_v60 = vld [vmem:[%s22188_s16 + $0x25e8] ss:$16 sps:$4 sm:$0xff]   ;;  %v20727_v13 = vld [vmem:[%s22188_s16 + $0x276c] ss:$16 sps:$4 sm:$0xff]   ;;  %v20722_v14 = vld [vmem:[%s22188_s16 + $0x2760] ss:$16 sps:$4 sm:$0xff]  }
 0x542   : > { %vm559_vm10 = vcmp.lt.s32.totalorder %v500_v20, 30000  ;;  %v20736_v20 = vld [vmem:[%s22188_s16 + $0x27a4] ss:$16 sps:$4 sm:$0xff]  }
 0x543   : > { %vm17833_vm11 = vmpackc.low %vm559_vm10, %vm559_vm10 }
 0x544   : > { %13115 = vmatpush1.bf16.msra.mxu0 %v20572_v23  ;;  %14345 = vmatpush1.bf16.msra.mxu1 %v20575_v24  ;;  %v503_v23 = vadd.s32 %v22262_v50, %v443_v18  ;;  %v20658_v24 = vld [vmem:[%s22188_s16 + $0x2604] ss:$16 sps:$4 sm:$0xff]   ;;  %v20733_v18 = vld [vmem:[%s22188_s16 + $0x278c] ss:$16 sps:$4 sm:$0xff]  }
 0x545   : > { %13116 = vmatprep.subr.bf16.mxu0 %v20580_v0  ;;  %14346 = vmatprep.subr.bf16.mxu1 %v20583_v25  ;;  %v20661_v0 = vld [vmem:[%s22188_s16 + $0x260c] ss:$16 sps:$4 sm:$0xff]   ;;  %v781_v25 = vcombine.high %v23701_v21, %v23701_v21 }
 0x546   : > { %vm562_vm12 = vcmp.lt.s32.totalorder %v503_v23, 30000  ;;  %v20737_v23 = vld [vmem:[%s22188_s16 + $0x27a8] ss:$16 sps:$4 sm:$0xff]  }
 0x547   : > { %vm17836_vm13 = vmpackc.low %vm562_vm12, %vm562_vm12 }
 0x548   : > { %13117 = vmatpush1.bf16.msra.mxu0 %v20578_v39  ;;  %14347 = vmatpush1.bf16.msra.mxu1 %v20581_v27  ;;  %v17834_v39 = vpack.c.bf16 %v23624_v6, %v23624_v6  ;;  %v20656_v27 = vld [vmem:[%s22188_s16 + $0x2600] ss:$16 sps:$4 sm:$0xff]  }
 0x549   : > { %13118 = vmatprep.subr.bf16.mxu0 %v20586_v28  ;;  %14348 = vmatprep.subr.bf16.mxu1 %v20589_v29  ;;  %v20659_v28 = vld [vmem:[%s22188_s16 + $0x2608] ss:$16 sps:$4 sm:$0xff]   ;;  %v20664_v29 = vld [vmem:[%s22188_s16 + $0x2624] ss:$16 sps:$4 sm:$0xff]   ;;  %v20662_v6 = vld [vmem:[%s22188_s16 + $0x2620] ss:$16 sps:$4 sm:$0xff]  }
 0x54c   : > { %13119 = vmatpush1.bf16.msra.mxu0 %v20584_v5  ;;  %14349 = vmatpush1.bf16.msra.mxu1 %v20587_v30  ;;  %v20667_v5 = vld [vmem:[%s22188_s16 + $0x262c] ss:$16 sps:$4 sm:$0xff]   ;;  %v17837_v30 = vpack.c.bf16 %v781_v25, %v781_v25  ;;  %v442_v25 = vadd.s32 4864, %v22251_v41 }
 0x54d   : > { %13120 = vmatprep.subr.bf16.mxu0 %v20592_v33  ;;  %14350 = vmatprep.subr.bf16.mxu1 %v20595_v34  ;;  %v20665_v33 = vld [vmem:[%s22188_s16 + $0x2628] ss:$16 sps:$4 sm:$0xff]   ;;  %v20670_v34 = vld [vmem:[%s22188_s16 + $0x2644] ss:$16 sps:$4 sm:$0xff]  }
 0x550   : > { %13121 = vmatpush1.bf16.msra.mxu0 %v20590_v35  ;;  %14351 = vmatpush1.bf16.msra.mxu1 %v20593_v10  ;;  %v20673_v35 = vld [vmem:[%s22188_s16 + $0x264c] ss:$16 sps:$4 sm:$0xff]   ;;  %v20668_v10 = vld [vmem:[%s22188_s16 + $0x2640] ss:$16 sps:$4 sm:$0xff]  }
 0x551   : > { %13122 = vmatprep.subr.bf16.mxu0 %v20598_v36  ;;  %14352 = vmatprep.subr.bf16.mxu1 %v20601_v11  ;;  %v20671_v36 = vld [vmem:[%s22188_s16 + $0x2648] ss:$16 sps:$4 sm:$0xff]   ;;  %v20676_v11 = vld [vmem:[%s22188_s16 + $0x2664] ss:$16 sps:$4 sm:$0xff]  }
 0x554   : > { %13123 = vmatpush1.bf16.msra.mxu0 %v20596_v40  ;;  %14353 = vmatpush1.bf16.msra.mxu1 %v20599_v42  ;;  %v20679_v40 = vld [vmem:[%s22188_s16 + $0x266c] ss:$16 sps:$4 sm:$0xff]   ;;  %v20674_v42 = vld [vmem:[%s22188_s16 + $0x2660] ss:$16 sps:$4 sm:$0xff]  }
 0x555   : > { %13124 = vmatprep.subr.bf16.mxu0 %v20604_v43  ;;  %14354 = vmatprep.subr.bf16.mxu1 %v20607_v44  ;;  %v20677_v43 = vld [vmem:[%s22188_s16 + $0x2668] ss:$16 sps:$4 sm:$0xff]   ;;  %v20682_v44 = vld [vmem:[%s22188_s16 + $0x2684] ss:$16 sps:$4 sm:$0xff]  }
 0x558   : > { %13125 = vmatpush1.bf16.msra.mxu0 %v20602_v17  ;;  %14355 = vmatpush1.bf16.msra.mxu1 %v20605_v48  ;;  %v20685_v17 = vld [vmem:[%s22188_s16 + $0x268c] ss:$16 sps:$4 sm:$0xff]   ;;  %v20680_v48 = vld [vmem:[%s22188_s16 + $0x2680] ss:$16 sps:$4 sm:$0xff]  }
 0x559   : > { %13126 = vmatprep.subr.bf16.mxu0 %v20610_v49  ;;  %14356 = vmatprep.subr.bf16.mxu1 %v20613_v51  ;;  %v20683_v49 = vld [vmem:[%s22188_s16 + $0x2688] ss:$16 sps:$4 sm:$0xff]   ;;  %v20688_v51 = vld [vmem:[%s22188_s16 + $0x26a4] ss:$16 sps:$4 sm:$0xff]  }
 0x55c   : > { %13127 = vmatpush1.bf16.msra.mxu0 %v20608_v52  ;;  %14357 = vmatpush1.bf16.msra.mxu1 %v20611_v22  ;;  %v20691_v52 = vld [vmem:[%s22188_s16 + $0x26ac] ss:$16 sps:$4 sm:$0xff]   ;;  %v20686_v22 = vld [vmem:[%s22188_s16 + $0x26a0] ss:$16 sps:$4 sm:$0xff]  }
 0x55d   : > { %13128 = vmatprep.subr.bf16.mxu0 %v20616_v56  ;;  %14358 = vmatprep.subr.bf16.mxu1 %v20619_v57  ;;  %v20689_v56 = vld [vmem:[%s22188_s16 + $0x26a8] ss:$16 sps:$4 sm:$0xff]   ;;  %v20694_v57 = vld [vmem:[%s22188_s16 + $0x26c4] ss:$16 sps:$4 sm:$0xff]  }
 0x560   : > { %13129 = vmatpush1.bf16.msra.mxu0 %v20614_v26  ;;  %14359 = vmatpush1.bf16.msra.mxu1 %v20617_v58  ;;  %v20697_v26 = vld [vmem:[%s22188_s16 + $0x26cc] ss:$16 sps:$4 sm:$0xff]   ;;  %v20692_v58 = vld [vmem:[%s22188_s16 + $0x26c0] ss:$16 sps:$4 sm:$0xff]  }
 0x561   : > { %13130 = vmatprep.subr.bf16.mxu0 %v20622_v55  ;;  %14360 = vmatprep.subr.bf16.mxu1 %v20625_v32  ;;  %v20695_v55 = vld [vmem:[%s22188_s16 + $0x26c8] ss:$16 sps:$4 sm:$0xff]   ;;  %v20700_v32 = vld [vmem:[%s22188_s16 + $0x26e4] ss:$16 sps:$4 sm:$0xff]  }
 0x564   : > { %13131 = vmatpush1.bf16.msra.mxu0 %v20620_v61  ;;  %14361 = vmatpush1.bf16.msra.mxu1 %v20623_v62  ;;  %v20703_v61 = vld [vmem:[%s22188_s16 + $0x26ec] ss:$16 sps:$4 sm:$0xff]   ;;  %v20698_v62 = vld [vmem:[%s22188_s16 + $0x26e0] ss:$16 sps:$4 sm:$0xff]  }
 0x565   : > { %13132 = vmatprep.subr.bf16.mxu0 %v20628_v31  ;;  %14362 = vmatprep.subr.bf16.mxu1 %v20631_v63  ;;  %v20701_v31 = vld [vmem:[%s22188_s16 + $0x26e8] ss:$16 sps:$4 sm:$0xff]   ;;  %v20706_v63 = vld [vmem:[%s22188_s16 + $0x2704] ss:$16 sps:$4 sm:$0xff]  }
 0x568   : > { %13133 = vmatpush1.bf16.msra.mxu0 %v20626_v1  ;;  %14363 = vmatpush1.bf16.msra.mxu1 %v20629_v2  ;;  %v20709_v1 = vld [vmem:[%s22188_s16 + $0x270c] ss:$16 sps:$4 sm:$0xff]   ;;  %v20704_v2 = vld [vmem:[%s22188_s16 + $0x2700] ss:$16 sps:$4 sm:$0xff]  }
 0x569   : > { %13134 = vmatprep.subr.bf16.mxu0 %v20634_v3  ;;  %14364 = vmatprep.subr.bf16.mxu1 %v20637_v37  ;;  %v20707_v3 = vld [vmem:[%s22188_s16 + $0x2708] ss:$16 sps:$4 sm:$0xff]   ;;  %v20712_v37 = vld [vmem:[%s22188_s16 + $0x2724] ss:$16 sps:$4 sm:$0xff]  }
 0x56c   : > { %13135 = vmatpush1.bf16.msra.mxu0 %v20632_v4  ;;  %14365 = vmatpush1.bf16.msra.mxu1 %v20635_v38  ;;  %v20715_v4 = vld [vmem:[%s22188_s16 + $0x272c] ss:$16 sps:$4 sm:$0xff]   ;;  %v20710_v38 = vld [vmem:[%s22188_s16 + $0x2720] ss:$16 sps:$4 sm:$0xff]  }
 0x56d   : > { %13136 = vmatprep.subr.bf16.mxu0 %v20640_v7  ;;  %14366 = vmatprep.subr.bf16.mxu1 %v20643_v8  ;;  %v20713_v7 = vld [vmem:[%s22188_s16 + $0x2728] ss:$16 sps:$4 sm:$0xff]   ;;  %v20718_v8 = vld [vmem:[%s22188_s16 + $0x2744] ss:$16 sps:$4 sm:$0xff]  }
 0x570   : > { %13137 = vmatpush1.bf16.msra.mxu0 %v20638_v46  ;;  %14367 = vmatpush1.bf16.msra.mxu1 %v20641_v9  ;;  %v20721_v46 = vld [vmem:[%s22188_s16 + $0x274c] ss:$16 sps:$4 sm:$0xff]   ;;  %v20716_v9 = vld [vmem:[%s22188_s16 + $0x2740] ss:$16 sps:$4 sm:$0xff]  }
 0x571   : > { %13138 = vmatprep.subr.bf16.mxu0 %v20646_v47  ;;  %14368 = vmatprep.subr.bf16.mxu1 %v20649_v12  ;;  %v20719_v47 = vld [vmem:[%s22188_s16 + $0x2748] ss:$16 sps:$4 sm:$0xff]   ;;  %v20724_v12 = vld [vmem:[%s22188_s16 + $0x2764] ss:$16 sps:$4 sm:$0xff]  }
 0x574   : > { %13139 = vmatpush1.bf16.msra.mxu0 %v20644_v15  ;;  %14369 = vmatpush1.bf16.msra.mxu1 %v20647_v54  ;;  %v20725_v15 = vld [vmem:[%s22188_s16 + $0x2768] ss:$16 sps:$4 sm:$0xff]   ;;  %v20730_v54 = vld [vmem:[%s22188_s16 + $0x2784] ss:$16 sps:$4 sm:$0xff]  }
 0x575   : > { %13140 = vmatprep.subr.bf16.mxu0 %v20652_v19  ;;  %14370 = vmatprep.subr.bf16.mxu1 %v20655_v59  ;;  %v20728_v19 = vld [vmem:[%s22188_s16 + $0x2780] ss:$16 sps:$4 sm:$0xff]   ;;  %v20731_v59 = vld [vmem:[%s22188_s16 + $0x2788] ss:$16 sps:$4 sm:$0xff]  }
 0x578   : > { %13141 = vmatpush1.bf16.msra.mxu0 %v20650_v16  ;;  %14371 = vmatpush1.bf16.msra.mxu1 %v20653_v60  ;;  %v20739_v16 = vld [vmem:[%s22188_s16 + $0x27ac] ss:$16 sps:$4 sm:$0xff]   ;;  %v20734_v60 = vld [vmem:[%s22188_s16 + $0x27a0] ss:$16 sps:$4 sm:$0xff]  }
 0x579   : > { %13151 = vmatprep.subr.bf16.mxu0 %v20658_v24  ;;  %14381 = vmatprep.subr.bf16.mxu1 %v20661_v0  ;;  %v20742_v24 = vld [vmem:[%s22188_s16 + $0x27c4] ss:$16 sps:$4 sm:$0xff]   ;;  %v20745_v0 = vld [vmem:[%s22188_s16 + $0x27cc] ss:$16 sps:$4 sm:$0xff]  }
 0x57b   : > { %17835 = vmatmul.mubr.msk.bf16.vlgmr.msra.gmra.mrb[0].mxu0 %vm17833_vm11, %v17834_v39  ;;  %18012 = vmatmul.mubr.msk.bf16.vlgmr.msra.gmra.mrb[0].mxu1 %vm17833_vm11, %v17834_v39  ;;  %v23770_v39 = vld [vmem:[%s22210_s15 + $0x50] sm:$0xff] }
 0x57c   : > { %13152 = vmatpush1.bf16.msra.mxu0 %v20656_v27  ;;  %14382 = vmatpush1.bf16.msra.mxu1 %v20659_v28  ;;  %v20740_v27 = vld [vmem:[%s22188_s16 + $0x27c0] ss:$16 sps:$4 sm:$0xff]   ;;  %v20743_v28 = vld [vmem:[%s22188_s16 + $0x27c8] ss:$16 sps:$4 sm:$0xff]  }
 0x57d   : > { %13153 = vmatprep.subr.bf16.mxu0 %v20664_v29  ;;  %14383 = vmatprep.subr.bf16.mxu1 %v20667_v5  ;;  %v445_v29 = vadd.s32 5248, %v22251_v41  ;;  %v20748_v5 = vld [vmem:[%s22188_s16 + $0x27e4] ss:$16 sps:$4 sm:$0xff]  }
 0x57e   : > { %17838 = vmatprep.mubr.msk.bf16.mxu0 %vm17836_vm13, %v17837_v30  ;;  %18015 = vmatprep.mubr.msk.bf16.mxu1 %vm17836_vm13, %v17837_v30  ;;  %v20751_v30 = vld [vmem:[%s22188_s16 + $0x27ec] ss:$16 sps:$4 sm:$0xff]  }
 0x580   : > { %13154 = vmatpush1.bf16.msra.mxu0 %v20662_v6  ;;  %14384 = vmatpush1.bf16.msra.mxu1 %v20665_v33  ;;  %v502_v6 = vadd.s32 %v22262_v50, %v442_v25  ;;  %v23780_v33 = vrot.slane %v23770_v39, %v22267_v53  ;;  %v20824_v25 = vld [vmem:[%s22188_s16 + $0x296c] ss:$16 sps:$4 sm:$0xff]  }
 0x581   : > { %13155 = vmatprep.subr.bf16.mxu0 %v20670_v34  ;;  %14385 = vmatprep.subr.bf16.mxu1 %v20673_v35  ;;  %v20746_v34 = vld [vmem:[%s22188_s16 + $0x27e0] ss:$16 sps:$4 sm:$0xff]   ;;  %v20749_v35 = vld [vmem:[%s22188_s16 + $0x27e8] ss:$16 sps:$4 sm:$0xff]  }
 0x582   : > { %vm561_vm14 = vcmp.lt.s32.totalorder %v502_v6, 30000  ;;  %v20828_v6 = vld [vmem:[%s22188_s16 + $0x2988] ss:$16 sps:$4 sm:$0xff]  }
 0x583   : > { %vm17839_vm15 = vmpackc.low %vm561_vm14, %vm561_vm14 }
 0x584   : > { %13156 = vmatpush1.bf16.msra.mxu0 %v20668_v10  ;;  %14386 = vmatpush1.bf16.msra.mxu1 %v20671_v36  ;;  %v505_v10 = vadd.s32 %v22262_v50, %v445_v29  ;;  %v20755_v36 = vld [vmem:[%s22188_s16 + $0x2804] ss:$16 sps:$4 sm:$0xff]  }
 0x585   : > { %13157 = vmatprep.subr.bf16.mxu0 %v20676_v11  ;;  %14387 = vmatprep.subr.bf16.mxu1 %v20679_v40  ;;  %v20758_v11 = vld [vmem:[%s22188_s16 + $0x280c] ss:$16 sps:$4 sm:$0xff]   ;;  %v797_v40 = vcombine.high %v23780_v33, %v23780_v33  ;;  %v20827_v29 = vld [vmem:[%s22188_s16 + $0x2984] ss:$16 sps:$4 sm:$0xff]  }
 0x586   : > { %vm564_vm0 = vcmp.lt.s32.totalorder %v505_v10, 30000  ;;  %v20831_v10 = vld [vmem:[%s22188_s16 + $0x29a0] ss:$16 sps:$4 sm:$0xff]  }
 0x587   : > { %vm17842_vm1 = vmpackc.low %vm564_vm0, %vm564_vm0 }
 0x588   : > { %13158 = vmatpush1.bf16.msra.mxu0 %v20674_v42  ;;  %14388 = vmatpush1.bf16.msra.mxu1 %v20677_v43  ;;  %v17840_v42 = vpack.c.bf16 %v23701_v21, %v23701_v21  ;;  %v20753_v43 = vld [vmem:[%s22188_s16 + $0x2800] ss:$16 sps:$4 sm:$0xff]  }
 0x589   : > { %13159 = vmatprep.subr.bf16.mxu0 %v20682_v44  ;;  %14389 = vmatprep.subr.bf16.mxu1 %v20685_v17  ;;  %v20756_v44 = vld [vmem:[%s22188_s16 + $0x2808] ss:$16 sps:$4 sm:$0xff]   ;;  %v20761_v17 = vld [vmem:[%s22188_s16 + $0x2824] ss:$16 sps:$4 sm:$0xff]   ;;  %v20759_v21 = vld [vmem:[%s22188_s16 + $0x2820] ss:$16 sps:$4 sm:$0xff]  }
 0x58c   : > { %13160 = vmatpush1.bf16.msra.mxu0 %v20680_v48  ;;  %14390 = vmatpush1.bf16.msra.mxu1 %v20683_v49  ;;  %v20764_v48 = vld [vmem:[%s22188_s16 + $0x282c] ss:$16 sps:$4 sm:$0xff]   ;;  %v17843_v49 = vpack.c.bf16 %v797_v40, %v797_v40 }
 0x58d   : > { %13161 = vmatprep.subr.bf16.mxu0 %v20688_v51  ;;  %14391 = vmatprep.subr.bf16.mxu1 %v20691_v52  ;;  %v20762_v51 = vld [vmem:[%s22188_s16 + $0x2828] ss:$16 sps:$4 sm:$0xff]   ;;  %v20767_v52 = vld [vmem:[%s22188_s16 + $0x2844] ss:$16 sps:$4 sm:$0xff]   ;;  %v20842_v40 = vld [vmem:[%s22188_s16 + $0x29cc] ss:$16 sps:$4 sm:$0xff]  }
 0x590   : > { %13162 = vmatpush1.bf16.msra.mxu0 %v20686_v22  ;;  %14392 = vmatpush1.bf16.msra.mxu1 %v20689_v56  ;;  %v20770_v22 = vld [vmem:[%s22188_s16 + $0x284c] ss:$16 sps:$4 sm:$0xff]   ;;  %v20765_v56 = vld [vmem:[%s22188_s16 + $0x2840] ss:$16 sps:$4 sm:$0xff]  }
 0x591   : > { %13163 = vmatprep.subr.bf16.mxu0 %v20694_v57  ;;  %14393 = vmatprep.subr.bf16.mxu1 %v20697_v26  ;;  %v20768_v57 = vld [vmem:[%s22188_s16 + $0x2848] ss:$16 sps:$4 sm:$0xff]   ;;  %v20773_v26 = vld [vmem:[%s22188_s16 + $0x2864] ss:$16 sps:$4 sm:$0xff]  }
 0x594   : > { %13164 = vmatpush1.bf16.msra.mxu0 %v20692_v58  ;;  %14394 = vmatpush1.bf16.msra.mxu1 %v20695_v55  ;;  %v20776_v58 = vld [vmem:[%s22188_s16 + $0x286c] ss:$16 sps:$4 sm:$0xff]   ;;  %v20771_v55 = vld [vmem:[%s22188_s16 + $0x2860] ss:$16 sps:$4 sm:$0xff]  }
 0x595   : > { %13165 = vmatprep.subr.bf16.mxu0 %v20700_v32  ;;  %14395 = vmatprep.subr.bf16.mxu1 %v20703_v61  ;;  %v20774_v32 = vld [vmem:[%s22188_s16 + $0x2868] ss:$16 sps:$4 sm:$0xff]   ;;  %v20779_v61 = vld [vmem:[%s22188_s16 + $0x2884] ss:$16 sps:$4 sm:$0xff]  }
 0x598   : > { %13166 = vmatpush1.bf16.msra.mxu0 %v20698_v62  ;;  %14396 = vmatpush1.bf16.msra.mxu1 %v20701_v31  ;;  %v20782_v62 = vld [vmem:[%s22188_s16 + $0x288c] ss:$16 sps:$4 sm:$0xff]   ;;  %v20777_v31 = vld [vmem:[%s22188_s16 + $0x2880] ss:$16 sps:$4 sm:$0xff]  }
 0x599   : > { %13167 = vmatprep.subr.bf16.mxu0 %v20706_v63  ;;  %14397 = vmatprep.subr.bf16.mxu1 %v20709_v1  ;;  %v20780_v63 = vld [vmem:[%s22188_s16 + $0x2888] ss:$16 sps:$4 sm:$0xff]   ;;  %v20785_v1 = vld [vmem:[%s22188_s16 + $0x28a4] ss:$16 sps:$4 sm:$0xff]  }
 0x59c   : > { %13168 = vmatpush1.bf16.msra.mxu0 %v20704_v2  ;;  %14398 = vmatpush1.bf16.msra.mxu1 %v20707_v3  ;;  %v20788_v2 = vld [vmem:[%s22188_s16 + $0x28ac] ss:$16 sps:$4 sm:$0xff]   ;;  %v20783_v3 = vld [vmem:[%s22188_s16 + $0x28a0] ss:$16 sps:$4 sm:$0xff]  }
 0x59d   : > { %13169 = vmatprep.subr.bf16.mxu0 %v20712_v37  ;;  %14399 = vmatprep.subr.bf16.mxu1 %v20715_v4  ;;  %v20786_v37 = vld [vmem:[%s22188_s16 + $0x28a8] ss:$16 sps:$4 sm:$0xff]   ;;  %v20791_v4 = vld [vmem:[%s22188_s16 + $0x28c4] ss:$16 sps:$4 sm:$0xff]  }
 0x5a0   : > { %13170 = vmatpush1.bf16.msra.mxu0 %v20710_v38  ;;  %14400 = vmatpush1.bf16.msra.mxu1 %v20713_v7  ;;  %v20794_v38 = vld [vmem:[%s22188_s16 + $0x28cc] ss:$16 sps:$4 sm:$0xff]   ;;  %v20789_v7 = vld [vmem:[%s22188_s16 + $0x28c0] ss:$16 sps:$4 sm:$0xff]  }
 0x5a1   : > { %13171 = vmatprep.subr.bf16.mxu0 %v20718_v8  ;;  %14401 = vmatprep.subr.bf16.mxu1 %v20721_v46  ;;  %v20792_v8 = vld [vmem:[%s22188_s16 + $0x28c8] ss:$16 sps:$4 sm:$0xff]   ;;  %v20797_v46 = vld [vmem:[%s22188_s16 + $0x28e4] ss:$16 sps:$4 sm:$0xff]  }
 0x5a4   : > { %13172 = vmatpush1.bf16.msra.mxu0 %v20716_v9  ;;  %14402 = vmatpush1.bf16.msra.mxu1 %v20719_v47  ;;  %v20800_v9 = vld [vmem:[%s22188_s16 + $0x28ec] ss:$16 sps:$4 sm:$0xff]   ;;  %v20795_v47 = vld [vmem:[%s22188_s16 + $0x28e0] ss:$16 sps:$4 sm:$0xff]  }
 0x5a5   : > { %13173 = vmatprep.subr.bf16.mxu0 %v20724_v12  ;;  %14403 = vmatprep.subr.bf16.mxu1 %v20727_v13  ;;  %v20798_v12 = vld [vmem:[%s22188_s16 + $0x28e8] ss:$16 sps:$4 sm:$0xff]   ;;  %v20803_v13 = vld [vmem:[%s22188_s16 + $0x2904] ss:$16 sps:$4 sm:$0xff]  }
 0x5a8   : > { %13174 = vmatpush1.bf16.msra.mxu0 %v20722_v14  ;;  %14404 = vmatpush1.bf16.msra.mxu1 %v20725_v15  ;;  %v20806_v14 = vld [vmem:[%s22188_s16 + $0x290c] ss:$16 sps:$4 sm:$0xff]   ;;  %v20801_v15 = vld [vmem:[%s22188_s16 + $0x2900] ss:$16 sps:$4 sm:$0xff]  }
 0x5a9   : > { %13175 = vmatprep.subr.bf16.mxu0 %v20730_v54  ;;  %14405 = vmatprep.subr.bf16.mxu1 %v20733_v18  ;;  %v20804_v54 = vld [vmem:[%s22188_s16 + $0x2908] ss:$16 sps:$4 sm:$0xff]   ;;  %v20809_v18 = vld [vmem:[%s22188_s16 + $0x2924] ss:$16 sps:$4 sm:$0xff]  }
 0x5ac   : > { %13176 = vmatpush1.bf16.msra.mxu0 %v20728_v19  ;;  %14406 = vmatpush1.bf16.msra.mxu1 %v20731_v59  ;;  %v20812_v19 = vld [vmem:[%s22188_s16 + $0x292c] ss:$16 sps:$4 sm:$0xff]   ;;  %v20807_v59 = vld [vmem:[%s22188_s16 + $0x2920] ss:$16 sps:$4 sm:$0xff]  }
 0x5ad   : > { %13177 = vmatprep.subr.bf16.mxu0 %v20736_v20  ;;  %14407 = vmatprep.subr.bf16.mxu1 %v20739_v16  ;;  %v20810_v20 = vld [vmem:[%s22188_s16 + $0x2928] ss:$16 sps:$4 sm:$0xff]   ;;  %v20815_v16 = vld [vmem:[%s22188_s16 + $0x2944] ss:$16 sps:$4 sm:$0xff]  }
 0x5b0   : > { %13178 = vmatpush1.bf16.msra.mxu0 %v20734_v60  ;;  %14408 = vmatpush1.bf16.msra.mxu1 %v20737_v23  ;;  %v20818_v60 = vld [vmem:[%s22188_s16 + $0x294c] ss:$16 sps:$4 sm:$0xff]   ;;  %v20813_v23 = vld [vmem:[%s22188_s16 + $0x2940] ss:$16 sps:$4 sm:$0xff]  }
 0x5b1   : > { %13179 = vmatprep.subr.bf16.mxu0 %v20742_v24  ;;  %14409 = vmatprep.subr.bf16.mxu1 %v20745_v0  ;;  %v20816_v24 = vld [vmem:[%s22188_s16 + $0x2948] ss:$16 sps:$4 sm:$0xff]   ;;  %v20821_v0 = vld [vmem:[%s22188_s16 + $0x2964] ss:$16 sps:$4 sm:$0xff]  }
 0x5b4   : > { %13180 = vmatpush1.bf16.msra.mxu0 %v20740_v27  ;;  %14410 = vmatpush1.bf16.msra.mxu1 %v20743_v28  ;;  %v20819_v27 = vld [vmem:[%s22188_s16 + $0x2960] ss:$16 sps:$4 sm:$0xff]   ;;  %v20822_v28 = vld [vmem:[%s22188_s16 + $0x2968] ss:$16 sps:$4 sm:$0xff]  }
 0x5b5   : > { %13181 = vmatprep.subr.bf16.mxu0 %v20748_v5  ;;  %14411 = vmatprep.subr.bf16.mxu1 %v20751_v30  ;;  %v20830_v5 = vld [vmem:[%s22188_s16 + $0x298c] ss:$16 sps:$4 sm:$0xff]   ;;  %v20825_v30 = vld [vmem:[%s22188_s16 + $0x2980] ss:$16 sps:$4 sm:$0xff]  }
 0x5b8   : > { %13182 = vmatpush1.bf16.msra.mxu0 %v20746_v34  ;;  %14412 = vmatpush1.bf16.msra.mxu1 %v20749_v35  ;;  %v20833_v34 = vld [vmem:[%s22188_s16 + $0x29a4] ss:$16 sps:$4 sm:$0xff]   ;;  %v20836_v35 = vld [vmem:[%s22188_s16 + $0x29ac] ss:$16 sps:$4 sm:$0xff]  }
 0x5b9   : > { %13192 = vmatprep.subr.bf16.mxu0 %v20755_v36  ;;  %14422 = vmatprep.subr.bf16.mxu1 %v20758_v11  ;;  %v20834_v36 = vld [vmem:[%s22188_s16 + $0x29a8] ss:$16 sps:$4 sm:$0xff]   ;;  %v20839_v11 = vld [vmem:[%s22188_s16 + $0x29c4] ss:$16 sps:$4 sm:$0xff]  }
 0x5bb   : > { %17841 = vmatmul.mubr.msk.bf16.vlgmr.msra.gmra.mrb[0].mxu0 %vm17839_vm15, %v17840_v42  ;;  %18018 = vmatmul.mubr.msk.bf16.vlgmr.msra.gmra.mrb[0].mxu1 %vm17839_vm15, %v17840_v42  ;;  %v444_v42 = vadd.s32 5120, %v22251_v41 }
 0x5bc   : > { %13193 = vmatpush1.bf16.msra.mxu0 %v20753_v43  ;;  %14423 = vmatpush1.bf16.msra.mxu1 %v20756_v44  ;;  %v782_v43 = vcombine.high %v23770_v39, %v23770_v39  ;;  %v20837_v44 = vld [vmem:[%s22188_s16 + $0x29c0] ss:$16 sps:$4 sm:$0xff]  }
 0x5bd   : > { %13194 = vmatprep.subr.bf16.mxu0 %v20761_v17  ;;  %14424 = vmatprep.subr.bf16.mxu1 %v20764_v48  ;;  %v20840_v17 = vld [vmem:[%s22188_s16 + $0x29c8] ss:$16 sps:$4 sm:$0xff]   ;;  %v447_v48 = vadd.s32 5504, %v22251_v41  ;;  %v20843_v39 = vld [vmem:[%s22188_s16 + $0x29e0] ss:$16 sps:$4 sm:$0xff]  }
 0x5be   : > { %17844 = vmatprep.mubr.msk.bf16.mxu0 %vm17842_vm1, %v17843_v49  ;;  %18021 = vmatprep.mubr.msk.bf16.mxu1 %vm17842_vm1, %v17843_v49  ;;  %v20845_v49 = vld [vmem:[%s22188_s16 + $0x29e4] ss:$16 sps:$4 sm:$0xff]  }
 0x5c0   : > { %13195 = vmatpush1.bf16.msra.mxu0 %v20759_v21  ;;  %14425 = vmatpush1.bf16.msra.mxu1 %v20762_v51  ;;  %v20848_v21 = vld [vmem:[%s22188_s16 + $0x29ec] ss:$16 sps:$4 sm:$0xff]   ;;  %v504_v51 = vadd.s32 %v22262_v50, %v444_v42 }
 0x5c1   : > { %13196 = vmatprep.subr.bf16.mxu0 %v20767_v52  ;;  %14426 = vmatprep.subr.bf16.mxu1 %v20770_v22  ;;  %v23857_v52 = vrot.slane %v782_v43, %v22267_v53  ;;  %v20846_v22 = vld [vmem:[%s22188_s16 + $0x29e8] ss:$16 sps:$4 sm:$0xff]   ;;  %v20920_v42 = vld [vmem:[%s22188_s16 + $0x2b6c] ss:$16 sps:$4 sm:$0xff]   ;;  %v20915_v43 = vld [vmem:[%s22188_s16 + $0x2b60] ss:$16 sps:$4 sm:$0xff]  }
 0x5c2   : > { %vm563_vm2 = vcmp.lt.s32.totalorder %v504_v51, 30000  ;;  %v20929_v51 = vld [vmem:[%s22188_s16 + $0x2ba4] ss:$16 sps:$4 sm:$0xff]  }
 0x5c3   : > { %vm17845_vm3 = vmpackc.low %vm563_vm2, %vm563_vm2 }
 0x5c4   : > { %13197 = vmatpush1.bf16.msra.mxu0 %v20765_v56  ;;  %14427 = vmatpush1.bf16.msra.mxu1 %v20768_v57  ;;  %v507_v56 = vadd.s32 %v22262_v50, %v447_v48  ;;  %v20851_v57 = vld [vmem:[%s22188_s16 + $0x2a04] ss:$16 sps:$4 sm:$0xff]   ;;  %v20926_v48 = vld [vmem:[%s22188_s16 + $0x2b8c] ss:$16 sps:$4 sm:$0xff]  }
 0x5c5   : > { %13198 = vmatprep.subr.bf16.mxu0 %v20773_v26  ;;  %14428 = vmatprep.subr.bf16.mxu1 %v20776_v58  ;;  %v20854_v26 = vld [vmem:[%s22188_s16 + $0x2a0c] ss:$16 sps:$4 sm:$0xff]   ;;  %v798_v58 = vcombine.high %v23857_v52, %v23857_v52 }
 0x5c6   : > { %vm566_vm4 = vcmp.lt.s32.totalorder %v507_v56, 30000  ;;  %v20930_v56 = vld [vmem:[%s22188_s16 + $0x2ba8] ss:$16 sps:$4 sm:$0xff]  }
 0x5c7   : > { %vm17848_vm5 = vmpackc.low %vm566_vm4, %vm566_vm4 }
 0x5c8   : > { %13199 = vmatpush1.bf16.msra.mxu0 %v20771_v55  ;;  %14429 = vmatpush1.bf16.msra.mxu1 %v20774_v32  ;;  %v17846_v55 = vpack.c.bf16 %v23780_v33, %v23780_v33  ;;  %v20849_v32 = vld [vmem:[%s22188_s16 + $0x2a00] ss:$16 sps:$4 sm:$0xff]  }
 0x5c9   : > { %13200 = vmatprep.subr.bf16.mxu0 %v20779_v61  ;;  %14430 = vmatprep.subr.bf16.mxu1 %v20782_v62  ;;  %v20852_v61 = vld [vmem:[%s22188_s16 + $0x2a08] ss:$16 sps:$4 sm:$0xff]   ;;  %v20857_v62 = vld [vmem:[%s22188_s16 + $0x2a24] ss:$16 sps:$4 sm:$0xff]   ;;  %v20855_v33 = vld [vmem:[%s22188_s16 + $0x2a20] ss:$16 sps:$4 sm:$0xff]  }
 0x5cc   : > { %13201 = vmatpush1.bf16.msra.mxu0 %v20777_v31  ;;  %14431 = vmatpush1.bf16.msra.mxu1 %v20780_v63  ;;  %v20860_v31 = vld [vmem:[%s22188_s16 + $0x2a2c] ss:$16 sps:$4 sm:$0xff]   ;;  %v17849_v63 = vpack.c.bf16 %v798_v58, %v798_v58  ;;  %v446_v58 = vadd.s32 5376, %v22251_v41 }
 0x5cd   : > { %13202 = vmatprep.subr.bf16.mxu0 %v20785_v1  ;;  %14432 = vmatprep.subr.bf16.mxu1 %v20788_v2  ;;  %v20858_v1 = vld [vmem:[%s22188_s16 + $0x2a28] ss:$16 sps:$4 sm:$0xff]   ;;  %v20863_v2 = vld [vmem:[%s22188_s16 + $0x2a44] ss:$16 sps:$4 sm:$0xff]  }
 0x5d0   : > { %13203 = vmatpush1.bf16.msra.mxu0 %v20783_v3  ;;  %14433 = vmatpush1.bf16.msra.mxu1 %v20786_v37  ;;  %v20866_v3 = vld [vmem:[%s22188_s16 + $0x2a4c] ss:$16 sps:$4 sm:$0xff]   ;;  %v20861_v37 = vld [vmem:[%s22188_s16 + $0x2a40] ss:$16 sps:$4 sm:$0xff]  }
 0x5d1   : > { %13204 = vmatprep.subr.bf16.mxu0 %v20791_v4  ;;  %14434 = vmatprep.subr.bf16.mxu1 %v20794_v38  ;;  %v20864_v4 = vld [vmem:[%s22188_s16 + $0x2a48] ss:$16 sps:$4 sm:$0xff]   ;;  %v20869_v38 = vld [vmem:[%s22188_s16 + $0x2a64] ss:$16 sps:$4 sm:$0xff]  }
 0x5d4   : > { %13205 = vmatpush1.bf16.msra.mxu0 %v20789_v7  ;;  %14435 = vmatpush1.bf16.msra.mxu1 %v20792_v8  ;;  %v20872_v7 = vld [vmem:[%s22188_s16 + $0x2a6c] ss:$16 sps:$4 sm:$0xff]   ;;  %v20867_v8 = vld [vmem:[%s22188_s16 + $0x2a60] ss:$16 sps:$4 sm:$0xff]  }
 0x5d5   : > { %13206 = vmatprep.subr.bf16.mxu0 %v20797_v46  ;;  %14436 = vmatprep.subr.bf16.mxu1 %v20800_v9  ;;  %v20870_v46 = vld [vmem:[%s22188_s16 + $0x2a68] ss:$16 sps:$4 sm:$0xff]   ;;  %v20875_v9 = vld [vmem:[%s22188_s16 + $0x2a84] ss:$16 sps:$4 sm:$0xff]  }
 0x5d8   : > { %13207 = vmatpush1.bf16.msra.mxu0 %v20795_v47  ;;  %14437 = vmatpush1.bf16.msra.mxu1 %v20798_v12  ;;  %v20878_v47 = vld [vmem:[%s22188_s16 + $0x2a8c] ss:$16 sps:$4 sm:$0xff]   ;;  %v20873_v12 = vld [vmem:[%s22188_s16 + $0x2a80] ss:$16 sps:$4 sm:$0xff]  }
 0x5d9   : > { %13208 = vmatprep.subr.bf16.mxu0 %v20803_v13  ;;  %14438 = vmatprep.subr.bf16.mxu1 %v20806_v14  ;;  %v20876_v13 = vld [vmem:[%s22188_s16 + $0x2a88] ss:$16 sps:$4 sm:$0xff]   ;;  %v20881_v14 = vld [vmem:[%s22188_s16 + $0x2aa4] ss:$16 sps:$4 sm:$0xff]  }
 0x5dc   : > { %13209 = vmatpush1.bf16.msra.mxu0 %v20801_v15  ;;  %14439 = vmatpush1.bf16.msra.mxu1 %v20804_v54  ;;  %v20884_v15 = vld [vmem:[%s22188_s16 + $0x2aac] ss:$16 sps:$4 sm:$0xff]   ;;  %v20879_v54 = vld [vmem:[%s22188_s16 + $0x2aa0] ss:$16 sps:$4 sm:$0xff]  }
 0x5dd   : > { %13210 = vmatprep.subr.bf16.mxu0 %v20809_v18  ;;  %14440 = vmatprep.subr.bf16.mxu1 %v20812_v19  ;;  %v20882_v18 = vld [vmem:[%s22188_s16 + $0x2aa8] ss:$16 sps:$4 sm:$0xff]   ;;  %v20887_v19 = vld [vmem:[%s22188_s16 + $0x2ac4] ss:$16 sps:$4 sm:$0xff]  }
 0x5e0   : > { %13211 = vmatpush1.bf16.msra.mxu0 %v20807_v59  ;;  %14441 = vmatpush1.bf16.msra.mxu1 %v20810_v20  ;;  %v20890_v59 = vld [vmem:[%s22188_s16 + $0x2acc] ss:$16 sps:$4 sm:$0xff]   ;;  %v20885_v20 = vld [vmem:[%s22188_s16 + $0x2ac0] ss:$16 sps:$4 sm:$0xff]  }
 0x5e1   : > { %13212 = vmatprep.subr.bf16.mxu0 %v20815_v16  ;;  %14442 = vmatprep.subr.bf16.mxu1 %v20818_v60  ;;  %v20888_v16 = vld [vmem:[%s22188_s16 + $0x2ac8] ss:$16 sps:$4 sm:$0xff]   ;;  %v20893_v60 = vld [vmem:[%s22188_s16 + $0x2ae4] ss:$16 sps:$4 sm:$0xff]  }
 0x5e4   : > { %13213 = vmatpush1.bf16.msra.mxu0 %v20813_v23  ;;  %14443 = vmatpush1.bf16.msra.mxu1 %v20816_v24  ;;  %v20896_v23 = vld [vmem:[%s22188_s16 + $0x2aec] ss:$16 sps:$4 sm:$0xff]   ;;  %v20891_v24 = vld [vmem:[%s22188_s16 + $0x2ae0] ss:$16 sps:$4 sm:$0xff]  }
 0x5e5   : > { %13214 = vmatprep.subr.bf16.mxu0 %v20821_v0  ;;  %14444 = vmatprep.subr.bf16.mxu1 %v20824_v25  ;;  %v20894_v0 = vld [vmem:[%s22188_s16 + $0x2ae8] ss:$16 sps:$4 sm:$0xff]   ;;  %v20899_v25 = vld [vmem:[%s22188_s16 + $0x2b04] ss:$16 sps:$4 sm:$0xff]  }
 0x5e8   : > { %13215 = vmatpush1.bf16.msra.mxu0 %v20819_v27  ;;  %14445 = vmatpush1.bf16.msra.mxu1 %v20822_v28  ;;  %v20902_v27 = vld [vmem:[%s22188_s16 + $0x2b0c] ss:$16 sps:$4 sm:$0xff]   ;;  %v20897_v28 = vld [vmem:[%s22188_s16 + $0x2b00] ss:$16 sps:$4 sm:$0xff]  }
 0x5e9   : > { %13216 = vmatprep.subr.bf16.mxu0 %v20827_v29  ;;  %14446 = vmatprep.subr.bf16.mxu1 %v20830_v5  ;;  %v20900_v29 = vld [vmem:[%s22188_s16 + $0x2b08] ss:$16 sps:$4 sm:$0xff]   ;;  %v20905_v5 = vld [vmem:[%s22188_s16 + $0x2b24] ss:$16 sps:$4 sm:$0xff]  }
 0x5ec   : > { %13217 = vmatpush1.bf16.msra.mxu0 %v20825_v30  ;;  %14447 = vmatpush1.bf16.msra.mxu1 %v20828_v6  ;;  %v20908_v30 = vld [vmem:[%s22188_s16 + $0x2b2c] ss:$16 sps:$4 sm:$0xff]   ;;  %v20903_v6 = vld [vmem:[%s22188_s16 + $0x2b20] ss:$16 sps:$4 sm:$0xff]  }
 0x5ed   : > { %13218 = vmatprep.subr.bf16.mxu0 %v20833_v34  ;;  %14448 = vmatprep.subr.bf16.mxu1 %v20836_v35  ;;  %v20906_v34 = vld [vmem:[%s22188_s16 + $0x2b28] ss:$16 sps:$4 sm:$0xff]   ;;  %v20911_v35 = vld [vmem:[%s22188_s16 + $0x2b44] ss:$16 sps:$4 sm:$0xff]  }
 0x5f0   : > { %13219 = vmatpush1.bf16.msra.mxu0 %v20831_v10  ;;  %14449 = vmatpush1.bf16.msra.mxu1 %v20834_v36  ;;  %v20914_v10 = vld [vmem:[%s22188_s16 + $0x2b4c] ss:$16 sps:$4 sm:$0xff]   ;;  %v20909_v36 = vld [vmem:[%s22188_s16 + $0x2b40] ss:$16 sps:$4 sm:$0xff]  }
 0x5f1   : > { %13220 = vmatprep.subr.bf16.mxu0 %v20839_v11  ;;  %14450 = vmatprep.subr.bf16.mxu1 %v20842_v40  ;;  %v20912_v11 = vld [vmem:[%s22188_s16 + $0x2b48] ss:$16 sps:$4 sm:$0xff]   ;;  %v20917_v40 = vld [vmem:[%s22188_s16 + $0x2b64] ss:$16 sps:$4 sm:$0xff]  }
 0x5f4   : > { %13221 = vmatpush1.bf16.msra.mxu0 %v20837_v44  ;;  %14451 = vmatpush1.bf16.msra.mxu1 %v20840_v17  ;;  %v20918_v44 = vld [vmem:[%s22188_s16 + $0x2b68] ss:$16 sps:$4 sm:$0xff]   ;;  %v20923_v17 = vld [vmem:[%s22188_s16 + $0x2b84] ss:$16 sps:$4 sm:$0xff]  }
 0x5f5   : > { %13222 = vmatprep.subr.bf16.mxu0 %v20845_v49  ;;  %14452 = vmatprep.subr.bf16.mxu1 %v20848_v21  ;;  %v20921_v49 = vld [vmem:[%s22188_s16 + $0x2b80] ss:$16 sps:$4 sm:$0xff]   ;;  %v20924_v21 = vld [vmem:[%s22188_s16 + $0x2b88] ss:$16 sps:$4 sm:$0xff]  }
 0x5f8   : > { %13223 = vmatpush1.bf16.msra.mxu0 %v20843_v39  ;;  %14453 = vmatpush1.bf16.msra.mxu1 %v20846_v22  ;;  %v20932_v39 = vld [vmem:[%s22188_s16 + $0x2bac] ss:$16 sps:$4 sm:$0xff]   ;;  %v20927_v22 = vld [vmem:[%s22188_s16 + $0x2ba0] ss:$16 sps:$4 sm:$0xff]  }
 0x5f9   : > { %13233 = vmatprep.subr.bf16.mxu0 %v20851_v57  ;;  %14463 = vmatprep.subr.bf16.mxu1 %v20854_v26  ;;  %v20935_v57 = vld [vmem:[%s22188_s16 + $0x2bc4] ss:$16 sps:$4 sm:$0xff]   ;;  %v20938_v26 = vld [vmem:[%s22188_s16 + $0x2bcc] ss:$16 sps:$4 sm:$0xff]  }
 0x5fb   : > { %17847 = vmatmul.mubr.msk.bf16.vlgmr.msra.gmra.mrb[0].mxu0 %vm17845_vm3, %v17846_v55  ;;  %18024 = vmatmul.mubr.msk.bf16.vlgmr.msra.gmra.mrb[0].mxu1 %vm17845_vm3, %v17846_v55  ;;  %v23926_v55 = vld [vmem:[%s22210_s15 + $0x58] sm:$0xff] }
 0x5fc   : > { %13234 = vmatpush1.bf16.msra.mxu0 %v20849_v32  ;;  %14464 = vmatpush1.bf16.msra.mxu1 %v20852_v61  ;;  %v20933_v32 = vld [vmem:[%s22188_s16 + $0x2bc0] ss:$16 sps:$4 sm:$0xff]   ;;  %v20936_v61 = vld [vmem:[%s22188_s16 + $0x2bc8] ss:$16 sps:$4 sm:$0xff]  }
 0x5fd   : > { %13235 = vmatprep.subr.bf16.mxu0 %v20857_v62  ;;  %14465 = vmatprep.subr.bf16.mxu1 %v20860_v31  ;;  %v449_v62 = vadd.s32 5760, %v22251_v41  ;;  %v20941_v31 = vld [vmem:[%s22188_s16 + $0x2be4] ss:$16 sps:$4 sm:$0xff]  }
 0x5fe   : > { %17850 = vmatprep.mubr.msk.bf16.mxu0 %vm17848_vm5, %v17849_v63  ;;  %18027 = vmatprep.mubr.msk.bf16.mxu1 %vm17848_vm5, %v17849_v63  ;;  %v20944_v63 = vld [vmem:[%s22188_s16 + $0x2bec] ss:$16 sps:$4 sm:$0xff]  }
 0x600   : > { %13236 = vmatpush1.bf16.msra.mxu0 %v20855_v33  ;;  %14466 = vmatpush1.bf16.msra.mxu1 %v20858_v1  ;;  %v506_v33 = vadd.s32 %v22262_v50, %v446_v58  ;;  %v23936_v1 = vrot.slane %v23926_v55, %v22267_v53  ;;  %v21017_v58 = vld [vmem:[%s22188_s16 + $0x2d6c] ss:$16 sps:$4 sm:$0xff]  }
 0x601   : > { %13237 = vmatprep.subr.bf16.mxu0 %v20863_v2  ;;  %14467 = vmatprep.subr.bf16.mxu1 %v20866_v3  ;;  %v20939_v2 = vld [vmem:[%s22188_s16 + $0x2be0] ss:$16 sps:$4 sm:$0xff]   ;;  %v20942_v3 = vld [vmem:[%s22188_s16 + $0x2be8] ss:$16 sps:$4 sm:$0xff]  }
 0x602   : > { %vm565_vm6 = vcmp.lt.s32.totalorder %v506_v33, 30000  ;;  %v21021_v33 = vld [vmem:[%s22188_s16 + $0x2d88] ss:$16 sps:$4 sm:$0xff]  }
 0x603   : > { %vm17851_vm7 = vmpackc.low %vm565_vm6, %vm565_vm6 }
 0x604   : > { %13238 = vmatpush1.bf16.msra.mxu0 %v20861_v37  ;;  %14468 = vmatpush1.bf16.msra.mxu1 %v20864_v4  ;;  %v509_v37 = vadd.s32 %v22262_v50, %v449_v62  ;;  %v20948_v4 = vld [vmem:[%s22188_s16 + $0x2c04] ss:$16 sps:$4 sm:$0xff]  }
 0x605   : > { %13239 = vmatprep.subr.bf16.mxu0 %v20869_v38  ;;  %14469 = vmatprep.subr.bf16.mxu1 %v20872_v7  ;;  %v20951_v38 = vld [vmem:[%s22188_s16 + $0x2c0c] ss:$16 sps:$4 sm:$0xff]   ;;  %v814_v7 = vcombine.high %v23936_v1, %v23936_v1  ;;  %v21020_v62 = vld [vmem:[%s22188_s16 + $0x2d84] ss:$16 sps:$4 sm:$0xff]  }
 0x606   : > { %vm568_vm8 = vcmp.lt.s32.totalorder %v509_v37, 30000  ;;  %v21024_v37 = vld [vmem:[%s22188_s16 + $0x2da0] ss:$16 sps:$4 sm:$0xff]  }
 0x607   : > { %vm17854_vm9 = vmpackc.low %vm568_vm8, %vm568_vm8 }
 0x608   : > { %13240 = vmatpush1.bf16.msra.mxu0 %v20867_v8  ;;  %14470 = vmatpush1.bf16.msra.mxu1 %v20870_v46  ;;  %v17852_v8 = vpack.c.bf16 %v23857_v52, %v23857_v52  ;;  %v20946_v46 = vld [vmem:[%s22188_s16 + $0x2c00] ss:$16 sps:$4 sm:$0xff]  }
 0x609   : > { %13241 = vmatprep.subr.bf16.mxu0 %v20875_v9  ;;  %14471 = vmatprep.subr.bf16.mxu1 %v20878_v47  ;;  %v20949_v9 = vld [vmem:[%s22188_s16 + $0x2c08] ss:$16 sps:$4 sm:$0xff]   ;;  %v20954_v47 = vld [vmem:[%s22188_s16 + $0x2c24] ss:$16 sps:$4 sm:$0xff]   ;;  %v20952_v52 = vld [vmem:[%s22188_s16 + $0x2c20] ss:$16 sps:$4 sm:$0xff]  }
 0x60c   : > { %13242 = vmatpush1.bf16.msra.mxu0 %v20873_v12  ;;  %14472 = vmatpush1.bf16.msra.mxu1 %v20876_v13  ;;  %v20957_v12 = vld [vmem:[%s22188_s16 + $0x2c2c] ss:$16 sps:$4 sm:$0xff]   ;;  %v17855_v13 = vpack.c.bf16 %v814_v7, %v814_v7 }
 0x60d   : > { %13243 = vmatprep.subr.bf16.mxu0 %v20881_v14  ;;  %14473 = vmatprep.subr.bf16.mxu1 %v20884_v15  ;;  %v20955_v14 = vld [vmem:[%s22188_s16 + $0x2c28] ss:$16 sps:$4 sm:$0xff]   ;;  %v20960_v15 = vld [vmem:[%s22188_s16 + $0x2c44] ss:$16 sps:$4 sm:$0xff]   ;;  %v21035_v7 = vld [vmem:[%s22188_s16 + $0x2dcc] ss:$16 sps:$4 sm:$0xff]  }
 0x610   : > { %13244 = vmatpush1.bf16.msra.mxu0 %v20879_v54  ;;  %14474 = vmatpush1.bf16.msra.mxu1 %v20882_v18  ;;  %v20963_v54 = vld [vmem:[%s22188_s16 + $0x2c4c] ss:$16 sps:$4 sm:$0xff]   ;;  %v20958_v18 = vld [vmem:[%s22188_s16 + $0x2c40] ss:$16 sps:$4 sm:$0xff]  }
 0x611   : > { %13245 = vmatprep.subr.bf16.mxu0 %v20887_v19  ;;  %14475 = vmatprep.subr.bf16.mxu1 %v20890_v59  ;;  %v20961_v19 = vld [vmem:[%s22188_s16 + $0x2c48] ss:$16 sps:$4 sm:$0xff]   ;;  %v20966_v59 = vld [vmem:[%s22188_s16 + $0x2c64] ss:$16 sps:$4 sm:$0xff]  }
 0x614   : > { %13246 = vmatpush1.bf16.msra.mxu0 %v20885_v20  ;;  %14476 = vmatpush1.bf16.msra.mxu1 %v20888_v16  ;;  %v20969_v20 = vld [vmem:[%s22188_s16 + $0x2c6c] ss:$16 sps:$4 sm:$0xff]   ;;  %v20964_v16 = vld [vmem:[%s22188_s16 + $0x2c60] ss:$16 sps:$4 sm:$0xff]  }
 0x615   : > { %13247 = vmatprep.subr.bf16.mxu0 %v20893_v60  ;;  %14477 = vmatprep.subr.bf16.mxu1 %v20896_v23  ;;  %v20967_v60 = vld [vmem:[%s22188_s16 + $0x2c68] ss:$16 sps:$4 sm:$0xff]   ;;  %v20972_v23 = vld [vmem:[%s22188_s16 + $0x2c84] ss:$16 sps:$4 sm:$0xff]  }
 0x618   : > { %13248 = vmatpush1.bf16.msra.mxu0 %v20891_v24  ;;  %14478 = vmatpush1.bf16.msra.mxu1 %v20894_v0  ;;  %v20975_v24 = vld [vmem:[%s22188_s16 + $0x2c8c] ss:$16 sps:$4 sm:$0xff]   ;;  %v20970_v0 = vld [vmem:[%s22188_s16 + $0x2c80] ss:$16 sps:$4 sm:$0xff]  }
 0x619   : > { %13249 = vmatprep.subr.bf16.mxu0 %v20899_v25  ;;  %14479 = vmatprep.subr.bf16.mxu1 %v20902_v27  ;;  %v20973_v25 = vld [vmem:[%s22188_s16 + $0x2c88] ss:$16 sps:$4 sm:$0xff]   ;;  %v20978_v27 = vld [vmem:[%s22188_s16 + $0x2ca4] ss:$16 sps:$4 sm:$0xff]  }
 0x61c   : > { %13250 = vmatpush1.bf16.msra.mxu0 %v20897_v28  ;;  %14480 = vmatpush1.bf16.msra.mxu1 %v20900_v29  ;;  %v20981_v28 = vld [vmem:[%s22188_s16 + $0x2cac] ss:$16 sps:$4 sm:$0xff]   ;;  %v20976_v29 = vld [vmem:[%s22188_s16 + $0x2ca0] ss:$16 sps:$4 sm:$0xff]  }
 0x61d   : > { %13251 = vmatprep.subr.bf16.mxu0 %v20905_v5  ;;  %14481 = vmatprep.subr.bf16.mxu1 %v20908_v30  ;;  %v20979_v5 = vld [vmem:[%s22188_s16 + $0x2ca8] ss:$16 sps:$4 sm:$0xff]   ;;  %v20984_v30 = vld [vmem:[%s22188_s16 + $0x2cc4] ss:$16 sps:$4 sm:$0xff]  }
 0x620   : > { %13252 = vmatpush1.bf16.msra.mxu0 %v20903_v6  ;;  %14482 = vmatpush1.bf16.msra.mxu1 %v20906_v34  ;;  %v20987_v6 = vld [vmem:[%s22188_s16 + $0x2ccc] ss:$16 sps:$4 sm:$0xff]   ;;  %v20982_v34 = vld [vmem:[%s22188_s16 + $0x2cc0] ss:$16 sps:$4 sm:$0xff]  }
 0x621   : > { %13253 = vmatprep.subr.bf16.mxu0 %v20911_v35  ;;  %14483 = vmatprep.subr.bf16.mxu1 %v20914_v10  ;;  %v20985_v35 = vld [vmem:[%s22188_s16 + $0x2cc8] ss:$16 sps:$4 sm:$0xff]   ;;  %v20990_v10 = vld [vmem:[%s22188_s16 + $0x2ce4] ss:$16 sps:$4 sm:$0xff]  }
 0x624   : > { %13254 = vmatpush1.bf16.msra.mxu0 %v20909_v36  ;;  %14484 = vmatpush1.bf16.msra.mxu1 %v20912_v11  ;;  %v20993_v36 = vld [vmem:[%s22188_s16 + $0x2cec] ss:$16 sps:$4 sm:$0xff]   ;;  %v20988_v11 = vld [vmem:[%s22188_s16 + $0x2ce0] ss:$16 sps:$4 sm:$0xff]  }
 0x625   : > { %13255 = vmatprep.subr.bf16.mxu0 %v20917_v40  ;;  %14485 = vmatprep.subr.bf16.mxu1 %v20920_v42  ;;  %v20991_v40 = vld [vmem:[%s22188_s16 + $0x2ce8] ss:$16 sps:$4 sm:$0xff]   ;;  %v20996_v42 = vld [vmem:[%s22188_s16 + $0x2d04] ss:$16 sps:$4 sm:$0xff]  }
 0x628   : > { %13256 = vmatpush1.bf16.msra.mxu0 %v20915_v43  ;;  %14486 = vmatpush1.bf16.msra.mxu1 %v20918_v44  ;;  %v20999_v43 = vld [vmem:[%s22188_s16 + $0x2d0c] ss:$16 sps:$4 sm:$0xff]   ;;  %v20994_v44 = vld [vmem:[%s22188_s16 + $0x2d00] ss:$16 sps:$4 sm:$0xff]  }
 0x629   : > { %13257 = vmatprep.subr.bf16.mxu0 %v20923_v17  ;;  %14487 = vmatprep.subr.bf16.mxu1 %v20926_v48  ;;  %v20997_v17 = vld [vmem:[%s22188_s16 + $0x2d08] ss:$16 sps:$4 sm:$0xff]   ;;  %v21002_v48 = vld [vmem:[%s22188_s16 + $0x2d24] ss:$16 sps:$4 sm:$0xff]  }
 0x62c   : > { %13258 = vmatpush1.bf16.msra.mxu0 %v20921_v49  ;;  %14488 = vmatpush1.bf16.msra.mxu1 %v20924_v21  ;;  %v21005_v49 = vld [vmem:[%s22188_s16 + $0x2d2c] ss:$16 sps:$4 sm:$0xff]   ;;  %v21000_v21 = vld [vmem:[%s22188_s16 + $0x2d20] ss:$16 sps:$4 sm:$0xff]  }
 0x62d   : > { %13259 = vmatprep.subr.bf16.mxu0 %v20929_v51  ;;  %14489 = vmatprep.subr.bf16.mxu1 %v20932_v39  ;;  %v21003_v51 = vld [vmem:[%s22188_s16 + $0x2d28] ss:$16 sps:$4 sm:$0xff]   ;;  %v21008_v39 = vld [vmem:[%s22188_s16 + $0x2d44] ss:$16 sps:$4 sm:$0xff]  }
 0x630   : > { %13260 = vmatpush1.bf16.msra.mxu0 %v20927_v22  ;;  %14490 = vmatpush1.bf16.msra.mxu1 %v20930_v56  ;;  %v21011_v22 = vld [vmem:[%s22188_s16 + $0x2d4c] ss:$16 sps:$4 sm:$0xff]   ;;  %v21006_v56 = vld [vmem:[%s22188_s16 + $0x2d40] ss:$16 sps:$4 sm:$0xff]  }
 0x631   : > { %13261 = vmatprep.subr.bf16.mxu0 %v20935_v57  ;;  %14491 = vmatprep.subr.bf16.mxu1 %v20938_v26  ;;  %v21009_v57 = vld [vmem:[%s22188_s16 + $0x2d48] ss:$16 sps:$4 sm:$0xff]   ;;  %v21014_v26 = vld [vmem:[%s22188_s16 + $0x2d64] ss:$16 sps:$4 sm:$0xff]  }
 0x634   : > { %13262 = vmatpush1.bf16.msra.mxu0 %v20933_v32  ;;  %14492 = vmatpush1.bf16.msra.mxu1 %v20936_v61  ;;  %v21012_v32 = vld [vmem:[%s22188_s16 + $0x2d60] ss:$16 sps:$4 sm:$0xff]   ;;  %v21015_v61 = vld [vmem:[%s22188_s16 + $0x2d68] ss:$16 sps:$4 sm:$0xff]  }
 0x635   : > { %13263 = vmatprep.subr.bf16.mxu0 %v20941_v31  ;;  %14493 = vmatprep.subr.bf16.mxu1 %v20944_v63  ;;  %v21023_v31 = vld [vmem:[%s22188_s16 + $0x2d8c] ss:$16 sps:$4 sm:$0xff]   ;;  %v21018_v63 = vld [vmem:[%s22188_s16 + $0x2d80] ss:$16 sps:$4 sm:$0xff]  }
 0x638   : > { %13264 = vmatpush1.bf16.msra.mxu0 %v20939_v2  ;;  %14494 = vmatpush1.bf16.msra.mxu1 %v20942_v3  ;;  %v21026_v2 = vld [vmem:[%s22188_s16 + $0x2da4] ss:$16 sps:$4 sm:$0xff]   ;;  %v21029_v3 = vld [vmem:[%s22188_s16 + $0x2dac] ss:$16 sps:$4 sm:$0xff]  }
 0x639   : > { %13274 = vmatprep.subr.bf16.mxu0 %v20948_v4  ;;  %14504 = vmatprep.subr.bf16.mxu1 %v20951_v38  ;;  %v21027_v4 = vld [vmem:[%s22188_s16 + $0x2da8] ss:$16 sps:$4 sm:$0xff]   ;;  %v21032_v38 = vld [vmem:[%s22188_s16 + $0x2dc4] ss:$16 sps:$4 sm:$0xff]  }
 0x63b   : > { %17853 = vmatmul.mubr.msk.bf16.vlgmr.msra.gmra.mrb[0].mxu0 %vm17851_vm7, %v17852_v8  ;;  %18030 = vmatmul.mubr.msk.bf16.vlgmr.msra.gmra.mrb[0].mxu1 %vm17851_vm7, %v17852_v8  ;;  %v448_v8 = vadd.s32 5632, %v22251_v41 }
 0x63c   : > { %13275 = vmatpush1.bf16.msra.mxu0 %v20946_v46  ;;  %14505 = vmatpush1.bf16.msra.mxu1 %v20949_v9  ;;  %v799_v46 = vcombine.high %v23926_v55, %v23926_v55  ;;  %v21030_v9 = vld [vmem:[%s22188_s16 + $0x2dc0] ss:$16 sps:$4 sm:$0xff]  }
 0x63d   : > { %13276 = vmatprep.subr.bf16.mxu0 %v20954_v47  ;;  %14506 = vmatprep.subr.bf16.mxu1 %v20957_v12  ;;  %v21033_v47 = vld [vmem:[%s22188_s16 + $0x2dc8] ss:$16 sps:$4 sm:$0xff]   ;;  %v451_v12 = vadd.s32 6016, %v22251_v41  ;;  %v21036_v55 = vld [vmem:[%s22188_s16 + $0x2de0] ss:$16 sps:$4 sm:$0xff]  }
 0x63e   : > { %17856 = vmatprep.mubr.msk.bf16.mxu0 %vm17854_vm9, %v17855_v13  ;;  %18033 = vmatprep.mubr.msk.bf16.mxu1 %vm17854_vm9, %v17855_v13  ;;  %v21038_v13 = vld [vmem:[%s22188_s16 + $0x2de4] ss:$16 sps:$4 sm:$0xff]  }
 0x640   : > { %13277 = vmatpush1.bf16.msra.mxu0 %v20952_v52  ;;  %14507 = vmatpush1.bf16.msra.mxu1 %v20955_v14  ;;  %v21041_v52 = vld [vmem:[%s22188_s16 + $0x2dec] ss:$16 sps:$4 sm:$0xff]   ;;  %v508_v14 = vadd.s32 %v22262_v50, %v448_v8 }
 0x641   : > { %13278 = vmatprep.subr.bf16.mxu0 %v20960_v15  ;;  %14508 = vmatprep.subr.bf16.mxu1 %v20963_v54  ;;  %v24013_v15 = vrot.slane %v799_v46, %v22267_v53  ;;  %v21039_v54 = vld [vmem:[%s22188_s16 + $0x2de8] ss:$16 sps:$4 sm:$0xff]   ;;  %v21113_v8 = vld [vmem:[%s22188_s16 + $0x2f6c] ss:$16 sps:$4 sm:$0xff]   ;;  %v21108_v46 = vld [vmem:[%s22188_s16 + $0x2f60] ss:$16 sps:$4 sm:$0xff]  }
 0x642   : > { %vm567_vm10 = vcmp.lt.s32.totalorder %v508_v14, 30000  ;;  %v21122_v14 = vld [vmem:[%s22188_s16 + $0x2fa4] ss:$16 sps:$4 sm:$0xff]  }
 0x643   : > { %vm17857_vm11 = vmpackc.low %vm567_vm10, %vm567_vm10 }
 0x644   : > { %13279 = vmatpush1.bf16.msra.mxu0 %v20958_v18  ;;  %14509 = vmatpush1.bf16.msra.mxu1 %v20961_v19  ;;  %v511_v18 = vadd.s32 %v22262_v50, %v451_v12  ;;  %v21044_v19 = vld [vmem:[%s22188_s16 + $0x2e04] ss:$16 sps:$4 sm:$0xff]   ;;  %v21119_v12 = vld [vmem:[%s22188_s16 + $0x2f8c] ss:$16 sps:$4 sm:$0xff]  }
 0x645   : > { %13280 = vmatprep.subr.bf16.mxu0 %v20966_v59  ;;  %14510 = vmatprep.subr.bf16.mxu1 %v20969_v20  ;;  %v21047_v59 = vld [vmem:[%s22188_s16 + $0x2e0c] ss:$16 sps:$4 sm:$0xff]   ;;  %v815_v20 = vcombine.high %v24013_v15, %v24013_v15 }
 0x646   : > { %vm570_vm12 = vcmp.lt.s32.totalorder %v511_v18, 30000  ;;  %v21123_v18 = vld [vmem:[%s22188_s16 + $0x2fa8] ss:$16 sps:$4 sm:$0xff]  }
 0x647   : > { %vm17860_vm13 = vmpackc.low %vm570_vm12, %vm570_vm12 }
 0x648   : > { %13281 = vmatpush1.bf16.msra.mxu0 %v20964_v16  ;;  %14511 = vmatpush1.bf16.msra.mxu1 %v20967_v60  ;;  %v17858_v16 = vpack.c.bf16 %v23936_v1, %v23936_v1  ;;  %v21042_v60 = vld [vmem:[%s22188_s16 + $0x2e00] ss:$16 sps:$4 sm:$0xff]  }
 0x649   : > { %13282 = vmatprep.subr.bf16.mxu0 %v20972_v23  ;;  %14512 = vmatprep.subr.bf16.mxu1 %v20975_v24  ;;  %v21045_v23 = vld [vmem:[%s22188_s16 + $0x2e08] ss:$16 sps:$4 sm:$0xff]   ;;  %v21050_v24 = vld [vmem:[%s22188_s16 + $0x2e24] ss:$16 sps:$4 sm:$0xff]   ;;  %v21048_v1 = vld [vmem:[%s22188_s16 + $0x2e20] ss:$16 sps:$4 sm:$0xff]  }
 0x64c   : > { %13283 = vmatpush1.bf16.msra.mxu0 %v20970_v0  ;;  %14513 = vmatpush1.bf16.msra.mxu1 %v20973_v25  ;;  %v21053_v0 = vld [vmem:[%s22188_s16 + $0x2e2c] ss:$16 sps:$4 sm:$0xff]   ;;  %v17861_v25 = vpack.c.bf16 %v815_v20, %v815_v20  ;;  %v450_v20 = vadd.s32 5888, %v22251_v41 }
 0x64d   : > { %13284 = vmatprep.subr.bf16.mxu0 %v20978_v27  ;;  %14514 = vmatprep.subr.bf16.mxu1 %v20981_v28  ;;  %v21051_v27 = vld [vmem:[%s22188_s16 + $0x2e28] ss:$16 sps:$4 sm:$0xff]   ;;  %v21056_v28 = vld [vmem:[%s22188_s16 + $0x2e44] ss:$16 sps:$4 sm:$0xff]  }
 0x650   : > { %13285 = vmatpush1.bf16.msra.mxu0 %v20976_v29  ;;  %14515 = vmatpush1.bf16.msra.mxu1 %v20979_v5  ;;  %v21059_v29 = vld [vmem:[%s22188_s16 + $0x2e4c] ss:$16 sps:$4 sm:$0xff]   ;;  %v21054_v5 = vld [vmem:[%s22188_s16 + $0x2e40] ss:$16 sps:$4 sm:$0xff]  }
 0x651   : > { %13286 = vmatprep.subr.bf16.mxu0 %v20984_v30  ;;  %14516 = vmatprep.subr.bf16.mxu1 %v20987_v6  ;;  %v21057_v30 = vld [vmem:[%s22188_s16 + $0x2e48] ss:$16 sps:$4 sm:$0xff]   ;;  %v21062_v6 = vld [vmem:[%s22188_s16 + $0x2e64] ss:$16 sps:$4 sm:$0xff]  }
 0x654   : > { %13287 = vmatpush1.bf16.msra.mxu0 %v20982_v34  ;;  %14517 = vmatpush1.bf16.msra.mxu1 %v20985_v35  ;;  %v21065_v34 = vld [vmem:[%s22188_s16 + $0x2e6c] ss:$16 sps:$4 sm:$0xff]   ;;  %v21060_v35 = vld [vmem:[%s22188_s16 + $0x2e60] ss:$16 sps:$4 sm:$0xff]  }
 0x655   : > { %13288 = vmatprep.subr.bf16.mxu0 %v20990_v10  ;;  %14518 = vmatprep.subr.bf16.mxu1 %v20993_v36  ;;  %v21063_v10 = vld [vmem:[%s22188_s16 + $0x2e68] ss:$16 sps:$4 sm:$0xff]   ;;  %v21068_v36 = vld [vmem:[%s22188_s16 + $0x2e84] ss:$16 sps:$4 sm:$0xff]  }
 0x658   : > { %13289 = vmatpush1.bf16.msra.mxu0 %v20988_v11  ;;  %14519 = vmatpush1.bf16.msra.mxu1 %v20991_v40  ;;  %v21071_v11 = vld [vmem:[%s22188_s16 + $0x2e8c] ss:$16 sps:$4 sm:$0xff]   ;;  %v21066_v40 = vld [vmem:[%s22188_s16 + $0x2e80] ss:$16 sps:$4 sm:$0xff]  }
 0x659   : > { %13290 = vmatprep.subr.bf16.mxu0 %v20996_v42  ;;  %14520 = vmatprep.subr.bf16.mxu1 %v20999_v43  ;;  %v21069_v42 = vld [vmem:[%s22188_s16 + $0x2e88] ss:$16 sps:$4 sm:$0xff]   ;;  %v21074_v43 = vld [vmem:[%s22188_s16 + $0x2ea4] ss:$16 sps:$4 sm:$0xff]  }
 0x65c   : > { %13291 = vmatpush1.bf16.msra.mxu0 %v20994_v44  ;;  %14521 = vmatpush1.bf16.msra.mxu1 %v20997_v17  ;;  %v21077_v44 = vld [vmem:[%s22188_s16 + $0x2eac] ss:$16 sps:$4 sm:$0xff]   ;;  %v21072_v17 = vld [vmem:[%s22188_s16 + $0x2ea0] ss:$16 sps:$4 sm:$0xff]  }
 0x65d   : > { %13292 = vmatprep.subr.bf16.mxu0 %v21002_v48  ;;  %14522 = vmatprep.subr.bf16.mxu1 %v21005_v49  ;;  %v21075_v48 = vld [vmem:[%s22188_s16 + $0x2ea8] ss:$16 sps:$4 sm:$0xff]   ;;  %v21080_v49 = vld [vmem:[%s22188_s16 + $0x2ec4] ss:$16 sps:$4 sm:$0xff]  }
 0x660   : > { %13293 = vmatpush1.bf16.msra.mxu0 %v21000_v21  ;;  %14523 = vmatpush1.bf16.msra.mxu1 %v21003_v51  ;;  %v21083_v21 = vld [vmem:[%s22188_s16 + $0x2ecc] ss:$16 sps:$4 sm:$0xff]   ;;  %v21078_v51 = vld [vmem:[%s22188_s16 + $0x2ec0] ss:$16 sps:$4 sm:$0xff]  }
 0x661   : > { %13294 = vmatprep.subr.bf16.mxu0 %v21008_v39  ;;  %14524 = vmatprep.subr.bf16.mxu1 %v21011_v22  ;;  %v21081_v39 = vld [vmem:[%s22188_s16 + $0x2ec8] ss:$16 sps:$4 sm:$0xff]   ;;  %v21086_v22 = vld [vmem:[%s22188_s16 + $0x2ee4] ss:$16 sps:$4 sm:$0xff]  }
 0x664   : > { %13295 = vmatpush1.bf16.msra.mxu0 %v21006_v56  ;;  %14525 = vmatpush1.bf16.msra.mxu1 %v21009_v57  ;;  %v21089_v56 = vld [vmem:[%s22188_s16 + $0x2eec] ss:$16 sps:$4 sm:$0xff]   ;;  %v21084_v57 = vld [vmem:[%s22188_s16 + $0x2ee0] ss:$16 sps:$4 sm:$0xff]  }
 0x665   : > { %13296 = vmatprep.subr.bf16.mxu0 %v21014_v26  ;;  %14526 = vmatprep.subr.bf16.mxu1 %v21017_v58  ;;  %v21087_v26 = vld [vmem:[%s22188_s16 + $0x2ee8] ss:$16 sps:$4 sm:$0xff]   ;;  %v21092_v58 = vld [vmem:[%s22188_s16 + $0x2f04] ss:$16 sps:$4 sm:$0xff]  }
 0x668   : > { %13297 = vmatpush1.bf16.msra.mxu0 %v21012_v32  ;;  %14527 = vmatpush1.bf16.msra.mxu1 %v21015_v61  ;;  %v21095_v32 = vld [vmem:[%s22188_s16 + $0x2f0c] ss:$16 sps:$4 sm:$0xff]   ;;  %v21090_v61 = vld [vmem:[%s22188_s16 + $0x2f00] ss:$16 sps:$4 sm:$0xff]  }
 0x669   : > { %13298 = vmatprep.subr.bf16.mxu0 %v21020_v62  ;;  %14528 = vmatprep.subr.bf16.mxu1 %v21023_v31  ;;  %v21093_v62 = vld [vmem:[%s22188_s16 + $0x2f08] ss:$16 sps:$4 sm:$0xff]   ;;  %v21098_v31 = vld [vmem:[%s22188_s16 + $0x2f24] ss:$16 sps:$4 sm:$0xff]  }
 0x66c   : > { %13299 = vmatpush1.bf16.msra.mxu0 %v21018_v63  ;;  %14529 = vmatpush1.bf16.msra.mxu1 %v21021_v33  ;;  %v21101_v63 = vld [vmem:[%s22188_s16 + $0x2f2c] ss:$16 sps:$4 sm:$0xff]   ;;  %v21096_v33 = vld [vmem:[%s22188_s16 + $0x2f20] ss:$16 sps:$4 sm:$0xff]  }
 0x66d   : > { %13300 = vmatprep.subr.bf16.mxu0 %v21026_v2  ;;  %14530 = vmatprep.subr.bf16.mxu1 %v21029_v3  ;;  %v21099_v2 = vld [vmem:[%s22188_s16 + $0x2f28] ss:$16 sps:$4 sm:$0xff]   ;;  %v21104_v3 = vld [vmem:[%s22188_s16 + $0x2f44] ss:$16 sps:$4 sm:$0xff]  }
 0x670   : > { %13301 = vmatpush1.bf16.msra.mxu0 %v21024_v37  ;;  %14531 = vmatpush1.bf16.msra.mxu1 %v21027_v4  ;;  %v21107_v37 = vld [vmem:[%s22188_s16 + $0x2f4c] ss:$16 sps:$4 sm:$0xff]   ;;  %v21102_v4 = vld [vmem:[%s22188_s16 + $0x2f40] ss:$16 sps:$4 sm:$0xff]  }
 0x671   : > { %13302 = vmatprep.subr.bf16.mxu0 %v21032_v38  ;;  %14532 = vmatprep.subr.bf16.mxu1 %v21035_v7  ;;  %v21105_v38 = vld [vmem:[%s22188_s16 + $0x2f48] ss:$16 sps:$4 sm:$0xff]   ;;  %v21110_v7 = vld [vmem:[%s22188_s16 + $0x2f64] ss:$16 sps:$4 sm:$0xff]  }
 0x674   : > { %13303 = vmatpush1.bf16.msra.mxu0 %v21030_v9  ;;  %14533 = vmatpush1.bf16.msra.mxu1 %v21033_v47  ;;  %v21111_v9 = vld [vmem:[%s22188_s16 + $0x2f68] ss:$16 sps:$4 sm:$0xff]   ;;  %v21116_v47 = vld [vmem:[%s22188_s16 + $0x2f84] ss:$16 sps:$4 sm:$0xff]  }
 0x675   : > { %13304 = vmatprep.subr.bf16.mxu0 %v21038_v13  ;;  %14534 = vmatprep.subr.bf16.mxu1 %v21041_v52  ;;  %v21114_v13 = vld [vmem:[%s22188_s16 + $0x2f80] ss:$16 sps:$4 sm:$0xff]   ;;  %v21117_v52 = vld [vmem:[%s22188_s16 + $0x2f88] ss:$16 sps:$4 sm:$0xff]  }
 0x678   : > { %13305 = vmatpush1.bf16.msra.mxu0 %v21036_v55  ;;  %14535 = vmatpush1.bf16.msra.mxu1 %v21039_v54  ;;  %v21125_v55 = vld [vmem:[%s22188_s16 + $0x2fac] ss:$16 sps:$4 sm:$0xff]   ;;  %v21120_v54 = vld [vmem:[%s22188_s16 + $0x2fa0] ss:$16 sps:$4 sm:$0xff]  }
 0x679   : > { %13315 = vmatprep.subr.bf16.mxu0 %v21044_v19  ;;  %14545 = vmatprep.subr.bf16.mxu1 %v21047_v59  ;;  %v21128_v19 = vld [vmem:[%s22188_s16 + $0x2fc4] ss:$16 sps:$4 sm:$0xff]   ;;  %v21131_v59 = vld [vmem:[%s22188_s16 + $0x2fcc] ss:$16 sps:$4 sm:$0xff]  }
 0x67b   : > { %17859 = vmatmul.mubr.msk.bf16.vlgmr.msra.gmra.mrb[0].mxu0 %vm17857_vm11, %v17858_v16  ;;  %18036 = vmatmul.mubr.msk.bf16.vlgmr.msra.gmra.mrb[0].mxu1 %vm17857_vm11, %v17858_v16  ;;  %v24082_v16 = vld [vmem:[%s22210_s15 + $0x60] sm:$0xff] }
 0x67c   : > { %13316 = vmatpush1.bf16.msra.mxu0 %v21042_v60  ;;  %14546 = vmatpush1.bf16.msra.mxu1 %v21045_v23  ;;  %v21126_v60 = vld [vmem:[%s22188_s16 + $0x2fc0] ss:$16 sps:$4 sm:$0xff]   ;;  %v21129_v23 = vld [vmem:[%s22188_s16 + $0x2fc8] ss:$16 sps:$4 sm:$0xff]  }
 0x67d   : > { %13317 = vmatprep.subr.bf16.mxu0 %v21050_v24  ;;  %14547 = vmatprep.subr.bf16.mxu1 %v21053_v0  ;;  %v453_v24 = vadd.s32 6272, %v22251_v41  ;;  %v21134_v0 = vld [vmem:[%s22188_s16 + $0x2fe4] ss:$16 sps:$4 sm:$0xff]  }
 0x67e   : > { %17862 = vmatprep.mubr.msk.bf16.mxu0 %vm17860_vm13, %v17861_v25  ;;  %18039 = vmatprep.mubr.msk.bf16.mxu1 %vm17860_vm13, %v17861_v25  ;;  %v21137_v25 = vld [vmem:[%s22188_s16 + $0x2fec] ss:$16 sps:$4 sm:$0xff]  }
 0x680   : > { %13318 = vmatpush1.bf16.msra.mxu0 %v21048_v1  ;;  %14548 = vmatpush1.bf16.msra.mxu1 %v21051_v27  ;;  %v510_v1 = vadd.s32 %v22262_v50, %v450_v20  ;;  %v24092_v27 = vrot.slane %v24082_v16, %v22267_v53  ;;  %v21210_v20 = vld [vmem:[%s22188_s16 + $0x316c] ss:$16 sps:$4 sm:$0xff]  }
 0x681   : > { %13319 = vmatprep.subr.bf16.mxu0 %v21056_v28  ;;  %14549 = vmatprep.subr.bf16.mxu1 %v21059_v29  ;;  %v21132_v28 = vld [vmem:[%s22188_s16 + $0x2fe0] ss:$16 sps:$4 sm:$0xff]   ;;  %v21135_v29 = vld [vmem:[%s22188_s16 + $0x2fe8] ss:$16 sps:$4 sm:$0xff]  }
 0x682   : > { %vm569_vm14 = vcmp.lt.s32.totalorder %v510_v1, 30000  ;;  %v21214_v1 = vld [vmem:[%s22188_s16 + $0x3188] ss:$16 sps:$4 sm:$0xff]  }
 0x683   : > { %vm17863_vm15 = vmpackc.low %vm569_vm14, %vm569_vm14 }
 0x684   : > { %13320 = vmatpush1.bf16.msra.mxu0 %v21054_v5  ;;  %14550 = vmatpush1.bf16.msra.mxu1 %v21057_v30  ;;  %v513_v5 = vadd.s32 %v22262_v50, %v453_v24  ;;  %v21141_v30 = vld [vmem:[%s22188_s16 + $0x3004] ss:$16 sps:$4 sm:$0xff]  }
 0x685   : > { %13321 = vmatprep.subr.bf16.mxu0 %v21062_v6  ;;  %14551 = vmatprep.subr.bf16.mxu1 %v21065_v34  ;;  %v21144_v6 = vld [vmem:[%s22188_s16 + $0x300c] ss:$16 sps:$4 sm:$0xff]   ;;  %v831_v34 = vcombine.high %v24092_v27, %v24092_v27  ;;  %v21213_v24 = vld [vmem:[%s22188_s16 + $0x3184] ss:$16 sps:$4 sm:$0xff]  }
 0x686   : > { %vm572_vm0 = vcmp.lt.s32.totalorder %v513_v5, 30000  ;;  %v21217_v5 = vld [vmem:[%s22188_s16 + $0x31a0] ss:$16 sps:$4 sm:$0xff]  }
 0x687   : > { %vm17866_vm1 = vmpackc.low %vm572_vm0, %vm572_vm0 }
 0x688   : > { %13322 = vmatpush1.bf16.msra.mxu0 %v21060_v35  ;;  %14552 = vmatpush1.bf16.msra.mxu1 %v21063_v10  ;;  %v17864_v35 = vpack.c.bf16 %v24013_v15, %v24013_v15  ;;  %v21139_v10 = vld [vmem:[%s22188_s16 + $0x3000] ss:$16 sps:$4 sm:$0xff]  }
 0x689   : > { %13323 = vmatprep.subr.bf16.mxu0 %v21068_v36  ;;  %14553 = vmatprep.subr.bf16.mxu1 %v21071_v11  ;;  %v21142_v36 = vld [vmem:[%s22188_s16 + $0x3008] ss:$16 sps:$4 sm:$0xff]   ;;  %v21147_v11 = vld [vmem:[%s22188_s16 + $0x3024] ss:$16 sps:$4 sm:$0xff]   ;;  %v21145_v15 = vld [vmem:[%s22188_s16 + $0x3020] ss:$16 sps:$4 sm:$0xff]  }
 0x68c   : > { %13324 = vmatpush1.bf16.msra.mxu0 %v21066_v40  ;;  %14554 = vmatpush1.bf16.msra.mxu1 %v21069_v42  ;;  %v21150_v40 = vld [vmem:[%s22188_s16 + $0x302c] ss:$16 sps:$4 sm:$0xff]   ;;  %v17867_v42 = vpack.c.bf16 %v831_v34, %v831_v34 }
 0x68d   : > { %13325 = vmatprep.subr.bf16.mxu0 %v21074_v43  ;;  %14555 = vmatprep.subr.bf16.mxu1 %v21077_v44  ;;  %v21148_v43 = vld [vmem:[%s22188_s16 + $0x3028] ss:$16 sps:$4 sm:$0xff]   ;;  %v21153_v44 = vld [vmem:[%s22188_s16 + $0x3044] ss:$16 sps:$4 sm:$0xff]   ;;  %v21228_v34 = vld [vmem:[%s22188_s16 + $0x31cc] ss:$16 sps:$4 sm:$0xff]  }
 0x690   : > { %13326 = vmatpush1.bf16.msra.mxu0 %v21072_v17  ;;  %14556 = vmatpush1.bf16.msra.mxu1 %v21075_v48  ;;  %v21156_v17 = vld [vmem:[%s22188_s16 + $0x304c] ss:$16 sps:$4 sm:$0xff]   ;;  %v21151_v48 = vld [vmem:[%s22188_s16 + $0x3040] ss:$16 sps:$4 sm:$0xff]  }
 0x691   : > { %13327 = vmatprep.subr.bf16.mxu0 %v21080_v49  ;;  %14557 = vmatprep.subr.bf16.mxu1 %v21083_v21  ;;  %v21154_v49 = vld [vmem:[%s22188_s16 + $0x3048] ss:$16 sps:$4 sm:$0xff]   ;;  %v21159_v21 = vld [vmem:[%s22188_s16 + $0x3064] ss:$16 sps:$4 sm:$0xff]  }
 0x694   : > { %13328 = vmatpush1.bf16.msra.mxu0 %v21078_v51  ;;  %14558 = vmatpush1.bf16.msra.mxu1 %v21081_v39  ;;  %v21162_v51 = vld [vmem:[%s22188_s16 + $0x306c] ss:$16 sps:$4 sm:$0xff]   ;;  %v21157_v39 = vld [vmem:[%s22188_s16 + $0x3060] ss:$16 sps:$4 sm:$0xff]  }
 0x695   : > { %13329 = vmatprep.subr.bf16.mxu0 %v21086_v22  ;;  %14559 = vmatprep.subr.bf16.mxu1 %v21089_v56  ;;  %v21160_v22 = vld [vmem:[%s22188_s16 + $0x3068] ss:$16 sps:$4 sm:$0xff]   ;;  %v21165_v56 = vld [vmem:[%s22188_s16 + $0x3084] ss:$16 sps:$4 sm:$0xff]  }
 0x698   : > { %13330 = vmatpush1.bf16.msra.mxu0 %v21084_v57  ;;  %14560 = vmatpush1.bf16.msra.mxu1 %v21087_v26  ;;  %v21168_v57 = vld [vmem:[%s22188_s16 + $0x308c] ss:$16 sps:$4 sm:$0xff]   ;;  %v21163_v26 = vld [vmem:[%s22188_s16 + $0x3080] ss:$16 sps:$4 sm:$0xff]  }
 0x699   : > { %13331 = vmatprep.subr.bf16.mxu0 %v21092_v58  ;;  %14561 = vmatprep.subr.bf16.mxu1 %v21095_v32  ;;  %v21166_v58 = vld [vmem:[%s22188_s16 + $0x3088] ss:$16 sps:$4 sm:$0xff]   ;;  %v21171_v32 = vld [vmem:[%s22188_s16 + $0x30a4] ss:$16 sps:$4 sm:$0xff]  }
 0x69c   : > { %13332 = vmatpush1.bf16.msra.mxu0 %v21090_v61  ;;  %14562 = vmatpush1.bf16.msra.mxu1 %v21093_v62  ;;  %v21174_v61 = vld [vmem:[%s22188_s16 + $0x30ac] ss:$16 sps:$4 sm:$0xff]   ;;  %v21169_v62 = vld [vmem:[%s22188_s16 + $0x30a0] ss:$16 sps:$4 sm:$0xff]  }
 0x69d   : > { %13333 = vmatprep.subr.bf16.mxu0 %v21098_v31  ;;  %14563 = vmatprep.subr.bf16.mxu1 %v21101_v63  ;;  %v21172_v31 = vld [vmem:[%s22188_s16 + $0x30a8] ss:$16 sps:$4 sm:$0xff]   ;;  %v21177_v63 = vld [vmem:[%s22188_s16 + $0x30c4] ss:$16 sps:$4 sm:$0xff]  }
 0x6a0   : > { %13334 = vmatpush1.bf16.msra.mxu0 %v21096_v33  ;;  %14564 = vmatpush1.bf16.msra.mxu1 %v21099_v2  ;;  %v21180_v33 = vld [vmem:[%s22188_s16 + $0x30cc] ss:$16 sps:$4 sm:$0xff]   ;;  %v21175_v2 = vld [vmem:[%s22188_s16 + $0x30c0] ss:$16 sps:$4 sm:$0xff]  }
 0x6a1   : > { %13335 = vmatprep.subr.bf16.mxu0 %v21104_v3  ;;  %14565 = vmatprep.subr.bf16.mxu1 %v21107_v37  ;;  %v21178_v3 = vld [vmem:[%s22188_s16 + $0x30c8] ss:$16 sps:$4 sm:$0xff]   ;;  %v21183_v37 = vld [vmem:[%s22188_s16 + $0x30e4] ss:$16 sps:$4 sm:$0xff]  }
 0x6a4   : > { %13336 = vmatpush1.bf16.msra.mxu0 %v21102_v4  ;;  %14566 = vmatpush1.bf16.msra.mxu1 %v21105_v38  ;;  %v21186_v4 = vld [vmem:[%s22188_s16 + $0x30ec] ss:$16 sps:$4 sm:$0xff]   ;;  %v21181_v38 = vld [vmem:[%s22188_s16 + $0x30e0] ss:$16 sps:$4 sm:$0xff]  }
 0x6a5   : > { %13337 = vmatprep.subr.bf16.mxu0 %v21110_v7  ;;  %14567 = vmatprep.subr.bf16.mxu1 %v21113_v8  ;;  %v21184_v7 = vld [vmem:[%s22188_s16 + $0x30e8] ss:$16 sps:$4 sm:$0xff]   ;;  %v21189_v8 = vld [vmem:[%s22188_s16 + $0x3104] ss:$16 sps:$4 sm:$0xff]  }
 0x6a8   : > { %13338 = vmatpush1.bf16.msra.mxu0 %v21108_v46  ;;  %14568 = vmatpush1.bf16.msra.mxu1 %v21111_v9  ;;  %v21192_v46 = vld [vmem:[%s22188_s16 + $0x310c] ss:$16 sps:$4 sm:$0xff]   ;;  %v21187_v9 = vld [vmem:[%s22188_s16 + $0x3100] ss:$16 sps:$4 sm:$0xff]  }
 0x6a9   : > { %13339 = vmatprep.subr.bf16.mxu0 %v21116_v47  ;;  %14569 = vmatprep.subr.bf16.mxu1 %v21119_v12  ;;  %v21190_v47 = vld [vmem:[%s22188_s16 + $0x3108] ss:$16 sps:$4 sm:$0xff]   ;;  %v21195_v12 = vld [vmem:[%s22188_s16 + $0x3124] ss:$16 sps:$4 sm:$0xff]  }
 0x6ac   : > { %13340 = vmatpush1.bf16.msra.mxu0 %v21114_v13  ;;  %14570 = vmatpush1.bf16.msra.mxu1 %v21117_v52  ;;  %v21198_v13 = vld [vmem:[%s22188_s16 + $0x312c] ss:$16 sps:$4 sm:$0xff]   ;;  %v21193_v52 = vld [vmem:[%s22188_s16 + $0x3120] ss:$16 sps:$4 sm:$0xff]  }
 0x6ad   : > { %13341 = vmatprep.subr.bf16.mxu0 %v21122_v14  ;;  %14571 = vmatprep.subr.bf16.mxu1 %v21125_v55  ;;  %v21196_v14 = vld [vmem:[%s22188_s16 + $0x3128] ss:$16 sps:$4 sm:$0xff]   ;;  %v21201_v55 = vld [vmem:[%s22188_s16 + $0x3144] ss:$16 sps:$4 sm:$0xff]  }
 0x6b0   : > { %13342 = vmatpush1.bf16.msra.mxu0 %v21120_v54  ;;  %14572 = vmatpush1.bf16.msra.mxu1 %v21123_v18  ;;  %v21204_v54 = vld [vmem:[%s22188_s16 + $0x314c] ss:$16 sps:$4 sm:$0xff]   ;;  %v21199_v18 = vld [vmem:[%s22188_s16 + $0x3140] ss:$16 sps:$4 sm:$0xff]  }
 0x6b1   : > { %13343 = vmatprep.subr.bf16.mxu0 %v21128_v19  ;;  %14573 = vmatprep.subr.bf16.mxu1 %v21131_v59  ;;  %v21202_v19 = vld [vmem:[%s22188_s16 + $0x3148] ss:$16 sps:$4 sm:$0xff]   ;;  %v21207_v59 = vld [vmem:[%s22188_s16 + $0x3164] ss:$16 sps:$4 sm:$0xff]  }
 0x6b4   : > { %13344 = vmatpush1.bf16.msra.mxu0 %v21126_v60  ;;  %14574 = vmatpush1.bf16.msra.mxu1 %v21129_v23  ;;  %v21205_v60 = vld [vmem:[%s22188_s16 + $0x3160] ss:$16 sps:$4 sm:$0xff]   ;;  %v21208_v23 = vld [vmem:[%s22188_s16 + $0x3168] ss:$16 sps:$4 sm:$0xff]  }
 0x6b5   : > { %13345 = vmatprep.subr.bf16.mxu0 %v21134_v0  ;;  %14575 = vmatprep.subr.bf16.mxu1 %v21137_v25  ;;  %v21216_v0 = vld [vmem:[%s22188_s16 + $0x318c] ss:$16 sps:$4 sm:$0xff]   ;;  %v21211_v25 = vld [vmem:[%s22188_s16 + $0x3180] ss:$16 sps:$4 sm:$0xff]  }
 0x6b8   : > { %13346 = vmatpush1.bf16.msra.mxu0 %v21132_v28  ;;  %14576 = vmatpush1.bf16.msra.mxu1 %v21135_v29  ;;  %v21219_v28 = vld [vmem:[%s22188_s16 + $0x31a4] ss:$16 sps:$4 sm:$0xff]   ;;  %v21222_v29 = vld [vmem:[%s22188_s16 + $0x31ac] ss:$16 sps:$4 sm:$0xff]  }
 0x6b9   : > { %13356 = vmatprep.subr.bf16.mxu0 %v21141_v30  ;;  %14586 = vmatprep.subr.bf16.mxu1 %v21144_v6  ;;  %v21220_v30 = vld [vmem:[%s22188_s16 + $0x31a8] ss:$16 sps:$4 sm:$0xff]   ;;  %v21225_v6 = vld [vmem:[%s22188_s16 + $0x31c4] ss:$16 sps:$4 sm:$0xff]  }
 0x6bb   : > { %17865 = vmatmul.mubr.msk.bf16.vlgmr.msra.gmra.mrb[0].mxu0 %vm17863_vm15, %v17864_v35  ;;  %18042 = vmatmul.mubr.msk.bf16.vlgmr.msra.gmra.mrb[0].mxu1 %vm17863_vm15, %v17864_v35  ;;  %v452_v35 = vadd.s32 6144, %v22251_v41 }
 0x6bc   : > { %13357 = vmatpush1.bf16.msra.mxu0 %v21139_v10  ;;  %14587 = vmatpush1.bf16.msra.mxu1 %v21142_v36  ;;  %v816_v10 = vcombine.high %v24082_v16, %v24082_v16  ;;  %v21223_v36 = vld [vmem:[%s22188_s16 + $0x31c0] ss:$16 sps:$4 sm:$0xff]  }
 0x6bd   : > { %13358 = vmatprep.subr.bf16.mxu0 %v21147_v11  ;;  %14588 = vmatprep.subr.bf16.mxu1 %v21150_v40  ;;  %v21226_v11 = vld [vmem:[%s22188_s16 + $0x31c8] ss:$16 sps:$4 sm:$0xff]   ;;  %v455_v40 = vadd.s32 6528, %v22251_v41  ;;  %v21229_v16 = vld [vmem:[%s22188_s16 + $0x31e0] ss:$16 sps:$4 sm:$0xff]  }
 0x6be   : > { %17868 = vmatprep.mubr.msk.bf16.mxu0 %vm17866_vm1, %v17867_v42  ;;  %18045 = vmatprep.mubr.msk.bf16.mxu1 %vm17866_vm1, %v17867_v42  ;;  %v21231_v42 = vld [vmem:[%s22188_s16 + $0x31e4] ss:$16 sps:$4 sm:$0xff]  }
 0x6c0   : > { %13359 = vmatpush1.bf16.msra.mxu0 %v21145_v15  ;;  %14589 = vmatpush1.bf16.msra.mxu1 %v21148_v43  ;;  %v21234_v15 = vld [vmem:[%s22188_s16 + $0x31ec] ss:$16 sps:$4 sm:$0xff]   ;;  %v512_v43 = vadd.s32 %v22262_v50, %v452_v35 }
 0x6c1   : > { %13360 = vmatprep.subr.bf16.mxu0 %v21153_v44  ;;  %14590 = vmatprep.subr.bf16.mxu1 %v21156_v17  ;;  %v24169_v44 = vrot.slane %v816_v10, %v22267_v53  ;;  %v21232_v17 = vld [vmem:[%s22188_s16 + $0x31e8] ss:$16 sps:$4 sm:$0xff]   ;;  %v21306_v35 = vld [vmem:[%s22188_s16 + $0x336c] ss:$16 sps:$4 sm:$0xff]   ;;  %v21301_v10 = vld [vmem:[%s22188_s16 + $0x3360] ss:$16 sps:$4 sm:$0xff]  }
 0x6c2   : > { %vm571_vm2 = vcmp.lt.s32.totalorder %v512_v43, 30000  ;;  %v21315_v43 = vld [vmem:[%s22188_s16 + $0x33a4] ss:$16 sps:$4 sm:$0xff]  }
 0x6c3   : > { %vm17869_vm3 = vmpackc.low %vm571_vm2, %vm571_vm2 }
 0x6c4   : > { %13361 = vmatpush1.bf16.msra.mxu0 %v21151_v48  ;;  %14591 = vmatpush1.bf16.msra.mxu1 %v21154_v49  ;;  %v515_v48 = vadd.s32 %v22262_v50, %v455_v40  ;;  %v21237_v49 = vld [vmem:[%s22188_s16 + $0x3204] ss:$16 sps:$4 sm:$0xff]   ;;  %v21312_v40 = vld [vmem:[%s22188_s16 + $0x338c] ss:$16 sps:$4 sm:$0xff]  }
 0x6c5   : > { %13362 = vmatprep.subr.bf16.mxu0 %v21159_v21  ;;  %14592 = vmatprep.subr.bf16.mxu1 %v21162_v51  ;;  %v21240_v21 = vld [vmem:[%s22188_s16 + $0x320c] ss:$16 sps:$4 sm:$0xff]   ;;  %v832_v51 = vcombine.high %v24169_v44, %v24169_v44 }
 0x6c6   : > { %vm574_vm4 = vcmp.lt.s32.totalorder %v515_v48, 30000  ;;  %v21316_v48 = vld [vmem:[%s22188_s16 + $0x33a8] ss:$16 sps:$4 sm:$0xff]  }
 0x6c7   : > { %vm17872_vm5 = vmpackc.low %vm574_vm4, %vm574_vm4 }
 0x6c8   : > { %13363 = vmatpush1.bf16.msra.mxu0 %v21157_v39  ;;  %14593 = vmatpush1.bf16.msra.mxu1 %v21160_v22  ;;  %v17870_v39 = vpack.c.bf16 %v24092_v27, %v24092_v27  ;;  %v21235_v22 = vld [vmem:[%s22188_s16 + $0x3200] ss:$16 sps:$4 sm:$0xff]  }
 0x6c9   : > { %13364 = vmatprep.subr.bf16.mxu0 %v21165_v56  ;;  %14594 = vmatprep.subr.bf16.mxu1 %v21168_v57  ;;  %v21238_v56 = vld [vmem:[%s22188_s16 + $0x3208] ss:$16 sps:$4 sm:$0xff]   ;;  %v21243_v57 = vld [vmem:[%s22188_s16 + $0x3224] ss:$16 sps:$4 sm:$0xff]   ;;  %v21241_v27 = vld [vmem:[%s22188_s16 + $0x3220] ss:$16 sps:$4 sm:$0xff]  }
 0x6cc   : > { %13365 = vmatpush1.bf16.msra.mxu0 %v21163_v26  ;;  %14595 = vmatpush1.bf16.msra.mxu1 %v21166_v58  ;;  %v21246_v26 = vld [vmem:[%s22188_s16 + $0x322c] ss:$16 sps:$4 sm:$0xff]   ;;  %v17873_v58 = vpack.c.bf16 %v832_v51, %v832_v51  ;;  %v454_v51 = vadd.s32 6400, %v22251_v41 }
 0x6cd   : > { %13366 = vmatprep.subr.bf16.mxu0 %v21171_v32  ;;  %14596 = vmatprep.subr.bf16.mxu1 %v21174_v61  ;;  %v21244_v32 = vld [vmem:[%s22188_s16 + $0x3228] ss:$16 sps:$4 sm:$0xff]   ;;  %v21249_v61 = vld [vmem:[%s22188_s16 + $0x3244] ss:$16 sps:$4 sm:$0xff]  }
 0x6d0   : > { %13367 = vmatpush1.bf16.msra.mxu0 %v21169_v62  ;;  %14597 = vmatpush1.bf16.msra.mxu1 %v21172_v31  ;;  %v21252_v62 = vld [vmem:[%s22188_s16 + $0x324c] ss:$16 sps:$4 sm:$0xff]   ;;  %v21247_v31 = vld [vmem:[%s22188_s16 + $0x3240] ss:$16 sps:$4 sm:$0xff]  }
 0x6d1   : > { %13368 = vmatprep.subr.bf16.mxu0 %v21177_v63  ;;  %14598 = vmatprep.subr.bf16.mxu1 %v21180_v33  ;;  %v21250_v63 = vld [vmem:[%s22188_s16 + $0x3248] ss:$16 sps:$4 sm:$0xff]   ;;  %v21255_v33 = vld [vmem:[%s22188_s16 + $0x3264] ss:$16 sps:$4 sm:$0xff]  }
 0x6d4   : > { %13369 = vmatpush1.bf16.msra.mxu0 %v21175_v2  ;;  %14599 = vmatpush1.bf16.msra.mxu1 %v21178_v3  ;;  %v21258_v2 = vld [vmem:[%s22188_s16 + $0x326c] ss:$16 sps:$4 sm:$0xff]   ;;  %v21253_v3 = vld [vmem:[%s22188_s16 + $0x3260] ss:$16 sps:$4 sm:$0xff]  }
 0x6d5   : > { %13370 = vmatprep.subr.bf16.mxu0 %v21183_v37  ;;  %14600 = vmatprep.subr.bf16.mxu1 %v21186_v4  ;;  %v21256_v37 = vld [vmem:[%s22188_s16 + $0x3268] ss:$16 sps:$4 sm:$0xff]   ;;  %v21261_v4 = vld [vmem:[%s22188_s16 + $0x3284] ss:$16 sps:$4 sm:$0xff]  }
 0x6d8   : > { %13371 = vmatpush1.bf16.msra.mxu0 %v21181_v38  ;;  %14601 = vmatpush1.bf16.msra.mxu1 %v21184_v7  ;;  %v21264_v38 = vld [vmem:[%s22188_s16 + $0x328c] ss:$16 sps:$4 sm:$0xff]   ;;  %v21259_v7 = vld [vmem:[%s22188_s16 + $0x3280] ss:$16 sps:$4 sm:$0xff]  }
 0x6d9   : > { %13372 = vmatprep.subr.bf16.mxu0 %v21189_v8  ;;  %14602 = vmatprep.subr.bf16.mxu1 %v21192_v46  ;;  %v21262_v8 = vld [vmem:[%s22188_s16 + $0x3288] ss:$16 sps:$4 sm:$0xff]   ;;  %v21267_v46 = vld [vmem:[%s22188_s16 + $0x32a4] ss:$16 sps:$4 sm:$0xff]  }
 0x6dc   : > { %13373 = vmatpush1.bf16.msra.mxu0 %v21187_v9  ;;  %14603 = vmatpush1.bf16.msra.mxu1 %v21190_v47  ;;  %v21270_v9 = vld [vmem:[%s22188_s16 + $0x32ac] ss:$16 sps:$4 sm:$0xff]   ;;  %v21265_v47 = vld [vmem:[%s22188_s16 + $0x32a0] ss:$16 sps:$4 sm:$0xff]  }
 0x6dd   : > { %13374 = vmatprep.subr.bf16.mxu0 %v21195_v12  ;;  %14604 = vmatprep.subr.bf16.mxu1 %v21198_v13  ;;  %v21268_v12 = vld [vmem:[%s22188_s16 + $0x32a8] ss:$16 sps:$4 sm:$0xff]   ;;  %v21273_v13 = vld [vmem:[%s22188_s16 + $0x32c4] ss:$16 sps:$4 sm:$0xff]  }
 0x6e0   : > { %13375 = vmatpush1.bf16.msra.mxu0 %v21193_v52  ;;  %14605 = vmatpush1.bf16.msra.mxu1 %v21196_v14  ;;  %v21276_v52 = vld [vmem:[%s22188_s16 + $0x32cc] ss:$16 sps:$4 sm:$0xff]   ;;  %v21271_v14 = vld [vmem:[%s22188_s16 + $0x32c0] ss:$16 sps:$4 sm:$0xff]  }
 0x6e1   : > { %13376 = vmatprep.subr.bf16.mxu0 %v21201_v55  ;;  %14606 = vmatprep.subr.bf16.mxu1 %v21204_v54  ;;  %v21274_v55 = vld [vmem:[%s22188_s16 + $0x32c8] ss:$16 sps:$4 sm:$0xff]   ;;  %v21279_v54 = vld [vmem:[%s22188_s16 + $0x32e4] ss:$16 sps:$4 sm:$0xff]  }
 0x6e4   : > { %13377 = vmatpush1.bf16.msra.mxu0 %v21199_v18  ;;  %14607 = vmatpush1.bf16.msra.mxu1 %v21202_v19  ;;  %v21282_v18 = vld [vmem:[%s22188_s16 + $0x32ec] ss:$16 sps:$4 sm:$0xff]   ;;  %v21277_v19 = vld [vmem:[%s22188_s16 + $0x32e0] ss:$16 sps:$4 sm:$0xff]  }
 0x6e5   : > { %13378 = vmatprep.subr.bf16.mxu0 %v21207_v59  ;;  %14608 = vmatprep.subr.bf16.mxu1 %v21210_v20  ;;  %v21280_v59 = vld [vmem:[%s22188_s16 + $0x32e8] ss:$16 sps:$4 sm:$0xff]   ;;  %v21285_v20 = vld [vmem:[%s22188_s16 + $0x3304] ss:$16 sps:$4 sm:$0xff]  }
 0x6e8   : > { %13379 = vmatpush1.bf16.msra.mxu0 %v21205_v60  ;;  %14609 = vmatpush1.bf16.msra.mxu1 %v21208_v23  ;;  %v21288_v60 = vld [vmem:[%s22188_s16 + $0x330c] ss:$16 sps:$4 sm:$0xff]   ;;  %v21283_v23 = vld [vmem:[%s22188_s16 + $0x3300] ss:$16 sps:$4 sm:$0xff]  }
 0x6e9   : > { %13380 = vmatprep.subr.bf16.mxu0 %v21213_v24  ;;  %14610 = vmatprep.subr.bf16.mxu1 %v21216_v0  ;;  %v21286_v24 = vld [vmem:[%s22188_s16 + $0x3308] ss:$16 sps:$4 sm:$0xff]   ;;  %v21291_v0 = vld [vmem:[%s22188_s16 + $0x3324] ss:$16 sps:$4 sm:$0xff]  }
 0x6ec   : > { %13381 = vmatpush1.bf16.msra.mxu0 %v21211_v25  ;;  %14611 = vmatpush1.bf16.msra.mxu1 %v21214_v1  ;;  %v21294_v25 = vld [vmem:[%s22188_s16 + $0x332c] ss:$16 sps:$4 sm:$0xff]   ;;  %v21289_v1 = vld [vmem:[%s22188_s16 + $0x3320] ss:$16 sps:$4 sm:$0xff]  }
 0x6ed   : > { %13382 = vmatprep.subr.bf16.mxu0 %v21219_v28  ;;  %14612 = vmatprep.subr.bf16.mxu1 %v21222_v29  ;;  %v21292_v28 = vld [vmem:[%s22188_s16 + $0x3328] ss:$16 sps:$4 sm:$0xff]   ;;  %v21297_v29 = vld [vmem:[%s22188_s16 + $0x3344] ss:$16 sps:$4 sm:$0xff]  }
 0x6f0   : > { %13383 = vmatpush1.bf16.msra.mxu0 %v21217_v5  ;;  %14613 = vmatpush1.bf16.msra.mxu1 %v21220_v30  ;;  %v21300_v5 = vld [vmem:[%s22188_s16 + $0x334c] ss:$16 sps:$4 sm:$0xff]   ;;  %v21295_v30 = vld [vmem:[%s22188_s16 + $0x3340] ss:$16 sps:$4 sm:$0xff]  }
 0x6f1   : > { %13384 = vmatprep.subr.bf16.mxu0 %v21225_v6  ;;  %14614 = vmatprep.subr.bf16.mxu1 %v21228_v34  ;;  %v21298_v6 = vld [vmem:[%s22188_s16 + $0x3348] ss:$16 sps:$4 sm:$0xff]   ;;  %v21303_v34 = vld [vmem:[%s22188_s16 + $0x3364] ss:$16 sps:$4 sm:$0xff]  }
 0x6f4   : > { %13385 = vmatpush1.bf16.msra.mxu0 %v21223_v36  ;;  %14615 = vmatpush1.bf16.msra.mxu1 %v21226_v11  ;;  %v21304_v36 = vld [vmem:[%s22188_s16 + $0x3368] ss:$16 sps:$4 sm:$0xff]   ;;  %v21309_v11 = vld [vmem:[%s22188_s16 + $0x3384] ss:$16 sps:$4 sm:$0xff]  }
 0x6f5   : > { %13386 = vmatprep.subr.bf16.mxu0 %v21231_v42  ;;  %14616 = vmatprep.subr.bf16.mxu1 %v21234_v15  ;;  %v21307_v42 = vld [vmem:[%s22188_s16 + $0x3380] ss:$16 sps:$4 sm:$0xff]   ;;  %v21310_v15 = vld [vmem:[%s22188_s16 + $0x3388] ss:$16 sps:$4 sm:$0xff]  }
 0x6f8   : > { %13387 = vmatpush1.bf16.msra.mxu0 %v21229_v16  ;;  %14617 = vmatpush1.bf16.msra.mxu1 %v21232_v17  ;;  %v21318_v16 = vld [vmem:[%s22188_s16 + $0x33ac] ss:$16 sps:$4 sm:$0xff]   ;;  %v21313_v17 = vld [vmem:[%s22188_s16 + $0x33a0] ss:$16 sps:$4 sm:$0xff]  }
 0x6f9   : > { %13397 = vmatprep.subr.bf16.mxu0 %v21237_v49  ;;  %14627 = vmatprep.subr.bf16.mxu1 %v21240_v21  ;;  %v21321_v49 = vld [vmem:[%s22188_s16 + $0x33c4] ss:$16 sps:$4 sm:$0xff]   ;;  %v21324_v21 = vld [vmem:[%s22188_s16 + $0x33cc] ss:$16 sps:$4 sm:$0xff]  }
 0x6fb   : > { %17871 = vmatmul.mubr.msk.bf16.vlgmr.msra.gmra.mrb[0].mxu0 %vm17869_vm3, %v17870_v39  ;;  %18048 = vmatmul.mubr.msk.bf16.vlgmr.msra.gmra.mrb[0].mxu1 %vm17869_vm3, %v17870_v39  ;;  %v24238_v39 = vld [vmem:[%s22210_s15 + $0x68] sm:$0xff] }
 0x6fc   : > { %13398 = vmatpush1.bf16.msra.mxu0 %v21235_v22  ;;  %14628 = vmatpush1.bf16.msra.mxu1 %v21238_v56  ;;  %v21319_v22 = vld [vmem:[%s22188_s16 + $0x33c0] ss:$16 sps:$4 sm:$0xff]   ;;  %v21322_v56 = vld [vmem:[%s22188_s16 + $0x33c8] ss:$16 sps:$4 sm:$0xff]  }
 0x6fd   : > { %13399 = vmatprep.subr.bf16.mxu0 %v21243_v57  ;;  %14629 = vmatprep.subr.bf16.mxu1 %v21246_v26  ;;  %v457_v57 = vadd.s32 6784, %v22251_v41  ;;  %v21327_v26 = vld [vmem:[%s22188_s16 + $0x33e4] ss:$16 sps:$4 sm:$0xff]  }
 0x6fe   : > { %17874 = vmatprep.mubr.msk.bf16.mxu0 %vm17872_vm5, %v17873_v58  ;;  %18051 = vmatprep.mubr.msk.bf16.mxu1 %vm17872_vm5, %v17873_v58  ;;  %v21330_v58 = vld [vmem:[%s22188_s16 + $0x33ec] ss:$16 sps:$4 sm:$0xff]  }
 0x700   : > { %13400 = vmatpush1.bf16.msra.mxu0 %v21241_v27  ;;  %14630 = vmatpush1.bf16.msra.mxu1 %v21244_v32  ;;  %v514_v27 = vadd.s32 %v22262_v50, %v454_v51  ;;  %v24248_v32 = vrot.slane %v24238_v39, %v22267_v53  ;;  %v21403_v51 = vld [vmem:[%s22188_s16 + $0x356c] ss:$16 sps:$4 sm:$0xff]  }
 0x701   : > { %13401 = vmatprep.subr.bf16.mxu0 %v21249_v61  ;;  %14631 = vmatprep.subr.bf16.mxu1 %v21252_v62  ;;  %v21325_v61 = vld [vmem:[%s22188_s16 + $0x33e0] ss:$16 sps:$4 sm:$0xff]   ;;  %v21328_v62 = vld [vmem:[%s22188_s16 + $0x33e8] ss:$16 sps:$4 sm:$0xff]  }
 0x702   : > { %vm573_vm6 = vcmp.lt.s32.totalorder %v514_v27, 30000  ;;  %v21407_v27 = vld [vmem:[%s22188_s16 + $0x3588] ss:$16 sps:$4 sm:$0xff]  }
 0x703   : > { %vm17875_vm7 = vmpackc.low %vm573_vm6, %vm573_vm6 }
 0x704   : > { %13402 = vmatpush1.bf16.msra.mxu0 %v21247_v31  ;;  %14632 = vmatpush1.bf16.msra.mxu1 %v21250_v63  ;;  %v517_v31 = vadd.s32 %v22262_v50, %v457_v57  ;;  %v21334_v63 = vld [vmem:[%s22188_s16 + $0x3404] ss:$16 sps:$4 sm:$0xff]  }
 0x705   : > { %13403 = vmatprep.subr.bf16.mxu0 %v21255_v33  ;;  %14633 = vmatprep.subr.bf16.mxu1 %v21258_v2  ;;  %v21337_v33 = vld [vmem:[%s22188_s16 + $0x340c] ss:$16 sps:$4 sm:$0xff]   ;;  %v848_v2 = vcombine.high %v24248_v32, %v24248_v32  ;;  %v21406_v57 = vld [vmem:[%s22188_s16 + $0x3584] ss:$16 sps:$4 sm:$0xff]  }
 0x706   : > { %vm576_vm8 = vcmp.lt.s32.totalorder %v517_v31, 30000  ;;  %v21410_v31 = vld [vmem:[%s22188_s16 + $0x35a0] ss:$16 sps:$4 sm:$0xff]  }
 0x707   : > { %vm17878_vm9 = vmpackc.low %vm576_vm8, %vm576_vm8 }
 0x708   : > { %13404 = vmatpush1.bf16.msra.mxu0 %v21253_v3  ;;  %14634 = vmatpush1.bf16.msra.mxu1 %v21256_v37  ;;  %v17876_v3 = vpack.c.bf16 %v24169_v44, %v24169_v44  ;;  %v21332_v37 = vld [vmem:[%s22188_s16 + $0x3400] ss:$16 sps:$4 sm:$0xff]  }
 0x709   : > { %13405 = vmatprep.subr.bf16.mxu0 %v21261_v4  ;;  %14635 = vmatprep.subr.bf16.mxu1 %v21264_v38  ;;  %v21335_v4 = vld [vmem:[%s22188_s16 + $0x3408] ss:$16 sps:$4 sm:$0xff]   ;;  %v21340_v38 = vld [vmem:[%s22188_s16 + $0x3424] ss:$16 sps:$4 sm:$0xff]   ;;  %v21338_v44 = vld [vmem:[%s22188_s16 + $0x3420] ss:$16 sps:$4 sm:$0xff]  }
 0x70c   : > { %13406 = vmatpush1.bf16.msra.mxu0 %v21259_v7  ;;  %14636 = vmatpush1.bf16.msra.mxu1 %v21262_v8  ;;  %v21343_v7 = vld [vmem:[%s22188_s16 + $0x342c] ss:$16 sps:$4 sm:$0xff]   ;;  %v17879_v8 = vpack.c.bf16 %v848_v2, %v848_v2 }
 0x70d   : > { %13407 = vmatprep.subr.bf16.mxu0 %v21267_v46  ;;  %14637 = vmatprep.subr.bf16.mxu1 %v21270_v9  ;;  %v21341_v46 = vld [vmem:[%s22188_s16 + $0x3428] ss:$16 sps:$4 sm:$0xff]   ;;  %v21346_v9 = vld [vmem:[%s22188_s16 + $0x3444] ss:$16 sps:$4 sm:$0xff]   ;;  %v21421_v2 = vld [vmem:[%s22188_s16 + $0x35cc] ss:$16 sps:$4 sm:$0xff]  }
 0x710   : > { %13408 = vmatpush1.bf16.msra.mxu0 %v21265_v47  ;;  %14638 = vmatpush1.bf16.msra.mxu1 %v21268_v12  ;;  %v21349_v47 = vld [vmem:[%s22188_s16 + $0x344c] ss:$16 sps:$4 sm:$0xff]   ;;  %v21344_v12 = vld [vmem:[%s22188_s16 + $0x3440] ss:$16 sps:$4 sm:$0xff]  }
 0x711   : > { %13409 = vmatprep.subr.bf16.mxu0 %v21273_v13  ;;  %14639 = vmatprep.subr.bf16.mxu1 %v21276_v52  ;;  %v21347_v13 = vld [vmem:[%s22188_s16 + $0x3448] ss:$16 sps:$4 sm:$0xff]   ;;  %v21352_v52 = vld [vmem:[%s22188_s16 + $0x3464] ss:$16 sps:$4 sm:$0xff]  }
 0x714   : > { %13410 = vmatpush1.bf16.msra.mxu0 %v21271_v14  ;;  %14640 = vmatpush1.bf16.msra.mxu1 %v21274_v55  ;;  %v21355_v14 = vld [vmem:[%s22188_s16 + $0x346c] ss:$16 sps:$4 sm:$0xff]   ;;  %v21350_v55 = vld [vmem:[%s22188_s16 + $0x3460] ss:$16 sps:$4 sm:$0xff]  }
 0x715   : > { %13411 = vmatprep.subr.bf16.mxu0 %v21279_v54  ;;  %14641 = vmatprep.subr.bf16.mxu1 %v21282_v18  ;;  %v21353_v54 = vld [vmem:[%s22188_s16 + $0x3468] ss:$16 sps:$4 sm:$0xff]   ;;  %v21358_v18 = vld [vmem:[%s22188_s16 + $0x3484] ss:$16 sps:$4 sm:$0xff]  }
 0x718   : > { %13412 = vmatpush1.bf16.msra.mxu0 %v21277_v19  ;;  %14642 = vmatpush1.bf16.msra.mxu1 %v21280_v59  ;;  %v21361_v19 = vld [vmem:[%s22188_s16 + $0x348c] ss:$16 sps:$4 sm:$0xff]   ;;  %v21356_v59 = vld [vmem:[%s22188_s16 + $0x3480] ss:$16 sps:$4 sm:$0xff]  }
 0x719   : > { %13413 = vmatprep.subr.bf16.mxu0 %v21285_v20  ;;  %14643 = vmatprep.subr.bf16.mxu1 %v21288_v60  ;;  %v21359_v20 = vld [vmem:[%s22188_s16 + $0x3488] ss:$16 sps:$4 sm:$0xff]   ;;  %v21364_v60 = vld [vmem:[%s22188_s16 + $0x34a4] ss:$16 sps:$4 sm:$0xff]  }
 0x71c   : > { %13414 = vmatpush1.bf16.msra.mxu0 %v21283_v23  ;;  %14644 = vmatpush1.bf16.msra.mxu1 %v21286_v24  ;;  %v21367_v23 = vld [vmem:[%s22188_s16 + $0x34ac] ss:$16 sps:$4 sm:$0xff]   ;;  %v21362_v24 = vld [vmem:[%s22188_s16 + $0x34a0] ss:$16 sps:$4 sm:$0xff]  }
 0x71d   : > { %13415 = vmatprep.subr.bf16.mxu0 %v21291_v0  ;;  %14645 = vmatprep.subr.bf16.mxu1 %v21294_v25  ;;  %v21365_v0 = vld [vmem:[%s22188_s16 + $0x34a8] ss:$16 sps:$4 sm:$0xff]   ;;  %v21370_v25 = vld [vmem:[%s22188_s16 + $0x34c4] ss:$16 sps:$4 sm:$0xff]  }
 0x720   : > { %13416 = vmatpush1.bf16.msra.mxu0 %v21289_v1  ;;  %14646 = vmatpush1.bf16.msra.mxu1 %v21292_v28  ;;  %v21373_v1 = vld [vmem:[%s22188_s16 + $0x34cc] ss:$16 sps:$4 sm:$0xff]   ;;  %v21368_v28 = vld [vmem:[%s22188_s16 + $0x34c0] ss:$16 sps:$4 sm:$0xff]  }
 0x721   : > { %13417 = vmatprep.subr.bf16.mxu0 %v21297_v29  ;;  %14647 = vmatprep.subr.bf16.mxu1 %v21300_v5  ;;  %v21371_v29 = vld [vmem:[%s22188_s16 + $0x34c8] ss:$16 sps:$4 sm:$0xff]   ;;  %v21376_v5 = vld [vmem:[%s22188_s16 + $0x34e4] ss:$16 sps:$4 sm:$0xff]  }
 0x724   : > { %13418 = vmatpush1.bf16.msra.mxu0 %v21295_v30  ;;  %14648 = vmatpush1.bf16.msra.mxu1 %v21298_v6  ;;  %v21379_v30 = vld [vmem:[%s22188_s16 + $0x34ec] ss:$16 sps:$4 sm:$0xff]   ;;  %v21374_v6 = vld [vmem:[%s22188_s16 + $0x34e0] ss:$16 sps:$4 sm:$0xff]  }
 0x725   : > { %13419 = vmatprep.subr.bf16.mxu0 %v21303_v34  ;;  %14649 = vmatprep.subr.bf16.mxu1 %v21306_v35  ;;  %v21377_v34 = vld [vmem:[%s22188_s16 + $0x34e8] ss:$16 sps:$4 sm:$0xff]   ;;  %v21382_v35 = vld [vmem:[%s22188_s16 + $0x3504] ss:$16 sps:$4 sm:$0xff]  }
 0x728   : > { %13420 = vmatpush1.bf16.msra.mxu0 %v21301_v10  ;;  %14650 = vmatpush1.bf16.msra.mxu1 %v21304_v36  ;;  %v21385_v10 = vld [vmem:[%s22188_s16 + $0x350c] ss:$16 sps:$4 sm:$0xff]   ;;  %v21380_v36 = vld [vmem:[%s22188_s16 + $0x3500] ss:$16 sps:$4 sm:$0xff]  }
 0x729   : > { %13421 = vmatprep.subr.bf16.mxu0 %v21309_v11  ;;  %14651 = vmatprep.subr.bf16.mxu1 %v21312_v40  ;;  %v21383_v11 = vld [vmem:[%s22188_s16 + $0x3508] ss:$16 sps:$4 sm:$0xff]   ;;  %v21388_v40 = vld [vmem:[%s22188_s16 + $0x3524] ss:$16 sps:$4 sm:$0xff]  }
 0x72c   : > { %13422 = vmatpush1.bf16.msra.mxu0 %v21307_v42  ;;  %14652 = vmatpush1.bf16.msra.mxu1 %v21310_v15  ;;  %v21391_v42 = vld [vmem:[%s22188_s16 + $0x352c] ss:$16 sps:$4 sm:$0xff]   ;;  %v21386_v15 = vld [vmem:[%s22188_s16 + $0x3520] ss:$16 sps:$4 sm:$0xff]  }
 0x72d   : > { %13423 = vmatprep.subr.bf16.mxu0 %v21315_v43  ;;  %14653 = vmatprep.subr.bf16.mxu1 %v21318_v16  ;;  %v21389_v43 = vld [vmem:[%s22188_s16 + $0x3528] ss:$16 sps:$4 sm:$0xff]   ;;  %v21394_v16 = vld [vmem:[%s22188_s16 + $0x3544] ss:$16 sps:$4 sm:$0xff]  }
 0x730   : > { %13424 = vmatpush1.bf16.msra.mxu0 %v21313_v17  ;;  %14654 = vmatpush1.bf16.msra.mxu1 %v21316_v48  ;;  %v21397_v17 = vld [vmem:[%s22188_s16 + $0x354c] ss:$16 sps:$4 sm:$0xff]   ;;  %v21392_v48 = vld [vmem:[%s22188_s16 + $0x3540] ss:$16 sps:$4 sm:$0xff]  }
 0x731   : > { %13425 = vmatprep.subr.bf16.mxu0 %v21321_v49  ;;  %14655 = vmatprep.subr.bf16.mxu1 %v21324_v21  ;;  %v21395_v49 = vld [vmem:[%s22188_s16 + $0x3548] ss:$16 sps:$4 sm:$0xff]   ;;  %v21400_v21 = vld [vmem:[%s22188_s16 + $0x3564] ss:$16 sps:$4 sm:$0xff]  }
 0x734   : > { %13426 = vmatpush1.bf16.msra.mxu0 %v21319_v22  ;;  %14656 = vmatpush1.bf16.msra.mxu1 %v21322_v56  ;;  %v21398_v22 = vld [vmem:[%s22188_s16 + $0x3560] ss:$16 sps:$4 sm:$0xff]   ;;  %v21401_v56 = vld [vmem:[%s22188_s16 + $0x3568] ss:$16 sps:$4 sm:$0xff]  }
 0x735   : > { %13427 = vmatprep.subr.bf16.mxu0 %v21327_v26  ;;  %14657 = vmatprep.subr.bf16.mxu1 %v21330_v58  ;;  %v21409_v26 = vld [vmem:[%s22188_s16 + $0x358c] ss:$16 sps:$4 sm:$0xff]   ;;  %v21404_v58 = vld [vmem:[%s22188_s16 + $0x3580] ss:$16 sps:$4 sm:$0xff]  }
 0x738   : > { %13428 = vmatpush1.bf16.msra.mxu0 %v21325_v61  ;;  %14658 = vmatpush1.bf16.msra.mxu1 %v21328_v62  ;;  %v21412_v61 = vld [vmem:[%s22188_s16 + $0x35a4] ss:$16 sps:$4 sm:$0xff]   ;;  %v21415_v62 = vld [vmem:[%s22188_s16 + $0x35ac] ss:$16 sps:$4 sm:$0xff]  }
 0x739   : > { %13438 = vmatprep.subr.bf16.mxu0 %v21334_v63  ;;  %14668 = vmatprep.subr.bf16.mxu1 %v21337_v33  ;;  %v21413_v63 = vld [vmem:[%s22188_s16 + $0x35a8] ss:$16 sps:$4 sm:$0xff]   ;;  %v21418_v33 = vld [vmem:[%s22188_s16 + $0x35c4] ss:$16 sps:$4 sm:$0xff]  }
 0x73b   : > { %17877 = vmatmul.mubr.msk.bf16.vlgmr.msra.gmra.mrb[0].mxu0 %vm17875_vm7, %v17876_v3  ;;  %18054 = vmatmul.mubr.msk.bf16.vlgmr.msra.gmra.mrb[0].mxu1 %vm17875_vm7, %v17876_v3  ;;  %v456_v3 = vadd.s32 6656, %v22251_v41 }
 0x73c   : > { %13439 = vmatpush1.bf16.msra.mxu0 %v21332_v37  ;;  %14669 = vmatpush1.bf16.msra.mxu1 %v21335_v4  ;;  %v833_v37 = vcombine.high %v24238_v39, %v24238_v39  ;;  %v21416_v4 = vld [vmem:[%s22188_s16 + $0x35c0] ss:$16 sps:$4 sm:$0xff]  }
 0x73d   : > { %13440 = vmatprep.subr.bf16.mxu0 %v21340_v38  ;;  %14670 = vmatprep.subr.bf16.mxu1 %v21343_v7  ;;  %v21419_v38 = vld [vmem:[%s22188_s16 + $0x35c8] ss:$16 sps:$4 sm:$0xff]   ;;  %v459_v7 = vadd.s32 7040, %v22251_v41  ;;  %v21422_v39 = vld [vmem:[%s22188_s16 + $0x35e0] ss:$16 sps:$4 sm:$0xff]  }
 0x73e   : > { %17880 = vmatprep.mubr.msk.bf16.mxu0 %vm17878_vm9, %v17879_v8  ;;  %18057 = vmatprep.mubr.msk.bf16.mxu1 %vm17878_vm9, %v17879_v8  ;;  %v21424_v8 = vld [vmem:[%s22188_s16 + $0x35e4] ss:$16 sps:$4 sm:$0xff]  }
 0x740   : > { %13441 = vmatpush1.bf16.msra.mxu0 %v21338_v44  ;;  %14671 = vmatpush1.bf16.msra.mxu1 %v21341_v46  ;;  %v21427_v44 = vld [vmem:[%s22188_s16 + $0x35ec] ss:$16 sps:$4 sm:$0xff]   ;;  %v516_v46 = vadd.s32 %v22262_v50, %v456_v3 }
 0x741   : > { %13442 = vmatprep.subr.bf16.mxu0 %v21346_v9  ;;  %14672 = vmatprep.subr.bf16.mxu1 %v21349_v47  ;;  %v24325_v9 = vrot.slane %v833_v37, %v22267_v53  ;;  %v21425_v47 = vld [vmem:[%s22188_s16 + $0x35e8] ss:$16 sps:$4 sm:$0xff]   ;;  %v21499_v3 = vld [vmem:[%s22188_s16 + $0x376c] ss:$16 sps:$4 sm:$0xff]   ;;  %v21494_v37 = vld [vmem:[%s22188_s16 + $0x3760] ss:$16 sps:$4 sm:$0xff]  }
 0x742   : > { %vm575_vm10 = vcmp.lt.s32.totalorder %v516_v46, 30000  ;;  %v21508_v46 = vld [vmem:[%s22188_s16 + $0x37a4] ss:$16 sps:$4 sm:$0xff]  }
 0x743   : > { %vm17881_vm11 = vmpackc.low %vm575_vm10, %vm575_vm10 }
 0x744   : > { %13443 = vmatpush1.bf16.msra.mxu0 %v21344_v12  ;;  %14673 = vmatpush1.bf16.msra.mxu1 %v21347_v13  ;;  %v519_v12 = vadd.s32 %v22262_v50, %v459_v7  ;;  %v21430_v13 = vld [vmem:[%s22188_s16 + $0x3604] ss:$16 sps:$4 sm:$0xff]   ;;  %v21505_v7 = vld [vmem:[%s22188_s16 + $0x378c] ss:$16 sps:$4 sm:$0xff]  }
 0x745   : > { %13444 = vmatprep.subr.bf16.mxu0 %v21352_v52  ;;  %14674 = vmatprep.subr.bf16.mxu1 %v21355_v14  ;;  %v21433_v52 = vld [vmem:[%s22188_s16 + $0x360c] ss:$16 sps:$4 sm:$0xff]   ;;  %v849_v14 = vcombine.high %v24325_v9, %v24325_v9 }
 0x746   : > { %vm578_vm12 = vcmp.lt.s32.totalorder %v519_v12, 30000  ;;  %v21509_v12 = vld [vmem:[%s22188_s16 + $0x37a8] ss:$16 sps:$4 sm:$0xff]  }
 0x747   : > { %vm17884_vm13 = vmpackc.low %vm578_vm12, %vm578_vm12 }
 0x748   : > { %13445 = vmatpush1.bf16.msra.mxu0 %v21350_v55  ;;  %14675 = vmatpush1.bf16.msra.mxu1 %v21353_v54  ;;  %v17882_v55 = vpack.c.bf16 %v24248_v32, %v24248_v32  ;;  %v21428_v54 = vld [vmem:[%s22188_s16 + $0x3600] ss:$16 sps:$4 sm:$0xff]  }
 0x749   : > { %13446 = vmatprep.subr.bf16.mxu0 %v21358_v18  ;;  %14676 = vmatprep.subr.bf16.mxu1 %v21361_v19  ;;  %v21431_v18 = vld [vmem:[%s22188_s16 + $0x3608] ss:$16 sps:$4 sm:$0xff]   ;;  %v21436_v19 = vld [vmem:[%s22188_s16 + $0x3624] ss:$16 sps:$4 sm:$0xff]   ;;  %v21434_v32 = vld [vmem:[%s22188_s16 + $0x3620] ss:$16 sps:$4 sm:$0xff]  }
 0x74c   : > { %13447 = vmatpush1.bf16.msra.mxu0 %v21356_v59  ;;  %14677 = vmatpush1.bf16.msra.mxu1 %v21359_v20  ;;  %v21439_v59 = vld [vmem:[%s22188_s16 + $0x362c] ss:$16 sps:$4 sm:$0xff]   ;;  %v17885_v20 = vpack.c.bf16 %v849_v14, %v849_v14  ;;  %v458_v14 = vadd.s32 6912, %v22251_v41 }
 0x74d   : > { %13448 = vmatprep.subr.bf16.mxu0 %v21364_v60  ;;  %14678 = vmatprep.subr.bf16.mxu1 %v21367_v23  ;;  %v21437_v60 = vld [vmem:[%s22188_s16 + $0x3628] ss:$16 sps:$4 sm:$0xff]   ;;  %v21442_v23 = vld [vmem:[%s22188_s16 + $0x3644] ss:$16 sps:$4 sm:$0xff]  }
 0x750   : > { %13449 = vmatpush1.bf16.msra.mxu0 %v21362_v24  ;;  %14679 = vmatpush1.bf16.msra.mxu1 %v21365_v0  ;;  %v21445_v24 = vld [vmem:[%s22188_s16 + $0x364c] ss:$16 sps:$4 sm:$0xff]   ;;  %v21440_v0 = vld [vmem:[%s22188_s16 + $0x3640] ss:$16 sps:$4 sm:$0xff]  }
 0x751   : > { %13450 = vmatprep.subr.bf16.mxu0 %v21370_v25  ;;  %14680 = vmatprep.subr.bf16.mxu1 %v21373_v1  ;;  %v21443_v25 = vld [vmem:[%s22188_s16 + $0x3648] ss:$16 sps:$4 sm:$0xff]   ;;  %v21448_v1 = vld [vmem:[%s22188_s16 + $0x3664] ss:$16 sps:$4 sm:$0xff]  }
 0x754   : > { %13451 = vmatpush1.bf16.msra.mxu0 %v21368_v28  ;;  %14681 = vmatpush1.bf16.msra.mxu1 %v21371_v29  ;;  %v21451_v28 = vld [vmem:[%s22188_s16 + $0x366c] ss:$16 sps:$4 sm:$0xff]   ;;  %v21446_v29 = vld [vmem:[%s22188_s16 + $0x3660] ss:$16 sps:$4 sm:$0xff]  }
 0x755   : > { %13452 = vmatprep.subr.bf16.mxu0 %v21376_v5  ;;  %14682 = vmatprep.subr.bf16.mxu1 %v21379_v30  ;;  %v21449_v5 = vld [vmem:[%s22188_s16 + $0x3668] ss:$16 sps:$4 sm:$0xff]   ;;  %v21454_v30 = vld [vmem:[%s22188_s16 + $0x3684] ss:$16 sps:$4 sm:$0xff]  }
 0x758   : > { %13453 = vmatpush1.bf16.msra.mxu0 %v21374_v6  ;;  %14683 = vmatpush1.bf16.msra.mxu1 %v21377_v34  ;;  %v21457_v6 = vld [vmem:[%s22188_s16 + $0x368c] ss:$16 sps:$4 sm:$0xff]   ;;  %v21452_v34 = vld [vmem:[%s22188_s16 + $0x3680] ss:$16 sps:$4 sm:$0xff]  }
 0x759   : > { %13454 = vmatprep.subr.bf16.mxu0 %v21382_v35  ;;  %14684 = vmatprep.subr.bf16.mxu1 %v21385_v10  ;;  %v21455_v35 = vld [vmem:[%s22188_s16 + $0x3688] ss:$16 sps:$4 sm:$0xff]   ;;  %v21460_v10 = vld [vmem:[%s22188_s16 + $0x36a4] ss:$16 sps:$4 sm:$0xff]  }
 0x75c   : > { %13455 = vmatpush1.bf16.msra.mxu0 %v21380_v36  ;;  %14685 = vmatpush1.bf16.msra.mxu1 %v21383_v11  ;;  %v21463_v36 = vld [vmem:[%s22188_s16 + $0x36ac] ss:$16 sps:$4 sm:$0xff]   ;;  %v21458_v11 = vld [vmem:[%s22188_s16 + $0x36a0] ss:$16 sps:$4 sm:$0xff]  }
 0x75d   : > { %13456 = vmatprep.subr.bf16.mxu0 %v21388_v40  ;;  %14686 = vmatprep.subr.bf16.mxu1 %v21391_v42  ;;  %v21461_v40 = vld [vmem:[%s22188_s16 + $0x36a8] ss:$16 sps:$4 sm:$0xff]   ;;  %v21466_v42 = vld [vmem:[%s22188_s16 + $0x36c4] ss:$16 sps:$4 sm:$0xff]  }
 0x760   : > { %13457 = vmatpush1.bf16.msra.mxu0 %v21386_v15  ;;  %14687 = vmatpush1.bf16.msra.mxu1 %v21389_v43  ;;  %v21469_v15 = vld [vmem:[%s22188_s16 + $0x36cc] ss:$16 sps:$4 sm:$0xff]   ;;  %v21464_v43 = vld [vmem:[%s22188_s16 + $0x36c0] ss:$16 sps:$4 sm:$0xff]  }
 0x761   : > { %13458 = vmatprep.subr.bf16.mxu0 %v21394_v16  ;;  %14688 = vmatprep.subr.bf16.mxu1 %v21397_v17  ;;  %v21467_v16 = vld [vmem:[%s22188_s16 + $0x36c8] ss:$16 sps:$4 sm:$0xff]   ;;  %v21472_v17 = vld [vmem:[%s22188_s16 + $0x36e4] ss:$16 sps:$4 sm:$0xff]  }
 0x764   : > { %13459 = vmatpush1.bf16.msra.mxu0 %v21392_v48  ;;  %14689 = vmatpush1.bf16.msra.mxu1 %v21395_v49  ;;  %v21475_v48 = vld [vmem:[%s22188_s16 + $0x36ec] ss:$16 sps:$4 sm:$0xff]   ;;  %v21470_v49 = vld [vmem:[%s22188_s16 + $0x36e0] ss:$16 sps:$4 sm:$0xff]  }
 0x765   : > { %13460 = vmatprep.subr.bf16.mxu0 %v21400_v21  ;;  %14690 = vmatprep.subr.bf16.mxu1 %v21403_v51  ;;  %v21473_v21 = vld [vmem:[%s22188_s16 + $0x36e8] ss:$16 sps:$4 sm:$0xff]   ;;  %v21478_v51 = vld [vmem:[%s22188_s16 + $0x3704] ss:$16 sps:$4 sm:$0xff]  }
 0x768   : > { %13461 = vmatpush1.bf16.msra.mxu0 %v21398_v22  ;;  %14691 = vmatpush1.bf16.msra.mxu1 %v21401_v56  ;;  %v21481_v22 = vld [vmem:[%s22188_s16 + $0x370c] ss:$16 sps:$4 sm:$0xff]   ;;  %v21476_v56 = vld [vmem:[%s22188_s16 + $0x3700] ss:$16 sps:$4 sm:$0xff]  }
 0x769   : > { %13462 = vmatprep.subr.bf16.mxu0 %v21406_v57  ;;  %14692 = vmatprep.subr.bf16.mxu1 %v21409_v26  ;;  %v21479_v57 = vld [vmem:[%s22188_s16 + $0x3708] ss:$16 sps:$4 sm:$0xff]   ;;  %v21484_v26 = vld [vmem:[%s22188_s16 + $0x3724] ss:$16 sps:$4 sm:$0xff]  }
 0x76c   : > { %13463 = vmatpush1.bf16.msra.mxu0 %v21404_v58  ;;  %14693 = vmatpush1.bf16.msra.mxu1 %v21407_v27  ;;  %v21487_v58 = vld [vmem:[%s22188_s16 + $0x372c] ss:$16 sps:$4 sm:$0xff]   ;;  %v21482_v27 = vld [vmem:[%s22188_s16 + $0x3720] ss:$16 sps:$4 sm:$0xff]  }
 0x76d   : > { %13464 = vmatprep.subr.bf16.mxu0 %v21412_v61  ;;  %14694 = vmatprep.subr.bf16.mxu1 %v21415_v62  ;;  %v21485_v61 = vld [vmem:[%s22188_s16 + $0x3728] ss:$16 sps:$4 sm:$0xff]   ;;  %v21490_v62 = vld [vmem:[%s22188_s16 + $0x3744] ss:$16 sps:$4 sm:$0xff]  }
 0x770   : > { %13465 = vmatpush1.bf16.msra.mxu0 %v21410_v31  ;;  %14695 = vmatpush1.bf16.msra.mxu1 %v21413_v63  ;;  %v21493_v31 = vld [vmem:[%s22188_s16 + $0x374c] ss:$16 sps:$4 sm:$0xff]   ;;  %v21488_v63 = vld [vmem:[%s22188_s16 + $0x3740] ss:$16 sps:$4 sm:$0xff]  }
 0x771   : > { %13466 = vmatprep.subr.bf16.mxu0 %v21418_v33  ;;  %14696 = vmatprep.subr.bf16.mxu1 %v21421_v2  ;;  %v21491_v33 = vld [vmem:[%s22188_s16 + $0x3748] ss:$16 sps:$4 sm:$0xff]   ;;  %v21496_v2 = vld [vmem:[%s22188_s16 + $0x3764] ss:$16 sps:$4 sm:$0xff]  }
 0x774   : > { %13467 = vmatpush1.bf16.msra.mxu0 %v21416_v4  ;;  %14697 = vmatpush1.bf16.msra.mxu1 %v21419_v38  ;;  %v21497_v4 = vld [vmem:[%s22188_s16 + $0x3768] ss:$16 sps:$4 sm:$0xff]   ;;  %v21502_v38 = vld [vmem:[%s22188_s16 + $0x3784] ss:$16 sps:$4 sm:$0xff]  }
 0x775   : > { %13468 = vmatprep.subr.bf16.mxu0 %v21424_v8  ;;  %14698 = vmatprep.subr.bf16.mxu1 %v21427_v44  ;;  %v21500_v8 = vld [vmem:[%s22188_s16 + $0x3780] ss:$16 sps:$4 sm:$0xff]   ;;  %v21503_v44 = vld [vmem:[%s22188_s16 + $0x3788] ss:$16 sps:$4 sm:$0xff]  }
 0x778   : > { %13469 = vmatpush1.bf16.msra.mxu0 %v21422_v39  ;;  %14699 = vmatpush1.bf16.msra.mxu1 %v21425_v47  ;;  %v21511_v39 = vld [vmem:[%s22188_s16 + $0x37ac] ss:$16 sps:$4 sm:$0xff]   ;;  %v21506_v47 = vld [vmem:[%s22188_s16 + $0x37a0] ss:$16 sps:$4 sm:$0xff]  }
 0x779   : > { %13479 = vmatprep.subr.bf16.mxu0 %v21430_v13  ;;  %14709 = vmatprep.subr.bf16.mxu1 %v21433_v52  ;;  %v21514_v13 = vld [vmem:[%s22188_s16 + $0x37c4] ss:$16 sps:$4 sm:$0xff]   ;;  %v21517_v52 = vld [vmem:[%s22188_s16 + $0x37cc] ss:$16 sps:$4 sm:$0xff]  }
 0x77b   : > { %17883 = vmatmul.mubr.msk.bf16.vlgmr.msra.gmra.mrb[0].mxu0 %vm17881_vm11, %v17882_v55  ;;  %18060 = vmatmul.mubr.msk.bf16.vlgmr.msra.gmra.mrb[0].mxu1 %vm17881_vm11, %v17882_v55  ;;  %v24394_v55 = vld [vmem:[%s22210_s15 + $0x70] sm:$0x3f] }
 0x77c   : > { %13480 = vmatpush1.bf16.msra.mxu0 %v21428_v54  ;;  %14710 = vmatpush1.bf16.msra.mxu1 %v21431_v18  ;;  %v21512_v54 = vld [vmem:[%s22188_s16 + $0x37c0] ss:$16 sps:$4 sm:$0xff]   ;;  %v21515_v18 = vld [vmem:[%s22188_s16 + $0x37c8] ss:$16 sps:$4 sm:$0xff]  }
 0x77d   : > { %13481 = vmatprep.subr.bf16.mxu0 %v21436_v19  ;;  %14711 = vmatprep.subr.bf16.mxu1 %v21439_v59  ;;  %v461_v19 = vadd.s32 7296, %v22251_v41  ;;  %v21520_v59 = vld [vmem:[%s22188_s16 + $0x37e4] ss:$16 sps:$4 sm:$0xff]  }
 0x77e   : > { %17886 = vmatprep.mubr.msk.bf16.mxu0 %vm17884_vm13, %v17885_v20  ;;  %18063 = vmatprep.mubr.msk.bf16.mxu1 %vm17884_vm13, %v17885_v20  ;;  %v21523_v20 = vld [vmem:[%s22188_s16 + $0x37ec] ss:$16 sps:$4 sm:$0xff]  }
 0x780   : > { %13482 = vmatpush1.bf16.msra.mxu0 %v21434_v32  ;;  %14712 = vmatpush1.bf16.msra.mxu1 %v21437_v60  ;;  %v518_v32 = vadd.s32 %v22262_v50, %v458_v14  ;;  %v24404_v60 = vrot.slane %v24394_v55, %v22267_v53  ;;  %v21596_v14 = vld [vmem:[%s22188_s16 + $0x396c] ss:$16 sps:$4 sm:$0xff]  }
 0x781   : > { %13483 = vmatprep.subr.bf16.mxu0 %v21442_v23  ;;  %14713 = vmatprep.subr.bf16.mxu1 %v21445_v24  ;;  %v21518_v23 = vld [vmem:[%s22188_s16 + $0x37e0] ss:$16 sps:$4 sm:$0xff]   ;;  %v21521_v24 = vld [vmem:[%s22188_s16 + $0x37e8] ss:$16 sps:$4 sm:$0xff]  }
 0x782   : > { %vm577_vm14 = vcmp.lt.s32.totalorder %v518_v32, 30000  ;;  %v21600_v32 = vld [vmem:[%s22188_s16 + $0x3988] ss:$16 sps:$4 sm:$0xff]  }
 0x783   : > { %vm17887_vm15 = vmpackc.low %vm577_vm14, %vm577_vm14 }
 0x784   : > { %13484 = vmatpush1.bf16.msra.mxu0 %v21440_v0  ;;  %14714 = vmatpush1.bf16.msra.mxu1 %v21443_v25  ;;  %v521_v0 = vadd.s32 %v22262_v50, %v461_v19  ;;  %v21527_v25 = vld [vmem:[%s22188_s16 + $0x3804] ss:$16 sps:$4 sm:$0xff]  }
 0x785   : > { %13485 = vmatprep.subr.bf16.mxu0 %v21448_v1  ;;  %14715 = vmatprep.subr.bf16.mxu1 %v21451_v28  ;;  %v21530_v1 = vld [vmem:[%s22188_s16 + $0x380c] ss:$16 sps:$4 sm:$0xff]   ;;  %v865_v28 = vcombine.high %v24404_v60, %v24404_v60  ;;  %v21599_v19 = vld [vmem:[%s22188_s16 + $0x3984] ss:$16 sps:$4 sm:$0xff]  }
 0x786   : > { %vm580_vm0 = vcmp.lt.s32.totalorder %v521_v0, 30000  ;;  %v21603_v0 = vld [vmem:[%s22188_s16 + $0x39a0] ss:$16 sps:$4 sm:$0xff]  }
 0x787   : > { %vm17890_vm1 = vmpackc.low %vm580_vm0, %vm580_vm0 }
 0x788   : > { %13486 = vmatpush1.bf16.msra.mxu0 %v21446_v29  ;;  %14716 = vmatpush1.bf16.msra.mxu1 %v21449_v5  ;;  %v17888_v29 = vpack.c.bf16 %v24325_v9, %v24325_v9  ;;  %v21525_v5 = vld [vmem:[%s22188_s16 + $0x3800] ss:$16 sps:$4 sm:$0xff]  }
 0x789   : > { %13487 = vmatprep.subr.bf16.mxu0 %v21454_v30  ;;  %14717 = vmatprep.subr.bf16.mxu1 %v21457_v6  ;;  %v21528_v30 = vld [vmem:[%s22188_s16 + $0x3808] ss:$16 sps:$4 sm:$0xff]   ;;  %v21533_v6 = vld [vmem:[%s22188_s16 + $0x3824] ss:$16 sps:$4 sm:$0xff]   ;;  %v21531_v9 = vld [vmem:[%s22188_s16 + $0x3820] ss:$16 sps:$4 sm:$0xff]  }
 0x78c   : > { %13488 = vmatpush1.bf16.msra.mxu0 %v21452_v34  ;;  %14718 = vmatpush1.bf16.msra.mxu1 %v21455_v35  ;;  %v21536_v34 = vld [vmem:[%s22188_s16 + $0x382c] ss:$16 sps:$4 sm:$0xff]   ;;  %v17891_v35 = vpack.c.bf16 %v865_v28, %v865_v28 }
 0x78d   : > { %13489 = vmatprep.subr.bf16.mxu0 %v21460_v10  ;;  %14719 = vmatprep.subr.bf16.mxu1 %v21463_v36  ;;  %v21534_v10 = vld [vmem:[%s22188_s16 + $0x3828] ss:$16 sps:$4 sm:$0xff]   ;;  %v21539_v36 = vld [vmem:[%s22188_s16 + $0x3844] ss:$16 sps:$4 sm:$0xff]   ;;  %v21614_v28 = vld [vmem:[%s22188_s16 + $0x39cc] ss:$16 sps:$4 sm:$0xff]  }
 0x790   : > { %13490 = vmatpush1.bf16.msra.mxu0 %v21458_v11  ;;  %14720 = vmatpush1.bf16.msra.mxu1 %v21461_v40  ;;  %v21542_v11 = vld [vmem:[%s22188_s16 + $0x384c] ss:$16 sps:$4 sm:$0xff]   ;;  %v21537_v40 = vld [vmem:[%s22188_s16 + $0x3840] ss:$16 sps:$4 sm:$0xff]  }
 0x791   : > { %13491 = vmatprep.subr.bf16.mxu0 %v21466_v42  ;;  %14721 = vmatprep.subr.bf16.mxu1 %v21469_v15  ;;  %v21540_v42 = vld [vmem:[%s22188_s16 + $0x3848] ss:$16 sps:$4 sm:$0xff]   ;;  %v21545_v15 = vld [vmem:[%s22188_s16 + $0x3864] ss:$16 sps:$4 sm:$0xff]  }
 0x794   : > { %13492 = vmatpush1.bf16.msra.mxu0 %v21464_v43  ;;  %14722 = vmatpush1.bf16.msra.mxu1 %v21467_v16  ;;  %v21548_v43 = vld [vmem:[%s22188_s16 + $0x386c] ss:$16 sps:$4 sm:$0xff]   ;;  %v21543_v16 = vld [vmem:[%s22188_s16 + $0x3860] ss:$16 sps:$4 sm:$0xff]  }
 0x795   : > { %13493 = vmatprep.subr.bf16.mxu0 %v21472_v17  ;;  %14723 = vmatprep.subr.bf16.mxu1 %v21475_v48  ;;  %v21546_v17 = vld [vmem:[%s22188_s16 + $0x3868] ss:$16 sps:$4 sm:$0xff]   ;;  %v21551_v48 = vld [vmem:[%s22188_s16 + $0x3884] ss:$16 sps:$4 sm:$0xff]  }
 0x798   : > { %13494 = vmatpush1.bf16.msra.mxu0 %v21470_v49  ;;  %14724 = vmatpush1.bf16.msra.mxu1 %v21473_v21  ;;  %v21554_v49 = vld [vmem:[%s22188_s16 + $0x388c] ss:$16 sps:$4 sm:$0xff]   ;;  %v21549_v21 = vld [vmem:[%s22188_s16 + $0x3880] ss:$16 sps:$4 sm:$0xff]  }
 0x799   : > { %13495 = vmatprep.subr.bf16.mxu0 %v21478_v51  ;;  %14725 = vmatprep.subr.bf16.mxu1 %v21481_v22  ;;  %v21552_v51 = vld [vmem:[%s22188_s16 + $0x3888] ss:$16 sps:$4 sm:$0xff]   ;;  %v21557_v22 = vld [vmem:[%s22188_s16 + $0x38a4] ss:$16 sps:$4 sm:$0xff]  }
 0x79c   : > { %13496 = vmatpush1.bf16.msra.mxu0 %v21476_v56  ;;  %14726 = vmatpush1.bf16.msra.mxu1 %v21479_v57  ;;  %v21560_v56 = vld [vmem:[%s22188_s16 + $0x38ac] ss:$16 sps:$4 sm:$0xff]   ;;  %v21555_v57 = vld [vmem:[%s22188_s16 + $0x38a0] ss:$16 sps:$4 sm:$0xff]  }
 0x79d   : > { %13497 = vmatprep.subr.bf16.mxu0 %v21484_v26  ;;  %14727 = vmatprep.subr.bf16.mxu1 %v21487_v58  ;;  %v21558_v26 = vld [vmem:[%s22188_s16 + $0x38a8] ss:$16 sps:$4 sm:$0xff]   ;;  %v21563_v58 = vld [vmem:[%s22188_s16 + $0x38c4] ss:$16 sps:$4 sm:$0xff]  }
 0x7a0   : > { %13498 = vmatpush1.bf16.msra.mxu0 %v21482_v27  ;;  %14728 = vmatpush1.bf16.msra.mxu1 %v21485_v61  ;;  %v21566_v27 = vld [vmem:[%s22188_s16 + $0x38cc] ss:$16 sps:$4 sm:$0xff]   ;;  %v21561_v61 = vld [vmem:[%s22188_s16 + $0x38c0] ss:$16 sps:$4 sm:$0xff]  }
 0x7a1   : > { %13499 = vmatprep.subr.bf16.mxu0 %v21490_v62  ;;  %14729 = vmatprep.subr.bf16.mxu1 %v21493_v31  ;;  %v21564_v62 = vld [vmem:[%s22188_s16 + $0x38c8] ss:$16 sps:$4 sm:$0xff]   ;;  %v21569_v31 = vld [vmem:[%s22188_s16 + $0x38e4] ss:$16 sps:$4 sm:$0xff]  }
 0x7a4   : > { %13500 = vmatpush1.bf16.msra.mxu0 %v21488_v63  ;;  %14730 = vmatpush1.bf16.msra.mxu1 %v21491_v33  ;;  %v21572_v63 = vld [vmem:[%s22188_s16 + $0x38ec] ss:$16 sps:$4 sm:$0xff]   ;;  %v21567_v33 = vld [vmem:[%s22188_s16 + $0x38e0] ss:$16 sps:$4 sm:$0xff]  }
 0x7a5   : > { %13501 = vmatprep.subr.bf16.mxu0 %v21496_v2  ;;  %14731 = vmatprep.subr.bf16.mxu1 %v21499_v3  ;;  %v21570_v2 = vld [vmem:[%s22188_s16 + $0x38e8] ss:$16 sps:$4 sm:$0xff]   ;;  %v21575_v3 = vld [vmem:[%s22188_s16 + $0x3904] ss:$16 sps:$4 sm:$0xff]  }
 0x7a8   : > { %13502 = vmatpush1.bf16.msra.mxu0 %v21494_v37  ;;  %14732 = vmatpush1.bf16.msra.mxu1 %v21497_v4  ;;  %v21578_v37 = vld [vmem:[%s22188_s16 + $0x390c] ss:$16 sps:$4 sm:$0xff]   ;;  %v21573_v4 = vld [vmem:[%s22188_s16 + $0x3900] ss:$16 sps:$4 sm:$0xff]  }
 0x7a9   : > { %13503 = vmatprep.subr.bf16.mxu0 %v21502_v38  ;;  %14733 = vmatprep.subr.bf16.mxu1 %v21505_v7  ;;  %v21576_v38 = vld [vmem:[%s22188_s16 + $0x3908] ss:$16 sps:$4 sm:$0xff]   ;;  %v21581_v7 = vld [vmem:[%s22188_s16 + $0x3924] ss:$16 sps:$4 sm:$0xff]  }
 0x7ac   : > { %13504 = vmatpush1.bf16.msra.mxu0 %v21500_v8  ;;  %14734 = vmatpush1.bf16.msra.mxu1 %v21503_v44  ;;  %v21584_v8 = vld [vmem:[%s22188_s16 + $0x392c] ss:$16 sps:$4 sm:$0xff]   ;;  %v21579_v44 = vld [vmem:[%s22188_s16 + $0x3920] ss:$16 sps:$4 sm:$0xff]  }
 0x7ad   : > { %13505 = vmatprep.subr.bf16.mxu0 %v21508_v46  ;;  %14735 = vmatprep.subr.bf16.mxu1 %v21511_v39  ;;  %v21582_v46 = vld [vmem:[%s22188_s16 + $0x3928] ss:$16 sps:$4 sm:$0xff]   ;;  %v21587_v39 = vld [vmem:[%s22188_s16 + $0x3944] ss:$16 sps:$4 sm:$0xff]  }
 0x7b0   : > { %13506 = vmatpush1.bf16.msra.mxu0 %v21506_v47  ;;  %14736 = vmatpush1.bf16.msra.mxu1 %v21509_v12  ;;  %v21590_v47 = vld [vmem:[%s22188_s16 + $0x394c] ss:$16 sps:$4 sm:$0xff]   ;;  %v21585_v12 = vld [vmem:[%s22188_s16 + $0x3940] ss:$16 sps:$4 sm:$0xff]  }
 0x7b1   : > { %13507 = vmatprep.subr.bf16.mxu0 %v21514_v13  ;;  %14737 = vmatprep.subr.bf16.mxu1 %v21517_v52  ;;  %v21588_v13 = vld [vmem:[%s22188_s16 + $0x3948] ss:$16 sps:$4 sm:$0xff]   ;;  %v21593_v52 = vld [vmem:[%s22188_s16 + $0x3964] ss:$16 sps:$4 sm:$0xff]  }
 0x7b4   : > { %13508 = vmatpush1.bf16.msra.mxu0 %v21512_v54  ;;  %14738 = vmatpush1.bf16.msra.mxu1 %v21515_v18  ;;  %v21591_v54 = vld [vmem:[%s22188_s16 + $0x3960] ss:$16 sps:$4 sm:$0xff]   ;;  %v21594_v18 = vld [vmem:[%s22188_s16 + $0x3968] ss:$16 sps:$4 sm:$0xff]  }
 0x7b5   : > { %13509 = vmatprep.subr.bf16.mxu0 %v21520_v59  ;;  %14739 = vmatprep.subr.bf16.mxu1 %v21523_v20  ;;  %v21602_v59 = vld [vmem:[%s22188_s16 + $0x398c] ss:$16 sps:$4 sm:$0xff]   ;;  %v21597_v20 = vld [vmem:[%s22188_s16 + $0x3980] ss:$16 sps:$4 sm:$0xff]  }
 0x7b8   : > { %13510 = vmatpush1.bf16.msra.mxu0 %v21518_v23  ;;  %14740 = vmatpush1.bf16.msra.mxu1 %v21521_v24  ;;  %v21605_v23 = vld [vmem:[%s22188_s16 + $0x39a4] ss:$16 sps:$4 sm:$0xff]   ;;  %v21608_v24 = vld [vmem:[%s22188_s16 + $0x39ac] ss:$16 sps:$4 sm:$0xff]  }
 0x7b9   : > { %13520 = vmatprep.subr.bf16.mxu0 %v21527_v25  ;;  %14750 = vmatprep.subr.bf16.mxu1 %v21530_v1  ;;  %v21606_v25 = vld [vmem:[%s22188_s16 + $0x39a8] ss:$16 sps:$4 sm:$0xff]   ;;  %v21611_v1 = vld [vmem:[%s22188_s16 + $0x39c4] ss:$16 sps:$4 sm:$0xff]  }
 0x7bb   : > { %17889 = vmatmul.mubr.msk.bf16.vlgmr.msra.gmra.mrb[0].mxu0 %vm17887_vm15, %v17888_v29  ;;  %18066 = vmatmul.mubr.msk.bf16.vlgmr.msra.gmra.mrb[0].mxu1 %vm17887_vm15, %v17888_v29  ;;  %v460_v29 = vadd.s32 7168, %v22251_v41 }
 0x7bc   : > { %13521 = vmatpush1.bf16.msra.mxu0 %v21525_v5  ;;  %14751 = vmatpush1.bf16.msra.mxu1 %v21528_v30  ;;  %v21609_v5 = vld [vmem:[%s22188_s16 + $0x39c0] ss:$16 sps:$4 sm:$0xff]   ;;  %v21612_v30 = vld [vmem:[%s22188_s16 + $0x39c8] ss:$16 sps:$4 sm:$0xff]  }
 0x7bd   : > { %13522 = vmatprep.subr.bf16.mxu0 %v21533_v6  ;;  %14752 = vmatprep.subr.bf16.mxu1 %v21536_v34  ;;  %v21617_v6 = vld [vmem:[%s22188_s16 + $0x39e4] ss:$16 sps:$4 sm:$0xff]   ;;  %v21620_v34 = vld [vmem:[%s22188_s16 + $0x39ec] ss:$16 sps:$4 sm:$0xff]  }
 0x7be   : > { %17892 = vmatprep.mubr.msk.bf16.mxu0 %vm17890_vm1, %v17891_v35  ;;  %18069 = vmatprep.mubr.msk.bf16.mxu1 %vm17890_vm1, %v17891_v35  ;;  %v520_v35 = vadd.s32 %v22262_v50, %v460_v29  ;;  %v14900_v29 = vld [vmem:[#allocation8 + $0x8] sm:$0xff] (!%p18076_p12) }
 0x7c0   : > { %13523 = vmatpush1.bf16.msra.mxu0 %v21531_v9  ;;  %14753 = vmatpush1.bf16.msra.mxu1 %v21534_v10  ;;  %v21615_v9 = vld [vmem:[%s22188_s16 + $0x39e0] ss:$16 sps:$4 sm:$0xff]   ;;  %v21618_v10 = vld [vmem:[%s22188_s16 + $0x39e8] ss:$16 sps:$4 sm:$0xff]   ;;  %vm579_vm2 = vcmp.lt.s32.totalorder %v520_v35, 30000 }
 0x7c1   : > { %13524 = vmatprep.subr.bf16.mxu0 %v21539_v36  ;;  %14754 = vmatprep.subr.bf16.mxu1 %v21542_v11  ;;  %v21624_v36 = vld [vmem:[%s22188_s16 + $0x3a04] ss:$16 sps:$4 sm:$0xff]   ;;  %v21627_v11 = vld [vmem:[%s22188_s16 + $0x3a0c] ss:$16 sps:$4 sm:$0xff]   ;;  %vm17893_vm3 = vmpackc.low %vm579_vm2, %vm579_vm2 }
 0x7c2   : > { %v14899_v35 = vld [vmem:[#allocation8] sm:$0xff] (!%p18076_p12) }
 0x7c4   : > { %13525 = vmatpush1.bf16.msra.mxu0 %v21537_v40  ;;  %14755 = vmatpush1.bf16.msra.mxu1 %v21540_v42  ;;  %v17894_v40 = vpack.c.bf16 %v24404_v60, %v24404_v60  ;;  %v21622_v42 = vld [vmem:[%s22188_s16 + $0x3a00] ss:$16 sps:$4 sm:$0xff]   ;;  %v21631_v60 = vld [vmem:[%s22188_s16 + $0x3a28] ss:$16 sps:$4 sm:$0xff]  }
 0x7c5   : > { %13526 = vmatprep.subr.bf16.mxu0 %v21545_v15  ;;  %14756 = vmatprep.subr.bf16.mxu1 %v21548_v43  ;;  %v21625_v15 = vld [vmem:[%s22188_s16 + $0x3a08] ss:$16 sps:$4 sm:$0xff]   ;;  %v21630_v43 = vld [vmem:[%s22188_s16 + $0x3a24] ss:$16 sps:$4 sm:$0xff]  }
 0x7c8   : > { %13527 = vmatpush1.bf16.msra.mxu0 %v21543_v16  ;;  %14757 = vmatpush1.bf16.msra.mxu1 %v21546_v17  ;;  %v21633_v16 = vld [vmem:[%s22188_s16 + $0x3a2c] ss:$16 sps:$4 sm:$0xff]   ;;  %v21628_v17 = vld [vmem:[%s22188_s16 + $0x3a20] ss:$16 sps:$4 sm:$0xff]  }
 0x7c9   : > { %13528 = vmatprep.subr.bf16.mxu0 %v21551_v48  ;;  %14758 = vmatprep.subr.bf16.mxu1 %v21554_v49  ;;  %v21636_v48 = vld [vmem:[%s22188_s16 + $0x3a44] ss:$16 sps:$4 sm:$0xff]   ;;  %v21639_v49 = vld [vmem:[%s22188_s16 + $0x3a4c] ss:$16 sps:$4 sm:$0xff]  }
 0x7cc   : > { %13529 = vmatpush1.bf16.msra.mxu0 %v21549_v21  ;;  %14759 = vmatpush1.bf16.msra.mxu1 %v21552_v51  ;;  %v21932_v21 = vmov 0   ;;  %v21634_v51 = vld [vmem:[%s22188_s16 + $0x3a40] ss:$16 sps:$4 sm:$0xff]  }
 0x7cd   : > { %13530 = vmatprep.subr.bf16.mxu0 %v21557_v22  ;;  %14760 = vmatprep.subr.bf16.mxu1 %v21560_v56  ;;  %v21637_v22 = vld [vmem:[%s22188_s16 + $0x3a48] ss:$16 sps:$4 sm:$0xff]   ;;  %v21642_v56 = vld [vmem:[%s22188_s16 + $0x3a64] ss:$16 sps:$4 sm:$0xff]  }
 0x7d0   : > { %13531 = vmatpush1.bf16.msra.mxu0 %v21555_v57  ;;  %14761 = vmatpush1.bf16.msra.mxu1 %v21558_v26  ;;  %v21645_v57 = vld [vmem:[%s22188_s16 + $0x3a6c] ss:$16 sps:$4 sm:$0xff]   ;;  %v21640_v26 = vld [vmem:[%s22188_s16 + $0x3a60] ss:$16 sps:$4 sm:$0xff]  }
 0x7d1   : > { %13532 = vmatprep.subr.bf16.mxu0 %v21563_v58  ;;  %14762 = vmatprep.subr.bf16.mxu1 %v21566_v27  ;;  %v21643_v58 = vld [vmem:[%s22188_s16 + $0x3a68] ss:$16 sps:$4 sm:$0xff]   ;;  %v21648_v27 = vld [vmem:[%s22188_s16 + $0x3a84] ss:$16 sps:$4 sm:$0xff]  }
 0x7d4   : > { %13533 = vmatpush1.bf16.msra.mxu0 %v21561_v61  ;;  %14763 = vmatpush1.bf16.msra.mxu1 %v21564_v62  ;;  %v21651_v61 = vld [vmem:[%s22188_s16 + $0x3a8c] ss:$16 sps:$4 sm:$0xff]   ;;  %v21646_v62 = vld [vmem:[%s22188_s16 + $0x3a80] ss:$16 sps:$4 sm:$0xff]  }
 0x7d5   : > { %13534 = vmatprep.subr.bf16.mxu0 %v21569_v31  ;;  %14764 = vmatprep.subr.bf16.mxu1 %v21572_v63  ;;  %v21649_v31 = vld [vmem:[%s22188_s16 + $0x3a88] ss:$16 sps:$4 sm:$0xff]   ;;  %v21654_v63 = vld [vmem:[%s22188_s16 + $0x3aa4] ss:$16 sps:$4 sm:$0xff]  }
 0x7d8   : > { %13535 = vmatpush1.bf16.msra.mxu0 %v21567_v33  ;;  %14765 = vmatpush1.bf16.msra.mxu1 %v21570_v2  ;;  %v21657_v33 = vld [vmem:[%s22188_s16 + $0x3aac] ss:$16 sps:$4 sm:$0xff]   ;;  %v21652_v2 = vld [vmem:[%s22188_s16 + $0x3aa0] ss:$16 sps:$4 sm:$0xff]  }
 0x7d9   : > { %13536 = vmatprep.subr.bf16.mxu0 %v21575_v3  ;;  %14766 = vmatprep.subr.bf16.mxu1 %v21578_v37  ;;  %v21655_v3 = vld [vmem:[%s22188_s16 + $0x3aa8] ss:$16 sps:$4 sm:$0xff]   ;;  %v21660_v37 = vld [vmem:[%s22188_s16 + $0x3ac4] ss:$16 sps:$4 sm:$0xff]  }
 0x7dc   : > { %13537 = vmatpush1.bf16.msra.mxu0 %v21573_v4  ;;  %14767 = vmatpush1.bf16.msra.mxu1 %v21576_v38  ;;  %v21663_v4 = vld [vmem:[%s22188_s16 + $0x3acc] ss:$16 sps:$4 sm:$0xff]   ;;  %v462_v38 = vadd.s32 7424, %v22251_v41 }
 0x7dd   : > { %13538 = vmatprep.subr.bf16.mxu0 %v21581_v7  ;;  %14768 = vmatprep.subr.bf16.mxu1 %v21584_v8  ;;  %v850_v7 = vcombine.high %v24394_v55, %v24394_v55  ;;  %v21658_v8 = vld [vmem:[%s22188_s16 + $0x3ac0] ss:$16 sps:$4 sm:$0xff]  }
 0x7e0   : > { %13539 = vmatpush1.bf16.msra.mxu0 %v21579_v44  ;;  %14769 = vmatpush1.bf16.msra.mxu1 %v21582_v46  ;;  %v21661_v44 = vld [vmem:[%s22188_s16 + $0x3ac8] ss:$16 sps:$4 sm:$0xff]   ;;  %v21666_v46 = vld [vmem:[%s22188_s16 + $0x3ae4] ss:$16 sps:$4 sm:$0xff]  }
 0x7e1   : > { %13540 = vmatprep.subr.bf16.mxu0 %v21587_v39  ;;  %14770 = vmatprep.subr.bf16.mxu1 %v21590_v47  ;;  %v21669_v39 = vld [vmem:[%s22188_s16 + $0x3aec] ss:$16 sps:$4 sm:$0xff]   ;;  %v522_v47 = vadd.s32 %v22262_v50, %v462_v38 }
 0x7e2   : > { %v14928_v38 = vld [vmem:[#allocation8 + $0xe8] sm:$0xff] (!%p18076_p12) }
 0x7e3   : > { %vm581_vm4 = vcmp.lt.s32.totalorder %v522_v47, 30000  ;;  %v14927_v47 = vld [vmem:[#allocation8 + $0xe0] sm:$0xff] (!%p18076_p12) }
 0x7e4   : > { %13541 = vmatpush1.bf16.msra.mxu0 %v21585_v12  ;;  %14771 = vmatpush1.bf16.msra.mxu1 %v21588_v13  ;;  %v864_v12 = vrot.slane %v850_v7, %v22267_v53  ;;  %v21664_v13 = vld [vmem:[%s22188_s16 + $0x3ae0] ss:$16 sps:$4 sm:$0xff]   ;;  %vm17896_vm5 = vmpackc.low %vm581_vm4, %vm581_vm4 }
 0x7e5   : > { %13542 = vmatprep.subr.bf16.mxu0 %v21593_v52  ;;  %14772 = vmatprep.subr.bf16.mxu1 %v21596_v14  ;;  %v21667_v52 = vld [vmem:[%s22188_s16 + $0x3ae8] ss:$16 sps:$4 sm:$0xff]   ;;  %v14926_v7 = vld [vmem:[#allocation8 + $0xd8] sm:$0xff] (!%p18076_p12) }
 0x7e6   : > { %v17897_v41 = vpack.c.bf16 %v864_v12, %v864_v12 }
 0x7e8   : > { %13543 = vmatpush1.bf16.msra.mxu0 %v21591_v54  ;;  %14773 = vmatpush1.bf16.msra.mxu1 %v21594_v18 }
 0x7e9   : > { %13544 = vmatprep.subr.bf16.mxu0 %v21599_v19  ;;  %14774 = vmatprep.subr.bf16.mxu1 %v21602_v59 }
 0x7ec   : > { %13545 = vmatpush1.bf16.msra.mxu0 %v21597_v20  ;;  %14775 = vmatpush1.bf16.msra.mxu1 %v21600_v32 }
 0x7ed   : > { %13546 = vmatprep.subr.bf16.mxu0 %v21605_v23  ;;  %14776 = vmatprep.subr.bf16.mxu1 %v21608_v24 }
 0x7f0   : > { %13547 = vmatpush1.bf16.msra.mxu0 %v21603_v0  ;;  %14777 = vmatpush1.bf16.msra.mxu1 %v21606_v25  ;;  %v1043_v25 = vld [vmem:[#allocation2] sm:$0xff] }
 0x7f1   : > { %13548 = vmatprep.subr.bf16.mxu0 %v21611_v1  ;;  %14778 = vmatprep.subr.bf16.mxu1 %v21614_v28 }
 0x7f4   : > { %13549 = vmatpush1.bf16.msra.mxu0 %v21609_v5  ;;  %14779 = vmatpush1.bf16.msra.mxu1 %v21612_v30  ;;  %v14904_v5 = vld [vmem:[#allocation8 + $0x28] sm:$0xff] (!%p18076_p12)  ;;  %v14902_v30 = vld [vmem:[#allocation8 + $0x18] sm:$0xff] (!%p18076_p12) }
 0x7f5   : > { %13550 = vmatprep.subr.bf16.mxu0 %v21617_v6  ;;  %14780 = vmatprep.subr.bf16.mxu1 %v21620_v34  ;;  %v18155_v6 = vpack.c.bf16 (!%p18076_p12), %v14904_v5, %v14900_v29  ;;  %v14906_v34 = vld [vmem:[#allocation8 + $0x38] sm:$0xff] (!%p18076_p12) }
 0x7f8   : > { %13551 = vmatpush1.bf16.msra.mxu0 %v21615_v9  ;;  %14781 = vmatpush1.bf16.msra.mxu1 %v21618_v10  ;;  %v14903_v9 = vld [vmem:[#allocation8 + $0x20] sm:$0xff] (!%p18076_p12)  ;;  %v18283_v10 = vpack.c.bf16 (!%p18076_p12), %v14906_v34, %v14902_v30 }
 0x7f9   : > { %13561 = vmatprep.subr.bf16.mxu0 %v21624_v36  ;;  %14791 = vmatprep.subr.bf16.mxu1 %v21627_v11  ;;  %v18157_v36 = vpack.c.bf16 (!%p18076_p12), %v14903_v9, %v14899_v35  ;;  %v14901_v11 = vld [vmem:[#allocation8 + $0x10] sm:$0xff] (!%p18076_p12)  ;;  %v14943_v34 = vld [vmem:[#allocation8 + $0x160] sm:$0xff] (!%p18076_p12) }
 0x7fa   : > { %v14941_v35 = vld [vmem:[#allocation8 + $0x150] sm:$0xff] (!%p18076_p12) }
 0x7fb   : > { %17895 = vmatmul.mubr.msk.bf16.vlgmr.msra.gmra.mrb[0].mxu0 %vm17893_vm3, %v17894_v40  ;;  %18072 = vmatmul.mubr.msk.bf16.vlgmr.msra.gmra.mrb[0].mxu1 %vm17893_vm3, %v17894_v40  ;;  %v14905_v40 = vld [vmem:[#allocation8 + $0x30] sm:$0xff] (!%p18076_p12) }
 0x7fc   : > { %13562 = vmatpush1.bf16.msra.mxu0 %v21622_v42  ;;  %14792 = vmatpush1.bf16.msra.mxu1 %v21625_v15  ;;  %v14908_v42 = vld [vmem:[#allocation8 + $0x48] sm:$0xff] (!%p18076_p12)  ;;  %v18285_v15 = vpack.c.bf16 (!%p18076_p12), %v14905_v40, %v14901_v11  ;;  %v14950_v40 = vld [vmem:[#allocation8 + $0x198] sm:$0xff] (!%p18076_p12) }
 0x7fd   : > { %13563 = vmatprep.subr.bf16.mxu0 %v21630_v43  ;;  %14793 = vmatprep.subr.bf16.mxu1 %v21633_v16  ;;  %v14912_v43 = vld [vmem:[#allocation8 + $0x68] sm:$0xff] (!%p18076_p12)  ;;  %v14910_v16 = vld [vmem:[#allocation8 + $0x58] sm:$0xff] (!%p18076_p12) }
 0x7fe   : > { %13593 = vmatprep.mubr.bf16.mxu0 %v21932_v21  ;;  %14823 = vmatprep.mubr.bf16.mxu1 %v21932_v21  ;;  %v14911_v21 = vld [vmem:[#allocation8 + $0x60] sm:$0xff] (!%p18076_p12)  ;;  %v14952_v11 = vld [vmem:[#allocation8 + $0x1a8] sm:$0xff] (!%p18076_p12) }
 0x800   : > { %13564 = vmatpush1.bf16.msra.mxu0 %v21628_v17  ;;  %14794 = vmatpush1.bf16.msra.mxu1 %v21631_v60  ;;  %v14914_v17 = vld [vmem:[#allocation8 + $0x78] sm:$0xff] (!%p18076_p12)  ;;  %v18159_v60 = vpack.c.bf16 (!%p18076_p12), %v14912_v43, %v14908_v42 }
 0x801   : > { %13565 = vmatprep.subr.bf16.mxu0 %v21636_v48  ;;  %14795 = vmatprep.subr.bf16.mxu1 %v21639_v49  ;;  %v18287_v48 = vpack.c.bf16 (!%p18076_p12), %v14914_v17, %v14910_v16  ;;  %v14907_v49 = vld [vmem:[#allocation8 + $0x40] sm:$0xff] (!%p18076_p12)  ;;  %v14954_v42 = vld [vmem:[#allocation8 + $0x1b8] sm:$0xff] (!%p18076_p12) }
 0x802   : > { %v14947_v17 = vld [vmem:[#allocation8 + $0x180] sm:$0xff] (!%p18076_p12) }
 0x804   : > { %13566 = vmatpush1.bf16.msra.mxu0 %v21634_v51  ;;  %14796 = vmatpush1.bf16.msra.mxu1 %v21637_v22  ;;  %v14909_v51 = vld [vmem:[#allocation8 + $0x50] sm:$0xff] (!%p18076_p12)  ;;  %v18161_v22 = vpack.c.bf16 (!%p18076_p12), %v14911_v21, %v14907_v49  ;;  %v18307_v49 = vpack.c.bf16 (!%p18076_p12), %v14954_v42, %v14950_v40  ;;  %v14865_v40 = vsub.s32 (!%p18076_p12), 0, %v22256_v45 }
 0x805   : > { %13567 = vmatprep.subr.bf16.mxu0 %v21642_v56  ;;  %14797 = vmatprep.subr.bf16.mxu1 %v21645_v57  ;;  %v14913_v56 = vld [vmem:[#allocation8 + $0x70] sm:$0xff] (!%p18076_p12)  ;;  %v14916_v57 = vld [vmem:[#allocation8 + $0x88] sm:$0xff] (!%p18076_p12) }
 0x806   : > { %v14953_v21 = vld [vmem:[#allocation8 + $0x1b0] sm:$0xff] (!%p18076_p12) }
 0x808   : > { %13568 = vmatpush1.bf16.msra.mxu0 %v21640_v26  ;;  %14798 = vmatpush1.bf16.msra.mxu1 %v21643_v58  ;;  %v14920_v26 = vld [vmem:[#allocation8 + $0xa8] sm:$0xff] (!%p18076_p12)  ;;  %v18289_v58 = vpack.c.bf16 (!%p18076_p12), %v14913_v56, %v14909_v51  ;;  %v14958_v56 = vld [vmem:[#allocation8 + $0x1d8] sm:$0xff] (!%p18076_p12) }
 0x809   : > { %13569 = vmatprep.subr.bf16.mxu0 %v21648_v27  ;;  %14799 = vmatprep.subr.bf16.mxu1 %v21651_v61  ;;  %v18163_v27 = vpack.c.bf16 (!%p18076_p12), %v14920_v26, %v14916_v57  ;;  %v14918_v61 = vld [vmem:[#allocation8 + $0x98] sm:$0xff] (!%p18076_p12)  ;;  %v14956_v51 = vld [vmem:[#allocation8 + $0x1c8] sm:$0xff] (!%p18076_p12) }
 0x80a   : > { %v14962_v57 = vld [vmem:[#allocation8 + $0x1f8] sm:$0xff] (!%p18076_p12) }
 0x80c   : > { %13570 = vmatpush1.bf16.msra.mxu0 %v21646_v62  ;;  %14800 = vmatpush1.bf16.msra.mxu1 %v21649_v31  ;;  %v14922_v62 = vld [vmem:[#allocation8 + $0xb8] sm:$0xff] (!%p18076_p12)  ;;  %v14915_v31 = vld [vmem:[#allocation8 + $0x80] sm:$0xff] (!%p18076_p12) }
 0x80d   : > { %13571 = vmatprep.subr.bf16.mxu0 %v21654_v63  ;;  %14801 = vmatprep.subr.bf16.mxu1 %v21657_v33  ;;  %v18291_v63 = vpack.c.bf16 (!%p18076_p12), %v14922_v62, %v14918_v61  ;;  %v14919_v33 = vld [vmem:[#allocation8 + $0xa0] sm:$0xff] (!%p18076_p12) }
 0x80e   : > { %v14955_v61 = vld [vmem:[#allocation8 + $0x1c0] sm:$0xff] (!%p18076_p12) }
 0x80f   : > { %v14959_v62 = vld [vmem:[#allocation8 + $0x1e0] sm:$0xff] (!%p18076_p12) }
 0x810   : > { %13572 = vmatpush1.bf16.msra.mxu0 %v21652_v2  ;;  %14802 = vmatpush1.bf16.msra.mxu1 %v21655_v3  ;;  %v14917_v2 = vld [vmem:[#allocation8 + $0x90] sm:$0xff] (!%p18076_p12) }
 0x811   : > { %13573 = vmatprep.subr.bf16.mxu0 %v21660_v37  ;;  %14803 = vmatprep.subr.bf16.mxu1 %v21663_v4  ;;  %v14921_v3 = vld [vmem:[#allocation8 + $0xb0] sm:$0xff] (!%p18076_p12)  ;;  %v18165_v37 = vpack.c.bf16 (!%p18076_p12), %v14919_v33, %v14915_v31  ;;  %v14924_v4 = vld [vmem:[#allocation8 + $0xc8] sm:$0xff] (!%p18076_p12) }
 0x812   : > { %v14957_v31 = vld [vmem:[#allocation8 + $0x1d0] sm:$0xff] (!%p18076_p12) }
 0x813   : > { %v14961_v33 = vld [vmem:[#allocation8 + $0x1f0] sm:$0xff] (!%p18076_p12) }
 0x814   : > { %13574 = vmatpush1.bf16.msra.mxu0 %v21658_v8  ;;  %14804 = vmatpush1.bf16.msra.mxu1 %v21661_v44  ;;  %v18293_v8 = vpack.c.bf16 (!%p18076_p12), %v14921_v3, %v14917_v2  ;;  %v18167_v44 = vpack.c.bf16 (!%p18076_p12), %v14928_v38, %v14924_v4  ;;  %v14964_v2 = vld [vmem:[#allocation8 + $0x208] sm:$0xff] (!%p18076_p12)  ;;  %v14970_v4 = vld [vmem:[#allocation8 + $0x238] sm:$0xff] (!%p18076_p12)  ;;  %v18185_v38 = vpack.c.bf16 (!%p18076_p12), %v14959_v62, %v14955_v61 }
 0x815   : > { %13575 = vmatprep.subr.bf16.mxu0 %v21666_v46  ;;  %14805 = vmatprep.subr.bf16.mxu1 %v21669_v39  ;;  %v14930_v46 = vld [vmem:[#allocation8 + $0xf8] sm:$0xff] (!%p18076_p12)  ;;  %v14923_v39 = vld [vmem:[#allocation8 + $0xc0] sm:$0xff] (!%p18076_p12)  ;;  %v14968_v3 = vld [vmem:[#allocation8 + $0x228] sm:$0xff] (!%p18076_p12) }
 0x816   : > { %v18295_v12 = vpack.c.bf16 (!%p18076_p12), %v14930_v46, %v14926_v7  ;;  %v18313_v7 = vpack.c.bf16 (!%p18076_p12), %v14961_v33, %v14957_v31  ;;  %v14967_v46 = vld [vmem:[#allocation8 + $0x220] sm:$0xff] (!%p18076_p12)  ;;  %v14861_v61 = vld [vmem:[#allocation6] sm:$0xf] (!%p18076_p12) }
 0x817   : > { %v14866_v62 = vrot.slane (!%p18076_p12), %v14861_v61, %v14865_v40 }
 0x818   : > { %13576 = vmatpush1.bf16.msra.mxu0 %v21664_v13  ;;  %14806 = vmatpush1.bf16.msra.mxu1 %v21667_v52  ;;  %v14925_v13 = vld [vmem:[#allocation8 + $0xd0] sm:$0xff] (!%p18076_p12) }
 0x819   : > { %18156 = vmatprep.subr.bf16.mxu0 (!%p18076_p12), %v18155_v6  ;;  %18284 = vmatprep.subr.bf16.mxu1 (!%p18076_p12), %v18283_v10  ;;  %v14929_v52 = vld [vmem:[#allocation8 + $0xf0] sm:$0xff] (!%p18076_p12)  ;;  %v14939_v6 = vld [vmem:[#allocation8 + $0x140] sm:$0xff] (!%p18076_p12) }
 0x81a   : > { %v14945_v10 = vld [vmem:[#allocation8 + $0x170] sm:$0xff] (!%p18076_p12) }
 0x81b   : > { %17898 = vmatmul.mubr.msk.bf16.vlgmr.msra.gmra.mrb[0].mxu0 %vm17896_vm5, %v17897_v41  ;;  %18075 = vmatmul.mubr.msk.bf16.vlgmr.msra.gmra.mrb[0].mxu1 %vm17896_vm5, %v17897_v41  ;;  %v14932_v41 = vld [vmem:[#allocation8 + $0x108] sm:$0xff] (!%p18076_p12)  ;;  %v18305_v43 = vpack.c.bf16 (!%p18076_p12), %v14945_v10, %v14941_v35  ;;  %v14985_v35 = vld [vmem:[#allocation8 + $0x2b0] sm:$0xff] (!%p18076_p12) }
 0x81c   : > { %18158 = vmatpush1.bf16.msra.mxu0 (!%p18076_p12), %v18157_v36  ;;  %18286 = vmatpush1.bf16.msra.mxu1 (!%p18076_p12), %v18285_v15  ;;  %v14948_v36 = vld [vmem:[#allocation8 + $0x188] sm:$0xff] (!%p18076_p12)  ;;  %v18177_v15 = vpack.c.bf16 (!%p18076_p12), %v14943_v34, %v14939_v6  ;;  %v14981_v6 = vld [vmem:[#allocation8 + $0x290] sm:$0xff] (!%p18076_p12) }
 0x81d   : > { %18160 = vmatprep.subr.bf16.mxu0 (!%p18076_p12), %v18159_v60  ;;  %18288 = vmatprep.subr.bf16.mxu1 (!%p18076_p12), %v18287_v48  ;;  %v18179_v16 = vpack.c.bf16 (!%p18076_p12), %v14952_v11, %v14948_v36  ;;  %v14951_v60 = vld [vmem:[#allocation8 + $0x1a0] sm:$0xff] (!%p18076_p12)  ;;  %v14949_v48 = vld [vmem:[#allocation8 + $0x190] sm:$0xff] (!%p18076_p12)  ;;  %v14992_v10 = vld [vmem:[#allocation8 + $0x2e8] sm:$0xff] (!%p18076_p12) }
 0x81e   : > { %v18181_v26 = vpack.c.bf16 (!%p18076_p12), %v14951_v60, %v14947_v17  ;;  %v14990_v36 = vld [vmem:[#allocation8 + $0x2d8] sm:$0xff] (!%p18076_p12)  ;;  %v14873_v17 = vsub.s32 (!%p18076_p12), 2, %v22256_v45  ;;  %v14877_v60 = vsub.s32 (!%p18076_p12), 3, %v22256_v45 }
 0x81f   : > { %v14994_v11 = vld [vmem:[#allocation8 + $0x2f8] sm:$0xff] (!%p18076_p12) }
 0x820   : > { %18162 = vmatpush1.bf16.msra.mxu0 (!%p18076_p12), %v18161_v22  ;;  %18290 = vmatpush1.bf16.msra.mxu1 (!%p18076_p12), %v18289_v58  ;;  %v14960_v22 = vld [vmem:[#allocation8 + $0x1e8] sm:$0xff] (!%p18076_p12)  ;;  %v18309_v58 = vpack.c.bf16 (!%p18076_p12), %v14953_v21, %v14949_v48  ;;  %v18325_v48 = vpack.c.bf16 (!%p18076_p12), %v14985_v35, %v14981_v6  ;;  %v14989_v21 = vld [vmem:[#allocation8 + $0x2d0] sm:$0xff] (!%p18076_p12)  ;;  %v14878_v33 = vrot.slane (!%p18076_p12), %v14861_v61, %v14877_v60  ;;  %v15011_v6 = vld [vmem:[#allocation8 + $0x380] sm:$0xff] (!%p18076_p12) }
 0x821   : > { %18164 = vmatprep.subr.bf16.mxu0 (!%p18076_p12), %v18163_v27  ;;  %18292 = vmatprep.subr.bf16.mxu1 (!%p18076_p12), %v18291_v63  ;;  %v18183_v27 = vpack.c.bf16 (!%p18076_p12), %v14960_v22, %v14956_v51  ;;  %v18311_v63 = vpack.c.bf16 (!%p18076_p12), %v14962_v57, %v14958_v56  ;;  %v18327_v51 = vpack.c.bf16 (!%p18076_p12), %v14994_v11, %v14990_v36  ;;  %v14993_v22 = vld [vmem:[#allocation8 + $0x2f0] sm:$0xff] (!%p18076_p12)  ;;  %v14996_v56 = vld [vmem:[#allocation8 + $0x308] sm:$0xff] (!%p18076_p12) }
 0x822   : > { %v15000_v57 = vld [vmem:[#allocation8 + $0x328] sm:$0xff] (!%p18076_p12)  ;;  %v15013_v35 = vld [vmem:[#allocation8 + $0x390] sm:$0xff] (!%p18076_p12) }
 0x823   : > { %v15020_v36 = vld [vmem:[#allocation8 + $0x3c8] sm:$0xff] (!%p18076_p12) }
 0x824   : > { %18166 = vmatpush1.bf16.msra.mxu0 (!%p18076_p12), %v18165_v37  ;;  %18294 = vmatpush1.bf16.msra.mxu1 (!%p18076_p12), %v18293_v8  ;;  %v14966_v37 = vld [vmem:[#allocation8 + $0x218] sm:$0xff] (!%p18076_p12)  ;;  %v18187_v8 = vpack.c.bf16 (!%p18076_p12), %v14968_v3, %v14964_v2  ;;  %v18329_v2 = vpack.c.bf16 (!%p18076_p12), %v14993_v22, %v14989_v21  ;;  %v18203_v3 = vpack.c.bf16 (!%p18076_p12), %v15000_v57, %v14996_v56  ;;  %v15024_v11 = vld [vmem:[#allocation8 + $0x3e8] sm:$0xff] (!%p18076_p12)  ;;  %v15019_v22 = vld [vmem:[#allocation8 + $0x3c0] sm:$0xff] (!%p18076_p12) }
 0x825   : > { %18168 = vmatprep.subr.bf16.mxu0 (!%p18076_p12), %v18167_v44  ;;  %18296 = vmatprep.subr.bf16.mxu1 (!%p18076_p12), %v18295_v12  ;;  %v14963_v44 = vld [vmem:[#allocation8 + $0x200] sm:$0xff] (!%p18076_p12)  ;;  %v14969_v12 = vld [vmem:[#allocation8 + $0x230] sm:$0xff] (!%p18076_p12) }
 0x826   : > { %v15023_v56 = vld [vmem:[#allocation8 + $0x3e0] sm:$0xff] (!%p18076_p12)  ;;  %v15021_v57 = vld [vmem:[#allocation8 + $0x3d0] sm:$0xff] (!%p18076_p12) }
 0x8ee   : > { %v13595_v55 = vpop.f32.mrb[0].mxu0  ;;  %v14825_v14 = vpop.f32.mrb[0].mxu1 }
 0x8ef   : > { %v13597_v54 = vpop.f32.mrb[1].mxu0  ;;  %v14827_v18 = vpop.f32.mrb[1].mxu1 }
 0x8f0   : > { %v14836_v50 = vcombine.low %v13595_v55, %v13597_v54  ;;  %v14837_v19 = vcombine.low %v14825_v14, %v14827_v18  ;;  %v13599_v59 = vpop.f32.mrb[2].mxu0  ;;  %v14829_v20 = vpop.f32.mrb[2].mxu1  ;;  %v14936_v55 = vld [vmem:[#allocation8 + $0x128] sm:$0xff] (!%p18076_p12)  ;;  %v14934_v14 = vld [vmem:[#allocation8 + $0x118] sm:$0xff] (!%p18076_p12)  ;;  %v18169_v18 = vpack.c.bf16 (!%p18076_p12), %v14927_v47, %v14923_v39  ;;  %v14965_v39 = vld [vmem:[#allocation8 + $0x210] sm:$0xff] (!%p18076_p12)  ;;  %v18315_v47 = vpack.c.bf16 (!%p18076_p12), %v14970_v4, %v14966_v37 }
 0x8f1   : > { %v13600_v32 = vpop.f32.mrb[3].mxu0  ;;  %v14830_v23 = vpop.f32.mrb[3].mxu1  ;;  %v14938_v54 = vld [vmem:[#allocation8 + $0x138] sm:$0xff] (!%p18076_p12)  ;;  %v14931_v59 = vld [vmem:[#allocation8 + $0x100] sm:$0xff] (!%p18076_p12) }
 0x8f2   : > { %v14844_v24 = vrot.slane %v14836_v50, %v22267_v53  ;;  %v14851_v0 = vrot.slane %v14837_v19, %v22267_v53  ;;  %14859 = sbr.rel (%p18076_p12) target bundleno = 2843 (0xb1b), region = 80  ;;  %v18297_v50 = vpack.c.bf16 (!%p18076_p12), %v14929_v52, %v14925_v13  ;;  %v18171_v19 = vpack.c.bf16 (!%p18076_p12), %v14936_v55, %v14932_v41  ;;  %v14935_v20 = vld [vmem:[#allocation8 + $0x120] sm:$0xff] (!%p18076_p12)  ;;  %v14933_v32 = vld [vmem:[#allocation8 + $0x110] sm:$0xff] (!%p18076_p12)  ;;  %18170 = vmatpush1.bf16.msra.mxu0 (!%p18076_p12), %v18169_v18  ;;  %v14972_v13 = vld [vmem:[#allocation8 + $0x248] sm:$0xff] (!%p18076_p12) }
 0x8f3   : > { %v18299_v23 = vpack.c.bf16 (!%p18076_p12), %v14938_v54, %v14934_v14  ;;  %v18173_v29 = vpack.c.bf16 (!%p18076_p12), %v14935_v20, %v14931_v59  ;;  %v14976_v52 = vld [vmem:[#allocation8 + $0x268] sm:$0xff] (!%p18076_p12)  ;;  %v14974_v41 = vld [vmem:[#allocation8 + $0x258] sm:$0xff] (!%p18076_p12)  ;;  %v18189_v14 = vpack.c.bf16 (!%p18076_p12), %v14967_v46, %v14963_v44  ;;  %v18317_v54 = vpack.c.bf16 (!%p18076_p12), %v14969_v12, %v14965_v39  ;;  %v14973_v59 = vld [vmem:[#allocation8 + $0x250] sm:$0xff] (!%p18076_p12) }
 0x8f4   : > { %v14852_v1 = vcombine.low %v14844_v24, %v14851_v0  ;;  %v14937_v24 = vld [vmem:[#allocation8 + $0x130] sm:$0xff] (!%p18076_p12)  ;;  %v14940_v0 = vld [vmem:[#allocation8 + $0x148] sm:$0xff] (!%p18076_p12)  ;;  %18298 = vmatpush1.bf16.msra.mxu1 (!%p18076_p12), %v18297_v50  ;;  %18172 = vmatprep.subr.bf16.mxu0 (!%p18076_p12), %v18171_v19  ;;  %v14978_v55 = vld [vmem:[#allocation8 + $0x278] sm:$0xff] (!%p18076_p12)  ;;  %v18191_v18 = vpack.c.bf16 (!%p18076_p12), %v14976_v52, %v14972_v13 }
 0x8f5   : > { %v18301_v5 = vpack.c.bf16 (!%p18076_p12), %v14937_v24, %v14933_v32  ;;  %18300 = vmatprep.subr.bf16.mxu1 (!%p18076_p12), %v18299_v23  ;;  %v14971_v50 = vld [vmem:[#allocation8 + $0x240] sm:$0xff] (!%p18076_p12)  ;;  %v18319_v20 = vpack.c.bf16 (!%p18076_p12), %v14978_v55, %v14974_v41  ;;  %v14977_v32 = vld [vmem:[#allocation8 + $0x270] sm:$0xff] (!%p18076_p12)  ;;  %v14980_v23 = vld [vmem:[#allocation8 + $0x288] sm:$0xff] (!%p18076_p12) }
 0x8f6   : > { %v14854_v28 = vadd.f32 %v14852_v1, %v1043_v25  ;;  %v14944_v25 = vld [vmem:[#allocation8 + $0x168] sm:$0xff] (!%p18076_p12)  ;;  %v14942_v1 = vld [vmem:[#allocation8 + $0x158] sm:$0xff] (!%p18076_p12)  ;;  %18174 = vmatpush1.bf16.msra.mxu0 (!%p18076_p12), %v18173_v29  ;;  %v14975_v19 = vld [vmem:[#allocation8 + $0x260] sm:$0xff] (!%p18076_p12) }
 0x8f7   : > { %v18175_v30 = vpack.c.bf16 (!%p18076_p12), %v14944_v25, %v14940_v0  ;;  %v14984_v24 = vld [vmem:[#allocation8 + $0x2a8] sm:$0xff] (!%p18076_p12)  ;;  %v14982_v0 = vld [vmem:[#allocation8 + $0x298] sm:$0xff] (!%p18076_p12)  ;;  %v14995_v37 = vld [vmem:[#allocation8 + $0x300] sm:$0xff] (!%p18076_p12) }
 0x8f8   : > { %14855 = vst [vmem:[#allocation2] sm:$0xff] %v14854_v28  ;;  %v14946_v28 = vld [vmem:[#allocation8 + $0x178] sm:$0xff] (!%p18076_p12)  ;;  %18302 = vmatpush1.bf16.msra.mxu1 (!%p18076_p12), %v18301_v5  ;;  %v18195_v29 = vpack.c.bf16 (!%p18076_p12), %v14984_v24, %v14980_v23  ;;  %v14979_v5 = vld [vmem:[#allocation8 + $0x280] sm:$0xff] (!%p18076_p12)  ;;  %v15004_v44 = vld [vmem:[#allocation8 + $0x348] sm:$0xff] (!%p18076_p12) }
 0x8f9   : > { %v18303_v9 = vpack.c.bf16 %v14946_v28, %v14942_v1  ;;  %18176 = vmatprep.subr.bf16.mxu0 %v18175_v30  ;;  %v14986_v25 = vld [vmem:[#allocation8 + $0x2b8] sm:$0xff]  ;;  %v18193_v1 = vpack.c.bf16 %v14975_v19, %v14971_v50  ;;  %v18321_v28 = vpack.c.bf16 %v14977_v32, %v14973_v59  ;;  %v14983_v30 = vld [vmem:[#allocation8 + $0x2a0] sm:$0xff]  ;;  %v15008_v46 = vld [vmem:[#allocation8 + $0x368] sm:$0xff] }
 0x8fa   : > { %18178 = vmatpush1.bf16.msra.mxu0 %v18177_v15  ;;  %v18323_v34 = vpack.c.bf16 %v14986_v25, %v14982_v0  ;;  %v18197_v42 = vpack.c.bf16 %v14983_v30, %v14979_v5  ;;  %v14987_v15 = vld [vmem:[#allocation8 + $0x2c0] sm:$0xff]  ;;  %v15006_v12 = vld [vmem:[#allocation8 + $0x358] sm:$0xff]  ;;  %v15005_v19 = vld [vmem:[#allocation8 + $0x350] sm:$0xff] }
 0x8fb   : > { %18304 = vmatprep.subr.bf16.mxu1 %v18303_v9  ;;  %18180 = vmatprep.subr.bf16.mxu0 %v18179_v16  ;;  %v14988_v9 = vld [vmem:[#allocation8 + $0x2c8] sm:$0xff]  ;;  %v14869_v16 = vsub.s32 1, %v22256_v45  ;;  %v14999_v4 = vld [vmem:[#allocation8 + $0x320] sm:$0xff]  ;;  %v15010_v13 = vld [vmem:[#allocation8 + $0x378] sm:$0xff] }
 0x8fc   : > { %18306 = vmatpush1.bf16.msra.mxu1 %v18305_v43  ;;  %v14991_v43 = vld [vmem:[#allocation8 + $0x2e0] sm:$0xff]  ;;  %v18205_v52 = vpack.c.bf16 %v14999_v4, %v14995_v37  ;;  %v15009_v32 = vld [vmem:[#allocation8 + $0x370] sm:$0xff]  ;;  %v15012_v23 = vld [vmem:[#allocation8 + $0x388] sm:$0xff] }
 0x8fd   : > { %18308 = vmatprep.subr.bf16.mxu1 %v18307_v49  ;;  %v18199_v49 = vpack.c.bf16 %v14992_v10, %v14988_v9  ;;  %v14870_v31 = vrot.slane %v14861_v61, %v14869_v16  ;;  %v15003_v41 = vld [vmem:[#allocation8 + $0x340] sm:$0xff]  ;;  %v15016_v24 = vld [vmem:[#allocation8 + $0x3a8] sm:$0xff]  ;;  %v15014_v25 = vld [vmem:[#allocation8 + $0x398] sm:$0xff]  ;;  %v18337_v5 = vpack.c.bf16 %v15009_v32, %v15005_v19 }
 0x8fe   : > { %18182 = vmatpush1.bf16.msra.mxu0 %v18181_v26  ;;  %v18201_v26 = vpack.c.bf16 %v14991_v43, %v14987_v15  ;;  %v15007_v50 = vld [vmem:[#allocation8 + $0x360] sm:$0xff]  ;;  %v18211_v30 = vpack.c.bf16 %v15016_v24, %v15012_v23  ;;  %v15017_v10 = vld [vmem:[#allocation8 + $0x3b0] sm:$0xff]  ;;  %v15022_v15 = vld [vmem:[#allocation8 + $0x3d8] sm:$0xff] }
 0x8ff   : > { %18184 = vmatprep.subr.bf16.mxu0 %v18183_v27  ;;  %v15002_v27 = vld [vmem:[#allocation8 + $0x338] sm:$0xff]  ;;  %v14879_v39 = vcombine.low %v14866_v62, %v14870_v31  ;;  %v18341_v21 = vpack.c.bf16 %v15017_v10, %v15013_v35  ;;  %v15032_v62 = vld [vmem:[#allocation8 + $0x428] sm:$0xff]  ;;  %v15027_v4 = vld [vmem:[#allocation8 + $0x400] sm:$0xff] }
 0x900   : > { %18310 = vmatpush1.bf16.msra.mxu1 %v18309_v58  ;;  %v14998_v58 = vld [vmem:[#allocation8 + $0x318] sm:$0xff]  ;;  %v15041_v19 = vld [vmem:[#allocation8 + $0x470] sm:$0xff]  ;;  %v18077_v45 = vld [vmem:[#allocation12] ss:$0 sm:$0xff] }
 0x901   : > { %18312 = vmatprep.subr.bf16.mxu1 %v18311_v63  ;;  %v14874_v63 = vrot.slane %v14861_v61, %v14873_v17  ;;  %v14887_v55 = vrot.slane %v14879_v39, %v22267_v53  ;;  %v14860_v59 = vld [vmem:[#allocation2] sm:$0xff]  ;;  %v15028_v61 = vld [vmem:[#allocation8 + $0x408] sm:$0xff] }
 0x902   : > { %18186 = vmatpush1.bf16.msra.mxu0 %v18185_v38  ;;  %v14997_v38 = vld [vmem:[#allocation8 + $0x310] sm:$0xff]  ;;  %v15026_v43 = vld [vmem:[#allocation8 + $0x3f8] sm:$0xff]  ;;  %v18219_v37 = vpack.c.bf16 %v15032_v62, %v15028_v61  ;;  %v15040_v39 = vld [vmem:[#allocation8 + $0x468] sm:$0xff] }
 0x903   : > { %18188 = vmatprep.subr.bf16.mxu0 %v18187_v8  ;;  %v15001_v8 = vld [vmem:[#allocation8 + $0x330] sm:$0xff]  ;;  %v15046_v32 = vld [vmem:[#allocation8 + $0x498] sm:$0xff]  ;;  %v15063_v61 = vld [vmem:[#allocation8 + $0x520] sm:$0xff] }
 0x904   : > { %18314 = vmatpush1.bf16.msra.mxu1 %v18313_v7  ;;  %v18331_v7 = vpack.c.bf16 %v15002_v27, %v14998_v58  ;;  %v15025_v58 = vld [vmem:[#allocation8 + $0x3f0] sm:$0xff]  ;;  %v15050_v23 = vld [vmem:[#allocation8 + $0x4b8] sm:$0xff] }
 0x905   : > { %18316 = vmatprep.subr.bf16.mxu1 %v18315_v47  ;;  %v14880_v47 = vcombine.low %v14874_v63, %v14878_v33  ;;  %v15030_v63 = vld [vmem:[#allocation8 + $0x418] sm:$0xff]  ;;  %v15061_v62 = vld [vmem:[#allocation8 + $0x510] sm:$0xff] }
 0x906   : > { %18190 = vmatpush1.bf16.msra.mxu0 %v18189_v14  ;;  %v15034_v33 = vld [vmem:[#allocation8 + $0x438] sm:$0xff] }
 0x907   : > { %18192 = vmatprep.subr.bf16.mxu0 %v18191_v18  ;;  %v14894_v14 = vrot.slane %v14880_v47, %v22267_v53  ;;  %v18207_v18 = vpack.c.bf16 %v15008_v46, %v15004_v44  ;;  %v15033_v44 = vld [vmem:[#allocation8 + $0x430] sm:$0xff]  ;;  %v15036_v46 = vld [vmem:[#allocation8 + $0x448] sm:$0xff]  ;;  %v15054_v35 = vld [vmem:[#allocation8 + $0x4d8] sm:$0xff] }
 0x908   : > { %18318 = vmatpush1.bf16.msra.mxu1 %v18317_v54  ;;  %v18333_v54 = vpack.c.bf16 %v15001_v8, %v14997_v38  ;;  %v15031_v38 = vld [vmem:[#allocation8 + $0x420] sm:$0xff]  ;;  %v18347_v8 = vpack.c.bf16 %v15034_v33, %v15030_v63  ;;  %v15065_v63 = vld [vmem:[#allocation8 + $0x530] sm:$0xff]  ;;  %v15068_v33 = vld [vmem:[#allocation8 + $0x548] sm:$0xff] }
 0x909   : > { %18320 = vmatprep.subr.bf16.mxu1 %v18319_v20  ;;  %v18335_v20 = vpack.c.bf16 %v15010_v13, %v15006_v12  ;;  %v14895_v0 = vcombine.low %v14887_v55, %v14894_v14  ;;  %v15038_v12 = vld [vmem:[#allocation8 + $0x458] sm:$0xff]  ;;  %v18223_v55 = vpack.c.bf16 %v15040_v39, %v15036_v46  ;;  %v15035_v14 = vld [vmem:[#allocation8 + $0x440] sm:$0xff]  ;;  %v15069_v46 = vld [vmem:[#allocation8 + $0x550] sm:$0xff] }
 0x90a   : > { %18194 = vmatpush1.bf16.msra.mxu0 %v18193_v1  ;;  %v15018_v1 = vld [vmem:[#allocation8 + $0x3b8] sm:$0xff] }
 0x90b   : > { %18196 = vmatprep.subr.bf16.mxu0 %v18195_v29  ;;  %v14897_v29 = vadd.f32 %v14895_v0, %v14860_v59  ;;  %v18339_v9 = vpack.c.bf16 %v15018_v1, %v15014_v25  ;;  %v15042_v13 = vld [vmem:[#allocation8 + $0x478] sm:$0xff]  ;;  %v15044_v59 = vld [vmem:[#allocation8 + $0x488] sm:$0xff]  ;;  %v15043_v1 = vld [vmem:[#allocation8 + $0x480] sm:$0xff] }
 0x90c   : > { %18322 = vmatpush1.bf16.msra.mxu1 %v18321_v28  ;;  %v18209_v28 = vpack.c.bf16 %v15007_v50, %v15003_v41  ;;  %v18351_v50 = vpack.c.bf16 %v15042_v13, %v15038_v12  ;;  %v15073_v12 = vld [vmem:[#allocation8 + $0x570] sm:$0xff]  ;;  %v15076_v13 = vld [vmem:[#allocation8 + $0x588] sm:$0xff] }
 0x90d   : > { %18324 = vmatprep.subr.bf16.mxu1 %v18323_v34  ;;  %v15015_v34 = vld [vmem:[#allocation8 + $0x3a0] sm:$0xff] }
 0x90e   : > { %18198 = vmatpush1.bf16.msra.mxu0 %v18197_v42  ;;  %v14898_v42 = vmax.f32 %v14897_v29, 0.0  ;;  %v15045_v29 = vld [vmem:[#allocation8 + $0x490] sm:$0xff] }
 0x90f   : > { %18200 = vmatprep.subr.bf16.mxu0 %v18199_v49 }
 0x910   : > { %18326 = vmatpush1.bf16.msra.mxu1 %v18325_v48  ;;  %v18213_v48 = vpack.c.bf16 %v15015_v34, %v15011_v6  ;;  %v15185_v49 = vrot.slane %v14898_v42, %v22267_v53  ;;  %v15178_v31 = vcombine.high %v14898_v42, %v14898_v42  ;;  %v15052_v6 = vld [vmem:[#allocation8 + $0x4c8] sm:$0xff]  ;;  %v15051_v42 = vld [vmem:[#allocation8 + $0x4c0] sm:$0xff] }
 0x911   : > { %18328 = vmatprep.subr.bf16.mxu1 %v18327_v51  ;;  %v18215_v51 = vpack.c.bf16 %v15024_v11, %v15020_v36  ;;  %v15056_v34 = vld [vmem:[#allocation8 + $0x4e8] sm:$0xff] }
 0x912   : > { %18202 = vmatpush1.bf16.msra.mxu0 %v18201_v26  ;;  %v18343_v26 = vpack.c.bf16 %v15026_v43, %v15022_v15  ;;  %v15193_v27 = vcombine.high %v15185_v49, %v15185_v49  ;;  %v24537_v47 = vrot.slane %v15178_v31, %v22267_v53  ;;  %v18231_v11 = vpack.c.bf16 %v15056_v34, %v15052_v6  ;;  %v15055_v15 = vld [vmem:[#allocation8 + $0x4e0] sm:$0xff]  ;;  %v15053_v43 = vld [vmem:[#allocation8 + $0x4d0] sm:$0xff] }
 0x913   : > { %18204 = vmatprep.subr.bf16.mxu0 %v18203_v3  ;;  %v18345_v3 = vpack.c.bf16 %v15025_v58, %v15021_v57  ;;  %v18233_v57 = vpack.c.bf16 %v15055_v15, %v15051_v42  ;;  %v15089_v34 = vld [vmem:[#allocation8 + $0x5f0] sm:$0xff] }
 0x914   : > { %18330 = vmatpush1.bf16.msra.mxu1 %v18329_v2  ;;  %v18217_v2 = vpack.c.bf16 %v15023_v56, %v15019_v22  ;;  %15263 = vmatprep.mubr.f32.mxu0 %v15193_v27  ;;  %v15194_v53 = vcombine.high %v24537_v47, %v24537_v47  ;;  %v15062_v22 = vld [vmem:[#allocation8 + $0x518] sm:$0xff] }
 0x915   : > { %18332 = vmatprep.subr.bf16.mxu1 %v18331_v7  ;;  %v15029_v7 = vld [vmem:[#allocation8 + $0x410] sm:$0xff]  ;;  %15405 = vmatprep.mubr.f32.mxu1 %v15193_v27  ;;  %v15066_v56 = vld [vmem:[#allocation8 + $0x538] sm:$0xff]  ;;  %v15059_v27 = vld [vmem:[#allocation8 + $0x500] sm:$0xff] }
 0x916   : > { %18206 = vmatpush1.bf16.msra.mxu0 %v18205_v52  ;;  %v18221_v52 = vpack.c.bf16 %v15031_v38, %v15027_v4  ;;  %v18349_v41 = vpack.c.bf16 %v15033_v44, %v15029_v7  ;;  %v18363_v31 = vpack.c.bf16 %v15066_v56, %v15062_v22  ;;  %v18237_v4 = vpack.c.bf16 %v15063_v61, %v15059_v27  ;;  %v15071_v44 = vld [vmem:[#allocation8 + $0x560] sm:$0xff]  ;;  %v15100_v22 = vld [vmem:[#allocation8 + $0x648] sm:$0xff] }
 0x917   : > { %18208 = vmatprep.subr.bf16.mxu0 %v18207_v18  ;;  %v15037_v18 = vld [vmem:[#allocation8 + $0x450] sm:$0xff]  ;;  %v18365_v38 = vpack.c.bf16 %v15065_v63, %v15061_v62  ;;  %v15104_v56 = vld [vmem:[#allocation8 + $0x668] sm:$0xff]  ;;  %v15099_v62 = vld [vmem:[#allocation8 + $0x640] sm:$0xff] }
 0x918   : > { %18334 = vmatpush1.bf16.msra.mxu1 %v18333_v54  ;;  %v15039_v54 = vld [vmem:[#allocation8 + $0x460] sm:$0xff]  ;;  %v18353_v0 = vpack.c.bf16 %v15041_v19, %v15037_v18  ;;  %v18255_v61 = vpack.c.bf16 %v15104_v56, %v15100_v22  ;;  %v15101_v63 = vld [vmem:[#allocation8 + $0x650] sm:$0xff] }
 0x919   : > { %18336 = vmatprep.subr.bf16.mxu1 %v18335_v20  ;;  %v15048_v20 = vld [vmem:[#allocation8 + $0x4a8] sm:$0xff]  ;;  %v18225_v24 = vpack.c.bf16 %v15039_v54, %v15035_v14  ;;  %v18369_v54 = vpack.c.bf16 %v15073_v12, %v15069_v46  ;;  %v15079_v19 = vld [vmem:[#allocation8 + $0x5a0] sm:$0xff]  ;;  %v15109_v12 = vld [vmem:[#allocation8 + $0x690] sm:$0xff] }
 0x91a   : > { %18210 = vmatpush1.bf16.msra.mxu0 %v18209_v28  ;;  %v18227_v25 = vpack.c.bf16 %v15048_v20, %v15044_v59  ;;  %v15047_v28 = vld [vmem:[#allocation8 + $0x4a0] sm:$0xff]  ;;  %v15077_v59 = vld [vmem:[#allocation8 + $0x590] sm:$0xff] }
 0x91b   : > { %18212 = vmatprep.subr.bf16.mxu0 %v18211_v30  ;;  %v15049_v30 = vld [vmem:[#allocation8 + $0x4b0] sm:$0xff]  ;;  %v18229_v10 = vpack.c.bf16 %v15047_v28, %v15043_v1  ;;  %v15107_v46 = vld [vmem:[#allocation8 + $0x680] sm:$0xff] }
 0x91c   : > { %18338 = vmatpush1.bf16.msra.mxu1 %v18337_v5  ;;  %v18355_v5 = vpack.c.bf16 %v15050_v23, %v15046_v32  ;;  %v18357_v36 = vpack.c.bf16 %v15049_v30, %v15045_v29  ;;  %v15084_v32 = vld [vmem:[#allocation8 + $0x5c8] sm:$0xff]  ;;  %v15083_v29 = vld [vmem:[#allocation8 + $0x5c0] sm:$0xff]  ;;  %v15085_v30 = vld [vmem:[#allocation8 + $0x5d0] sm:$0xff] }
 0x91d   : > { %18340 = vmatprep.subr.bf16.mxu1 %v18339_v9  ;;  %v15058_v9 = vld [vmem:[#allocation8 + $0x4f8] sm:$0xff]  ;;  %v15088_v23 = vld [vmem:[#allocation8 + $0x5e8] sm:$0xff]  ;;  %v18377_v42 = vpack.c.bf16 %v15089_v34, %v15085_v30  ;;  %v15123_v30 = vld [vmem:[#allocation8 + $0x700] sm:$0xff] }
 0x91e   : > { %18214 = vmatpush1.bf16.msra.mxu0 %v18213_v48  ;;  %v18359_v48 = vpack.c.bf16 %v15058_v9, %v15054_v35  ;;  %v18247_v28 = vpack.c.bf16 %v15088_v23, %v15084_v32  ;;  %v15092_v35 = vld [vmem:[#allocation8 + $0x608] sm:$0xff]  ;;  %v15121_v23 = vld [vmem:[#allocation8 + $0x6f0] sm:$0xff] }
 0x91f   : > { %18216 = vmatprep.subr.bf16.mxu0 %v18215_v51  ;;  %v15064_v51 = vld [vmem:[#allocation8 + $0x528] sm:$0xff]  ;;  %v15125_v34 = vld [vmem:[#allocation8 + $0x710] sm:$0xff] }
 0x920   : > { %18342 = vmatpush1.bf16.msra.mxu1 %v18341_v21  ;;  %v15060_v21 = vld [vmem:[#allocation8 + $0x508] sm:$0xff]  ;;  %v15137_v56 = vld [vmem:[#allocation8 + $0x770] sm:$0xff] }
 0x921   : > { %18344 = vmatprep.subr.bf16.mxu1 %v18343_v26  ;;  %v18235_v58 = vpack.c.bf16 %v15064_v51, %v15060_v21  ;;  %v15096_v9 = vld [vmem:[#allocation8 + $0x628] sm:$0xff]  ;;  %v15097_v51 = vld [vmem:[#allocation8 + $0x630] sm:$0xff] }
 0x922   : > { %18218 = vmatpush1.bf16.msra.mxu0 %v18217_v2  ;;  %v15072_v2 = vld [vmem:[#allocation8 + $0x568] sm:$0xff]  ;;  %v18251_v15 = vpack.c.bf16 %v15096_v9, %v15092_v35  ;;  %v15129_v9 = vld [vmem:[#allocation8 + $0x730] sm:$0xff] }
 0x923   : > { %18220 = vmatprep.subr.bf16.mxu0 %v18219_v37  ;;  %v15074_v37 = vld [vmem:[#allocation8 + $0x578] sm:$0xff]  ;;  %v18239_v7 = vpack.c.bf16 %v15072_v2, %v15068_v33  ;;  %v15105_v2 = vld [vmem:[#allocation8 + $0x670] sm:$0xff] }
 0x924   : > { %18346 = vmatpush1.bf16.msra.mxu1 %v18345_v3  ;;  %v15070_v3 = vld [vmem:[#allocation8 + $0x558] sm:$0xff] }
 0x925   : > { %18348 = vmatprep.subr.bf16.mxu1 %v18347_v8  ;;  %15264 = vmatmul.mubr.f32.vlgmr.msra.gmra.mrb[0].mxu0 %v15185_v49  ;;  %v15067_v8 = vld [vmem:[#allocation8 + $0x540] sm:$0xff]  ;;  %v18367_v39 = vpack.c.bf16 %v15074_v37, %v15070_v3  ;;  %v15108_v3 = vld [vmem:[#allocation8 + $0x688] sm:$0xff] }
 0x926   : > { %18222 = vmatpush1.bf16.msra.mxu0 %v18221_v52  ;;  %15334 = vmatprep.mubr.f32.mxu0 %v15194_v53  ;;  %v15080_v52 = vld [vmem:[#allocation8 + $0x5a8] sm:$0xff]  ;;  %v18241_v14 = vpack.c.bf16 %v15071_v44, %v15067_v8  ;;  %v18385_v8 = vpack.c.bf16 %v15105_v2, %v15101_v63  ;;  %v15139_v63 = vld [vmem:[#allocation8 + $0x780] sm:$0xff]  ;;  %v15141_v2 = vld [vmem:[#allocation8 + $0x790] sm:$0xff] }
 0x927   : > { %15406 = vmatmul.mubr.f32.vlgmr.msra.gmra.mrb[0].mxu1 %v15185_v49  ;;  %18224 = vmatprep.subr.bf16.mxu0 %v18223_v55  ;;  %v15057_v49 = vld [vmem:[#allocation8 + $0x4f0] sm:$0xff]  ;;  %v15082_v55 = vld [vmem:[#allocation8 + $0x5b8] sm:$0xff]  ;;  %v18243_v18 = vpack.c.bf16 %v15080_v52, %v15076_v13  ;;  %v15112_v37 = vld [vmem:[#allocation8 + $0x6a8] sm:$0xff] }
 0x928   : > { %18350 = vmatpush1.bf16.msra.mxu1 %v18349_v41  ;;  %15476 = vmatprep.mubr.f32.mxu1 %v15194_v53  ;;  %v18361_v26 = vpack.c.bf16 %v15057_v49, %v15053_v43  ;;  %v15078_v41 = vld [vmem:[#allocation8 + $0x598] sm:$0xff]  ;;  %v15081_v53 = vld [vmem:[#allocation8 + $0x5b0] sm:$0xff]  ;;  %v15091_v43 = vld [vmem:[#allocation8 + $0x600] sm:$0xff]  ;;  %v18259_v44 = vpack.c.bf16 %v15112_v37, %v15108_v3 }
 0x929   : > { %18352 = vmatprep.subr.bf16.mxu1 %v18351_v50  ;;  %v15075_v50 = vld [vmem:[#allocation8 + $0x580] sm:$0xff]  ;;  %v18371_v20 = vpack.c.bf16 %v15082_v55, %v15078_v41  ;;  %v18373_v1 = vpack.c.bf16 %v15081_v53, %v15077_v59  ;;  %v15093_v49 = vld [vmem:[#allocation8 + $0x610] sm:$0xff]  ;;  %v15116_v41 = vld [vmem:[#allocation8 + $0x6c8] sm:$0xff] }
 0x92a   : > { %18226 = vmatpush1.bf16.msra.mxu0 %v18225_v24  ;;  %v15086_v24 = vld [vmem:[#allocation8 + $0x5d8] sm:$0xff]  ;;  %v18381_v27 = vpack.c.bf16 %v15097_v51, %v15093_v49  ;;  %v15113_v52 = vld [vmem:[#allocation8 + $0x6b0] sm:$0xff]  ;;  %v15120_v55 = vld [vmem:[#allocation8 + $0x6e8] sm:$0xff] }
 0x92b   : > { %18228 = vmatprep.subr.bf16.mxu0 %v18227_v25  ;;  %v18245_v25 = vpack.c.bf16 %v15079_v19, %v15075_v50  ;;  %v18389_v50 = vpack.c.bf16 %v15113_v52, %v15109_v12  ;;  %v18263_v19 = vpack.c.bf16 %v15120_v55, %v15116_v41  ;;  %v15115_v59 = vld [vmem:[#allocation8 + $0x6c0] sm:$0xff]  ;;  %v15117_v53 = vld [vmem:[#allocation8 + $0x6d0] sm:$0xff] }
 0x92c   : > { %18354 = vmatpush1.bf16.msra.mxu1 %v18353_v0  ;;  %v15090_v0 = vld [vmem:[#allocation8 + $0x5f8] sm:$0xff]  ;;  %v15131_v49 = vld [vmem:[#allocation8 + $0x740] sm:$0xff]  ;;  %v15133_v51 = vld [vmem:[#allocation8 + $0x750] sm:$0xff] }
 0x92d   : > { %18356 = vmatprep.subr.bf16.mxu1 %v18355_v5  ;;  %v15087_v5 = vld [vmem:[#allocation8 + $0x5e0] sm:$0xff]  ;;  %v18375_v6 = vpack.c.bf16 %v15090_v0, %v15086_v24  ;;  %v15124_v24 = vld [vmem:[#allocation8 + $0x708] sm:$0xff]  ;;  %v15145_v37 = vld [vmem:[#allocation8 + $0x7b0] sm:$0xff] }
 0x92e   : > { %18230 = vmatpush1.bf16.msra.mxu0 %v18229_v10  ;;  %v15094_v10 = vld [vmem:[#allocation8 + $0x618] sm:$0xff]  ;;  %v15128_v0 = vld [vmem:[#allocation8 + $0x728] sm:$0xff]  ;;  %v15147_v12 = vld [vmem:[#allocation8 + $0x7c0] sm:$0xff] }
 0x92f   : > { %18232 = vmatprep.subr.bf16.mxu0 %v18231_v11  ;;  %v18249_v11 = vpack.c.bf16 %v15087_v5, %v15083_v29  ;;  %v18393_v29 = vpack.c.bf16 %v15121_v23, %v15117_v53  ;;  %v18267_v5 = vpack.c.bf16 %v15128_v0, %v15124_v24  ;;  %v15149_v52 = vld [vmem:[#allocation8 + $0x7d0] sm:$0xff]  ;;  %v15487_v53 = vld [vmem:[#allocation11] sm:$0xff] }
 0x930   : > { %18358 = vmatpush1.bf16.msra.mxu1 %v18357_v36  ;;  %v15098_v36 = vld [vmem:[#allocation8 + $0x638] sm:$0xff]  ;;  %v15153_v55 = vld [vmem:[#allocation8 + $0x7f0] sm:$0xff]  ;;  %v15519_v23 = vld [vmem:[#allocation11 + $0x100] sm:$0xff] }
 0x931   : > { %18360 = vmatprep.subr.bf16.mxu1 %v18359_v48  ;;  %v15095_v48 = vld [vmem:[#allocation8 + $0x620] sm:$0xff]  ;;  %v18379_v21 = vpack.c.bf16 %v15098_v36, %v15094_v10  ;;  %v15132_v10 = vld [vmem:[#allocation8 + $0x748] sm:$0xff] }
 0x932   : > { %18234 = vmatpush1.bf16.msra.mxu0 %v18233_v57  ;;  %v15102_v57 = vld [vmem:[#allocation8 + $0x658] sm:$0xff]  ;;  %v15136_v36 = vld [vmem:[#allocation8 + $0x768] sm:$0xff] }
 0x933   : > { %18236 = vmatprep.subr.bf16.mxu0 %v18235_v58  ;;  %v18253_v58 = vpack.c.bf16 %v15095_v48, %v15091_v43  ;;  %v18397_v43 = vpack.c.bf16 %v15129_v9, %v15125_v34  ;;  %v18271_v48 = vpack.c.bf16 %v15136_v36, %v15132_v10  ;;  %v15520_v0 = vld [vmem:[#allocation11 + $0x108] sm:$0xff]  ;;  %v15489_v34 = vld [vmem:[#allocation11 + $0x10] sm:$0xff]  ;;  %v15522_v36 = vld [vmem:[#allocation11 + $0x118] sm:$0xff] }
 0x934   : > { %18362 = vmatpush1.bf16.msra.mxu1 %v18361_v26  ;;  %v15106_v26 = vld [vmem:[#allocation8 + $0x678] sm:$0xff] }
 0x935   : > { %18364 = vmatprep.subr.bf16.mxu1 %v18363_v31  ;;  %v15103_v31 = vld [vmem:[#allocation8 + $0x660] sm:$0xff]  ;;  %v18383_v33 = vpack.c.bf16 %v15106_v26, %v15102_v57  ;;  %v15140_v57 = vld [vmem:[#allocation8 + $0x788] sm:$0xff]  ;;  %v15521_v9 = vld [vmem:[#allocation11 + $0x110] sm:$0xff] }
 0x936   : > { %18238 = vmatpush1.bf16.msra.mxu0 %v18237_v4  ;;  %v15110_v4 = vld [vmem:[#allocation8 + $0x698] sm:$0xff]  ;;  %v15144_v26 = vld [vmem:[#allocation8 + $0x7a8] sm:$0xff] }
 0x937   : > { %18240 = vmatprep.subr.bf16.mxu0 %v18239_v7  ;;  %v18257_v7 = vpack.c.bf16 %v15103_v31, %v15099_v62  ;;  %v18401_v62 = vpack.c.bf16 %v15137_v56, %v15133_v51  ;;  %v18275_v31 = vpack.c.bf16 %v15144_v26, %v15140_v57  ;;  %v15491_v51 = vld [vmem:[#allocation11 + $0x20] sm:$0xff]  ;;  %v15524_v26 = vld [vmem:[#allocation11 + $0x128] sm:$0xff] }
 0x938   : > { %18366 = vmatpush1.bf16.msra.mxu1 %v18365_v38  ;;  %v15114_v38 = vld [vmem:[#allocation8 + $0x6b8] sm:$0xff]  ;;  %v15523_v56 = vld [vmem:[#allocation11 + $0x120] sm:$0xff] }
 0x939   : > { %18368 = vmatprep.subr.bf16.mxu1 %v18367_v39  ;;  %v15111_v39 = vld [vmem:[#allocation8 + $0x6a0] sm:$0xff]  ;;  %v18387_v13 = vpack.c.bf16 %v15114_v38, %v15110_v4  ;;  %v15148_v4 = vld [vmem:[#allocation8 + $0x7c8] sm:$0xff] }
 0x93a   : > { %18242 = vmatpush1.bf16.msra.mxu0 %v18241_v14  ;;  %v15118_v14 = vld [vmem:[#allocation8 + $0x6d8] sm:$0xff]  ;;  %v15152_v38 = vld [vmem:[#allocation8 + $0x7e8] sm:$0xff] }
 0x93b   : > { %18244 = vmatprep.subr.bf16.mxu0 %v18243_v18  ;;  %v18261_v18 = vpack.c.bf16 %v15111_v39, %v15107_v46  ;;  %v18405_v46 = vpack.c.bf16 %v15145_v37, %v15141_v2  ;;  %v18279_v39 = vpack.c.bf16 %v15152_v38, %v15148_v4  ;;  %v15494_v2 = vld [vmem:[#allocation11 + $0x38] sm:$0xff]  ;;  %v15511_v38 = vld [vmem:[#allocation11 + $0xc0] sm:$0xff] }
 0x93c   : > { %18370 = vmatpush1.bf16.msra.mxu1 %v18369_v54  ;;  %v15122_v54 = vld [vmem:[#allocation8 + $0x6f8] sm:$0xff] }
 0x93d   : > { %18372 = vmatprep.subr.bf16.mxu1 %v18371_v20  ;;  %v15119_v20 = vld [vmem:[#allocation8 + $0x6e0] sm:$0xff]  ;;  %v18391_v32 = vpack.c.bf16 %v15122_v54, %v15118_v14  ;;  %v15504_v54 = vld [vmem:[#allocation11 + $0x88] sm:$0xff] }
 0x93e   : > { %18246 = vmatpush1.bf16.msra.mxu0 %v18245_v25  ;;  %v15126_v25 = vld [vmem:[#allocation8 + $0x718] sm:$0xff]  ;;  %v15503_v14 = vld [vmem:[#allocation11 + $0x80] sm:$0xff] }
 0x93f   : > { %18248 = vmatprep.subr.bf16.mxu0 %v18247_v28  ;;  %v18265_v28 = vpack.c.bf16 %v15119_v20, %v15115_v59  ;;  %v18409_v59 = vpack.c.bf16 %v15153_v55, %v15149_v52  ;;  %v18411_v20 = vpack.c.bf16 %v15504_v54, %v15503_v14  ;;  %v15526_v4 = vld [vmem:[#allocation11 + $0x138] sm:$0xff]  ;;  %v15496_v52 = vld [vmem:[#allocation11 + $0x48] sm:$0xff]  ;;  %v15513_v54 = vld [vmem:[#allocation11 + $0xd0] sm:$0xff] }
 0x940   : > { %18374 = vmatpush1.bf16.msra.mxu1 %v18373_v1  ;;  %v15130_v1 = vld [vmem:[#allocation8 + $0x738] sm:$0xff]  ;;  %v15528_v14 = vld [vmem:[#allocation11 + $0x148] sm:$0xff] }
 0x941   : > { %18376 = vmatprep.subr.bf16.mxu1 %v18375_v6  ;;  %v15127_v6 = vld [vmem:[#allocation8 + $0x720] sm:$0xff]  ;;  %v18395_v35 = vpack.c.bf16 %v15130_v1, %v15126_v25  ;;  %v15505_v25 = vld [vmem:[#allocation11 + $0x90] sm:$0xff] }
 0x942   : > { %18250 = vmatpush1.bf16.msra.mxu0 %v18249_v11  ;;  %v15134_v11 = vld [vmem:[#allocation8 + $0x758] sm:$0xff] }
 0x943   : > { %18252 = vmatprep.subr.bf16.mxu0 %v18251_v15  ;;  %v18269_v15 = vpack.c.bf16 %v15127_v6, %v15123_v30  ;;  %v15506_v1 = vld [vmem:[#allocation11 + $0x98] sm:$0xff]  ;;  %v18445_v30 = vpack.c.bf16 %v15520_v0, %v15519_v23 }
 0x944   : > { %18378 = vmatpush1.bf16.msra.mxu1 %v18377_v42  ;;  %v15138_v42 = vld [vmem:[#allocation8 + $0x778] sm:$0xff]  ;;  %v18415_v6 = vpack.c.bf16 %v15506_v1, %v15505_v25  ;;  %v15515_v1 = vld [vmem:[#allocation11 + $0xe0] sm:$0xff] }
 0x945   : > { %18380 = vmatprep.subr.bf16.mxu1 %v18379_v21  ;;  %v15135_v21 = vld [vmem:[#allocation8 + $0x760] sm:$0xff]  ;;  %v18399_v22 = vpack.c.bf16 %v15138_v42, %v15134_v11  ;;  %v15508_v42 = vld [vmem:[#allocation11 + $0xa8] sm:$0xff] }
 0x946   : > { %18254 = vmatpush1.bf16.msra.mxu0 %v18253_v58  ;;  %v15142_v58 = vld [vmem:[#allocation8 + $0x798] sm:$0xff]  ;;  %v15507_v11 = vld [vmem:[#allocation11 + $0xa0] sm:$0xff] }
 0x947   : > { %18256 = vmatprep.subr.bf16.mxu0 %v18255_v61  ;;  %v18273_v61 = vpack.c.bf16 %v15135_v21, %v15131_v49  ;;  %v18449_v49 = vpack.c.bf16 %v15522_v36, %v15521_v9  ;;  %v18419_v21 = vpack.c.bf16 %v15508_v42, %v15507_v11  ;;  %v15498_v23 = vld [vmem:[#allocation11 + $0x58] sm:$0xff]  ;;  %v15499_v9 = vld [vmem:[#allocation11 + $0x60] sm:$0xff]  ;;  %v15532_v42 = vld [vmem:[#allocation11 + $0x168] sm:$0xff] }
 0x948   : > { %18382 = vmatpush1.bf16.msra.mxu1 %v18381_v27  ;;  %v15146_v27 = vld [vmem:[#allocation8 + $0x7b8] sm:$0xff]  ;;  %v15531_v36 = vld [vmem:[#allocation11 + $0x160] sm:$0xff] }
 0x949   : > { %18384 = vmatprep.subr.bf16.mxu1 %v18383_v33  ;;  %v15143_v33 = vld [vmem:[#allocation8 + $0x7a0] sm:$0xff]  ;;  %v18403_v3 = vpack.c.bf16 %v15146_v27, %v15142_v58  ;;  %v15509_v58 = vld [vmem:[#allocation11 + $0xb0] sm:$0xff] }
 0x94a   : > { %18258 = vmatpush1.bf16.msra.mxu0 %v18257_v7  ;;  %v15150_v7 = vld [vmem:[#allocation8 + $0x7d8] sm:$0xff] }
 0x94b   : > { %18260 = vmatprep.subr.bf16.mxu0 %v18259_v44  ;;  %v18277_v44 = vpack.c.bf16 %v15143_v33, %v15139_v63  ;;  %v15510_v27 = vld [vmem:[#allocation11 + $0xb8] sm:$0xff]  ;;  %v15493_v33 = vld [vmem:[#allocation11 + $0x30] sm:$0xff] }
 0x94c   : > { %18386 = vmatpush1.bf16.msra.mxu1 %v18385_v8  ;;  %v15154_v8 = vld [vmem:[#allocation8 + $0x7f8] sm:$0xff]  ;;  %v18423_v63 = vpack.c.bf16 %v15510_v27, %v15509_v58 }
 0x94d   : > { %18388 = vmatprep.subr.bf16.mxu1 %v18387_v13  ;;  %v15151_v13 = vld [vmem:[#allocation8 + $0x7e0] sm:$0xff]  ;;  %v18407_v41 = vpack.c.bf16 %v15154_v8, %v15150_v7  ;;  %v15512_v7 = vld [vmem:[#allocation11 + $0xc8] sm:$0xff]  ;;  %v15533_v58 = vld [vmem:[#allocation11 + $0x170] sm:$0xff] }
 0x94e   : > { %18262 = vmatpush1.bf16.msra.mxu0 %v18261_v18  ;;  %v15535_v18 = vld [vmem:[#allocation11 + $0x180] sm:$0xff]  ;;  %v15530_v25 = vld [vmem:[#allocation11 + $0x158] sm:$0xff] }
 0x94f   : > { %18264 = vmatprep.subr.bf16.mxu0 %v18263_v19  ;;  %v18281_v19 = vpack.c.bf16 %v15151_v13, %v15147_v12  ;;  %v15543_v8 = vld [vmem:[#allocation11 + $0x1c0] sm:$0xff]  ;;  %v18427_v12 = vpack.c.bf16 %v15512_v7, %v15511_v38  ;;  %v15534_v27 = vld [vmem:[#allocation11 + $0x178] sm:$0xff] }
 0x950   : > { %18390 = vmatpush1.bf16.msra.mxu1 %v18389_v50  ;;  %v15536_v50 = vld [vmem:[#allocation11 + $0x188] sm:$0xff]  ;;  %v15495_v13 = vld [vmem:[#allocation11 + $0x40] sm:$0xff] }
 0x951   : > { %18392 = vmatprep.subr.bf16.mxu1 %v18391_v32  ;;  %v15488_v32 = vld [vmem:[#allocation11 + $0x8] sm:$0xff]  ;;  %v18443_v24 = vpack.c.bf16 %v15536_v50, %v15535_v18  ;;  %v15514_v18 = vld [vmem:[#allocation11 + $0xd8] sm:$0xff]  ;;  %v15545_v50 = vld [vmem:[#allocation11 + $0x1d0] sm:$0xff] }
 0x952   : > { %18266 = vmatpush1.bf16.msra.mxu0 %v18265_v28  ;;  %v15537_v28 = vld [vmem:[#allocation11 + $0x190] sm:$0xff] }
 0x953   : > { %18268 = vmatprep.subr.bf16.mxu0 %v18267_v5  ;;  %v18413_v5 = vpack.c.bf16 %v15488_v32, %v15487_v53  ;;  %v18431_v53 = vpack.c.bf16 %v15514_v18, %v15513_v54  ;;  %v15497_v32 = vld [vmem:[#allocation11 + $0x50] sm:$0xff] }
 0x954   : > { %18394 = vmatpush1.bf16.msra.mxu1 %v18393_v29  ;;  %v15538_v29 = vld [vmem:[#allocation11 + $0x198] sm:$0xff] }
 0x955   : > { %18396 = vmatprep.subr.bf16.mxu1 %v18395_v35  ;;  %v15490_v35 = vld [vmem:[#allocation11 + $0x18] sm:$0xff]  ;;  %v18447_v10 = vpack.c.bf16 %v15538_v29, %v15537_v28  ;;  %v15516_v28 = vld [vmem:[#allocation11 + $0xe8] sm:$0xff]  ;;  %v15547_v29 = vld [vmem:[#allocation11 + $0x1e0] sm:$0xff] }
 0x956   : > { %18270 = vmatpush1.bf16.msra.mxu0 %v18269_v15  ;;  %v15539_v15 = vld [vmem:[#allocation11 + $0x1a0] sm:$0xff] }
 0x957   : > { %18272 = vmatprep.subr.bf16.mxu0 %v18271_v48  ;;  %v18417_v48 = vpack.c.bf16 %v15490_v35, %v15489_v34  ;;  %v18435_v34 = vpack.c.bf16 %v15516_v28, %v15515_v1 }
 0x958   : > { %18398 = vmatpush1.bf16.msra.mxu1 %v18397_v43  ;;  %v15540_v43 = vld [vmem:[#allocation11 + $0x1a8] sm:$0xff] }
 0x959   : > { %18400 = vmatprep.subr.bf16.mxu1 %v18399_v22  ;;  %v15492_v22 = vld [vmem:[#allocation11 + $0x28] sm:$0xff]  ;;  %v18451_v57 = vpack.c.bf16 %v15540_v43, %v15539_v15  ;;  %v18469_v15 = vpack.c.bf16 %v15532_v42, %v15531_v36  ;;  %v15517_v43 = vld [vmem:[#allocation11 + $0xf0] sm:$0xff] }
 0x95a   : > { %18274 = vmatpush1.bf16.msra.mxu0 %v18273_v61  ;;  %v15541_v61 = vld [vmem:[#allocation11 + $0x1b0] sm:$0xff] }
 0x95b   : > { %18276 = vmatprep.subr.bf16.mxu0 %v18275_v31  ;;  %v18421_v31 = vpack.c.bf16 %v15492_v22, %v15491_v51  ;;  %v15550_v51 = vld [vmem:[#allocation11 + $0x1f8] sm:$0xff]  ;;  %v15501_v22 = vld [vmem:[#allocation11 + $0x70] sm:$0xff] }
 0x95c   : > { %18402 = vmatpush1.bf16.msra.mxu1 %v18401_v62  ;;  %v15542_v62 = vld [vmem:[#allocation11 + $0x1b8] sm:$0xff] }
 0x95d   : > { %18404 = vmatprep.subr.bf16.mxu1 %v18403_v3  ;;  %v15525_v3 = vld [vmem:[#allocation11 + $0x130] sm:$0xff]  ;;  %v18455_v37 = vpack.c.bf16 %v15542_v62, %v15541_v61  ;;  %v18473_v61 = vpack.c.bf16 %v15534_v27, %v15533_v58  ;;  %v15155_v62 = vld [vmem:[#allocation9] sm:$0xf] }
 0x95e   : > { %18278 = vmatpush1.bf16.msra.mxu0 %v18277_v44  ;;  %v15544_v44 = vld [vmem:[#allocation11 + $0x1c8] sm:$0xff] }
 0x95f   : > { %18280 = vmatprep.subr.bf16.mxu0 %v18279_v39  ;;  %v18457_v39 = vpack.c.bf16 %v15526_v4, %v15525_v3  ;;  %v18459_v55 = vpack.c.bf16 %v15544_v44, %v15543_v8 }
 0x960   : > { %18406 = vmatpush1.bf16.msra.mxu1 %v18405_v46  ;;  %v18425_v46 = vpack.c.bf16 %v15494_v2, %v15493_v33  ;;  %v15172_v33 = vrot.slane %v15155_v62, %v14877_v60 }
 0x961   : > { %18408 = vmatprep.subr.bf16.mxu1 %v18407_v41  ;;  %v15527_v41 = vld [vmem:[#allocation11 + $0x140] sm:$0xff] }
 0x962   : > { %18282 = vmatpush1.bf16.msra.mxu0 %v18281_v19  ;;  %v15546_v19 = vld [vmem:[#allocation11 + $0x1d8] sm:$0xff] }
 0x963   : > { %18412 = vmatprep.subr.bf16.mxu0 %v18411_v20  ;;  %v18461_v20 = vpack.c.bf16 %v15528_v14, %v15527_v41  ;;  %v18463_v0 = vpack.c.bf16 %v15546_v19, %v15545_v50 }
 0x964   : > { %18410 = vmatpush1.bf16.msra.mxu1 %v18409_v59  ;;  %v18429_v59 = vpack.c.bf16 %v15496_v52, %v15495_v13 }
 0x965   : > { %18444 = vmatprep.subr.bf16.mxu1 %v18443_v24  ;;  %15335 = vmatmul.mubr.f32.vlgmr.msra.gmra.mrb[0].mxu0 %v24537_v47  ;;  %v15529_v24 = vld [vmem:[#allocation11 + $0x150] sm:$0xff] }
 0x966   : > { %18414 = vmatpush3.bf16.msra.mxu0 %v18413_v5  ;;  %v15548_v5 = vld [vmem:[#allocation11 + $0x1e8] sm:$0xff] }
 0x967   : > { %15477 = vmatmul.mubr.f32.vlgmr.msra.gmra.mrb[0].mxu1 %v24537_v47  ;;  %18416 = vmatprep.subr.bf16.mxu0 %v18415_v6  ;;  %v18453_v47 = vpack.c.bf16 %v15524_v26, %v15523_v56  ;;  %v18465_v6 = vpack.c.bf16 %v15530_v25, %v15529_v24  ;;  %v18467_v35 = vpack.c.bf16 %v15548_v5, %v15547_v29  ;;  %v15502_v56 = vld [vmem:[#allocation11 + $0x78] sm:$0xff] }
 0x968   : > { %18446 = vmatpush3.bf16.msra.mxu1 %v18445_v30  ;;  %v18433_v30 = vpack.c.bf16 %v15498_v23, %v15497_v32  ;;  %v18441_v26 = vpack.c.bf16 %v15502_v56, %v15501_v22 }
 0x969   : > { %18448 = vmatprep.subr.bf16.mxu1 %v18447_v10  ;;  %v15500_v10 = vld [vmem:[#allocation11 + $0x68] sm:$0xff] }
 0x96a   : > { %18418 = vmatpush3.bf16.msra.mxu0 %v18417_v48  ;;  %v18437_v11 = vpack.c.bf16 %v15500_v10, %v15499_v9  ;;  %v15518_v48 = vld [vmem:[#allocation11 + $0xf8] sm:$0xff] }
 0x96b   : > { %18420 = vmatprep.subr.bf16.mxu0 %v18419_v21  ;;  %v18439_v21 = vpack.c.bf16 %v15518_v48, %v15517_v43 }
 0x96c   : > { %18450 = vmatpush3.bf16.msra.mxu1 %v18449_v49  ;;  %v15549_v49 = vld [vmem:[#allocation11 + $0x1f0] sm:$0xff] }
 0x96d   : > { %18452 = vmatprep.subr.bf16.mxu1 %v18451_v57  ;;  %v18471_v57 = vpack.c.bf16 %v15550_v51, %v15549_v49 }
 0x96e   : > { %18422 = vmatpush3.bf16.msra.mxu0 %v18421_v31  ;;  %v15160_v31 = vrot.slane %v15155_v62, %v14865_v40 }
 0x96f   : > { %18424 = vmatprep.subr.bf16.mxu0 %v18423_v63  ;;  %v15164_v63 = vrot.slane %v15155_v62, %v14869_v16 }
 0x970   : > { %18454 = vmatpush3.bf16.msra.mxu1 %v18453_v47  ;;  %v15168_v47 = vrot.slane %v15155_v62, %v14873_v17 }
 0x971   : > { %18456 = vmatprep.subr.bf16.mxu1 %v18455_v37 }
 0x972   : > { %18426 = vmatpush3.bf16.msra.mxu0 %v18425_v46 }
 0x973   : > { %18428 = vmatprep.subr.bf16.mxu0 %v18427_v12 }
 0x974   : > { %18458 = vmatpush3.bf16.msra.mxu1 %v18457_v39 }
 0x975   : > { %18460 = vmatprep.subr.bf16.mxu1 %v18459_v55 }
 0x976   : > { %18430 = vmatpush3.bf16.msra.mxu0 %v18429_v59 }
 0x977   : > { %18432 = vmatprep.subr.bf16.mxu0 %v18431_v53 }
 0x978   : > { %18462 = vmatpush3.bf16.msra.mxu1 %v18461_v20 }
 0x979   : > { %18464 = vmatprep.subr.bf16.mxu1 %v18463_v0 }
 0x97a   : > { %18434 = vmatpush3.bf16.msra.mxu0 %v18433_v30 }
 0x97b   : > { %18436 = vmatprep.subr.bf16.mxu0 %v18435_v34 }
 0x97c   : > { %18466 = vmatpush3.bf16.msra.mxu1 %v18465_v6 }
 0x97d   : > { %18468 = vmatprep.subr.bf16.mxu1 %v18467_v35 }
 0x97e   : > { %18438 = vmatpush3.bf16.msra.mxu0 %v18437_v11 }
 0x97f   : > { %18440 = vmatprep.subr.bf16.mxu0 %v18439_v21 }
 0x980   : > { %18470 = vmatpush3.bf16.msra.mxu1 %v18469_v15 }
 0x981   : > { %18472 = vmatprep.subr.bf16.mxu1 %v18471_v57 }
 0x982   : > { %18442 = vmatpush3.bf16.msra.mxu0 %v18441_v26 }
 0x984   : > { %18474 = vmatpush3.bf16.msra.mxu1 %v18473_v61 }
 0xa38   : > { %v15336_v2 = vpop.f32.mrb[0].mxu0 }
 0xa39   : > { %v18707_v3 = vadd.f32 %v15336_v2, %v15160_v31  ;;  %v15338_v4 = vpop.f32.mrb[1].mxu0 }
 0xa3a   : > { %v15478_v37 = vpop.f32.mrb[0].mxu1  ;;  %v18708_v7 = vadd.f32 %v15338_v4, %v15164_v63 }
 0xa3b   : > { %v18709_v38 = vadd.f32 %v15478_v37, %v15168_v47  ;;  %v15480_v8 = vpop.f32.mrb[1].mxu1  ;;  %v15483_v39 = vmax.f32 %v18707_v3, 0.0 }
 0xa3c   : > { %v18710_v44 = vadd.f32 %v15480_v8, %v15172_v33  ;;  %v15484_v46 = vmax.f32 %v18708_v7, 0.0 }
 0xa3d   : > { %v15485_v12 = vmax.f32 %v18709_v38, 0.0 }
 0xa3e   : > { %v15486_v40 = vmax.f32 %v18710_v44, 0.0  ;;  %15622 = vmatprep.mubr.f32.mxu0 %v15484_v46 }
 0xa3f   : > { %15623 = vmatmul.mubr.f32.vlgmr.msra.gmra.mrb[2].mxu0 %v15483_v39 }
 0xa40   : > { %15692 = vmatprep.mubr.f32.mxu1 %v15486_v40 }
 0xa41   : > { %15693 = vmatmul.mubr.f32.vlgmr.msra.gmra.mrb[2].mxu1 %v15485_v12 }
 0xb12   : > { %v18117_v16 = vpop.f32.mrb[2].mxu0 }
 0xb13   : > { %v18118_v60 = vpop.f32.mrb[3].mxu0 }
 0xb14   : > { %v18152_v17 = vpop.f32.mrb[2].mxu1  ;;  %v18119_v13 = vadd.f32 %v18118_v60, %v18117_v16 }
 0xb15   : > { %v18153_v52 = vpop.f32.mrb[3].mxu1 }
 0xb16   : > { %v18154_v41 = vadd.f32 %v18153_v52, %v18152_v17  ;;  %v15625_v55 = vadd.f32 %v18119_v13, %v18077_v45 }
 0xb18   : > { %v15695_v14 = vadd.f32 %v18154_v41, %v15625_v55 }
 0xb1a   : > { %15698 = vst [vmem:[#allocation14] sm:$0x3] %v15695_v14 }
 0xb1b PF: > { %p18774_p0 = scmp.eq.s32.totalorder %s21995_s30, 3  ;;  %s21933_s13 = smov [#allocation14]  }
 0xb1c   : > { %s15706_s17 = sshll.u32 %s21933_s13, 4  ;;  %s15707_s17 = int_to_ptr.vmem [resolvable:$true] %s15706_s17 }
 0xb1d   : > { %s21840_s22 = scalar_lea.vmem %s15707_s17, 32  ;;  %p21847_p13 = scmp.lt.s32.totalorder %s15707_s17, %s15707_s17 }
 0xb1e   : > { %p21841_p5 = scmp.ne.s32.totalorder %s15707_s17, %s21840_s22  ;;  %p21848_p2 = scmp.lt.s32.totalorder %s21840_s22, %s21840_s22 }
 0xb20   : > { %p21842_p8 = pnand %p21841_p5, %p18774_p0  ;;  %p21849_p6 = por %p21848_p2, %p21847_p13 }
 0xb22   : > { %p21843_p7 = pneg %p21842_p8 }
 0xb24   : > { %p21850_p9 = pnand %p21849_p6, %p21843_p7 }
 0xb26   : > { %21853 = shalt.err (!%p21850_p9)
}
 0xb27   : > { %s21854_s9 = scalar_lea.hbm %s24594_s7, 32 }
 0xb28   : > { %p21855_p3 = scmp.ne.s32.totalorder %s24594_s7, %s21854_s9  ;;  %p21860_p10 = scmp.lt.u32.totalorder %s21854_s9, %s24594_s7 }
 0xb2a   : > { %p21856_p1 = pnand %p21855_p3, %p18774_p0 }
 0xb2c   : > { %p21857_p4 = pneg %p21856_p1 }
 0xb2e   : > { %p21862_p11 = pnand %p21860_p10, %p21857_p4 }
 0xb30   : > { %21865 = shalt.err (!%p21862_p11)
}
 0xb31   : > { %18740 = dma.vmem_to_hbm [thread:$0]  (%p18774_p0), %s15707_s17, 32, %s24594_s7, [#allocation5]  }
 0xb32   : > { %21899 = dma.done.wait (%p18774_p0), [#allocation5], 32  }
 0xb33   : > { %21901 = vsyncadd (%p18774_p0), [#allocation5], 4294967264 }
 0xb34 PF: > { %p21_p12 = scmp.ge.s32.totalorder %s22124_s19, 6   ;;  %s24611_s24 = smov %s21908_s25 }
 0xb35   : > { %s24612_s25 = smov %s21912_s26  ;;  %s24613_s26 = smov %s22135_s18 }
 0xb36   : > { %s24614_s27 = smov %s22124_s19  ;;  %23 = sbr.rel (!%p21_p12) target bundleno = 7 (0x7), region = 116 }
 0xb3d   :  { %15719 = vsyncpa [#allocation4], 1 }
 0xb3e   :  { %15721 = vsyncpa [#allocation4 + $0x1], 1 }
 0xb3f   :  { %15722 = vsyncpa [#allocation7], 1 }
 0xb40   :  { %15723 = vsyncpa [#allocation10], 1 }
 0xb41   :  { %15724 = vsyncpa [#allocation13], 1 }
 0xb42   :  { %15725 = vsyncpa [#allocation5], 1 }
 0xb43   :  { %15727 = vsyncpa [#allocation5 + $0x1], 1 }

</bundles_post_ra>
